<compile_context>
chip_gen: v5e
topology: v5e:2x2
jax: 0.10.0
libtpu: 0.0.40
codegen_flags: <defaults>
</compile_context>

<pallas_src>
import functools

import jax
import jax.numpy as jnp
import numpy as np
from jax.experimental import pallas as pl
from jax.experimental.pallas import tpu as pltpu

# Module hyper-parameters (constructor defaults of LDFusion).
D1, D2, H, O = 164, 30, 256, 512
EPS = 1e-5  # nn.LayerNorm default eps


def _round_up(x, n):
    return (x + n - 1) // n * n


# ---------------------------------------------------------------------------
# In-kernel math helpers.
# ---------------------------------------------------------------------------
def _gelu(x, fast):
    if fast:
        # tanh approximation -> EUP slot (fast-math path only).
        c = np.float32(np.sqrt(2.0 / np.pi))
        return 0.5 * x * (1.0 + jnp.tanh(c * (x + np.float32(0.044715) * x * x * x)))
    # nn.GELU() default = exact (erf-based) GELU.
    return 0.5 * x * (1.0 + jax.lax.erf(x * np.float32(1.0 / np.sqrt(2.0))))


def _layernorm(x, g, b):
    mu = jnp.mean(x, axis=-1, keepdims=True)
    var = jnp.mean((x - mu) ** 2, axis=-1, keepdims=True)
    return (x - mu) * jax.lax.rsqrt(var + EPS) * g + b


# ---------------------------------------------------------------------------
# The fused Pallas kernel: one batch TILE (bt sequences, m = bt*seq_len token
# rows) per grid step.  x_ref is the lane-packed [x1 | x2 | 0] slab; weights
# are pre-split / pre-folded / pre-fused by prepare_params().
# ---------------------------------------------------------------------------
def ldfusion_kernel(
    x_ref,
    wproj_ref, bproj_ref, gp1_ref, bep1_ref, gp2_ref, bep2_ref,
    wqkv1_ref, bq1_ref, wqkv2_ref, bq2_ref, bkv_ref,
    wg1_ref, wg2_ref, bg_ref,
    wdist_ref, btap_ref,
    wfuc_ref, wfuh_ref, bfu_ref,
    o_ref,
    *, seq_len, fast,
):
    m = x_ref.shape[0]                       # bt * seq_len token rows
    bt = m // seq_len
    hdim = gp1_ref.shape[1]                  # 256
    cdt = wproj_ref.dtype                    # MXU operand dtype (f32 or bf16)

    def mm(a, w):                            # MXU matmul, f32 accumulation.
        # astype is a no-op when a is already cdt; every activation below is
        # consumed by exactly one matmul (weights were merged offline), so
        # each value is converted at most once.
        return jnp.dot(a.astype(cdt), w, preferred_element_type=jnp.float32)

    # ---- proj1/proj2 as ONE matmul on the lane-packed input with a
    #      block-diagonal weight:  [x1|x2|0] @ Wproj = [h1_pre | h2_pre].
    pre = _gelu(mm(x_ref[...], wproj_ref[...]) + bproj_ref[...], fast)   # (m, 2H)
    h1 = _layernorm(pre[:, :hdim], gp1_ref[...], bep1_ref[...])
    h2 = _layernorm(pre[:, hdim:], gp2_ref[...], bep2_ref[...])

    # ---- fused per-stream Q/K/V (attention scale pre-folded into Q).
    qkv1 = mm(h1, wqkv1_ref[...])            # (m, 3H) = [q1 | k1 | v1] partials
    qkv2 = mm(h2, wqkv2_ref[...])            # (m, 3H) = [q2 | k2 | v2] partials
    hsumc = (h1 + h2).astype(cdt)            # fusion-layer input; h1/h2 die here
    q1 = qkv1[:, :hdim] + bq1_ref[...]
    q2 = qkv2[:, :hdim] + bq2_ref[...]
    kv = qkv1[:, hdim:] + qkv2[:, hdim:] + bkv_ref[...]                  # (m, 2H)

    # ---- merged cross attention: both query streams share a single batched
    #      score matmul and PV matmul against the shared K/V.
    kc = kv[:, :hdim].astype(cdt).reshape(bt, seq_len, hdim)
    vc = kv[:, hdim:].astype(cdt).reshape(bt, seq_len, hdim)
    qc = jnp.concatenate(
        [q1.astype(cdt).reshape(bt, seq_len, hdim),
         q2.astype(cdt).reshape(bt, seq_len, hdim)], axis=1)             # (bt,2S,H)
    s = jax.lax.dot_general(qc, kc, (((2,), (2,)), ((0,), (0,))),
                            preferred_element_type=jnp.float32)          # (bt,2S,S)
    s = s - jnp.max(s, axis=-1, keepdims=True)
    p = jnp.exp(s)
    denom = jnp.sum(p, axis=-1, keepdims=True)
    if fast:
        p = p * pl.reciprocal(denom, approx=True)    # EUP slot, ~free
    else:
        p = p / denom                                # exact (f32 path)
    ao = jax.lax.dot_general(p.astype(cdt), vc, (((2,), (1,)), ((0,), (0,))),
                             preferred_element_type=jnp.float32)         # (bt,2S,H)
    attn1 = ao[:, :seq_len].reshape(m, hdim)
    attn2 = ao[:, seq_len:].reshape(m, hdim)

    # ---- distillation gate (split weights; a*g + b*(1-g) -> b + g*(a-b)).
    gate = jax.nn.sigmoid(mm(attn1, wg1_ref[...]) + mm(attn2, wg2_ref[...])
                          + bg_ref[...])
    distilled = attn2 + gate * (attn1 - attn2)

    # ---- conv branches + conv_fuse (folded into 7 taps) AND the fusion-layer
    #      'distilled' partial, all as ONE matmul:  (m,H) @ (H, 7H + O).
    y = mm(distilled, wdist_ref[...])
    out = y[:, 7 * hdim:]                                   # distilled @ Wfu_d
    seqpos = jax.lax.broadcasted_iota(jnp.int32, (m, 1), 0) % seq_len
    acc = y[:, 3 * hdim:4 * hdim]                           # centre tap (d=0)
    for t in range(7):                                      # static unroll
        d = t - 3
        if d == 0:
            continue
        yd = y[:, t * hdim:(t + 1) * hdim]
        if d > 0:       # out[r] += Y_t[r+d]   (masked at sequence boundaries)
            sh = jnp.concatenate(
                [yd[d:, :], jnp.zeros((d, hdim), jnp.float32)], axis=0)
            sh = jnp.where(seqpos < seq_len - d, sh, 0.0)
        else:           # d < 0
            sh = jnp.concatenate(
                [jnp.zeros((-d, hdim), jnp.float32), yd[:m + d, :]], axis=0)
            sh = jnp.where(seqpos >= -d, sh, 0.0)
        acc = acc + sh
    fused_conv = acc + btap_ref[...]

    # ---- fusion layer: remaining split-weight partial sums.
    out = (out + mm(fused_conv, wfuc_ref[...]) + mm(hsumc, wfuh_ref[...])
           + bfu_ref[...])                                  # (m, O)
    o_ref[...] = out.astype(o_ref.dtype)


# ---------------------------------------------------------------------------
# Offline weight preparation: block-diagonal projection, fused Q/K/V (scale
# folded in), split gate/fusion weights, conv_fuse folded into 7 taps which are
# stacked and fused with the fusion-layer 'distilled' partial.  Matmul weights
# are cast to the MXU operand dtype; biases / LayerNorm params stay float32.
# ---------------------------------------------------------------------------
def prepare_params(params, weight_dtype=jnp.float32):
    (wp1, bp1, gp1, bep1, wp2, bp2, gp2, bep2,
     wq1, bq1, wq2, bq2, wkv, bkv, wg, bg,
     wc3, bc3, wc5, bc5, wc7, bc7, wcf, bcf, wfu, bfu) = params

    h = wq1.shape[0]
    d1, d2 = wp1.shape[0], wp2.shape[0]
    cin = _round_up(d1 + d2, 128)            # lane-padded packed input width

    # Block-diagonal projection: [x1 | x2 | 0] @ Wproj = [h1_pre | h2_pre].
    wproj = jnp.zeros((cin, 2 * h), jnp.float32)
    wproj = wproj.at[:d1, :h].set(wp1)
    wproj = wproj.at[d1:d1 + d2, h:].set(wp2)
    bproj = jnp.concatenate([bp1, bp2], axis=1)

    # Fused per-stream Q/K/V weights; 1/sqrt(h) attention scale folded into Q.
    scale = np.float32(1.0 / np.sqrt(h))
    wqkv1 = jnp.concatenate([wq1 * scale, wkv[:h, :]], axis=1)   # (h, 3h)
    wqkv2 = jnp.concatenate([wq2 * scale, wkv[h:, :]], axis=1)   # (h, 3h)
    bq1s, bq2s = bq1 * scale, bq2 * scale

    # Gate weight split (replaces concat([attn1, attn2]) @ Wg).
    wg1, wg2 = wg[:h, :], wg[h:, :]

    # conv_fuse folded into the tap weights: fused_conv[s] =
    #   sum_{d=-3..3} distilled[s+d] @ Wtap[d+3] + btap
    wcf3, wcf5, wcf7 = wcf[:h], wcf[h:2 * h], wcf[2 * h:]
    wtap = jnp.zeros((7, h, h), jnp.float32)
    for j in range(3):                       # branch k=3, offsets -1..+1
        wtap = wtap.at[j + 2].add(wc3[j] @ wcf3)
    for j in range(5):                       # branch k=5, offsets -2..+2
        wtap = wtap.at[j + 1].add(wc5[j] @ wcf5)
    for j in range(7):                       # branch k=7, offsets -3..+3
        wtap = wtap.at[j].add(wc7[j] @ wcf7)
    btap = bc3 @ wcf3 + bc5 @ wcf5 + bc7 @ wcf7 + bcf

    # Fusion layer split; the 'distilled' partial is fused with the conv taps.
    wfud, wfuc, wfuh = wfu[:h], wfu[h:2 * h], wfu[2 * h:]
    wtap_all = jnp.transpose(wtap, (1, 0, 2)).reshape(h, 7 * h)
    wdist = jnp.concatenate([wtap_all, wfud], axis=1)            # (h, 7h + O)

    cast = lambda w: w.astype(weight_dtype)
    return (
        cast(wproj), bproj, gp1, bep1, gp2, bep2,
        cast(wqkv1), bq1s, cast(wqkv2), bq2s, bkv,
        cast(wg1), cast(wg2), bg,
        cast(wdist), btap,
        cast(wfuc), cast(wfuh), bfu,
    )


def _pick_batch_tile(batch, seq, target_rows):
    """Largest sublane-aligned batch tile within the row budget that still
    leaves >= 2 grid steps (so both v7x TensorCores get work).  Falls back to a
    single full-array block if no aligned tiling exists (always legal)."""
    divs = [c for c in range(1, batch + 1) if batch % c == 0]
    cap = batch // 2 if batch >= 2 else batch
    ok = [c for c in divs
          if c <= cap and c * seq <= target_rows and (c * seq) % 8 == 0]
    if ok:
        return max(ok)
    return batch


def _device_defaults():
    """Per-generation tile/VMEM defaults: v5e/v6e have 128 MiB physical VMEM so
    take big tiles + high cap; v7x (64 MiB) and unknown chips stay conservative."""
    try:
        kind = jax.devices()[0].device_kind.lower()
    except Exception:
        kind = ""
    if "v5" in kind or "v6" in kind:
        return 1024, 96 * 1024 * 1024
    return 512, 48 * 1024 * 1024


# ---------------------------------------------------------------------------
# Wrapper: pack x1/x2 into one lane-dense slab, batch-tiled 1-D grid.
# ---------------------------------------------------------------------------
def ldfusion(x1, x2, params, *, weight_dtype=jnp.float32, fast_math=None,
             target_rows=None, vmem_limit_bytes=None,
             single_buffer_weights=False):
    if fast_math is None:
        # Approximations (tanh GELU, approx reciprocal) opt-in by default only
        # on the low-precision path.
        fast_math = jnp.dtype(weight_dtype) != jnp.dtype(jnp.float32)
    def_rows, def_vmem = _device_defaults()
    if target_rows is None:
        target_rows = def_rows
    if vmem_limit_bytes is None:
        vmem_limit_bytes = def_vmem

    B, S, d1 = x1.shape
    _, _, d2 = x2.shape
    bt = _pick_batch_tile(B, S, target_rows)
    rows = bt * S
    grid = (B // bt,)

    prepared = prepare_params(params, weight_dtype)
    cin = prepared[0].shape[0]               # lane-padded packed input width
    odim = prepared[-1].shape[1]             # output width

    # Lane-dense packed input [x1 | x2 | 0]: one clean DMA per tile instead of
    # two ragged (164 / 30 lane) ones.
    parts = [x1.reshape(B * S, d1), x2.reshape(B * S, d2)]
    if cin - d1 - d2 > 0:
        parts.append(jnp.zeros((B * S, cin - d1 - d2), x1.dtype))
    x12 = jnp.concatenate(parts, axis=1)

    def weight_spec(a):
        # Weights use a constant block index across the batch grid.  With
        # single_buffer_weights=True they are additionally single-buffered
        # (saves ~3-6 MiB of VMEM); off by default since pipeline_mode plumbing
        # for the implicit TPU pipeline differs across JAX versions.
        kwargs = {}
        if single_buffer_weights:
            kwargs["pipeline_mode"] = pl.Buffered(1)
        return pl.BlockSpec(a.shape, lambda b, _n=a.ndim: (0,) * _n, **kwargs)

    in_specs = [pl.BlockSpec((rows, cin), lambda b: (b, 0))]
    in_specs += [weight_spec(w) for w in prepared]
    out_spec = pl.BlockSpec((rows, odim), lambda b: (b, 0))

    out_flat = pl.pallas_call(
        functools.partial(ldfusion_kernel, seq_len=S, fast=fast_math),
        out_shape=jax.ShapeDtypeStruct((B * S, odim), jnp.float32),
        grid=grid,
        in_specs=in_specs,
        out_specs=out_spec,
        compiler_params=pltpu.CompilerParams(
            dimension_semantics=("parallel",),       # batch tiles shard across TCs
            vmem_limit_bytes=vmem_limit_bytes,
        ),
    )(x12, *prepared)
    return out_flat.reshape(B, S, odim)


# ---------------------------------------------------------------------------
# Deterministic synthetic parameter init (shapes from LDFusion.__init__).
# Weights stored as (in, out); biases as (1, out).  Conv weights stored
# tap-major: (k, in_ch, out_ch)  (== PyTorch Conv1d (out, in, k) transposed;
# real PyTorch checkpoints must be transposed on import).
# ---------------------------------------------------------------------------
def init_params(key):
    ks = iter(jax.random.split(key, 40))

    def lin(fan_in, fan_out, std=None):
        std = np.float32(std if std is not None else 1.0 / np.sqrt(fan_in))
        w = jax.random.normal(next(ks), (fan_in, fan_out), jnp.float32) * std
        b = jax.random.normal(next(ks), (1, fan_out), jnp.float32) * 0.01
        return w, b

    def conv(k_sz, ch):
        std = np.float32(1.0 / np.sqrt(ch * k_sz))
        w = jax.random.normal(next(ks), (k_sz, ch, ch), jnp.float32) * std
        b = jax.random.normal(next(ks), (1, ch), jnp.float32) * 0.01
        return w, b

    wp1, bp1 = lin(D1, H, std=np.sqrt(2.0 / H))   # kaiming_normal fan_out-ish
    gp1 = jnp.ones((1, H), jnp.float32)
    bep1 = jnp.zeros((1, H), jnp.float32)
    wp2, bp2 = lin(D2, H, std=np.sqrt(2.0 / H))
    gp2 = jnp.ones((1, H), jnp.float32)
    bep2 = jnp.zeros((1, H), jnp.float32)
    wq1, bq1 = lin(H, H)
    wq2, bq2 = lin(H, H)
    wkv, bkv = lin(2 * H, 2 * H)
    wg, bg = lin(2 * H, H)
    wc3, bc3 = conv(3, H)
    wc5, bc5 = conv(5, H)
    wc7, bc7 = conv(7, H)
    wcf, bcf = lin(3 * H, H)
    wfu, bfu = lin(3 * H, O)

    return (wp1, bp1, gp1, bep1, wp2, bp2, gp2, bep2,
            wq1, bq1, wq2, bq2, wkv, bkv, wg, bg,
            wc3, bc3, wc5, bc5, wc7, bc7, wcf, bcf, wfu, bfu)


# ---------------------------------------------------------------------------
# Pure-JAX reference of the ORIGINAL (unfolded, concat-based) module.
# ---------------------------------------------------------------------------
def ldfusion_ref(x1, x2, params):
    (wp1, bp1, gp1, bep1, wp2, bp2, gp2, bep2,
     wq1, bq1, wq2, bq2, wkv, bkv, wg, bg,
     wc3, bc3, wc5, bc5, wc7, bc7, wcf, bcf, wfu, bfu) = params

    def ln(x, g, b):
        mu = jnp.mean(x, -1, keepdims=True)
        var = jnp.mean((x - mu) ** 2, -1, keepdims=True)
        return (x - mu) * jax.lax.rsqrt(var + EPS) * g + b

    gelu = lambda x: 0.5 * x * (1.0 + jax.lax.erf(x / np.sqrt(2.0)))

    h1 = ln(gelu(x1 @ wp1 + bp1), gp1, bep1)
    h2 = ln(gelu(x2 @ wp2 + bp2), gp2, bep2)
    q1 = h1 @ wq1 + bq1
    q2 = h2 @ wq2 + bq2
    kv = jnp.concatenate([h1, h2], -1) @ wkv + bkv
    k, v = kv[..., :H], kv[..., H:]

    def sdpa(q):
        s = jnp.einsum("bsh,bth->bst", q, k) / np.sqrt(H)
        p = jax.nn.softmax(s, axis=-1)
        return jnp.einsum("bst,bth->bsh", p, v)

    a1, a2 = sdpa(q1), sdpa(q2)
    gate = jax.nn.sigmoid(jnp.concatenate([a1, a2], -1) @ wg + bg)
    distilled = gate * a1 + (1 - gate) * a2

    def conv(x, w, b, ksz):
        pad = ksz // 2
        xp = jnp.pad(x, ((0, 0), (pad, pad), (0, 0)))
        acc = jnp.zeros(x.shape[:2] + (w.shape[2],), jnp.float32)
        for t in range(ksz):
            acc = acc + jnp.einsum("bsc,co->bso", xp[:, t:t + x.shape[1]], w[t])
        return acc + b

    c3 = conv(distilled, wc3, bc3, 3)
    c5 = conv(distilled, wc5, bc5, 5)
    c7 = conv(distilled, wc7, bc7, 7)
    fused_conv = jnp.concatenate([c3, c5, c7], -1) @ wcf + bcf
    combined = jnp.concatenate([distilled, fused_conv, h1 + h2], -1)
    return combined @ wfu + bfu


# ---------------------------------------------------------------------------
if __name__ == "__main__":
    B, S = 2, 8
    key = jax.random.PRNGKey(0)
    k1, k2, kp = jax.random.split(key, 3)
    x1 = jax.random.normal(k1, (B, S, D1), jnp.float32)
    x2 = jax.random.normal(k2, (B, S, D2), jnp.float32)
    params = init_params(kp)

    ref = jax.block_until_ready(ldfusion_ref(x1, x2, params))

    # Exact-precision path (erf GELU, exact softmax): validates the packed-
    # input, fused-QKV, merged-SDPA, conv-folded kernel at tight tolerance.
    out_f32 = jax.block_until_ready(
        ldfusion(x1, x2, params, weight_dtype=jnp.float32))
    np.testing.assert_allclose(np.asarray(out_f32), np.asarray(ref),
                               rtol=2e-3, atol=2e-3)

    # bf16-MXU fast path (tanh GELU + approx reciprocal): aggregate relative
    # error must stay within a bf16-precision band.
    out_bf16 = jax.block_until_ready(
        ldfusion(x1, x2, params, weight_dtype=jnp.bfloat16))
    rel_err = (np.linalg.norm(np.asarray(out_bf16) - np.asarray(ref))
               / np.linalg.norm(np.asarray(ref)))
    assert rel_err < 5e-2, f"bf16 fast path relative error too large: {rel_err}"

    print("KERNEL_OK")
</pallas_src>

<mosaic_0001>
module attributes {stable_mosaic.version = 11 : i64} {
  func.func @ldfusion_kernel(%arg0: i32, %arg1: memref<8x256xf32, #tpu.memory_space<vmem>>, %arg2: memref<256x512xf32, #tpu.memory_space<vmem>>, %arg3: memref<1x512xf32, #tpu.memory_space<vmem>>, %arg4: memref<1x256xf32, #tpu.memory_space<vmem>>, %arg5: memref<1x256xf32, #tpu.memory_space<vmem>>, %arg6: memref<1x256xf32, #tpu.memory_space<vmem>>, %arg7: memref<1x256xf32, #tpu.memory_space<vmem>>, %arg8: memref<256x768xf32, #tpu.memory_space<vmem>>, %arg9: memref<1x256xf32, #tpu.memory_space<vmem>>, %arg10: memref<256x768xf32, #tpu.memory_space<vmem>>, %arg11: memref<1x256xf32, #tpu.memory_space<vmem>>, %arg12: memref<1x512xf32, #tpu.memory_space<vmem>>, %arg13: memref<256x256xf32, #tpu.memory_space<vmem>>, %arg14: memref<256x256xf32, #tpu.memory_space<vmem>>, %arg15: memref<1x256xf32, #tpu.memory_space<vmem>>, %arg16: memref<256x2304xf32, #tpu.memory_space<vmem>>, %arg17: memref<1x256xf32, #tpu.memory_space<vmem>>, %arg18: memref<256x512xf32, #tpu.memory_space<vmem>>, %arg19: memref<256x512xf32, #tpu.memory_space<vmem>>, %arg20: memref<1x512xf32, #tpu.memory_space<vmem>>, %arg21: memref<8x512xf32, #tpu.memory_space<vmem>>) attributes {dimension_semantics = [#tpu.dimension_semantics<parallel>], iteration_bounds = array<i64: 2>, scalar_prefetch = 0 : i64, scratch_operands = 0 : i64, tpu.core_type = #tpu.core_type<tc>, window_params = [{transform_indices = @transform_0, window_bounds = array<i64: 8, 256>}, {pipeline_mode = #tpu.pipeline_mode<synchronous>, transform_indices = @transform_1, window_bounds = array<i64: 256, 512>}, {pipeline_mode = #tpu.pipeline_mode<synchronous>, transform_indices = @transform_2, window_bounds = array<i64: 1, 512>}, {pipeline_mode = #tpu.pipeline_mode<synchronous>, transform_indices = @transform_3, window_bounds = array<i64: 1, 256>}, {pipeline_mode = #tpu.pipeline_mode<synchronous>, transform_indices = @transform_4, window_bounds = array<i64: 1, 256>}, {pipeline_mode = #tpu.pipeline_mode<synchronous>, transform_indices = @transform_5, window_bounds = array<i64: 1, 256>}, {pipeline_mode = #tpu.pipeline_mode<synchronous>, transform_indices = @transform_6, window_bounds = array<i64: 1, 256>}, {pipeline_mode = #tpu.pipeline_mode<synchronous>, transform_indices = @transform_7, window_bounds = array<i64: 256, 768>}, {pipeline_mode = #tpu.pipeline_mode<synchronous>, transform_indices = @transform_8, window_bounds = array<i64: 1, 256>}, {pipeline_mode = #tpu.pipeline_mode<synchronous>, transform_indices = @transform_9, window_bounds = array<i64: 256, 768>}, {pipeline_mode = #tpu.pipeline_mode<synchronous>, transform_indices = @transform_10, window_bounds = array<i64: 1, 256>}, {pipeline_mode = #tpu.pipeline_mode<synchronous>, transform_indices = @transform_11, window_bounds = array<i64: 1, 512>}, {pipeline_mode = #tpu.pipeline_mode<synchronous>, transform_indices = @transform_12, window_bounds = array<i64: 256, 256>}, {pipeline_mode = #tpu.pipeline_mode<synchronous>, transform_indices = @transform_13, window_bounds = array<i64: 256, 256>}, {pipeline_mode = #tpu.pipeline_mode<synchronous>, transform_indices = @transform_14, window_bounds = array<i64: 1, 256>}, {pipeline_mode = #tpu.pipeline_mode<synchronous>, transform_indices = @transform_15, window_bounds = array<i64: 256, 2304>}, {pipeline_mode = #tpu.pipeline_mode<synchronous>, transform_indices = @transform_16, window_bounds = array<i64: 1, 256>}, {pipeline_mode = #tpu.pipeline_mode<synchronous>, transform_indices = @transform_17, window_bounds = array<i64: 256, 512>}, {pipeline_mode = #tpu.pipeline_mode<synchronous>, transform_indices = @transform_18, window_bounds = array<i64: 256, 512>}, {pipeline_mode = #tpu.pipeline_mode<synchronous>, transform_indices = @transform_19, window_bounds = array<i64: 1, 512>}, {transform_indices = @transform_20, window_bounds = array<i64: 8, 512>}]} {
    %c0 = arith.constant 0 : index
    %c0_0 = arith.constant 0 : index
    %0 = vector.load %arg1[%c0, %c0_0] : memref<8x256xf32, #tpu.memory_space<vmem>>, vector<8x256xf32>
    %c0_1 = arith.constant 0 : index
    %c0_2 = arith.constant 0 : index
    %1 = vector.load %arg2[%c0_1, %c0_2] : memref<256x512xf32, #tpu.memory_space<vmem>>, vector<256x512xf32>
    %cst = arith.constant dense<0.000000e+00> : vector<8x512xf32>
    %2 = tpu.matmul %0, %1, %cst {dimension_numbers = #tpu.dot_dimension_numbers<[1], [0], [0], [1], [0, 0, 1, 1], [], []>} : vector<8x256xf32>, vector<256x512xf32>, vector<8x512xf32> -> vector<8x512xf32>
    %c0_3 = arith.constant 0 : index
    %c0_4 = arith.constant 0 : index
    %3 = vector.load %arg3[%c0_3, %c0_4] : memref<1x512xf32, #tpu.memory_space<vmem>>, vector<1x512xf32>
    %4 = vector.broadcast %3 : vector<1x512xf32> to vector<8x512xf32>
    %5 = arith.addf %2, %4 : vector<8x512xf32>
    %cst_5 = arith.constant 5.000000e-01 : f32
    %6 = vector.broadcast %cst_5 : f32 to vector<8x512xf32>
    %7 = arith.mulf %6, %5 : vector<8x512xf32>
    %cst_6 = arith.constant 0.707106769 : f32
    %8 = vector.broadcast %cst_6 : f32 to vector<8x512xf32>
    %9 = arith.mulf %5, %8 : vector<8x512xf32>
    %10 = math.erf %9 : vector<8x512xf32>
    %cst_7 = arith.constant 1.000000e+00 : f32
    %11 = vector.broadcast %cst_7 : f32 to vector<8x512xf32>
    %12 = arith.addf %11, %10 : vector<8x512xf32>
    %13 = arith.mulf %7, %12 : vector<8x512xf32>
    %14 = vector.extract_strided_slice %13 {offsets = [0, 0], sizes = [8, 256], strides = [1, 1]} : vector<8x512xf32> to vector<8x256xf32>
    %c0_8 = arith.constant 0 : index
    %c0_9 = arith.constant 0 : index
    %15 = vector.load %arg4[%c0_8, %c0_9] : memref<1x256xf32, #tpu.memory_space<vmem>>, vector<1x256xf32>
    %c0_10 = arith.constant 0 : index
    %c0_11 = arith.constant 0 : index
    %16 = vector.load %arg5[%c0_10, %c0_11] : memref<1x256xf32, #tpu.memory_space<vmem>>, vector<1x256xf32>
    %cst_12 = arith.constant dense<0.000000e+00> : vector<8xf32>
    %17 = vector.multi_reduction <add>, %14, %cst_12 [1] : vector<8x256xf32> to vector<8xf32>
    %18 = vector.shape_cast %17 : vector<8xf32> to vector<8x1xf32>
    %cst_13 = arith.constant 2.560000e+02 : f32
    %19 = vector.broadcast %cst_13 : f32 to vector<8x1xf32>
    %20 = arith.divf %18, %19 : vector<8x1xf32>
    %21 = vector.broadcast %20 : vector<8x1xf32> to vector<8x256xf32>
    %22 = arith.subf %14, %21 : vector<8x256xf32>
    %23 = arith.mulf %22, %22 : vector<8x256xf32>
    %cst_14 = arith.constant dense<0.000000e+00> : vector<8xf32>
    %24 = vector.multi_reduction <add>, %23, %cst_14 [1] : vector<8x256xf32> to vector<8xf32>
    %25 = vector.shape_cast %24 : vector<8xf32> to vector<8x1xf32>
    %cst_15 = arith.constant 2.560000e+02 : f32
    %26 = vector.broadcast %cst_15 : f32 to vector<8x1xf32>
    %27 = arith.divf %25, %26 : vector<8x1xf32>
    %28 = vector.broadcast %20 : vector<8x1xf32> to vector<8x256xf32>
    %29 = arith.subf %14, %28 : vector<8x256xf32>
    %cst_16 = arith.constant 9.99999974E-6 : f32
    %30 = vector.broadcast %cst_16 : f32 to vector<8x1xf32>
    %31 = arith.addf %27, %30 : vector<8x1xf32>
    %32 = math.rsqrt %31 : vector<8x1xf32>
    %33 = vector.broadcast %32 : vector<8x1xf32> to vector<8x256xf32>
    %34 = arith.mulf %29, %33 : vector<8x256xf32>
    %35 = vector.broadcast %15 : vector<1x256xf32> to vector<8x256xf32>
    %36 = arith.mulf %34, %35 : vector<8x256xf32>
    %37 = vector.broadcast %16 : vector<1x256xf32> to vector<8x256xf32>
    %38 = arith.addf %36, %37 : vector<8x256xf32>
    %39 = vector.extract_strided_slice %13 {offsets = [0, 256], sizes = [8, 256], strides = [1, 1]} : vector<8x512xf32> to vector<8x256xf32>
    %c0_17 = arith.constant 0 : index
    %c0_18 = arith.constant 0 : index
    %40 = vector.load %arg6[%c0_17, %c0_18] : memref<1x256xf32, #tpu.memory_space<vmem>>, vector<1x256xf32>
    %c0_19 = arith.constant 0 : index
    %c0_20 = arith.constant 0 : index
    %41 = vector.load %arg7[%c0_19, %c0_20] : memref<1x256xf32, #tpu.memory_space<vmem>>, vector<1x256xf32>
    %cst_21 = arith.constant dense<0.000000e+00> : vector<8xf32>
    %42 = vector.multi_reduction <add>, %39, %cst_21 [1] : vector<8x256xf32> to vector<8xf32>
    %43 = vector.shape_cast %42 : vector<8xf32> to vector<8x1xf32>
    %cst_22 = arith.constant 2.560000e+02 : f32
    %44 = vector.broadcast %cst_22 : f32 to vector<8x1xf32>
    %45 = arith.divf %43, %44 : vector<8x1xf32>
    %46 = vector.broadcast %45 : vector<8x1xf32> to vector<8x256xf32>
    %47 = arith.subf %39, %46 : vector<8x256xf32>
    %48 = arith.mulf %47, %47 : vector<8x256xf32>
    %cst_23 = arith.constant dense<0.000000e+00> : vector<8xf32>
    %49 = vector.multi_reduction <add>, %48, %cst_23 [1] : vector<8x256xf32> to vector<8xf32>
    %50 = vector.shape_cast %49 : vector<8xf32> to vector<8x1xf32>
    %cst_24 = arith.constant 2.560000e+02 : f32
    %51 = vector.broadcast %cst_24 : f32 to vector<8x1xf32>
    %52 = arith.divf %50, %51 : vector<8x1xf32>
    %53 = vector.broadcast %45 : vector<8x1xf32> to vector<8x256xf32>
    %54 = arith.subf %39, %53 : vector<8x256xf32>
    %cst_25 = arith.constant 9.99999974E-6 : f32
    %55 = vector.broadcast %cst_25 : f32 to vector<8x1xf32>
    %56 = arith.addf %52, %55 : vector<8x1xf32>
    %57 = math.rsqrt %56 : vector<8x1xf32>
    %58 = vector.broadcast %57 : vector<8x1xf32> to vector<8x256xf32>
    %59 = arith.mulf %54, %58 : vector<8x256xf32>
    %60 = vector.broadcast %40 : vector<1x256xf32> to vector<8x256xf32>
    %61 = arith.mulf %59, %60 : vector<8x256xf32>
    %62 = vector.broadcast %41 : vector<1x256xf32> to vector<8x256xf32>
    %63 = arith.addf %61, %62 : vector<8x256xf32>
    %c0_26 = arith.constant 0 : index
    %c0_27 = arith.constant 0 : index
    %64 = vector.load %arg8[%c0_26, %c0_27] : memref<256x768xf32, #tpu.memory_space<vmem>>, vector<256x768xf32>
    %cst_28 = arith.constant dense<0.000000e+00> : vector<8x768xf32>
    %65 = tpu.matmul %38, %64, %cst_28 {dimension_numbers = #tpu.dot_dimension_numbers<[1], [0], [0], [1], [0, 0, 1, 1], [], []>} : vector<8x256xf32>, vector<256x768xf32>, vector<8x768xf32> -> vector<8x768xf32>
    %c0_29 = arith.constant 0 : index
    %c0_30 = arith.constant 0 : index
    %66 = vector.load %arg10[%c0_29, %c0_30] : memref<256x768xf32, #tpu.memory_space<vmem>>, vector<256x768xf32>
    %cst_31 = arith.constant dense<0.000000e+00> : vector<8x768xf32>
    %67 = tpu.matmul %63, %66, %cst_31 {dimension_numbers = #tpu.dot_dimension_numbers<[1], [0], [0], [1], [0, 0, 1, 1], [], []>} : vector<8x256xf32>, vector<256x768xf32>, vector<8x768xf32> -> vector<8x768xf32>
    %68 = arith.addf %38, %63 : vector<8x256xf32>
    %69 = vector.extract_strided_slice %65 {offsets = [0, 0], sizes = [8, 256], strides = [1, 1]} : vector<8x768xf32> to vector<8x256xf32>
    %c0_32 = arith.constant 0 : index
    %c0_33 = arith.constant 0 : index
    %70 = vector.load %arg9[%c0_32, %c0_33] : memref<1x256xf32, #tpu.memory_space<vmem>>, vector<1x256xf32>
    %71 = vector.broadcast %70 : vector<1x256xf32> to vector<8x256xf32>
    %72 = arith.addf %69, %71 : vector<8x256xf32>
    %73 = vector.extract_strided_slice %67 {offsets = [0, 0], sizes = [8, 256], strides = [1, 1]} : vector<8x768xf32> to vector<8x256xf32>
    %c0_34 = arith.constant 0 : index
    %c0_35 = arith.constant 0 : index
    %74 = vector.load %arg11[%c0_34, %c0_35] : memref<1x256xf32, #tpu.memory_space<vmem>>, vector<1x256xf32>
    %75 = vector.broadcast %74 : vector<1x256xf32> to vector<8x256xf32>
    %76 = arith.addf %73, %75 : vector<8x256xf32>
    %77 = vector.extract_strided_slice %65 {offsets = [0, 256], sizes = [8, 512], strides = [1, 1]} : vector<8x768xf32> to vector<8x512xf32>
    %78 = vector.extract_strided_slice %67 {offsets = [0, 256], sizes = [8, 512], strides = [1, 1]} : vector<8x768xf32> to vector<8x512xf32>
    %79 = arith.addf %77, %78 : vector<8x512xf32>
    %c0_36 = arith.constant 0 : index
    %c0_37 = arith.constant 0 : index
    %80 = vector.load %arg12[%c0_36, %c0_37] : memref<1x512xf32, #tpu.memory_space<vmem>>, vector<1x512xf32>
    %81 = vector.broadcast %80 : vector<1x512xf32> to vector<8x512xf32>
    %82 = arith.addf %79, %81 : vector<8x512xf32>
    %83 = vector.extract_strided_slice %82 {offsets = [0, 0], sizes = [8, 256], strides = [1, 1]} : vector<8x512xf32> to vector<8x256xf32>
    %84 = vector.shape_cast %83 : vector<8x256xf32> to vector<1x8x256xf32>
    %85 = vector.extract_strided_slice %82 {offsets = [0, 256], sizes = [8, 256], strides = [1, 1]} : vector<8x512xf32> to vector<8x256xf32>
    %86 = vector.shape_cast %85 : vector<8x256xf32> to vector<1x8x256xf32>
    %87 = vector.shape_cast %72 : vector<8x256xf32> to vector<1x8x256xf32>
    %88 = vector.shape_cast %76 : vector<8x256xf32> to vector<1x8x256xf32>
    %89 = tpu.concatenate %87, %88 in 1 : vector<1x8x256xf32>, vector<1x8x256xf32> -> vector<1x16x256xf32>
    %cst_38 = arith.constant dense<0.000000e+00> : vector<1x16x8xf32>
    %90 = tpu.matmul %89, %84, %cst_38 {dimension_numbers = #tpu.dot_dimension_numbers<[2], [2], [1], [1], [0, 0, 0, 1, 1, 1], [0], [0]>} : vector<1x16x256xf32>, vector<1x8x256xf32>, vector<1x16x8xf32> -> vector<1x16x8xf32>
    %cst_39 = arith.constant dense<0xFF800000> : vector<1x16xf32>
    %91 = vector.multi_reduction <maximumf>, %90, %cst_39 [2] : vector<1x16x8xf32> to vector<1x16xf32>
    %92 = vector.shape_cast %91 : vector<1x16xf32> to vector<1x16x1xf32>
    %93 = vector.broadcast %92 : vector<1x16x1xf32> to vector<1x16x8xf32>
    %94 = arith.subf %90, %93 : vector<1x16x8xf32>
    %95 = math.exp %94 : vector<1x16x8xf32>
    %cst_40 = arith.constant dense<0.000000e+00> : vector<1x16xf32>
    %96 = vector.multi_reduction <add>, %95, %cst_40 [2] : vector<1x16x8xf32> to vector<1x16xf32>
    %97 = vector.shape_cast %96 : vector<1x16xf32> to vector<1x16x1xf32>
    %98 = vector.broadcast %97 : vector<1x16x1xf32> to vector<1x16x8xf32>
    %99 = arith.divf %95, %98 : vector<1x16x8xf32>
    %cst_41 = arith.constant dense<0.000000e+00> : vector<1x16x256xf32>
    %100 = tpu.matmul %99, %86, %cst_41 {dimension_numbers = #tpu.dot_dimension_numbers<[2], [1], [1], [2], [0, 0, 0, 1, 1, 2], [0], [0]>} : vector<1x16x8xf32>, vector<1x8x256xf32>, vector<1x16x256xf32> -> vector<1x16x256xf32>
    %101 = vector.extract_strided_slice %100 {offsets = [0, 0, 0], sizes = [1, 8, 256], strides = [1, 1, 1]} : vector<1x16x256xf32> to vector<1x8x256xf32>
    %102 = vector.shape_cast %101 : vector<1x8x256xf32> to vector<8x256xf32>
    %103 = vector.extract_strided_slice %100 {offsets = [0, 8, 0], sizes = [1, 8, 256], strides = [1, 1, 1]} : vector<1x16x256xf32> to vector<1x8x256xf32>
    %104 = vector.shape_cast %103 : vector<1x8x256xf32> to vector<8x256xf32>
    %c0_42 = arith.constant 0 : index
    %c0_43 = arith.constant 0 : index
    %105 = vector.load %arg13[%c0_42, %c0_43] : memref<256x256xf32, #tpu.memory_space<vmem>>, vector<256x256xf32>
    %cst_44 = arith.constant dense<0.000000e+00> : vector<8x256xf32>
    %106 = tpu.matmul %102, %105, %cst_44 {dimension_numbers = #tpu.dot_dimension_numbers<[1], [0], [0], [1], [0, 0, 1, 1], [], []>} : vector<8x256xf32>, vector<256x256xf32>, vector<8x256xf32> -> vector<8x256xf32>
    %c0_45 = arith.constant 0 : index
    %c0_46 = arith.constant 0 : index
    %107 = vector.load %arg14[%c0_45, %c0_46] : memref<256x256xf32, #tpu.memory_space<vmem>>, vector<256x256xf32>
    %cst_47 = arith.constant dense<0.000000e+00> : vector<8x256xf32>
    %108 = tpu.matmul %104, %107, %cst_47 {dimension_numbers = #tpu.dot_dimension_numbers<[1], [0], [0], [1], [0, 0, 1, 1], [], []>} : vector<8x256xf32>, vector<256x256xf32>, vector<8x256xf32> -> vector<8x256xf32>
    %109 = arith.addf %106, %108 : vector<8x256xf32>
    %c0_48 = arith.constant 0 : index
    %c0_49 = arith.constant 0 : index
    %110 = vector.load %arg15[%c0_48, %c0_49] : memref<1x256xf32, #tpu.memory_space<vmem>>, vector<1x256xf32>
    %111 = vector.broadcast %110 : vector<1x256xf32> to vector<8x256xf32>
    %112 = arith.addf %109, %111 : vector<8x256xf32>
    %113 = arith.negf %112 : vector<8x256xf32>
    %114 = math.exp %113 : vector<8x256xf32>
    %cst_50 = arith.constant 1.000000e+00 : f32
    %115 = vector.broadcast %cst_50 : f32 to vector<8x256xf32>
    %116 = arith.addf %115, %114 : vector<8x256xf32>
    %117 = arith.divf %115, %116 : vector<8x256xf32>
    %118 = arith.subf %102, %104 : vector<8x256xf32>
    %119 = arith.mulf %117, %118 : vector<8x256xf32>
    %120 = arith.addf %104, %119 : vector<8x256xf32>
    %c0_51 = arith.constant 0 : index
    %c0_52 = arith.constant 0 : index
    %121 = vector.load %arg16[%c0_51, %c0_52] : memref<256x2304xf32, #tpu.memory_space<vmem>>, vector<256x2304xf32>
    %cst_53 = arith.constant dense<0.000000e+00> : vector<8x2304xf32>
    %122 = tpu.matmul %120, %121, %cst_53 {dimension_numbers = #tpu.dot_dimension_numbers<[1], [0], [0], [1], [0, 0, 1, 1], [], []>} : vector<8x256xf32>, vector<256x2304xf32>, vector<8x2304xf32> -> vector<8x2304xf32>
    %123 = vector.extract_strided_slice %122 {offsets = [0, 1792], sizes = [8, 512], strides = [1, 1]} : vector<8x2304xf32> to vector<8x512xf32>
    %124 = tpu.iota {dimensions = array<i32: 0>} : vector<8x1xi32>
    %c8_i32 = arith.constant 8 : i32
    %c0_i32 = arith.constant 0 : i32
    %125 = arith.cmpi eq, %c8_i32, %c0_i32 : i32
    %c1_i32 = arith.constant 1 : i32
    %126 = arith.select %125, %c1_i32, %c8_i32 : i32
    %127 = vector.broadcast %126 : i32 to vector<8x1xi32>
    %128 = arith.remsi %124, %127 : vector<8x1xi32>
    %c0_i32_54 = arith.constant 0 : i32
    %129 = vector.broadcast %c0_i32_54 : i32 to vector<8x1xi32>
    %130 = arith.cmpi ne, %128, %129 : vector<8x1xi32>
    %c0_i32_55 = arith.constant 0 : i32
    %131 = vector.broadcast %c0_i32_55 : i32 to vector<8x1xi32>
    %132 = arith.cmpi slt, %128, %131 : vector<8x1xi32>
    %c0_i32_56 = arith.constant 0 : i32
    %133 = arith.cmpi slt, %126, %c0_i32_56 : i32
    %134 = vector.broadcast %133 : i1 to vector<8x1xi1>
    %135 = vector.broadcast %134 : vector<8x1xi1> to vector<8x1xi1>
    %136 = arith.xori %132, %135 : vector<8x1xi1>
    %137 = arith.andi %136, %130 : vector<8x1xi1>
    %138 = vector.broadcast %126 : i32 to vector<8x1xi32>
    %139 = arith.addi %128, %138 : vector<8x1xi32>
    %140 = arith.select %137, %139, %128 : vector<8x1xi1>, vector<8x1xi32>
    %141 = vector.extract_strided_slice %122 {offsets = [0, 768], sizes = [8, 256], strides = [1, 1]} : vector<8x2304xf32> to vector<8x256xf32>
    %142 = vector.extract_strided_slice %122 {offsets = [0, 0], sizes = [8, 256], strides = [1, 1]} : vector<8x2304xf32> to vector<8x256xf32>
    %cst_57 = arith.constant 0.000000e+00 : f32
    %143 = vector.broadcast %cst_57 : f32 to vector<3x256xf32>
    %144 = vector.extract_strided_slice %142 {offsets = [0, 0], sizes = [5, 256], strides = [1, 1]} : vector<8x256xf32> to vector<5x256xf32>
    %145 = tpu.concatenate %143, %144 in 0 : vector<3x256xf32>, vector<5x256xf32> -> vector<8x256xf32>
    %c3_i32 = arith.constant 3 : i32
    %146 = vector.broadcast %c3_i32 : i32 to vector<8x1xi32>
    %147 = arith.cmpi sge, %140, %146 : vector<8x1xi32>
    %cst_58 = arith.constant 0.000000e+00 : f32
    %148 = vector.shape_cast %147 : vector<8x1xi1> to vector<8x1xi1>
    %149 = vector.broadcast %148 : vector<8x1xi1> to vector<8x256xi1>
    %150 = vector.broadcast %cst_58 : f32 to vector<8x256xf32>
    %151 = arith.select %149, %145, %150 : vector<8x256xi1>, vector<8x256xf32>
    %152 = arith.addf %141, %151 : vector<8x256xf32>
    %153 = vector.extract_strided_slice %122 {offsets = [0, 256], sizes = [8, 256], strides = [1, 1]} : vector<8x2304xf32> to vector<8x256xf32>
    %cst_59 = arith.constant 0.000000e+00 : f32
    %154 = vector.broadcast %cst_59 : f32 to vector<2x256xf32>
    %155 = vector.extract_strided_slice %153 {offsets = [0, 0], sizes = [6, 256], strides = [1, 1]} : vector<8x256xf32> to vector<6x256xf32>
    %156 = tpu.concatenate %154, %155 in 0 : vector<2x256xf32>, vector<6x256xf32> -> vector<8x256xf32>
    %c2_i32 = arith.constant 2 : i32
    %157 = vector.broadcast %c2_i32 : i32 to vector<8x1xi32>
    %158 = arith.cmpi sge, %140, %157 : vector<8x1xi32>
    %cst_60 = arith.constant 0.000000e+00 : f32
    %159 = vector.shape_cast %158 : vector<8x1xi1> to vector<8x1xi1>
    %160 = vector.broadcast %159 : vector<8x1xi1> to vector<8x256xi1>
    %161 = vector.broadcast %cst_60 : f32 to vector<8x256xf32>
    %162 = arith.select %160, %156, %161 : vector<8x256xi1>, vector<8x256xf32>
    %163 = arith.addf %152, %162 : vector<8x256xf32>
    %164 = vector.extract_strided_slice %122 {offsets = [0, 512], sizes = [8, 256], strides = [1, 1]} : vector<8x2304xf32> to vector<8x256xf32>
    %cst_61 = arith.constant 0.000000e+00 : f32
    %165 = vector.broadcast %cst_61 : f32 to vector<1x256xf32>
    %166 = vector.extract_strided_slice %164 {offsets = [0, 0], sizes = [7, 256], strides = [1, 1]} : vector<8x256xf32> to vector<7x256xf32>
    %167 = tpu.concatenate %165, %166 in 0 : vector<1x256xf32>, vector<7x256xf32> -> vector<8x256xf32>
    %c1_i32_62 = arith.constant 1 : i32
    %168 = vector.broadcast %c1_i32_62 : i32 to vector<8x1xi32>
    %169 = arith.cmpi sge, %140, %168 : vector<8x1xi32>
    %cst_63 = arith.constant 0.000000e+00 : f32
    %170 = vector.shape_cast %169 : vector<8x1xi1> to vector<8x1xi1>
    %171 = vector.broadcast %170 : vector<8x1xi1> to vector<8x256xi1>
    %172 = vector.broadcast %cst_63 : f32 to vector<8x256xf32>
    %173 = arith.select %171, %167, %172 : vector<8x256xi1>, vector<8x256xf32>
    %174 = arith.addf %163, %173 : vector<8x256xf32>
    %175 = vector.extract_strided_slice %122 {offsets = [0, 1024], sizes = [8, 256], strides = [1, 1]} : vector<8x2304xf32> to vector<8x256xf32>
    %176 = vector.extract_strided_slice %175 {offsets = [1, 0], sizes = [7, 256], strides = [1, 1]} : vector<8x256xf32> to vector<7x256xf32>
    %cst_64 = arith.constant 0.000000e+00 : f32
    %177 = vector.broadcast %cst_64 : f32 to vector<1x256xf32>
    %178 = tpu.concatenate %176, %177 in 0 : vector<7x256xf32>, vector<1x256xf32> -> vector<8x256xf32>
    %c7_i32 = arith.constant 7 : i32
    %179 = vector.broadcast %c7_i32 : i32 to vector<8x1xi32>
    %180 = arith.cmpi slt, %140, %179 : vector<8x1xi32>
    %cst_65 = arith.constant 0.000000e+00 : f32
    %181 = vector.shape_cast %180 : vector<8x1xi1> to vector<8x1xi1>
    %182 = vector.broadcast %181 : vector<8x1xi1> to vector<8x256xi1>
    %183 = vector.broadcast %cst_65 : f32 to vector<8x256xf32>
    %184 = arith.select %182, %178, %183 : vector<8x256xi1>, vector<8x256xf32>
    %185 = arith.addf %174, %184 : vector<8x256xf32>
    %186 = vector.extract_strided_slice %122 {offsets = [0, 1280], sizes = [8, 256], strides = [1, 1]} : vector<8x2304xf32> to vector<8x256xf32>
    %187 = vector.extract_strided_slice %186 {offsets = [2, 0], sizes = [6, 256], strides = [1, 1]} : vector<8x256xf32> to vector<6x256xf32>
    %cst_66 = arith.constant 0.000000e+00 : f32
    %188 = vector.broadcast %cst_66 : f32 to vector<2x256xf32>
    %189 = tpu.concatenate %187, %188 in 0 : vector<6x256xf32>, vector<2x256xf32> -> vector<8x256xf32>
    %c6_i32 = arith.constant 6 : i32
    %190 = vector.broadcast %c6_i32 : i32 to vector<8x1xi32>
    %191 = arith.cmpi slt, %140, %190 : vector<8x1xi32>
    %cst_67 = arith.constant 0.000000e+00 : f32
    %192 = vector.shape_cast %191 : vector<8x1xi1> to vector<8x1xi1>
    %193 = vector.broadcast %192 : vector<8x1xi1> to vector<8x256xi1>
    %194 = vector.broadcast %cst_67 : f32 to vector<8x256xf32>
    %195 = arith.select %193, %189, %194 : vector<8x256xi1>, vector<8x256xf32>
    %196 = arith.addf %185, %195 : vector<8x256xf32>
    %197 = vector.extract_strided_slice %122 {offsets = [0, 1536], sizes = [8, 256], strides = [1, 1]} : vector<8x2304xf32> to vector<8x256xf32>
    %198 = vector.extract_strided_slice %197 {offsets = [3, 0], sizes = [5, 256], strides = [1, 1]} : vector<8x256xf32> to vector<5x256xf32>
    %cst_68 = arith.constant 0.000000e+00 : f32
    %199 = vector.broadcast %cst_68 : f32 to vector<3x256xf32>
    %200 = tpu.concatenate %198, %199 in 0 : vector<5x256xf32>, vector<3x256xf32> -> vector<8x256xf32>
    %c5_i32 = arith.constant 5 : i32
    %201 = vector.broadcast %c5_i32 : i32 to vector<8x1xi32>
    %202 = arith.cmpi slt, %140, %201 : vector<8x1xi32>
    %cst_69 = arith.constant 0.000000e+00 : f32
    %203 = vector.shape_cast %202 : vector<8x1xi1> to vector<8x1xi1>
    %204 = vector.broadcast %203 : vector<8x1xi1> to vector<8x256xi1>
    %205 = vector.broadcast %cst_69 : f32 to vector<8x256xf32>
    %206 = arith.select %204, %200, %205 : vector<8x256xi1>, vector<8x256xf32>
    %207 = arith.addf %196, %206 : vector<8x256xf32>
    %c0_70 = arith.constant 0 : index
    %c0_71 = arith.constant 0 : index
    %208 = vector.load %arg17[%c0_70, %c0_71] : memref<1x256xf32, #tpu.memory_space<vmem>>, vector<1x256xf32>
    %209 = vector.broadcast %208 : vector<1x256xf32> to vector<8x256xf32>
    %210 = arith.addf %207, %209 : vector<8x256xf32>
    %c0_72 = arith.constant 0 : index
    %c0_73 = arith.constant 0 : index
    %211 = vector.load %arg18[%c0_72, %c0_73] : memref<256x512xf32, #tpu.memory_space<vmem>>, vector<256x512xf32>
    %cst_74 = arith.constant dense<0.000000e+00> : vector<8x512xf32>
    %212 = tpu.matmul %210, %211, %cst_74 {dimension_numbers = #tpu.dot_dimension_numbers<[1], [0], [0], [1], [0, 0, 1, 1], [], []>} : vector<8x256xf32>, vector<256x512xf32>, vector<8x512xf32> -> vector<8x512xf32>
    %213 = arith.addf %123, %212 : vector<8x512xf32>
    %c0_75 = arith.constant 0 : index
    %c0_76 = arith.constant 0 : index
    %214 = vector.load %arg19[%c0_75, %c0_76] : memref<256x512xf32, #tpu.memory_space<vmem>>, vector<256x512xf32>
    %cst_77 = arith.constant dense<0.000000e+00> : vector<8x512xf32>
    %215 = tpu.matmul %68, %214, %cst_77 {dimension_numbers = #tpu.dot_dimension_numbers<[1], [0], [0], [1], [0, 0, 1, 1], [], []>} : vector<8x256xf32>, vector<256x512xf32>, vector<8x512xf32> -> vector<8x512xf32>
    %216 = arith.addf %213, %215 : vector<8x512xf32>
    %c0_78 = arith.constant 0 : index
    %c0_79 = arith.constant 0 : index
    %217 = vector.load %arg20[%c0_78, %c0_79] : memref<1x512xf32, #tpu.memory_space<vmem>>, vector<1x512xf32>
    %218 = vector.broadcast %217 : vector<1x512xf32> to vector<8x512xf32>
    %219 = arith.addf %216, %218 : vector<8x512xf32>
    %c0_80 = arith.constant 0 : index
    %c0_81 = arith.constant 0 : index
    %220 = vector.load %arg21[%c0_80, %c0_81] : memref<8x512xf32, #tpu.memory_space<vmem>>, vector<8x512xf32>
    tpu.vector_store %arg21[%c0_80, %c0_81], %219 {strides = array<i32>} : memref<8x512xf32, #tpu.memory_space<vmem>>, vector<8x512xf32>,
    return
  }
  func.func @transform_0(%arg0: i32) -> (i32, i32) {
    %c0_i32 = arith.constant 0 : i32
    %c0_i32_0 = arith.constant 0 : i32
    return %arg0, %c0_i32 : i32, i32
  }
  func.func @transform_1(%arg0: i32) -> (i32, i32) {
    %c0_i32 = arith.constant 0 : i32
    %c0_i32_0 = arith.constant 0 : i32
    %c0_i32_1 = arith.constant 0 : i32
    return %c0_i32, %c0_i32_0 : i32, i32
  }
  func.func @transform_2(%arg0: i32) -> (i32, i32) {
    %c0_i32 = arith.constant 0 : i32
    %c0_i32_0 = arith.constant 0 : i32
    %c0_i32_1 = arith.constant 0 : i32
    return %c0_i32, %c0_i32_0 : i32, i32
  }
  func.func @transform_3(%arg0: i32) -> (i32, i32) {
    %c0_i32 = arith.constant 0 : i32
    %c0_i32_0 = arith.constant 0 : i32
    %c0_i32_1 = arith.constant 0 : i32
    return %c0_i32, %c0_i32_0 : i32, i32
  }
  func.func @transform_4(%arg0: i32) -> (i32, i32) {
    %c0_i32 = arith.constant 0 : i32
    %c0_i32_0 = arith.constant 0 : i32
    %c0_i32_1 = arith.constant 0 : i32
    return %c0_i32, %c0_i32_0 : i32, i32
  }
  func.func @transform_5(%arg0: i32) -> (i32, i32) {
    %c0_i32 = arith.constant 0 : i32
    %c0_i32_0 = arith.constant 0 : i32
    %c0_i32_1 = arith.constant 0 : i32
    return %c0_i32, %c0_i32_0 : i32, i32
  }
  func.func @transform_6(%arg0: i32) -> (i32, i32) {
    %c0_i32 = arith.constant 0 : i32
    %c0_i32_0 = arith.constant 0 : i32
    %c0_i32_1 = arith.constant 0 : i32
    return %c0_i32, %c0_i32_0 : i32, i32
  }
  func.func @transform_7(%arg0: i32) -> (i32, i32) {
    %c0_i32 = arith.constant 0 : i32
    %c0_i32_0 = arith.constant 0 : i32
    %c0_i32_1 = arith.constant 0 : i32
    return %c0_i32, %c0_i32_0 : i32, i32
  }
  func.func @transform_8(%arg0: i32) -> (i32, i32) {
    %c0_i32 = arith.constant 0 : i32
    %c0_i32_0 = arith.constant 0 : i32
    %c0_i32_1 = arith.constant 0 : i32
    return %c0_i32, %c0_i32_0 : i32, i32
  }
  func.func @transform_9(%arg0: i32) -> (i32, i32) {
    %c0_i32 = arith.constant 0 : i32
    %c0_i32_0 = arith.constant 0 : i32
    %c0_i32_1 = arith.constant 0 : i32
    return %c0_i32, %c0_i32_0 : i32, i32
  }
  func.func @transform_10(%arg0: i32) -> (i32, i32) {
    %c0_i32 = arith.constant 0 : i32
    %c0_i32_0 = arith.constant 0 : i32
    %c0_i32_1 = arith.constant 0 : i32
    return %c0_i32, %c0_i32_0 : i32, i32
  }
  func.func @transform_11(%arg0: i32) -> (i32, i32) {
    %c0_i32 = arith.constant 0 : i32
    %c0_i32_0 = arith.constant 0 : i32
    %c0_i32_1 = arith.constant 0 : i32
    return %c0_i32, %c0_i32_0 : i32, i32
  }
  func.func @transform_12(%arg0: i32) -> (i32, i32) {
    %c0_i32 = arith.constant 0 : i32
    %c0_i32_0 = arith.constant 0 : i32
    %c0_i32_1 = arith.constant 0 : i32
    return %c0_i32, %c0_i32_0 : i32, i32
  }
  func.func @transform_13(%arg0: i32) -> (i32, i32) {
    %c0_i32 = arith.constant 0 : i32
    %c0_i32_0 = arith.constant 0 : i32
    %c0_i32_1 = arith.constant 0 : i32
    return %c0_i32, %c0_i32_0 : i32, i32
  }
  func.func @transform_14(%arg0: i32) -> (i32, i32) {
    %c0_i32 = arith.constant 0 : i32
    %c0_i32_0 = arith.constant 0 : i32
    %c0_i32_1 = arith.constant 0 : i32
    return %c0_i32, %c0_i32_0 : i32, i32
  }
  func.func @transform_15(%arg0: i32) -> (i32, i32) {
    %c0_i32 = arith.constant 0 : i32
    %c0_i32_0 = arith.constant 0 : i32
    %c0_i32_1 = arith.constant 0 : i32
    return %c0_i32, %c0_i32_0 : i32, i32
  }
  func.func @transform_16(%arg0: i32) -> (i32, i32) {
    %c0_i32 = arith.constant 0 : i32
    %c0_i32_0 = arith.constant 0 : i32
    %c0_i32_1 = arith.constant 0 : i32
    return %c0_i32, %c0_i32_0 : i32, i32
  }
  func.func @transform_17(%arg0: i32) -> (i32, i32) {
    %c0_i32 = arith.constant 0 : i32
    %c0_i32_0 = arith.constant 0 : i32
    %c0_i32_1 = arith.constant 0 : i32
    return %c0_i32, %c0_i32_0 : i32, i32
  }
  func.func @transform_18(%arg0: i32) -> (i32, i32) {
    %c0_i32 = arith.constant 0 : i32
    %c0_i32_0 = arith.constant 0 : i32
    %c0_i32_1 = arith.constant 0 : i32
    return %c0_i32, %c0_i32_0 : i32, i32
  }
  func.func @transform_19(%arg0: i32) -> (i32, i32) {
    %c0_i32 = arith.constant 0 : i32
    %c0_i32_0 = arith.constant 0 : i32
    %c0_i32_1 = arith.constant 0 : i32
    return %c0_i32, %c0_i32_0 : i32, i32
  }
  func.func @transform_20(%arg0: i32) -> (i32, i32) {
    %c0_i32 = arith.constant 0 : i32
    %c0_i32_0 = arith.constant 0 : i32
    return %arg0, %c0_i32 : i32, i32
  }
}

</mosaic_0001>

<bundles_post_ra>
// kernel: tpu_custom_call.1
= control target key start
LH: loop header
LB: loop body
LE: loop exit
PB: predicated region body
PF: predicated region fallthrough
CT: control target
= control target key end

     0   :  { %s7029_s0 = inlined_call_operand.hbm [shape: f32[16,256], index: 0, kind: input, shape index: {}]   ;;  %s7030_s1 = inlined_call_operand.hbm [shape: f32[256,512], index: 1, kind: input, shape index: {}]   ;;  %s7031_s2 = inlined_call_operand.hbm [shape: f32[1,512], index: 2, kind: input, shape index: {}]   ;;  %s7032_s3 = inlined_call_operand.hbm [shape: f32[1,256], index: 3, kind: input, shape index: {}]   ;;  %s7033_s4 = inlined_call_operand.hbm [shape: f32[1,256], index: 4, kind: input, shape index: {}]   ;;  %s7034_s5 = inlined_call_operand.hbm [shape: f32[1,256], index: 5, kind: input, shape index: {}]   ;;  %s7035_s6 = inlined_call_operand.hbm [shape: f32[1,256], index: 6, kind: input, shape index: {}]   ;;  %s7036_s7 = inlined_call_operand.hbm [shape: f32[256,768], index: 7, kind: input, shape index: {}]   ;;  %s7037_s8 = inlined_call_operand.hbm [shape: f32[1,256], index: 8, kind: input, shape index: {}]   ;;  %s7038_s9 = inlined_call_operand.hbm [shape: f32[256,768], index: 9, kind: input, shape index: {}]   ;;  %s7039_s10 = inlined_call_operand.hbm [shape: f32[1,256], index: 10, kind: input, shape index: {}]   ;;  %s7040_s11 = inlined_call_operand.hbm [shape: f32[1,512], index: 11, kind: input, shape index: {}]   ;;  %s7041_s12 = inlined_call_operand.hbm [shape: f32[256,256], index: 12, kind: input, shape index: {}]   ;;  %s7042_s13 = inlined_call_operand.hbm [shape: f32[256,256], index: 13, kind: input, shape index: {}]   ;;  %s7043_s14 = inlined_call_operand.hbm [shape: f32[1,256], index: 14, kind: input, shape index: {}]   ;;  %s7044_s15 = inlined_call_operand.hbm [shape: f32[256,2304], index: 15, kind: input, shape index: {}]   ;;  %s7045_s16 = inlined_call_operand.hbm [shape: f32[1,256], index: 16, kind: input, shape index: {}]   ;;  %s7046_s17 = inlined_call_operand.hbm [shape: f32[256,512], index: 17, kind: input, shape index: {}]   ;;  %s7047_s18 = inlined_call_operand.hbm [shape: f32[256,512], index: 18, kind: input, shape index: {}]   ;;  %s7048_s19 = inlined_call_operand.hbm [shape: f32[1,512], index: 19, kind: input, shape index: {}]   ;;  %s7049_s20 = inlined_call_operand.hbm [shape: f32[16,512], index: 20, kind: output, shape index: {}]  }
   0x1   :  { %7060 = sst [smem:[#allocation50_spill]] %s7029_s0 }
   0x2   :  { %7061 = sst [smem:[#allocation51_spill]] %s7030_s1 }
   0x3   :  { %7062 = sst [smem:[#allocation52_spill]] %s7031_s2 }
   0x4   :  { %7063 = sst [smem:[#allocation53_spill]] %s7032_s3 }
   0x5   :  { %7064 = sst [smem:[#allocation54_spill]] %s7033_s4 }
   0x6   :  { %7065 = sst [smem:[#allocation55_spill]] %s7034_s5 }
   0x7   :  { %7066 = sst [smem:[#allocation56_spill]] %s7035_s6 }
   0x8   :  { %7067 = sst [smem:[#allocation57_spill]] %s7036_s7 }
   0x9   :  { %7068 = sst [smem:[#allocation58_spill]] %s7037_s8 }
   0xa   :  { %7069 = sst [smem:[#allocation59_spill]] %s7038_s9 }
   0xb   :  { %7070 = sst [smem:[#allocation60_spill]] %s7039_s10 }
   0xc   :  { %7071 = sst [smem:[#allocation61_spill]] %s7048_s19 }
   0xd   :  { %7072 = sst [smem:[#allocation62_spill]] %s7049_s20 }
   0xe   :  { %25 = vsyncpa [#allocation3], 0 }
   0xf   :  { %27 = vsyncpa [#allocation3 + $0x1], 0 }
  0x10   :  { %28 = vsyncpa [#allocation6], 0 }
  0x11   :  { %29 = vsyncpa [#allocation9], 0 }
  0x12   :  { %30 = vsyncpa [#allocation12], 0 }
  0x13   :  { %31 = vsyncpa [#allocation15], 0 }
  0x14   :  { %32 = vsyncpa [#allocation18], 0 }
  0x15   :  { %33 = vsyncpa [#allocation21], 0 }
  0x16   :  { %34 = vsyncpa [#allocation24], 0 }
  0x17   :  { %35 = vsyncpa [#allocation27], 0 }
  0x18   :  { %36 = vsyncpa [#allocation30], 0 }
  0x19   :  { %37 = vsyncpa [#allocation33], 0 }
  0x1a   :  { %38 = vsyncpa [#allocation4], 0 }
  0x1b   :  { %40 = vsyncpa [#allocation4 + $0x1], 0  ;;  %s6357_s1 = smov 0   ;;  %s6359_s22 = smov 0  }
  0x1c   :  { %s6361_s23 = smov 0   ;;  %s6363_s24 = smov 0  }
  0x1d LB: > { %7073 = sst [smem:[#allocation47_spill]] %s6210_s1  ;;  %s6381_s27 = sadd.s32 4294967295, %s6222_s24   ;;  %s6222_s24 = sphi %s6363_s24, %s7109_s24   ;;  %s6218_s23 = sphi %s6361_s23, %s7108_s23   ;;  %s6214_s22 = sphi %s6359_s22, %s7107_s22   ;;  %s6210_s1 = sphi %s6357_s1, %s7106_s1  }
  0x1e   : > { %7074 = sst [smem:[#allocation48_spill]] %s6214_s22  ;;  %p5177_p0 = scmp.ge.s32.totalorder %s6222_s24, 1 }
  0x1f   : > { %s7075_s3 = sld [smem:[#allocation51_spill]]  ;;  %p67_p1 = scmp.eq.s32.totalorder %s6381_s27, 0 }
  0x20   : > { %p502_p2 = scmp.lt.s32.totalorder %s6222_s24, 3  ;;  %s6224_s4 = smov [#allocation5]  }
  0x21   : > { %s515_s29 = sshll.u32 %s6224_s4, 4  ;;  %s7078_s21 = sld [smem:[#allocation53_spill]]  ;;  %s516_s29 = int_to_ptr.vmem [resolvable:$true] %s515_s29 }
  0x22   : > { %p6386_p3 = pnand %p5177_p0, %p502_p2  ;;  %s7080_s5 = sld [smem:[#allocation55_spill]] }
  0x23   : > { %s7054_s19 = smov 512   ;;  %s7056_s22 = smov 32  }
  0x24   : > { %s7076_s28 = scalar_select %p6386_p3, 1, 0 }
  0x25   : > { %s513_s26 = sshll.u32 %s7075_s3, 4  ;;  %p5320_p4 = pneg %p6386_p3  ;;  %s514_s26 = int_to_ptr.hbm [resolvable:$true] %s513_s26 }
  0x26   : > { %7077 = sst [smem:[#allocation49_spill]] %s7076_s28  ;;  %s6225_s28 = smov [#allocation8]  }
  0x27   : > { %s540_s2 = sshll.u32 %s7078_s21, 4  ;;  %p6398_p6 = pnand %p5320_p4, %p67_p1  ;;  %s541_s2 = int_to_ptr.hbm [resolvable:$true] %s540_s2 }
  0x28   : > { %s564_s4 = sshll.u32 %s7080_s5, 4  ;;  %s542_s1 = sshll.u32 %s6225_s28, 4  ;;  %s543_s1 = int_to_ptr.vmem [resolvable:$true] %s542_s1  ;;  %s565_s4 = int_to_ptr.hbm [resolvable:$true] %s564_s4 }
  0x29   : > { %5323 = dma.hbm_to_vmem [thread:$0]  (!%p6398_p6), %s514_s26, 16384, %s516_s29, [#allocation6], %s7054_s19, %s7054_s19, %s7056_s22  }
  0x2a   : > { %5329 = dma.hbm_to_vmem [thread:$0]  (!%p6398_p6), %s541_s2, 32, %s543_s1, [#allocation9]  }
  0x2b   : > { %s7081_s7 = sld [smem:[#allocation57_spill]]  ;;  %s6228_s20 = smov [#allocation11]  }
  0x2c   : > { %s566_s3 = sshll.u32 %s6228_s20, 4  ;;  %s6229_s28 = smov [#allocation14]   ;;  %s567_s3 = int_to_ptr.vmem [resolvable:$true] %s566_s3 }
  0x2d   : > { %5335 = dma.hbm_to_vmem [thread:$0]  (!%p6398_p6), %s565_s4, 32, %s567_s3, [#allocation12]  }
  0x2e   : > { %s589_s5 = sshll.u32 %s6229_s28, 4  ;;  %s6230_s26 = smov 768   ;;  %s590_s5 = int_to_ptr.vmem [resolvable:$true] %s589_s5 }
  0x2f   : > { %s6231_s29 = smov 48   ;;  %s7082_s9 = sld [smem:[#allocation59_spill]] }
  0x30   : > { %s6232_s0 = smov [#allocation17]   ;;  %s640_s4 = sshll.u32 %s7040_s11, 4  ;;  %s641_s4 = int_to_ptr.hbm [resolvable:$true] %s640_s4 }
  0x31   : > { %s587_s21 = sshll.u32 %s7081_s7, 4  ;;  %s615_s20 = sshll.u32 %s6232_s0, 4  ;;  %s588_s21 = int_to_ptr.hbm [resolvable:$true] %s587_s21  ;;  %s616_s20 = int_to_ptr.vmem [resolvable:$true] %s615_s20 }
  0x32   : > { %5341 = dma.hbm_to_vmem [thread:$0]  (!%p6398_p6), %s588_s21, 24576, %s590_s5, [#allocation15], %s6230_s26, %s6230_s26, %s6231_s29  }
  0x33   : > { %s6233_s3 = smov [#allocation20]   ;;  %s665_s1 = sshll.u32 %s7042_s13, 4  ;;  %s666_s1 = int_to_ptr.hbm [resolvable:$true] %s665_s1 }
  0x34   : > { %s642_s28 = sshll.u32 %s6233_s3, 4  ;;  %s6234_s2 = smov [#allocation23]   ;;  %s643_s28 = int_to_ptr.vmem [resolvable:$true] %s642_s28 }
  0x35   : > { %s613_s30 = sshll.u32 %s7082_s9, 4  ;;  %s667_s0 = sshll.u32 %s6234_s2, 4  ;;  %s614_s30 = int_to_ptr.hbm [resolvable:$true] %s613_s30  ;;  %s668_s0 = int_to_ptr.vmem [resolvable:$true] %s667_s0 }
  0x36   : > { %5347 = dma.hbm_to_vmem [thread:$0]  (!%p6398_p6), %s614_s30, 24576, %s616_s20, [#allocation18], %s6230_s26, %s6230_s26, %s6231_s29  }
  0x37   : > { %5353 = dma.hbm_to_vmem [thread:$0]  (!%p6398_p6), %s641_s4, 64, %s643_s28, [#allocation21]  }
  0x38   : > { %s691_s7 = sshll.u32 %s7044_s15, 4  ;;  %s7058_s26 = smov 256   ;;  %s692_s7 = int_to_ptr.hbm [resolvable:$true] %s691_s7 }
  0x39   : > { %s7059_s29 = smov 16   ;;  %s6237_s30 = smov [#allocation26]  }
  0x3a   : > { %5359 = dma.hbm_to_vmem [thread:$0]  (!%p6398_p6), %s666_s1, 8192, %s668_s0, [#allocation24], %s7058_s26, %s7058_s26, %s7059_s29  }
  0x3b   : > { %s693_s20 = sshll.u32 %s6237_s30, 4  ;;  %s6238_s4 = smov 2304   ;;  %s694_s20 = int_to_ptr.vmem [resolvable:$true] %s693_s20 }
  0x3c   : > { %s6239_s3 = smov 144   ;;  %s717_s21 = sshll.u32 %s7046_s17, 4  ;;  %s718_s21 = int_to_ptr.hbm [resolvable:$true] %s717_s21 }
  0x3d   : > { %5365 = dma.hbm_to_vmem [thread:$0]  (!%p6398_p6), %s692_s7, 73728, %s694_s20, [#allocation27], %s6238_s4, %s6238_s4, %s6239_s3  }
  0x3e   : > { %s6240_s2 = smov [#allocation29]   ;;  %s7083_s0 = sld [smem:[#allocation52_spill]] }
  0x3f   : > { %s719_s19 = sshll.u32 %s6240_s2, 4  ;;  %s7084_s30 = smov 32   ;;  %s720_s19 = int_to_ptr.vmem [resolvable:$true] %s719_s19 }
  0x40   : > { %s7085_s29 = smov 512   ;;  %s6241_s7 = smov [#allocation7]  }
  0x41   : > { %5371 = dma.hbm_to_vmem [thread:$0]  (!%p6398_p6), %s718_s21, 16384, %s720_s19, [#allocation30], %s7085_s29, %s7085_s29, %s7084_s30  }
  0x42   : > { %s530_s20 = sshll.u32 %s6241_s7, 4  ;;  %s7086_s28 = sld [smem:[#allocation54_spill]]  ;;  %s531_s20 = int_to_ptr.vmem [resolvable:$true] %s530_s20 }
  0x43   : > { %s7087_s6 = sld [smem:[#allocation56_spill]]  ;;  %s6243_s21 = smov [#allocation13]  }
  0x44   : > { %s528_s26 = sshll.u32 %s7083_s0, 4  ;;  %s6242_s0 = smov [#allocation10]   ;;  %s529_s26 = int_to_ptr.hbm [resolvable:$true] %s528_s26 }
  0x45   : > { %5326 = dma.hbm_to_vmem [thread:$0]  (!%p6398_p6), %s529_s26, 64, %s531_s20, [#allocation6]  }
  0x46   : > { %s554_s9 = sshll.u32 %s6242_s0, 4  ;;  %s578_s19 = sshll.u32 %s6243_s21, 4  ;;  %s555_s9 = int_to_ptr.vmem [resolvable:$true] %s554_s9  ;;  %s579_s19 = int_to_ptr.vmem [resolvable:$true] %s578_s19 }
  0x47   : > { %s7088_s8 = sld [smem:[#allocation58_spill]]  ;;  %s6244_s2 = smov [#allocation16]  }
  0x48   : > { %s552_s5 = sshll.u32 %s7086_s28, 4  ;;  %s7089_s10 = sld [smem:[#allocation60_spill]]  ;;  %s553_s5 = int_to_ptr.hbm [resolvable:$true] %s552_s5 }
  0x49   : > { %s576_s1 = sshll.u32 %s7087_s6, 4  ;;  %s604_s22 = sshll.u32 %s6244_s2, 4  ;;  %s577_s1 = int_to_ptr.hbm [resolvable:$true] %s576_s1  ;;  %s605_s22 = int_to_ptr.vmem [resolvable:$true] %s604_s22 }
  0x4a   : > { %5332 = dma.hbm_to_vmem [thread:$0]  (!%p6398_p6), %s553_s5, 32, %s555_s9, [#allocation9]  }
  0x4b   : > { %5338 = dma.hbm_to_vmem [thread:$0]  (!%p6398_p6), %s577_s1, 32, %s579_s19, [#allocation12]  }
  0x4c   : > { %s6245_s9 = smov [#allocation19]   ;;  %s651_s7 = sshll.u32 %s7041_s12, 4  ;;  %s652_s7 = int_to_ptr.hbm [resolvable:$true] %s651_s7 }
  0x4d   : > { %s602_s3 = sshll.u32 %s7088_s8, 4  ;;  %s630_s5 = sshll.u32 %s6245_s9, 4  ;;  %s603_s3 = int_to_ptr.hbm [resolvable:$true] %s602_s3  ;;  %s631_s5 = int_to_ptr.vmem [resolvable:$true] %s630_s5 }
  0x4e   : > { %s628_s28 = sshll.u32 %s7089_s10, 4  ;;  %s680_s4 = sshll.u32 %s7043_s14, 4  ;;  %s629_s28 = int_to_ptr.hbm [resolvable:$true] %s628_s28  ;;  %s681_s4 = int_to_ptr.hbm [resolvable:$true] %s680_s4 }
  0x4f   : > { %5344 = dma.hbm_to_vmem [thread:$0]  (!%p6398_p6), %s603_s3, 32, %s605_s22, [#allocation15]  }
  0x50   : > { %5350 = dma.hbm_to_vmem [thread:$0]  (!%p6398_p6), %s629_s28, 32, %s631_s5, [#allocation18]  }
  0x51   : > { %s6246_s26 = smov [#allocation22]   ;;  %s7090_s3 = smov 16  }
  0x52   : > { %s653_s20 = sshll.u32 %s6246_s26, 4  ;;  %s7091_s2 = smov 256   ;;  %s654_s20 = int_to_ptr.vmem [resolvable:$true] %s653_s20 }
  0x53   : > { %5356 = dma.hbm_to_vmem [thread:$0]  (!%p6398_p6), %s652_s7, 8192, %s654_s20, [#allocation21], %s7091_s2, %s7091_s2, %s7090_s3  }
  0x54   : > { %s6247_s22 = smov [#allocation25]   ;;  %s706_s28 = sshll.u32 %s7045_s16, 4  ;;  %s707_s28 = int_to_ptr.hbm [resolvable:$true] %s706_s28 }
  0x55   : > { %s682_s9 = sshll.u32 %s6247_s22, 4  ;;  %s731_s19 = sshll.u32 %s7047_s18, 4  ;;  %s683_s9 = int_to_ptr.vmem [resolvable:$true] %s682_s9  ;;  %s732_s19 = int_to_ptr.hbm [resolvable:$true] %s731_s19 }
  0x56   : > { %5362 = dma.hbm_to_vmem [thread:$0]  (!%p6398_p6), %s681_s4, 32, %s683_s9, [#allocation24]  }
  0x57   : > { %s6248_s26 = smov [#allocation28]   ;;  %s7092_s20 = sld [smem:[#allocation48_spill]] }
  0x58   : > { %s708_s7 = sshll.u32 %s6248_s26, 4  ;;  %s6249_s3 = smov [#allocation31]   ;;  %s709_s7 = int_to_ptr.vmem [resolvable:$true] %s708_s7 }
  0x59   : > { %5368 = dma.hbm_to_vmem [thread:$0]  (!%p6398_p6), %s707_s28, 32, %s709_s7, [#allocation27]  }
  0x5a   : > { %s733_s4 = sshll.u32 %s6249_s3, 4  ;;  %s7093_s9 = sld [smem:[#allocation61_spill]]  ;;  %s734_s4 = int_to_ptr.vmem [resolvable:$true] %s733_s4 }
  0x5b   : > { %s7094_s0 = sld [smem:[#allocation47_spill]]  ;;  %s6250_s28 = smov [#allocation32]  }
  0x5c   : > { %5374 = dma.hbm_to_vmem [thread:$0]  (!%p6398_p6), %s732_s19, 16384, %s734_s4, [#allocation30], %s7085_s29, %s7085_s29, %s7084_s30  }
  0x5d   : > { %s748_s5 = sshll.u32 %s6250_s28, 4  ;;  %s5176_s1 = sadd.s32 4294967294, %s6222_s24   ;;  %s749_s5 = int_to_ptr.vmem [resolvable:$true] %s748_s5 }
  0x5e   : > { %s6508_s26 = sadd.s32 1, %s6222_s24   ;;  %s53_s7 = sadd.s32 1, %s6218_s23 }
  0x5f   : > { %s50_s3 = ssub.s32 %s6222_s24, %s6508_s26  ;;  %p60_p7 = scmp.ne.s32.totalorder %s6218_s23, %s7092_s20 }
  0x60   : > { %s746_s21 = sshll.u32 %s7093_s9, 4  ;;  %p51_p8 = scmp.eq.s32.totalorder %s50_s3, 0  ;;  %s747_s21 = int_to_ptr.hbm [resolvable:$true] %s746_s21 }
  0x61   : > { %5377 = dma.hbm_to_vmem [thread:$0]  (!%p6398_p6), %s747_s21, 64, %s749_s5, [#allocation33]  }
  0x62   : > { %p61_p9 = scmp.eq.s32.totalorder %s6222_s24, 0  ;;  %p66_p10 = scmp.ne.s32.totalorder %s7092_s20, %s7094_s0 }
  0x63   : > { %p489_p11 = scmp.eq.s32.totalorder %s6381_s27, 1  ;;  %p495_p0 = scmp.eq.s32.totalorder %s5176_s1, 1 }
  0x64   : > { %s6520_s29 = scalar_select %p51_p8, %s6218_s23, %s53_s7  }
  0x65   : > { %p6524_p12 = por %p67_p1, %p66_p10  ;;  %p6528_p13 = por %p489_p11, %p60_p7 }
  0x66   : > { %p62_p2 = por %p61_p9, %p60_p7  ;;  %s759_s19 = sand.u32 1, %s6218_s23  }
  0x67   : > { %p6533_p4 = por %p495_p0, %p66_p10  ;;  %p5405_p6 = scmp.lt.s32.totalorder %s6222_s24, 2 }
  0x68   : > { %s5198_s20 = sshll.u32 %s759_s19, 4  ;;  %s5238_s2 = sshll.u32 %s6222_s24, 4 }
  0x69   : > { %s7098_s0 = sld [smem:[#allocation50_spill]]  ;;  %s763_s5 = scalar_lea.vmem [#allocation2], %s5198_s20 }
  0x6a   : > { %s772_s7 = sshll.u32 %s763_s5, 4  ;;  %p6542_p8 = pnand %p5405_p6, %p62_p2  ;;  %s773_s7 = int_to_ptr.vmem [resolvable:$true] %s772_s7 }
  0x6b   : > { %s760_s3 = scalar_lea.sflag [#allocation3], %s759_s19 }
  0x6c   : > { %p6090_p9 = pneg %p6542_p8 }
  0x6f   : > { %s768_s21 = scalar_lea.hbm %s7098_s0, %s5238_s2  ;;  %s6093_s20 = scalar_lea.hbm %s7098_s0, 32 }
  0x70   : > { %s770_s28 = sshll.u32 %s768_s21, 4  ;;  %s771_s28 = int_to_ptr.hbm [resolvable:$true] %s770_s28 }
  0x71   : > { %s6086_s6 = sshra.s32 %s771_s28, 4  ;;  %s6087_s6 = int_to_ptr.hbm [resolvable:$true] %s6086_s6 }
  0x72   : > { %s6088_s8 = scalar_lea.hbm %s6087_s6, 16  ;;  %p6094_p0 = scmp.lt.s32.totalorder %s6087_s6, %s7098_s0 }
  0x73   : > { %p6089_p7 = scmp.ne.s32.totalorder %s6087_s6, %s6088_s8  ;;  %p6095_p2 = scmp.lt.s32.totalorder %s6093_s20, %s6088_s8 }
  0x75   : > { %p6091_p10 = pnand %p6090_p9, %p6089_p7  ;;  %p6096_p6 = por %p6095_p2, %p6094_p0 }
  0x77   : > { %p6092_p11 = pneg %p6091_p10 }
  0x79   : > { %p6097_p5 = pnand %p6096_p6, %p6092_p11 }
  0x7b   : > { %6100 = shalt.err (!%p6097_p5)
}
  0x7c   : > { %5381 = dma.hbm_to_vmem [thread:$0]  (!%p6542_p8), %s771_s28, 256, %s773_s7, %s760_s3  }
  0x7d   : > { %781 = sbr.rel (%p6386_p3) target bundleno = 2127 (0x84f), region = 100  ;;  %s7101_s5 = sld [smem:[#allocation48_spill]] (!%p6386_p3) }
  0x83   : > { %s6559_s10 = sand.u32 1, %s7101_s5  }
  0x84   : > { %s5202_s2 = sshll.u32 %s6559_s10, 4  ;;  %s784_s22 = scalar_lea.sflag [#allocation3], %s6559_s10 }
  0x85   : > { %s6563_s9 = scalar_lea.vmem [#allocation2], %s5202_s2 }
  0x86   : > { %6161 = dma.done.wait (%p6524_p12), %s784_s22, 256  }
  0x87   : > { %6163 = vsyncadd (%p6524_p12), %s784_s22, 4294967040 }
  0x88   : > { %6165 = dma.done.wait (%p67_p1), [#allocation6], 16448  }
  0x89   : > { %6167 = vsyncadd (%p67_p1), [#allocation6], 4294950848 }
  0x8a   : > { %6169 = dma.done.wait (%p67_p1), [#allocation9], 64  }
  0x8b   : > { %6171 = vsyncadd (%p67_p1), [#allocation9], 4294967232 }
  0x8c   : > { %6173 = dma.done.wait (%p67_p1), [#allocation12], 64  }
  0x8d   : > { %6175 = vsyncadd (%p67_p1), [#allocation12], 4294967232 }
  0x8e   : > { %6177 = dma.done.wait (%p67_p1), [#allocation15], 24608  }
  0x8f   : > { %6179 = vsyncadd (%p67_p1), [#allocation15], 4294942688 }
  0x90   : > { %6181 = dma.done.wait (%p67_p1), [#allocation18], 24608  }
  0x91   : > { %6183 = vsyncadd (%p67_p1), [#allocation18], 4294942688 }
  0x92   : > { %6185 = dma.done.wait (%p67_p1), [#allocation21], 8256  }
  0x93   : > { %6187 = vsyncadd (%p67_p1), [#allocation21], 4294959040 }
  0x94   : > { %6189 = dma.done.wait (%p67_p1), [#allocation24], 8224  }
  0x95   : > { %6191 = vsyncadd (%p67_p1), [#allocation24], 4294959072 }
  0x96   : > { %6193 = dma.done.wait (%p67_p1), [#allocation27], 73760  }
  0x97   : > { %6195 = vsyncadd (%p67_p1), [#allocation27], 4294893536 }
  0x98   : > { %6197 = dma.done.wait (%p67_p1), [#allocation30], 32768  }
  0x99   : > { %6199 = vsyncadd (%p67_p1), [#allocation30], 4294934528 }
  0x9a   : > { %6201 = dma.done.wait (%p67_p1), [#allocation33], 64  }
  0x9b   : > { %6203 = vsyncadd (%p67_p1), [#allocation33], 4294967232  ;;  %v1002_v0 = vld [vmem:[#allocation5 + $0x1e0] sm:$0xff]  ;;  %v1003_v1 = vld [vmem:[#allocation5 + $0x1e8] sm:$0xff]  ;;  %s5222_s6 = sshll.u32 %s6559_s10, 5  ;;  %s5239_s25 = sshll.u32 %s6381_s27, 5 }
  0x9c   : > { %v998_v2 = vld [vmem:[#allocation5 + $0x1c0] sm:$0xff]  ;;  %1080 = vmatpush.msra.mxu0 %v1002_v0  ;;  %1120 = vmatpush.msra.mxu2 %v1003_v1  ;;  %v999_v4 = vld [vmem:[#allocation5 + $0x1c8] sm:$0xff]  ;;  %v1005_v63 = vld [vmem:[#allocation5 + $0x1f8] sm:$0xff]  ;;  %s6989_s8 = scalar_lea.vmem [#allocation34], %s5222_s6  ;;  %s7102_s1 = sld [smem:[#allocation62_spill]] }
  0x9d   : > { %v1066_v3 = vld [vmem:[#allocation5 + $0x3e0] sm:$0xff]  ;;  %v1067_v5 = vld [vmem:[#allocation5 + $0x3e8] sm:$0xff]  ;;  %s4922_s21 = sshll.u32 %s6989_s8, 4  ;;  %s4909_s27 = scalar_lea.sflag [#allocation4], %s6559_s10  ;;  %s4923_s21 = int_to_ptr.vmem [resolvable:$true] %s4922_s21 }
  0x9e   : > { %1100 = vmatpush.msra.mxu1 %v1066_v3  ;;  %1140 = vmatpush.msra.mxu3 %v1067_v5  ;;  %v994_v6 = vld [vmem:[#allocation5 + $0x1a0] sm:$0xff]  ;;  %v995_v8 = vld [vmem:[#allocation5 + $0x1a8] sm:$0xff]  ;;  %v1001_v3 = vld [vmem:[#allocation5 + $0x1d8] sm:$0xff] }
  0x9f   : > { %v1062_v7 = vld [vmem:[#allocation5 + $0x3c0] sm:$0xff]  ;;  %1081 = vmatpush.msra.mxu0 %v998_v2  ;;  %1121 = vmatpush.msra.mxu2 %v999_v4  ;;  %v1063_v9 = vld [vmem:[#allocation5 + $0x3c8] sm:$0xff]  ;;  %v1069_v4 = vld [vmem:[#allocation5 + $0x3f8] sm:$0xff] }
  0xa0   : > { %v1058_v10 = vld [vmem:[#allocation5 + $0x3a0] sm:$0xff]  ;;  %1101 = vmatpush.msra.mxu1 %v1062_v7  ;;  %1141 = vmatpush.msra.mxu3 %v1063_v9  ;;  %v991_v12 = vld [vmem:[#allocation5 + $0x188] sm:$0xff]  ;;  %v1004_v5 = vld [vmem:[#allocation5 + $0x1f0] sm:$0xff] }
  0xa1   : > { %v990_v11 = vld [vmem:[#allocation5 + $0x180] sm:$0xff]  ;;  %v1059_v13 = vld [vmem:[#allocation5 + $0x3a8] sm:$0xff]  ;;  %1082 = vmatpush.msra.mxu0 %v994_v6  ;;  %1122 = vmatpush.msra.mxu2 %v995_v8  ;;  %v997_v6 = vld [vmem:[#allocation5 + $0x1b8] sm:$0xff] }
  0xa2   : > { %v1054_v14 = vld [vmem:[#allocation5 + $0x380] sm:$0xff]  ;;  %v1055_v15 = vld [vmem:[#allocation5 + $0x388] sm:$0xff]  ;;  %1102 = vmatpush.msra.mxu1 %v1058_v10  ;;  %1142 = vmatpush.msra.mxu3 %v1059_v13  ;;  %v1068_v7 = vld [vmem:[#allocation5 + $0x3f0] sm:$0xff]  ;;  %s7103_s3 = smov %s7102_s1  ;;  %s4920_s20 = scalar_lea.hbm %s7102_s1, %s5239_s25 }
  0xa3   : > { %v986_v16 = vld [vmem:[#allocation5 + $0x160] sm:$0xff]  ;;  %v987_v17 = vld [vmem:[#allocation5 + $0x168] sm:$0xff]  ;;  %1083 = vmatpush.msra.mxu0 %v990_v11  ;;  %1123 = vmatpush.msra.mxu2 %v991_v12  ;;  %v1065_v8 = vld [vmem:[#allocation5 + $0x3d8] sm:$0xff]  ;;  %s4924_s19 = sshll.u32 %s4920_s20, 4  ;;  %s6136_s6 = scalar_lea.hbm %s7103_s3, 64  ;;  %s4925_s19 = int_to_ptr.hbm [resolvable:$true] %s4924_s19 }
  0xa4   : > { %v1050_v18 = vld [vmem:[#allocation5 + $0x360] sm:$0xff]  ;;  %v1051_v19 = vld [vmem:[#allocation5 + $0x368] sm:$0xff]  ;;  %1103 = vmatpush.msra.mxu1 %v1054_v14  ;;  %1143 = vmatpush.msra.mxu3 %v1055_v15  ;;  %v1000_v9 = vld [vmem:[#allocation5 + $0x1d0] sm:$0xff]  ;;  %s6130_s5 = sshra.s32 %s4925_s19, 4  ;;  %s6131_s5 = int_to_ptr.hbm [resolvable:$true] %s6130_s5 }
  0xa5   : > { %v982_v20 = vld [vmem:[#allocation5 + $0x140] sm:$0xff]  ;;  %v983_v21 = vld [vmem:[#allocation5 + $0x148] sm:$0xff]  ;;  %1084 = vmatpush.msra.mxu0 %v986_v16  ;;  %1124 = vmatpush.msra.mxu2 %v987_v17  ;;  %v993_v10 = vld [vmem:[#allocation5 + $0x198] sm:$0xff]  ;;  %s6132_s2 = scalar_lea.hbm %s6131_s5, 32  ;;  %p6137_p12 = scmp.lt.s32.totalorder %s6131_s5, %s7103_s3 }
  0xa6   : > { %v1046_v22 = vld [vmem:[#allocation5 + $0x340] sm:$0xff]  ;;  %v1047_v23 = vld [vmem:[#allocation5 + $0x348] sm:$0xff]  ;;  %1104 = vmatpush.msra.mxu1 %v1050_v18  ;;  %1144 = vmatpush.msra.mxu3 %v1051_v19  ;;  %v1064_v11 = vld [vmem:[#allocation5 + $0x3d0] sm:$0xff]  ;;  %p6133_p1 = scmp.ne.s32.totalorder %s6131_s5, %s6132_s2  ;;  %p6138_p8 = scmp.lt.s32.totalorder %s6136_s6, %s6132_s2 }
  0xa7   : > { %v978_v24 = vld [vmem:[#allocation5 + $0x120] sm:$0xff]  ;;  %v979_v25 = vld [vmem:[#allocation5 + $0x128] sm:$0xff]  ;;  %1085 = vmatpush.msra.mxu0 %v982_v20  ;;  %1125 = vmatpush.msra.mxu2 %v983_v21  ;;  %v1061_v12 = vld [vmem:[#allocation5 + $0x3b8] sm:$0xff] }
  0xa8   : > { %v1042_v26 = vld [vmem:[#allocation5 + $0x320] sm:$0xff]  ;;  %v1043_v27 = vld [vmem:[#allocation5 + $0x328] sm:$0xff]  ;;  %1105 = vmatpush.msra.mxu1 %v1046_v22  ;;  %1145 = vmatpush.msra.mxu3 %v1047_v23  ;;  %v996_v13 = vld [vmem:[#allocation5 + $0x1b0] sm:$0xff]  ;;  %p6134_p3 = pnand %p6133_p1, %p6528_p13  ;;  %p6139_p7 = por %p6138_p8, %p6137_p12 }
  0xa9   : > { %v974_v28 = vld [vmem:[#allocation5 + $0x100] sm:$0xff]  ;;  %v975_v29 = vld [vmem:[#allocation5 + $0x108] sm:$0xff]  ;;  %1086 = vmatpush.msra.mxu0 %v978_v24  ;;  %1126 = vmatpush.msra.mxu2 %v979_v25  ;;  %v989_v14 = vld [vmem:[#allocation5 + $0x178] sm:$0xff] }
  0xaa   : > { %v1038_v30 = vld [vmem:[#allocation5 + $0x300] sm:$0xff]  ;;  %v1039_v31 = vld [vmem:[#allocation5 + $0x308] sm:$0xff]  ;;  %1106 = vmatpush.msra.mxu1 %v1042_v26  ;;  %1146 = vmatpush.msra.mxu3 %v1043_v27  ;;  %v1060_v15 = vld [vmem:[#allocation5 + $0x3b0] sm:$0xff]  ;;  %p6135_p5 = pneg %p6134_p3 }
  0xab   : > { %v970_v32 = vld [vmem:[#allocation5 + $0xe0] sm:$0xff]  ;;  %v971_v33 = vld [vmem:[#allocation5 + $0xe8] sm:$0xff]  ;;  %1087 = vmatpush.msra.mxu0 %v974_v28  ;;  %1127 = vmatpush.msra.mxu2 %v975_v29  ;;  %v1057_v16 = vld [vmem:[#allocation5 + $0x398] sm:$0xff] }
  0xac   : > { %v1034_v34 = vld [vmem:[#allocation5 + $0x2e0] sm:$0xff]  ;;  %v1035_v35 = vld [vmem:[#allocation5 + $0x2e8] sm:$0xff]  ;;  %1107 = vmatpush.msra.mxu1 %v1038_v30  ;;  %1147 = vmatpush.msra.mxu3 %v1039_v31  ;;  %v992_v17 = vld [vmem:[#allocation5 + $0x190] sm:$0xff]  ;;  %p6140_p9 = pnand %p6139_p7, %p6135_p5 }
  0xad   : > { %v966_v36 = vld [vmem:[#allocation5 + $0xc0] sm:$0xff]  ;;  %v967_v37 = vld [vmem:[#allocation5 + $0xc8] sm:$0xff]  ;;  %1088 = vmatpush.msra.mxu0 %v970_v32  ;;  %1128 = vmatpush.msra.mxu2 %v971_v33  ;;  %v985_v18 = vld [vmem:[#allocation5 + $0x158] sm:$0xff] }
  0xae   : > { %v1030_v38 = vld [vmem:[#allocation5 + $0x2c0] sm:$0xff]  ;;  %v1031_v39 = vld [vmem:[#allocation5 + $0x2c8] sm:$0xff]  ;;  %1108 = vmatpush.msra.mxu1 %v1034_v34  ;;  %1148 = vmatpush.msra.mxu3 %v1035_v35  ;;  %v1056_v19 = vld [vmem:[#allocation5 + $0x390] sm:$0xff] }
  0xaf   : > { %v962_v40 = vld [vmem:[#allocation5 + $0xa0] sm:$0xff]  ;;  %v963_v41 = vld [vmem:[#allocation5 + $0xa8] sm:$0xff]  ;;  %1089 = vmatpush.msra.mxu0 %v966_v36  ;;  %1129 = vmatpush.msra.mxu2 %v967_v37  ;;  %v1053_v20 = vld [vmem:[#allocation5 + $0x378] sm:$0xff] }
  0xb0   : > { %v1026_v42 = vld [vmem:[#allocation5 + $0x2a0] sm:$0xff]  ;;  %v1027_v43 = vld [vmem:[#allocation5 + $0x2a8] sm:$0xff]  ;;  %1109 = vmatpush.msra.mxu1 %v1030_v38  ;;  %1149 = vmatpush.msra.mxu3 %v1031_v39  ;;  %v988_v21 = vld [vmem:[#allocation5 + $0x170] sm:$0xff] }
  0xb1   : > { %v958_v44 = vld [vmem:[#allocation5 + $0x80] sm:$0xff]  ;;  %v959_v45 = vld [vmem:[#allocation5 + $0x88] sm:$0xff]  ;;  %1090 = vmatpush.msra.mxu0 %v962_v40  ;;  %1130 = vmatpush.msra.mxu2 %v963_v41  ;;  %v981_v22 = vld [vmem:[#allocation5 + $0x138] sm:$0xff] }
  0xb2   : > { %v1022_v46 = vld [vmem:[#allocation5 + $0x280] sm:$0xff]  ;;  %v1023_v47 = vld [vmem:[#allocation5 + $0x288] sm:$0xff]  ;;  %1110 = vmatpush.msra.mxu1 %v1026_v42  ;;  %1150 = vmatpush.msra.mxu3 %v1027_v43  ;;  %v1052_v23 = vld [vmem:[#allocation5 + $0x370] sm:$0xff] }
  0xb3   : > { %v954_v48 = vld [vmem:[#allocation5 + $0x60] sm:$0xff]  ;;  %v955_v49 = vld [vmem:[#allocation5 + $0x68] sm:$0xff]  ;;  %1091 = vmatpush.msra.mxu0 %v958_v44  ;;  %1131 = vmatpush.msra.mxu2 %v959_v45  ;;  %v1049_v24 = vld [vmem:[#allocation5 + $0x358] sm:$0xff] }
  0xb4   : > { %v1018_v50 = vld [vmem:[#allocation5 + $0x260] sm:$0xff]  ;;  %v1019_v51 = vld [vmem:[#allocation5 + $0x268] sm:$0xff]  ;;  %1111 = vmatpush.msra.mxu1 %v1022_v46  ;;  %1151 = vmatpush.msra.mxu3 %v1023_v47  ;;  %v984_v25 = vld [vmem:[#allocation5 + $0x150] sm:$0xff] }
  0xb5   : > { %v950_v52 = vld [vmem:[#allocation5 + $0x40] sm:$0xff]  ;;  %v951_v53 = vld [vmem:[#allocation5 + $0x48] sm:$0xff]  ;;  %1092 = vmatpush.msra.mxu0 %v954_v48  ;;  %1132 = vmatpush.msra.mxu2 %v955_v49  ;;  %v977_v26 = vld [vmem:[#allocation5 + $0x118] sm:$0xff] }
  0xb6   : > { %v1014_v54 = vld [vmem:[#allocation5 + $0x240] sm:$0xff]  ;;  %v1015_v55 = vld [vmem:[#allocation5 + $0x248] sm:$0xff]  ;;  %1112 = vmatpush.msra.mxu1 %v1018_v50  ;;  %1152 = vmatpush.msra.mxu3 %v1019_v51  ;;  %v1048_v27 = vld [vmem:[#allocation5 + $0x350] sm:$0xff] }
  0xb7   : > { %v946_v56 = vld [vmem:[#allocation5 + $0x20] sm:$0xff]  ;;  %v947_v57 = vld [vmem:[#allocation5 + $0x28] sm:$0xff]  ;;  %1093 = vmatpush.msra.mxu0 %v950_v52  ;;  %1133 = vmatpush.msra.mxu2 %v951_v53  ;;  %v1045_v28 = vld [vmem:[#allocation5 + $0x338] sm:$0xff] }
  0xb8   : > { %v1010_v58 = vld [vmem:[#allocation5 + $0x220] sm:$0xff]  ;;  %v1011_v59 = vld [vmem:[#allocation5 + $0x228] sm:$0xff]  ;;  %1113 = vmatpush.msra.mxu1 %v1014_v54  ;;  %1153 = vmatpush.msra.mxu3 %v1015_v55  ;;  %v980_v29 = vld [vmem:[#allocation5 + $0x130] sm:$0xff] }
  0xb9   : > { %v942_v60 = vld [vmem:[#allocation5] sm:$0xff]  ;;  %v943_v61 = vld [vmem:[#allocation5 + $0x8] sm:$0xff]  ;;  %1094 = vmatpush.msra.mxu0 %v946_v56  ;;  %1134 = vmatpush.msra.mxu2 %v947_v57  ;;  %v973_v30 = vld [vmem:[#allocation5 + $0xf8] sm:$0xff] }
  0xba   : > { %v6610_v62 = vld [vmem:[%s6563_s9] sm:$0xff]  ;;  %1114 = vmatpush.msra.mxu1 %v1010_v58  ;;  %1154 = vmatpush.msra.mxu3 %v1011_v59  ;;  %v1007_v1 = vld [vmem:[#allocation5 + $0x208] sm:$0xff]  ;;  %v1041_v32 = vld [vmem:[#allocation5 + $0x318] sm:$0xff] }
  0xbb   : > { %v1006_v0 = vld [vmem:[#allocation5 + $0x200] sm:$0xff]  ;;  %1095 = vmatpush.msra.mxu0 %v942_v60  ;;  %1135 = vmatpush.msra.mxu2 %v943_v61  ;;  %v6613_v2 = vld [vmem:[%s6563_s9 + $0x8] sm:$0xff]  ;;  %v1044_v31 = vld [vmem:[#allocation5 + $0x330] sm:$0xff] }
  0xbc   : > { %1096 = vmatmul.f32.vlgmr.msra.gmra.mxu0 %v6610_v62  ;;  %1136 = vmatmul.f32.vlgmr.msra.gmra.mxu2 %v6610_v62  ;;  %v976_v33 = vld [vmem:[#allocation5 + $0x110] sm:$0xff]  ;;  %v969_v34 = vld [vmem:[#allocation5 + $0xd8] sm:$0xff] }
  0xbd   : > { %1200 = vmatpush.msrb.mxu2 %v1005_v63  ;;  %1115 = vmatpush.msra.mxu1 %v1006_v0  ;;  %v1040_v35 = vld [vmem:[#allocation5 + $0x310] sm:$0xff]  ;;  %v1037_v36 = vld [vmem:[#allocation5 + $0x2f8] sm:$0xff] }
  0xbe   : > { %1155 = vmatpush.msra.mxu3 %v1007_v1  ;;  %1116 = vmatmul.f32.vlgmr.msra.gmra.mxu1 %v6613_v2  ;;  %v972_v37 = vld [vmem:[#allocation5 + $0xf0] sm:$0xff]  ;;  %v965_v38 = vld [vmem:[#allocation5 + $0xb8] sm:$0xff] }
  0xbf   : > { %1156 = vmatmul.f32.vlgmr.msra.gmra.mxu3 %v6613_v2  ;;  %1201 = vmatpush.msrb.mxu2 %v1001_v3  ;;  %v1036_v39 = vld [vmem:[#allocation5 + $0x2f0] sm:$0xff]  ;;  %v1033_v40 = vld [vmem:[#allocation5 + $0x2d8] sm:$0xff] }
  0xc0   : > { %1220 = vmatpush.msrb.mxu3 %v1069_v4  ;;  %1160 = vmatpush.msrb.mxu0 %v1004_v5  ;;  %v968_v41 = vld [vmem:[#allocation5 + $0xd0] sm:$0xff]  ;;  %v961_v42 = vld [vmem:[#allocation5 + $0x98] sm:$0xff]  ;;  %v6623_v4 = vld [vmem:[#allocation7] sm:$0xf] }
  0xc1   : > { %1202 = vmatpush.msrb.mxu2 %v997_v6  ;;  %1180 = vmatpush.msrb.mxu1 %v1068_v7  ;;  %v1032_v43 = vld [vmem:[#allocation5 + $0x2d0] sm:$0xff]  ;;  %v1029_v44 = vld [vmem:[#allocation5 + $0x2b8] sm:$0xff]  ;;  %v1072_v5 = vperm.slane %v6623_v4, 0 }
  0xc2   : > { %1221 = vmatpush.msrb.mxu3 %v1065_v8  ;;  %1161 = vmatpush.msrb.mxu0 %v1000_v9  ;;  %v964_v45 = vld [vmem:[#allocation5 + $0xb0] sm:$0xff]  ;;  %v957_v46 = vld [vmem:[#allocation5 + $0x78] sm:$0xff] }
  0xc3   : > { %1203 = vmatpush.msrb.mxu2 %v993_v10  ;;  %1181 = vmatpush.msrb.mxu1 %v1064_v11  ;;  %v1028_v47 = vld [vmem:[#allocation5 + $0x2b0] sm:$0xff]  ;;  %v1025_v48 = vld [vmem:[#allocation5 + $0x298] sm:$0xff]  ;;  %v1073_v10 = vperm.slane %v6623_v4, 1 }
  0xc4   : > { %1222 = vmatpush.msrb.mxu3 %v1061_v12  ;;  %1162 = vmatpush.msrb.mxu0 %v996_v13  ;;  %v960_v49 = vld [vmem:[#allocation5 + $0x90] sm:$0xff]  ;;  %v953_v50 = vld [vmem:[#allocation5 + $0x58] sm:$0xff] }
  0xc5   : > { %1204 = vmatpush.msrb.mxu2 %v989_v14  ;;  %1182 = vmatpush.msrb.mxu1 %v1060_v15  ;;  %v1024_v51 = vld [vmem:[#allocation5 + $0x290] sm:$0xff]  ;;  %v1021_v52 = vld [vmem:[#allocation5 + $0x278] sm:$0xff] }
  0xc6   : > { %1223 = vmatpush.msrb.mxu3 %v1057_v16  ;;  %1163 = vmatpush.msrb.mxu0 %v992_v17  ;;  %v956_v53 = vld [vmem:[#allocation5 + $0x70] sm:$0xff]  ;;  %v949_v54 = vld [vmem:[#allocation5 + $0x38] sm:$0xff] }
  0xc7   : > { %1205 = vmatpush.msrb.mxu2 %v985_v18  ;;  %1183 = vmatpush.msrb.mxu1 %v1056_v19  ;;  %v1020_v55 = vld [vmem:[#allocation5 + $0x270] sm:$0xff]  ;;  %v1017_v56 = vld [vmem:[#allocation5 + $0x258] sm:$0xff] }
  0xc8   : > { %1224 = vmatpush.msrb.mxu3 %v1053_v20  ;;  %1164 = vmatpush.msrb.mxu0 %v988_v21  ;;  %v952_v57 = vld [vmem:[#allocation5 + $0x50] sm:$0xff]  ;;  %v945_v58 = vld [vmem:[#allocation5 + $0x18] sm:$0xff] }
  0xc9   : > { %1206 = vmatpush.msrb.mxu2 %v981_v22  ;;  %1184 = vmatpush.msrb.mxu1 %v1052_v23  ;;  %v1016_v59 = vld [vmem:[#allocation5 + $0x250] sm:$0xff]  ;;  %v1013_v60 = vld [vmem:[#allocation5 + $0x238] sm:$0xff] }
  0xca   : > { %1225 = vmatpush.msrb.mxu3 %v1049_v24  ;;  %1165 = vmatpush.msrb.mxu0 %v984_v25  ;;  %v948_v61 = vld [vmem:[#allocation5 + $0x30] sm:$0xff]  ;;  %v1009_v0 = vld [vmem:[#allocation5 + $0x218] sm:$0xff] }
  0xcb   : > { %1207 = vmatpush.msrb.mxu2 %v977_v26  ;;  %1185 = vmatpush.msrb.mxu1 %v1048_v27  ;;  %v1012_v63 = vld [vmem:[#allocation5 + $0x230] sm:$0xff] }
  0xcc   : > { %1226 = vmatpush.msrb.mxu3 %v1045_v28  ;;  %1166 = vmatpush.msrb.mxu0 %v980_v29  ;;  %v944_v1 = vld [vmem:[#allocation5 + $0x10] sm:$0xff] }
  0xcd   : > { %1208 = vmatpush.msrb.mxu2 %v973_v30  ;;  %1186 = vmatpush.msrb.mxu1 %v1044_v31  ;;  %v1008_v3 = vld [vmem:[#allocation5 + $0x210] sm:$0xff] }
  0xce   : > { %1227 = vmatpush.msrb.mxu3 %v1041_v32  ;;  %1167 = vmatpush.msrb.mxu0 %v976_v33 }
  0xcf   : > { %1209 = vmatpush.msrb.mxu2 %v969_v34  ;;  %1187 = vmatpush.msrb.mxu1 %v1040_v35 }
  0xd0   : > { %1228 = vmatpush.msrb.mxu3 %v1037_v36  ;;  %1168 = vmatpush.msrb.mxu0 %v972_v37 }
  0xd1   : > { %1210 = vmatpush.msrb.mxu2 %v965_v38  ;;  %1188 = vmatpush.msrb.mxu1 %v1036_v39 }
  0xd2   : > { %1229 = vmatpush.msrb.mxu3 %v1033_v40  ;;  %1169 = vmatpush.msrb.mxu0 %v968_v41 }
  0xd3   : > { %1211 = vmatpush.msrb.mxu2 %v961_v42  ;;  %1189 = vmatpush.msrb.mxu1 %v1032_v43 }
  0xd4   : > { %1230 = vmatpush.msrb.mxu3 %v1029_v44  ;;  %1170 = vmatpush.msrb.mxu0 %v964_v45 }
  0xd5   : > { %1212 = vmatpush.msrb.mxu2 %v957_v46  ;;  %1190 = vmatpush.msrb.mxu1 %v1028_v47 }
  0xd6   : > { %1231 = vmatpush.msrb.mxu3 %v1025_v48  ;;  %1171 = vmatpush.msrb.mxu0 %v960_v49 }
  0xd7   : > { %1213 = vmatpush.msrb.mxu2 %v953_v50  ;;  %1191 = vmatpush.msrb.mxu1 %v1024_v51  ;;  %v1074_v51 = vperm.slane %v6623_v4, 2 }
  0xd8   : > { %1232 = vmatpush.msrb.mxu3 %v1021_v52  ;;  %1172 = vmatpush.msrb.mxu0 %v956_v53 }
  0xd9   : > { %1214 = vmatpush.msrb.mxu2 %v949_v54  ;;  %1192 = vmatpush.msrb.mxu1 %v1020_v55  ;;  %v1075_v54 = vperm.slane %v6623_v4, 3 }
  0xda   : > { %1233 = vmatpush.msrb.mxu3 %v1017_v56  ;;  %1173 = vmatpush.msrb.mxu0 %v952_v57 }
  0xdb   : > { %1215 = vmatpush.msrb.mxu2 %v945_v58  ;;  %1193 = vmatpush.msrb.mxu1 %v1016_v59 }
  0xdc   : > { %1234 = vmatpush.msrb.mxu3 %v1013_v60  ;;  %1216 = vmatmul.f32.vlgmr.msrb.gmra.mxu2 %v6610_v62 }
  0xdd   : > { %1174 = vmatpush.msrb.mxu0 %v948_v61  ;;  %1194 = vmatpush.msrb.mxu1 %v1012_v63 }
  0xde   : > { %1235 = vmatpush.msrb.mxu3 %v1009_v0 }
  0xdf   : > { %1236 = vmatmul.f32.vlgmr.msrb.gmra.mxu3 %v6613_v2  ;;  %1175 = vmatpush.msrb.mxu0 %v944_v1 }
  0xe0   : > { %1176 = vmatmul.f32.vlgmr.msrb.gmra.mxu0 %v6610_v62  ;;  %1195 = vmatpush.msrb.mxu1 %v1008_v3 }
  0xe1   : > { %1196 = vmatmul.f32.vlgmr.msrb.gmra.mxu1 %v6613_v2 }
 0x139   : > { %v1097_v6 = vpop.f32.mrf.mxu0 }
 0x13a   : > { %v1098_v7 = vadd.f32 %v1097_v6, %v1072_v5 }
 0x13b   : > { %v1117_v8 = vpop.f32.mrf.mxu1 }
 0x13c   : > { %v6626_v9 = vadd.f32 %v1117_v8, %v1098_v7 }
 0x13e   : > { %v6630_v11 = vmul.f32 0.70710677, %v6626_v9 }
 0x13f   : > { %v1137_v12 = vpop.f32.mrf.mxu2 }
 0x140   : > { %v1248_v62 = vmul.f32 %v6630_v11, %v6630_v11  ;;  %v1138_v13 = vadd.f32 %v1137_v12, %v1073_v10 }
 0x142   : > { %v1249_v2 = vmin.f32 %v1248_v62, 16.0  ;;  %v1157_v14 = vpop.f32.mrf.mxu3 }
 0x143   : > { %v6634_v15 = vadd.f32 %v1157_v14, %v1138_v13 }
 0x144   : > { %v1250_v16 = vmul.f32 2.1237322e-06, %v1249_v2  ;;  %v1261_v17 = vmul.f32 3.8918573e-05, %v1249_v2 }
 0x145   : > { %v6637_v18 = vmul.f32 0.70710677, %v6634_v15 }
 0x146   : > { %v1251_v19 = vadd.f32 0.00028619796, %v1250_v16  ;;  %v1262_v20 = vadd.f32 0.001143296, %v1261_v17 }
 0x147   : > { %v1288_v21 = vmul.f32 %v6637_v18, %v6637_v18 }
 0x148   : > { %v1252_v22 = vmul.f32 %v1251_v19, %v1249_v2  ;;  %v1263_v23 = vmul.f32 %v1262_v20, %v1249_v2 }
 0x149   : > { %v1289_v24 = vmin.f32 %v1288_v21, 16.0 }
 0x14a   : > { %v1253_v25 = vadd.f32 0.0036580483, %v1252_v22  ;;  %v1264_v26 = vadd.f32 0.014752088, %v1263_v23 }
 0x14b   : > { %v1290_v27 = vmul.f32 2.1237322e-06, %v1289_v24  ;;  %v1301_v28 = vmul.f32 3.8918573e-05, %v1289_v24 }
 0x14c   : > { %v1265_v29 = vmul.f32 %v1264_v26, %v1249_v2  ;;  %v1254_v30 = vmul.f32 %v1253_v25, %v1249_v2 }
 0x14d   : > { %v1291_v31 = vadd.f32 0.00028619796, %v1290_v27  ;;  %v1302_v32 = vadd.f32 0.001143296, %v1301_v28 }
 0x14e   : > { %v1266_v33 = vadd.f32 0.112945676, %v1265_v29  ;;  %v1255_v37 = vadd.f32 0.05243302, %v1254_v30 }
 0x14f   : > { %v1292_v34 = vmul.f32 %v1291_v31, %v1289_v24  ;;  %v1303_v35 = vmul.f32 %v1302_v32, %v1289_v24 }
 0x150   : > { %v1267_v36 = vmul.f32 %v1266_v33, %v1249_v2  ;;  %v1256_v44 = vmul.f32 %v1255_v37, %v1249_v2 }
 0x151   : > { %v1293_v38 = vadd.f32 0.0036580483, %v1292_v34  ;;  %v1304_v39 = vadd.f32 0.014752088, %v1303_v35 }
 0x152   : > { %v1268_v40 = vadd.f32 0.4994258, %v1267_v36  ;;  %v1257_v49 = vadd.f32 0.18741608, %v1256_v44 }
 0x153   : > { %v1294_v41 = vmul.f32 %v1293_v38, %v1289_v24  ;;  %v1305_v42 = vmul.f32 %v1304_v39, %v1289_v24 }
 0x154   : > { %v1269_v43 = vmul.f32 %v1268_v40, %v1249_v2  ;;  %v1258_v55 = vmul.f32 %v1257_v49, %v1249_v2 }
 0x155   : > { %v1306_v45 = vadd.f32 0.112945676, %v1305_v42  ;;  %v1295_v47 = vadd.f32 0.05243302, %v1294_v41 }
 0x156   : > { %v1270_v46 = vadd.f32 1.0, %v1269_v43  ;;  %v1259_v5 = vadd.f32 1.1283791, %v1258_v55 }
 0x157   : > { %v1307_v48 = vmul.f32 %v1306_v45, %v1289_v24  ;;  %v1296_v52 = vmul.f32 %v1295_v47, %v1289_v24 }
 0x158   : > { %5486 = vrcp.f32 %v1270_v46  ;;  %v1280_v4 = vand.u32 2147483647, %v1270_v46  ;;  %v1282_v10 = vand.u32 2147483648, %v1270_v46  ;;  %vm1276_vm1 = vweird.f32 %v1270_v46 }
 0x159   : > { %v1308_v50 = vadd.f32 0.4994258, %v1307_v48  ;;  %v1297_v61 = vadd.f32 0.18741608, %v1296_v52  ;;  %v1260_v19 = vmul.f32 %v1259_v5, %v6630_v11 }
 0x15a   : > { %v1283_v21 = vor.u32 1.1754944e-38, %v1282_v10  ;;  %vm1281_vm3 = vcmp.eq.f32.partialorder %v1280_v4, 8.507059e+37 }
 0x15b   : > { %v1309_v53 = vmul.f32 %v1308_v50, %v1289_v24  ;;  %v1298_v12 = vmul.f32 %v1297_v61, %v1289_v24 }
 0x15d   : > { %v1177_v56 = vpop.f32.mrf.mxu0  ;;  %v1310_v57 = vadd.f32 1.0, %v1309_v53  ;;  %v1299_v23 = vadd.f32 1.1283791, %v1298_v12 }
 0x15e   : > { %v5487_v58 = vpop.eup %5486  ;;  %v1178_v59 = vadd.f32 %v1177_v56, %v1074_v51  ;;  %v1197_v60 = vpop.f32.mrf.mxu1 }
 0x15f   : > { %v1217_v63 = vpop.f32.mrf.mxu2  ;;  %v1272_v0 = vmul.f32 %v5487_v58, %v1270_v46  ;;  %5488 = vrcp.f32 %v1310_v57  ;;  %vm1277_vm0 = vweird.f32 %v5487_v58  ;;  %v1320_v11 = vand.u32 2147483647, %v1310_v57 }
 0x160   : > { %v1218_v1 = vadd.f32 %v1217_v63, %v1075_v54  ;;  %v6643_v3 = vadd.f32 %v1197_v60, %v1178_v59  ;;  %vm1278_vm2 = vmor %vm1276_vm1, %vm1277_vm0  ;;  %v1322_v31 = vand.u32 2147483648, %v1310_v57  ;;  %v1300_v36 = vmul.f32 %v1299_v23, %v6637_v18 }
 0x161   : > { %v1273_v6 = vsub.f32 1.0, %v1272_v0  ;;  %vm1316_vm5 = vweird.f32 %v1310_v57  ;;  %vm1321_vm7 = vcmp.eq.f32.partialorder %v1320_v11, 8.507059e+37  ;;  %v1240_v59 = vmul.f32 0.5, %v6626_v9 }
 0x162   : > { %v6646_v7 = vmul.f32 0.70710677, %v6643_v3  ;;  %v1237_v8 = vpop.f32.mrf.mxu3  ;;  %v1323_v43 = vor.u32 1.1754944e-38, %v1322_v31  ;;  %v1241_v63 = vmul.f32 0.5, %v6634_v15 }
 0x163   : > { %v6648_v62 = vadd.f32 %v1237_v8, %v1218_v1  ;;  %v1274_v13 = vmul.f32 %v5487_v58, %v1273_v6 }
 0x164   : > { %v1328_v2 = vmul.f32 %v6646_v7, %v6646_v7 }
 0x165   : > { %v5489_v14 = vpop.eup %5488  ;;  %v6653_v16 = vmul.f32 0.70710677, %v6648_v62  ;;  %v1275_v17 = vadd.f32 %v5487_v58, %v1274_v13 }
 0x166   : > { %v6656_v20 = vmin.f32 %v1328_v2, 16.0  ;;  %v1312_v22 = vmul.f32 %v5489_v14, %v1310_v57  ;;  %vm1317_vm4 = vweird.f32 %v5489_v14 }
 0x167   : > { %v1368_v24 = vmul.f32 %v6653_v16, %v6653_v16  ;;  %v1279_v25 = vsel %vm1278_vm2, %v5487_v58, %v1275_v17  ;;  %vm1318_vm6 = vmor %vm1316_vm5, %vm1317_vm4 }
 0x168   : > { %v1330_v26 = vmul.f32 2.1237322e-06, %v6656_v20  ;;  %v1284_v27 = vsel %vm1281_vm3, %v1283_v21, %v1279_v25  ;;  %v1313_v28 = vsub.f32 1.0, %v1312_v22  ;;  %v1341_v29 = vmul.f32 3.8918573e-05, %v6656_v20 }
 0x169   : > { %v6662_v30 = vmin.f32 %v1368_v24, 16.0  ;;  %v1285_v33 = vmul.f32 %v1284_v27, %v1260_v19 }
 0x16a   : > { %v1331_v32 = vadd.f32 0.00028619796, %v1330_v26  ;;  %v1314_v34 = vmul.f32 %v5489_v14, %v1313_v28  ;;  %v1342_v35 = vadd.f32 0.001143296, %v1341_v29 }
 0x16b   : > { %v1370_v37 = vmul.f32 2.1237322e-06, %v6662_v30  ;;  %v1381_v38 = vmul.f32 3.8918573e-05, %v6662_v30  ;;  %v5223_v46 = vclamps-f32 %v1285_v33, 1.0 }
 0x16c   : > { %v1332_v39 = vmul.f32 %v1331_v32, %v6656_v20  ;;  %v1315_v40 = vadd.f32 %v5489_v14, %v1314_v34  ;;  %v1343_v41 = vmul.f32 %v1342_v35, %v6656_v20 }
 0x16d   : > { %v1371_v42 = vadd.f32 0.00028619796, %v1370_v37  ;;  %v1382_v44 = vadd.f32 0.001143296, %v1381_v38  ;;  %v1408_v57 = vadd.f32 1.0, %v5223_v46 }
 0x16e   : > { %v1333_v45 = vadd.f32 0.0036580483, %v1332_v39  ;;  %v1319_v47 = vsel %vm1318_vm6, %v5489_v14, %v1315_v40  ;;  %v1344_v18 = vadd.f32 0.014752088, %v1343_v41 }
 0x16f   : > { %v1372_v48 = vmul.f32 %v1371_v42, %v6662_v30  ;;  %v1324_v49 = vsel %vm1321_vm7, %v1323_v43, %v1319_v47  ;;  %v1383_v50 = vmul.f32 %v1382_v44, %v6662_v30  ;;  %v6679_v8 = vmul.f32 %v1408_v57, %v1240_v59 }
 0x170   : > { %v1334_v51 = vmul.f32 %v1333_v45, %v6656_v20  ;;  %v1325_v52 = vmul.f32 %v1324_v49, %v1300_v36  ;;  %v1345_v53 = vmul.f32 %v1344_v18, %v6656_v20  ;;  %v6251_v57 = vmov 256.0  }
 0x171   : > { %v1373_v54 = vadd.f32 0.0036580483, %v1372_v48  ;;  %v1384_v55 = vadd.f32 0.014752088, %v1383_v50  ;;  %v1242_v50 = vmul.f32 0.5, %v6643_v3  ;;  %vm2451_vm7 = vcmask 64512  }
 0x172   : > { %v5224_v56 = vclamps-f32 %v1325_v52, 1.0  ;;  %v1346_v58 = vadd.f32 0.112945676, %v1345_v53  ;;  %v1335_v0 = vadd.f32 0.05243302, %v1334_v51 }
 0x173   : > { %v1374_v60 = vmul.f32 %v1373_v54, %v6662_v30  ;;  %v1385_v61 = vmul.f32 %v1384_v55, %v6662_v30 }
 0x174   : > { %v1409_v1 = vadd.f32 1.0, %v5224_v56  ;;  %v1347_v5 = vmul.f32 %v1346_v58, %v6656_v20  ;;  %v1336_v9 = vmul.f32 %v1335_v0, %v6656_v20 }
 0x175   : > { %v1386_v6 = vadd.f32 0.112945676, %v1385_v61  ;;  %v1375_v12 = vadd.f32 0.05243302, %v1374_v60 }
 0x176   : > { %v6681_v4 = vmul.f32 %v1409_v1, %v1241_v63  ;;  %v1348_v10 = vadd.f32 0.4994258, %v1347_v5  ;;  %v1337_v22 = vadd.f32 0.18741608, %v1336_v9  ;;  %v1691_v9 = vld [vmem:[#allocation14 + $0x5d0] sm:$0xff] }
 0x177   : > { %v1387_v13 = vmul.f32 %v1386_v6, %v6662_v30  ;;  %v1376_v19 = vmul.f32 %v1375_v12, %v6662_v30  ;;  %1717 = vmatpush.msra.mxu1 %v1691_v9  ;;  %v1511_v9 = vld [vmem:[#allocation14 + $0x30] sm:$0xff] }
 0x178   : > { %v1418_v2 = vadd.f32 %v6681_v4, %v6679_v8  ;;  %v1349_v15 = vmul.f32 %v1348_v10, %v6656_v20  ;;  %v1338_v25 = vmul.f32 %v1337_v22, %v6656_v20  ;;  %v1584_v22 = vld [vmem:[#allocation14 + $0x278] sm:$0xff] }
 0x179   : > { %v1388_v14 = vadd.f32 0.4994258, %v1387_v13  ;;  %v1377_v24 = vadd.f32 0.18741608, %v1376_v19  ;;  %v1595_v13 = vld [vmem:[#allocation14 + $0x2d0] sm:$0xff] }
 0x17a   : > { %1419 = vadd.xlane.f32.xlu0 %v1418_v2  ;;  %v1350_v17 = vadd.f32 1.0, %v1349_v15  ;;  %v1339_v11 = vadd.f32 1.1283791, %v1338_v25  ;;  %v1596_v2 = vld [vmem:[#allocation14 + $0x2d8] sm:$0xff]  ;;  %1697 = vmatpush.msra.mxu0 %v1595_v13  ;;  %v1583_v19 = vld [vmem:[#allocation14 + $0x270] sm:$0xff]  ;;  %v1673_v25 = vld [vmem:[#allocation14 + $0x540] sm:$0xff] }
 0x17b   : > { %v1389_v21 = vmul.f32 %v1388_v14, %v6662_v30  ;;  %v1378_v27 = vmul.f32 %v1377_v24, %v6662_v30  ;;  %v1692_v15 = vld [vmem:[#allocation14 + $0x5d8] sm:$0xff]  ;;  %v1589_v14 = vld [vmem:[#allocation14 + $0x2a0] sm:$0xff]  ;;  %1737 = vmatpush.msra.mxu2 %v1596_v2  ;;  %v1607_v2 = vld [vmem:[#allocation14 + $0x330] sm:$0xff] }
 0x17c   : > { %5490 = vrcp.f32 %v1350_v17  ;;  %v1362_v29 = vand.u32 2147483648, %v1350_v17  ;;  %vm1356_vm8 = vweird.f32 %v1350_v17  ;;  %v1360_v33 = vand.u32 2147483647, %v1350_v17  ;;  %1757 = vmatpush.msra.mxu3 %v1692_v15  ;;  %1698 = vmatpush.msra.mxu0 %v1589_v14  ;;  %v1577_v24 = vld [vmem:[#allocation14 + $0x240] sm:$0xff]  ;;  %v1512_v15 = vld [vmem:[#allocation14 + $0x38] sm:$0xff] }
 0x17d   : > { %v1390_v23 = vadd.f32 1.0, %v1389_v21  ;;  %v1379_v35 = vadd.f32 1.1283791, %v1378_v27  ;;  %v1340_v30 = vmul.f32 %v1339_v11, %v6646_v7  ;;  %v1243_v7 = vmul.f32 0.5, %v6648_v62  ;;  %v1679_v21 = vld [vmem:[#allocation14 + $0x570] sm:$0xff]  ;;  %v1674_v27 = vld [vmem:[#allocation14 + $0x548] sm:$0xff] }
 0x17e   : > { %v1363_v37 = vor.u32 1.1754944e-38, %v1362_v29  ;;  %vm1361_vm13 = vcmp.eq.f32.partialorder %v1360_v33, 8.507059e+37  ;;  %1699 = vmatpush.msra.mxu0 %v1583_v19  ;;  %v1667_v29 = vld [vmem:[#allocation14 + $0x510] sm:$0xff]  ;;  %v1572_v11 = vld [vmem:[#allocation14 + $0x218] sm:$0xff]  ;;  %v1661_v33 = vld [vmem:[#allocation14 + $0x4e0] sm:$0xff] }
 0x17f   : > { %5492 = vrcp.f32 %v1390_v23  ;;  %v1402_v38 = vand.u32 2147483648, %v1390_v23  ;;  %vm1396_vm11 = vweird.f32 %v1390_v23  ;;  %v1400_v20 = vand.u32 2147483647, %v1390_v23  ;;  %v1608_v14 = vld [vmem:[#allocation14 + $0x338] sm:$0xff] }
 0x180   : > { %v1380_v44 = vmul.f32 %v1379_v35, %v6653_v16  ;;  %5494 = vrcp.f32 %v6251_v57  ;;  %1700 = vmatpush.msra.mxu0 %v1577_v24  ;;  %v1662_v35 = vld [vmem:[#allocation14 + $0x4e8] sm:$0xff]  ;;  %v1523_v57 = vld [vmem:[#allocation14 + $0x90] sm:$0xff] }
 0x181   : > { %v1403_v43 = vor.u32 1.1754944e-38, %v1402_v38  ;;  %vm1401_vm15 = vcmp.eq.f32.partialorder %v1400_v20, 8.507059e+37  ;;  %v1560_v38 = vld [vmem:[#allocation14 + $0x1b8] sm:$0xff]  ;;  %v1553_v20 = vld [vmem:[#allocation14 + $0x180] sm:$0xff]  ;;  %v1598_v24 = vld [vmem:[#allocation14 + $0x2e8] sm:$0xff] }
 0x182   : > { %v5491_v26 = vpop.eup %5490 }
 0x183   : > { %v1352_v28 = vmul.f32 %v5491_v26, %v1350_v17  ;;  %vm1357_vm9 = vweird.f32 %v5491_v26  ;;  %v1686_v17 = vld [vmem:[#allocation14 + $0x5a8] sm:$0xff] }
 0x184   : > { %vm1358_vm10 = vmor %vm1356_vm8, %vm1357_vm9  ;;  %1758 = vmatpush.msra.mxu3 %v1686_v17  ;;  %v1601_v17 = vld [vmem:[#allocation14 + $0x300] sm:$0xff] }
 0x185   : > { %v5493_v31 = vpop.eup %5492  ;;  %v1353_v32 = vsub.f32 1.0, %v1352_v28  ;;  %v1571_v28 = vld [vmem:[#allocation14 + $0x210] sm:$0xff] }
 0x186   : > { %v1392_v34 = vmul.f32 %v5493_v31, %v1390_v23  ;;  %vm1397_vm12 = vweird.f32 %v5493_v31  ;;  %v5495_v58 = vpop.eup %5494  ;;  %v1680_v23 = vld [vmem:[#allocation14 + $0x578] sm:$0xff]  ;;  %1701 = vmatpush.msra.mxu0 %v1571_v28 }
 0x187   : > { %v1354_v36 = vmul.f32 %v5491_v26, %v1353_v32  ;;  %vm1398_vm14 = vmor %vm1396_vm11, %vm1397_vm12  ;;  %v1422_v59 = vmul.f32 256.0, %v5495_v58  ;;  %vm1426_vm0 = vweird.f32 %v5495_v58  ;;  %1759 = vmatpush.msra.mxu3 %v1680_v23  ;;  %v1565_v32 = vld [vmem:[#allocation14 + $0x1e0] sm:$0xff]  ;;  %v1592_v28 = vld [vmem:[#allocation14 + $0x2b8] sm:$0xff] }
 0x188   : > { %v1393_v39 = vsub.f32 1.0, %v1392_v34  ;;  %v1566_v34 = vld [vmem:[#allocation14 + $0x1e8] sm:$0xff]  ;;  %1702 = vmatpush.msra.mxu0 %v1565_v32  ;;  %v1693_v23 = vld [vmem:[#allocation14 + $0x5e0] sm:$0xff] }
 0x189   : > { %v1355_v40 = vadd.f32 %v5491_v26, %v1354_v36  ;;  %v1423_v60 = vsub.f32 1.0, %v1422_v59  ;;  %1760 = vmatpush.msra.mxu3 %v1674_v27  ;;  %v1559_v36 = vld [vmem:[#allocation14 + $0x1b0] sm:$0xff]  ;;  %v1586_v32 = vld [vmem:[#allocation14 + $0x288] sm:$0xff] }
 0x18a   : > { %v1394_v41 = vmul.f32 %v5493_v31, %v1393_v39  ;;  %v1656_v39 = vld [vmem:[#allocation14 + $0x4b8] sm:$0xff]  ;;  %1703 = vmatpush.msra.mxu0 %v1559_v36  ;;  %v1687_v27 = vld [vmem:[#allocation14 + $0x5b0] sm:$0xff] }
 0x18b   : > { %v1359_v42 = vsel %vm1358_vm10, %v5491_v26, %v1355_v40  ;;  %v1424_v3 = vmul.f32 %v5495_v58, %v1423_v60  ;;  %v1578_v26 = vld [vmem:[#allocation14 + $0x248] sm:$0xff]  ;;  %v1524_v60 = vld [vmem:[#allocation14 + $0x98] sm:$0xff] }
 0x18c   : > { %v1364_v45 = vsel %vm1361_vm13, %v1363_v37, %v1359_v42  ;;  %v1395_v46 = vadd.f32 %v5493_v31, %v1394_v41  ;;  %v1655_v37 = vld [vmem:[#allocation14 + $0x4b0] sm:$0xff]  ;;  %v1554_v40 = vld [vmem:[#allocation14 + $0x188] sm:$0xff]  ;;  %1704 = vmatpush.msra.mxu0 %v1553_v20  ;;  %v1580_v36 = vld [vmem:[#allocation14 + $0x258] sm:$0xff] }
 0x18d   : > { %v1365_v47 = vmul.f32 %v1364_v45, %v1340_v30  ;;  %v1425_v61 = vadd.f32 %v5495_v58, %v1424_v3  ;;  %v1649_v30 = vld [vmem:[#allocation14 + $0x480] sm:$0xff]  ;;  %v1650_v41 = vld [vmem:[#allocation14 + $0x488] sm:$0xff]  ;;  %v1547_v42 = vld [vmem:[#allocation14 + $0x150] sm:$0xff] }
 0x18e   : > { %v1399_v18 = vsel %vm1398_vm14, %v5493_v31, %v1395_v46  ;;  %v1668_v31 = vld [vmem:[#allocation14 + $0x518] sm:$0xff]  ;;  %v1541_v46 = vld [vmem:[#allocation14 + $0x120] sm:$0xff]  ;;  %1705 = vmatpush.msra.mxu0 %v1547_v42  ;;  %v1574_v20 = vld [vmem:[#allocation14 + $0x228] sm:$0xff] }
 0x18f   : > { %v5225_v48 = vclamps-f32 %v1365_v47, 1.0  ;;  %v1404_v49 = vsel %vm1401_vm15, %v1403_v43, %v1399_v18  ;;  %v6702_v63 = vsel %vm1426_vm0, %v5495_v58, %v1425_v61  ;;  %1761 = vmatpush.msra.mxu3 %v1668_v31  ;;  %v1643_v43 = vld [vmem:[#allocation14 + $0x450] sm:$0xff]  ;;  %v1644_v45 = vld [vmem:[#allocation14 + $0x458] sm:$0xff]  ;;  %v1637_v47 = vld [vmem:[#allocation14 + $0x420] sm:$0xff] }
 0x190   : > { %v1405_v51 = vmul.f32 %v1404_v49, %v1380_v44  ;;  %v1548_v44 = vld [vmem:[#allocation14 + $0x158] sm:$0xff]  ;;  %v1542_v18 = vld [vmem:[#allocation14 + $0x128] sm:$0xff]  ;;  %v1535_v49 = vld [vmem:[#allocation14 + $0xf0] sm:$0xff]  ;;  %1706 = vmatpush.msra.mxu0 %v1541_v46 }
 0x191   : > { %v1410_v52 = vadd.f32 1.0, %v5225_v48  ;;  %1762 = vmatpush.msra.mxu3 %v1662_v35  ;;  %v1638_v48 = vld [vmem:[#allocation14 + $0x428] sm:$0xff]  ;;  %v1619_v58 = vld [vmem:[#allocation14 + $0x390] sm:$0xff]  ;;  %v1620_v3 = vld [vmem:[#allocation14 + $0x398] sm:$0xff] }
 0x192   : > { %v5226_v53 = vclamps-f32 %v1405_v51, 1.0  ;;  %v1536_v51 = vld [vmem:[#allocation14 + $0xf8] sm:$0xff]  ;;  %1707 = vmatpush.msra.mxu0 %v1535_v49  ;;  %v1681_v31 = vld [vmem:[#allocation14 + $0x580] sm:$0xff]  ;;  %v1675_v35 = vld [vmem:[#allocation14 + $0x550] sm:$0xff] }
 0x193   : > { %v6696_v55 = vmul.f32 %v1410_v52, %v1242_v50  ;;  %1763 = vmatpush.msra.mxu3 %v1656_v39  ;;  %v1631_v50 = vld [vmem:[#allocation14 + $0x3f0] sm:$0xff]  ;;  %v1632_v52 = vld [vmem:[#allocation14 + $0x3f8] sm:$0xff]  ;;  %v1669_v39 = vld [vmem:[#allocation14 + $0x520] sm:$0xff] }
 0x194   : > { %v1411_v54 = vadd.f32 1.0, %v5226_v53  ;;  %v1625_v53 = vld [vmem:[#allocation14 + $0x3c0] sm:$0xff]  ;;  %v1568_v42 = vld [vmem:[#allocation14 + $0x1f8] sm:$0xff]  ;;  %v1562_v46 = vld [vmem:[#allocation14 + $0x1c8] sm:$0xff] }
 0x195   : > { %1764 = vmatpush.msra.mxu3 %v1650_v41  ;;  %v1663_v41 = vld [vmem:[#allocation14 + $0x4f0] sm:$0xff]  ;;  %v1556_v49 = vld [vmem:[#allocation14 + $0x198] sm:$0xff] }
 0x196   : > { %v6698_v56 = vmul.f32 %v1411_v54, %v1243_v7  ;;  %v1529_v7 = vld [vmem:[#allocation14 + $0xc0] sm:$0xff]  ;;  %v1530_v54 = vld [vmem:[#allocation14 + $0xc8] sm:$0xff] }
 0x197   : > { %1765 = vmatpush.msra.mxu3 %v1644_v45  ;;  %1708 = vmatpush.msra.mxu0 %v1529_v7  ;;  %v1657_v45 = vld [vmem:[#allocation14 + $0x4c0] sm:$0xff]  ;;  %v1550_v7 = vld [vmem:[#allocation14 + $0x168] sm:$0xff] }
 0x198   : > { %v1466_v16 = vadd.f32 %v6698_v56, %v6696_v55 }
 0x199   : > { %1766 = vmatpush.msra.mxu3 %v1638_v48  ;;  %1709 = vmatpush.msra.mxu0 %v1523_v57  ;;  %v1651_v48 = vld [vmem:[#allocation14 + $0x490] sm:$0xff]  ;;  %v1544_v57 = vld [vmem:[#allocation14 + $0x138] sm:$0xff] }
 0x19a   : > { %1467 = vadd.xlane.f32.xlu1 %v1466_v16  ;;  %v1626_v16 = vld [vmem:[#allocation14 + $0x3c8] sm:$0xff] }
 0x19b   : > { %1767 = vmatpush.msra.mxu3 %v1632_v52  ;;  %v1645_v52 = vld [vmem:[#allocation14 + $0x460] sm:$0xff] }
 0x19d   : > { %1768 = vmatpush.msra.mxu3 %v1626_v16  ;;  %v1639_v16 = vld [vmem:[#allocation14 + $0x430] sm:$0xff] }
 0x19f   : > { %1769 = vmatpush.msra.mxu3 %v1620_v3  ;;  %v1538_v3 = vld [vmem:[#allocation14 + $0x108] sm:$0xff] }
 0x1ed   : > { %v1420_v62 = vpop.xlane.xlu0 %1419 }
 0x1ee   : > { %v1428_v0 = vmul.f32 %v6702_v63, %v1420_v62  ;;  %v1517_v62 = vld [vmem:[#allocation14 + $0x60] sm:$0xff] }
 0x1ef   : > { %1710 = vmatpush.msra.mxu0 %v1517_v62  ;;  %v1531_v62 = vld [vmem:[#allocation14 + $0xd0] sm:$0xff] }
 0x1f0   : > { %v6706_v1 = vsub.f32 %v6679_v8, %v1428_v0  ;;  %v6709_v5 = vsub.f32 %v6681_v4, %v1428_v0  ;;  %v1685_v8 = vld [vmem:[#allocation14 + $0x5a0] sm:$0xff]  ;;  %v1590_v4 = vld [vmem:[#allocation14 + $0x2a8] sm:$0xff] }
 0x1f1   : > { %1718 = vmatpush.msra.mxu1 %v1685_v8  ;;  %1738 = vmatpush.msra.mxu2 %v1590_v4  ;;  %v1613_v0 = vld [vmem:[#allocation14 + $0x360] sm:$0xff] }
 0x1f2   : > { %v1431_v6 = vmul.f32 %v6706_v1, %v6706_v1  ;;  %v1432_v10 = vmul.f32 %v6709_v5, %v6709_v5  ;;  %1711 = vmatpush.msra.mxu0 %v1511_v9  ;;  %v1525_v9 = vld [vmem:[#allocation14 + $0xa0] sm:$0xff] }
 0x1f3   : > { %1719 = vmatpush.msra.mxu1 %v1679_v21  ;;  %1739 = vmatpush.msra.mxu2 %v1584_v22  ;;  %v1602_v21 = vld [vmem:[#allocation14 + $0x308] sm:$0xff]  ;;  %v1597_v22 = vld [vmem:[#allocation14 + $0x2e0] sm:$0xff] }
 0x1f4   : > { %v1433_v12 = vadd.f32 %v1432_v10, %v1431_v6  ;;  %v1518_v6 = vld [vmem:[#allocation14 + $0x68] sm:$0xff] }
 0x1f5   : > { %1720 = vmatpush.msra.mxu1 %v1673_v25  ;;  %1740 = vmatpush.msra.mxu2 %v1578_v26  ;;  %v1614_v10 = vld [vmem:[#allocation14 + $0x368] sm:$0xff]  ;;  %v1591_v26 = vld [vmem:[#allocation14 + $0x2b0] sm:$0xff] }
 0x1f6   : > { %1434 = vadd.xlane.f32.xlu0 %v1433_v12  ;;  %1770 = vmatpush.msra.mxu3 %v1614_v10  ;;  %v1694_v25 = vld [vmem:[#allocation14 + $0x5e8] sm:$0xff]  ;;  %v1628_v10 = vld [vmem:[#allocation14 + $0x3d8] sm:$0xff] }
 0x1f7   : > { %1721 = vmatpush.msra.mxu1 %v1667_v29  ;;  %1741 = vmatpush.msra.mxu2 %v1572_v11  ;;  %v1688_v29 = vld [vmem:[#allocation14 + $0x5b8] sm:$0xff]  ;;  %v1585_v11 = vld [vmem:[#allocation14 + $0x280] sm:$0xff] }
 0x1f8   : > { %1771 = vmatpush.msra.mxu3 %v1608_v14  ;;  %v1622_v14 = vld [vmem:[#allocation14 + $0x3a8] sm:$0xff] }
 0x1f9   : > { %1722 = vmatpush.msra.mxu1 %v1661_v33  ;;  %1742 = vmatpush.msra.mxu2 %v1566_v34  ;;  %v1682_v33 = vld [vmem:[#allocation14 + $0x588] sm:$0xff]  ;;  %v1579_v34 = vld [vmem:[#allocation14 + $0x250] sm:$0xff] }
 0x1fa   : > { %1772 = vmatpush.msra.mxu3 %v1602_v21  ;;  %v1514_v21 = vld [vmem:[#allocation14 + $0x48] sm:$0xff] }
 0x1fb   : > { %1723 = vmatpush.msra.mxu1 %v1655_v37  ;;  %1743 = vmatpush.msra.mxu2 %v1560_v38  ;;  %v1676_v37 = vld [vmem:[#allocation14 + $0x558] sm:$0xff]  ;;  %v1573_v38 = vld [vmem:[#allocation14 + $0x220] sm:$0xff] }
 0x1fc   : > { %1837 = vmatpush.msrb.mxu3 %v1694_v25  ;;  %v1508_v25 = vld [vmem:[#allocation14 + $0x18] sm:$0xff] }
 0x1fd   : > { %1724 = vmatpush.msra.mxu1 %v1649_v30  ;;  %1744 = vmatpush.msra.mxu2 %v1554_v40  ;;  %v1670_v30 = vld [vmem:[#allocation14 + $0x528] sm:$0xff]  ;;  %v1567_v40 = vld [vmem:[#allocation14 + $0x1f0] sm:$0xff] }
 0x1fe   : > { %1838 = vmatpush.msrb.mxu3 %v1688_v29 }
 0x1ff   : > { %1725 = vmatpush.msra.mxu1 %v1643_v43  ;;  %1745 = vmatpush.msra.mxu2 %v1548_v44  ;;  %v1664_v43 = vld [vmem:[#allocation14 + $0x4f8] sm:$0xff]  ;;  %v1561_v44 = vld [vmem:[#allocation14 + $0x1c0] sm:$0xff] }
 0x200   : > { %1839 = vmatpush.msrb.mxu3 %v1682_v33 }
 0x201   : > { %1726 = vmatpush.msra.mxu1 %v1637_v47  ;;  %1746 = vmatpush.msra.mxu2 %v1542_v18  ;;  %v1658_v47 = vld [vmem:[#allocation14 + $0x4c8] sm:$0xff]  ;;  %v1555_v18 = vld [vmem:[#allocation14 + $0x190] sm:$0xff] }
 0x202   : > { %1840 = vmatpush.msrb.mxu3 %v1676_v37 }
 0x203   : > { %1727 = vmatpush.msra.mxu1 %v1631_v50  ;;  %1747 = vmatpush.msra.mxu2 %v1536_v51  ;;  %v1652_v50 = vld [vmem:[#allocation14 + $0x498] sm:$0xff]  ;;  %v1549_v51 = vld [vmem:[#allocation14 + $0x160] sm:$0xff] }
 0x204   : > { %1841 = vmatpush.msrb.mxu3 %v1670_v30 }
 0x205   : > { %1728 = vmatpush.msra.mxu1 %v1625_v53  ;;  %1748 = vmatpush.msra.mxu2 %v1530_v54  ;;  %v1646_v53 = vld [vmem:[#allocation14 + $0x468] sm:$0xff]  ;;  %v1543_v54 = vld [vmem:[#allocation14 + $0x130] sm:$0xff] }
 0x206   : > { %1842 = vmatpush.msrb.mxu3 %v1664_v43 }
 0x207   : > { %1729 = vmatpush.msra.mxu1 %v1619_v58  ;;  %1749 = vmatpush.msra.mxu2 %v1524_v60  ;;  %v1640_v58 = vld [vmem:[#allocation14 + $0x438] sm:$0xff]  ;;  %v1633_v60 = vld [vmem:[#allocation14 + $0x400] sm:$0xff] }
 0x208   : > { %1843 = vmatpush.msrb.mxu3 %v1658_v47  ;;  %v1599_v47 = vld [vmem:[#allocation14 + $0x2f0] sm:$0xff] }
 0x209   : > { %1730 = vmatpush.msra.mxu1 %v1613_v0  ;;  %1750 = vmatpush.msra.mxu2 %v1518_v6  ;;  %v1627_v0 = vld [vmem:[#allocation14 + $0x3d0] sm:$0xff]  ;;  %v1532_v6 = vld [vmem:[#allocation14 + $0xd8] sm:$0xff] }
 0x20a   : > { %1844 = vmatpush.msrb.mxu3 %v1652_v50  ;;  %v1594_v50 = vld [vmem:[#allocation14 + $0x2c8] sm:$0xff] }
 0x20b   : > { %1731 = vmatpush.msra.mxu1 %v1607_v2  ;;  %1751 = vmatpush.msra.mxu2 %v1512_v15  ;;  %v1621_v2 = vld [vmem:[#allocation14 + $0x3a0] sm:$0xff]  ;;  %v1526_v15 = vld [vmem:[#allocation14 + $0xa8] sm:$0xff] }
 0x20c   : > { %1845 = vmatpush.msrb.mxu3 %v1646_v53  ;;  %v1588_v53 = vld [vmem:[#allocation14 + $0x298] sm:$0xff] }
 0x20d   : > { %v1468_v59 = vpop.xlane.xlu1 %1467  ;;  %1732 = vmatpush.msra.mxu1 %v1601_v17  ;;  %v1616_v17 = vld [vmem:[#allocation14 + $0x378] sm:$0xff] }
 0x20e   : > { %v1469_v61 = vmul.f32 %v1468_v59, %v6702_v63  ;;  %1846 = vmatpush.msrb.mxu3 %v1640_v58  ;;  %v1537_v59 = vld [vmem:[#allocation14 + $0x100] sm:$0xff]  ;;  %v1582_v58 = vld [vmem:[#allocation14 + $0x268] sm:$0xff] }
 0x20f   : > { %1797 = vmatpush.msrb.mxu1 %v1693_v23  ;;  %v1507_v23 = vld [vmem:[#allocation14 + $0x10] sm:$0xff] }
 0x210   : > { %v6717_v12 = vsub.f32 %v6696_v55, %v1469_v61  ;;  %v6720_v13 = vsub.f32 %v6698_v56, %v1469_v61  ;;  %v1505_v55 = vld [vmem:[#allocation14] sm:$0xff]  ;;  %v1506_v56 = vld [vmem:[#allocation14 + $0x8] sm:$0xff] }
 0x211   : > { %1712 = vmatpush.msra.mxu0 %v1505_v55  ;;  %1752 = vmatpush.msra.mxu2 %v1506_v56  ;;  %v1634_v61 = vld [vmem:[#allocation14 + $0x408] sm:$0xff]  ;;  %v1520_v55 = vld [vmem:[#allocation14 + $0x78] sm:$0xff]  ;;  %v1513_v56 = vld [vmem:[#allocation14 + $0x40] sm:$0xff] }
 0x212   : > { %v1472_v8 = vmul.f32 %v6717_v12, %v6717_v12  ;;  %v1473_v4 = vmul.f32 %v6720_v13, %v6720_v13  ;;  %1798 = vmatpush.msrb.mxu1 %v1687_v27  ;;  %1847 = vmatpush.msrb.mxu3 %v1634_v61  ;;  %v1576_v61 = vld [vmem:[#allocation14 + $0x238] sm:$0xff] }
 0x213   : > { %1777 = vmatpush.msrb.mxu0 %v1597_v22  ;;  %1817 = vmatpush.msrb.mxu2 %v1598_v24  ;;  %v1610_v22 = vld [vmem:[#allocation14 + $0x348] sm:$0xff]  ;;  %v1603_v24 = vld [vmem:[#allocation14 + $0x310] sm:$0xff] }
 0x214   : > { %v1474_v19 = vadd.f32 %v1473_v4, %v1472_v8  ;;  %1799 = vmatpush.msrb.mxu1 %v1681_v31  ;;  %1848 = vmatpush.msrb.mxu3 %v1628_v10  ;;  %v1519_v8 = vld [vmem:[#allocation14 + $0x70] sm:$0xff]  ;;  %v1570_v10 = vld [vmem:[#allocation14 + $0x208] sm:$0xff] }
 0x215   : > { %1778 = vmatpush.msrb.mxu0 %v1591_v26  ;;  %1818 = vmatpush.msrb.mxu2 %v1592_v28  ;;  %v1615_v4 = vld [vmem:[#allocation14 + $0x370] sm:$0xff]  ;;  %v1604_v26 = vld [vmem:[#allocation14 + $0x318] sm:$0xff] }
 0x216   : > { %1475 = vadd.xlane.f32.xlu1 %v1474_v19  ;;  %1800 = vmatpush.msrb.mxu1 %v1675_v35  ;;  %v1609_v19 = vld [vmem:[#allocation14 + $0x340] sm:$0xff] }
 0x217   : > { %1779 = vmatpush.msrb.mxu0 %v1585_v11  ;;  %1819 = vmatpush.msrb.mxu2 %v1586_v32 }
 0x218   : > { %1801 = vmatpush.msrb.mxu1 %v1669_v39  ;;  %1849 = vmatpush.msrb.mxu3 %v1622_v14  ;;  %v1564_v14 = vld [vmem:[#allocation14 + $0x1d8] sm:$0xff] }
 0x219   : > { %1780 = vmatpush.msrb.mxu0 %v1579_v34  ;;  %1820 = vmatpush.msrb.mxu2 %v1580_v36  ;;  %v1416_v34 = vld [vmem:[#allocation8] sm:$0x3]  ;;  %v1417_v36 = vld [vmem:[#allocation10] sm:$0x3] }
 0x21a   : > { %1802 = vmatpush.msrb.mxu1 %v1663_v41  ;;  %1850 = vmatpush.msrb.mxu3 %v1616_v17  ;;  %v1452_v39 = vperm.slane %v1416_v34, 1  ;;  %v1458_v30 = vperm.slane %v1417_v36, 0  ;;  %v1558_v17 = vld [vmem:[#allocation14 + $0x1a8] sm:$0xff] }
 0x21b   : > { %1781 = vmatpush.msrb.mxu0 %v1573_v38  ;;  %1821 = vmatpush.msrb.mxu2 %v1574_v20  ;;  %v1451_v38 = vperm.slane %v1416_v34, 0  ;;  %v1533_v34 = vld [vmem:[#allocation14 + $0xe0] sm:$0xff] }
 0x21c   : > { %1803 = vmatpush.msrb.mxu1 %v1657_v45  ;;  %1851 = vmatpush.msrb.mxu3 %v1610_v22  ;;  %v1647_v22 = vld [vmem:[#allocation14 + $0x470] sm:$0xff] }
 0x21d   : > { %1782 = vmatpush.msrb.mxu0 %v1567_v40  ;;  %1822 = vmatpush.msrb.mxu2 %v1568_v42  ;;  %v1459_v40 = vperm.slane %v1417_v36, 1 }
 0x21e   : > { %1804 = vmatpush.msrb.mxu1 %v1651_v48  ;;  %1852 = vmatpush.msrb.mxu3 %v1604_v26  ;;  %v1600_v48 = vld [vmem:[#allocation14 + $0x2f8] sm:$0xff]  ;;  %v1641_v26 = vld [vmem:[#allocation14 + $0x440] sm:$0xff] }
 0x21f   : > { %1783 = vmatpush.msrb.mxu0 %v1561_v44  ;;  %1823 = vmatpush.msrb.mxu2 %v1562_v46 }
 0x220   : > { %1805 = vmatpush.msrb.mxu1 %v1645_v52  ;;  %v1587_v52 = vld [vmem:[#allocation14 + $0x290] sm:$0xff] }
 0x221   : > { %1784 = vmatpush.msrb.mxu0 %v1555_v18  ;;  %1824 = vmatpush.msrb.mxu2 %v1556_v49  ;;  %v1695_v18 = vld [vmem:[#allocation14 + $0x5f0] sm:$0xff]  ;;  %v1696_v49 = vld [vmem:[#allocation14 + $0x5f8] sm:$0xff] }
 0x222   : > { %1806 = vmatpush.msrb.mxu1 %v1639_v16  ;;  %v1581_v16 = vld [vmem:[#allocation14 + $0x260] sm:$0xff] }
 0x223   : > { %1785 = vmatpush.msrb.mxu0 %v1549_v51  ;;  %1825 = vmatpush.msrb.mxu2 %v1550_v7  ;;  %v1690_v51 = vld [vmem:[#allocation14 + $0x5c8] sm:$0xff]  ;;  %v1683_v7 = vld [vmem:[#allocation14 + $0x590] sm:$0xff] }
 0x224   : > { %1807 = vmatpush.msrb.mxu1 %v1633_v60  ;;  %v1575_v60 = vld [vmem:[#allocation14 + $0x230] sm:$0xff] }
 0x225   : > { %1786 = vmatpush.msrb.mxu0 %v1543_v54  ;;  %1826 = vmatpush.msrb.mxu2 %v1544_v57  ;;  %v1684_v54 = vld [vmem:[#allocation14 + $0x598] sm:$0xff]  ;;  %v1677_v57 = vld [vmem:[#allocation14 + $0x560] sm:$0xff] }
 0x226   : > { %1808 = vmatpush.msrb.mxu1 %v1627_v0  ;;  %v1569_v0 = vld [vmem:[#allocation14 + $0x200] sm:$0xff] }
 0x227   : > { %1787 = vmatpush.msrb.mxu0 %v1537_v59  ;;  %1827 = vmatpush.msrb.mxu2 %v1538_v3  ;;  %v1678_v59 = vld [vmem:[#allocation14 + $0x568] sm:$0xff]  ;;  %v1671_v3 = vld [vmem:[#allocation14 + $0x530] sm:$0xff] }
 0x228   : > { %1809 = vmatpush.msrb.mxu1 %v1621_v2  ;;  %v1563_v2 = vld [vmem:[#allocation14 + $0x1d0] sm:$0xff] }
 0x229   : > { %1788 = vmatpush.msrb.mxu0 %v1531_v62  ;;  %1828 = vmatpush.msrb.mxu2 %v1532_v6  ;;  %v1672_v62 = vld [vmem:[#allocation14 + $0x538] sm:$0xff]  ;;  %v1665_v6 = vld [vmem:[#allocation14 + $0x500] sm:$0xff] }
 0x22a   : > { %1810 = vmatpush.msrb.mxu1 %v1615_v4  ;;  %v1557_v4 = vld [vmem:[#allocation14 + $0x1a0] sm:$0xff] }
 0x22b   : > { %1789 = vmatpush.msrb.mxu0 %v1525_v9  ;;  %1829 = vmatpush.msrb.mxu2 %v1526_v15  ;;  %v1666_v9 = vld [vmem:[#allocation14 + $0x508] sm:$0xff]  ;;  %v1659_v15 = vld [vmem:[#allocation14 + $0x4d0] sm:$0xff] }
 0x22c   : > { %1811 = vmatpush.msrb.mxu1 %v1609_v19 }
 0x22d   : > { %1790 = vmatpush.msrb.mxu0 %v1519_v8  ;;  %1830 = vmatpush.msrb.mxu2 %v1520_v55  ;;  %v1660_v8 = vld [vmem:[#allocation14 + $0x4d8] sm:$0xff]  ;;  %v1653_v55 = vld [vmem:[#allocation14 + $0x4a0] sm:$0xff] }
 0x22e   : > { %1812 = vmatpush.msrb.mxu1 %v1603_v24  ;;  %v1648_v24 = vld [vmem:[#allocation14 + $0x478] sm:$0xff] }
 0x22f   : > { %1791 = vmatpush.msrb.mxu0 %v1513_v56  ;;  %1831 = vmatpush.msrb.mxu2 %v1514_v21  ;;  %v1654_v56 = vld [vmem:[#allocation14 + $0x4a8] sm:$0xff]  ;;  %v1551_v21 = vld [vmem:[#allocation14 + $0x170] sm:$0xff] }
 0x231   : > { %1792 = vmatpush.msrb.mxu0 %v1507_v23  ;;  %1832 = vmatpush.msrb.mxu2 %v1508_v25  ;;  %v1552_v23 = vld [vmem:[#allocation14 + $0x178] sm:$0xff]  ;;  %v1545_v25 = vld [vmem:[#allocation14 + $0x140] sm:$0xff] }
 0x269   : > { %v1435_v27 = vpop.xlane.xlu0 %1434 }
 0x26a   : > { %v1436_v28 = vmul.f32 %v1435_v27, %v6702_v63 }
 0x26c   : > { %v1437_v29 = vadd.f32 1e-05, %v1436_v28  ;;  %v1546_v28 = vld [vmem:[#allocation14 + $0x148] sm:$0xff] }
 0x26e   : > { %5496 = vrsqrt.f32 %v1437_v29  ;;  %vm1444_vm2 = vweird.f32 %v1437_v29 }
 0x274   : > { %v5497_v11 = vpop.eup %5496 }
 0x275   : > { %v1439_v31 = vmul.f32 %v5497_v11, %v1437_v29  ;;  %vm1445_vm1 = vweird.f32 %v5497_v11  ;;  %v1642_v29 = vld [vmem:[#allocation14 + $0x448] sm:$0xff] }
 0x276   : > { %vm1446_vm3 = vmor %vm1444_vm2, %vm1445_vm1 }
 0x277   : > { %v1440_v32 = vmul.f32 %v5497_v11, %v1439_v31  ;;  %v1635_v31 = vld [vmem:[#allocation14 + $0x410] sm:$0xff] }
 0x279   : > { %v1441_v33 = vmul.f32 0.5, %v1440_v32  ;;  %v1540_v32 = vld [vmem:[#allocation14 + $0x118] sm:$0xff] }
 0x27b   : > { %v1442_v35 = vsub.f32 1.5, %v1441_v33  ;;  %v1636_v33 = vld [vmem:[#allocation14 + $0x418] sm:$0xff] }
 0x27d   : > { %v1443_v37 = vmul.f32 %v5497_v11, %v1442_v35  ;;  %v1629_v35 = vld [vmem:[#allocation14 + $0x3e0] sm:$0xff] }
 0x27f   : > { %v1447_v20 = vsel %vm1446_vm3, %v5497_v11, %v1443_v37  ;;  %v1539_v11 = vld [vmem:[#allocation14 + $0x110] sm:$0xff]  ;;  %v1630_v37 = vld [vmem:[#allocation14 + $0x3e8] sm:$0xff] }
 0x280   : > { %v1448_v41 = vmul.f32 %v1447_v20, %v6706_v1  ;;  %v1449_v42 = vmul.f32 %v1447_v20, %v6709_v5  ;;  %v1593_v1 = vld [vmem:[#allocation14 + $0x2c0] sm:$0xff]  ;;  %v1528_v20 = vld [vmem:[#allocation14 + $0xb8] sm:$0xff] }
 0x281   : > { %v1689_v5 = vld [vmem:[#allocation14 + $0x5c0] sm:$0xff] }
 0x282   : > { %v1455_v43 = vmul.f32 %v1451_v38, %v1448_v41  ;;  %v1456_v44 = vmul.f32 %v1452_v39, %v1449_v42  ;;  %v1527_v38 = vld [vmem:[#allocation14 + $0xb0] sm:$0xff]  ;;  %v1617_v41 = vld [vmem:[#allocation14 + $0x380] sm:$0xff]  ;;  %v1522_v42 = vld [vmem:[#allocation14 + $0x88] sm:$0xff] }
 0x283   : > { %v1623_v39 = vld [vmem:[#allocation14 + $0x3b0] sm:$0xff] }
 0x284   : > { %v6729_v45 = vadd.f32 %v1458_v30, %v1455_v43  ;;  %v6731_v46 = vadd.f32 %v1459_v40, %v1456_v44  ;;  %v1624_v30 = vld [vmem:[#allocation14 + $0x3b8] sm:$0xff]  ;;  %v1521_v40 = vld [vmem:[#allocation14 + $0x80] sm:$0xff]  ;;  %v1618_v43 = vld [vmem:[#allocation14 + $0x388] sm:$0xff] }
 0x285   : > { %v1515_v44 = vld [vmem:[#allocation14 + $0x50] sm:$0xff] }
 0x286   : > { %1713 = vmatmul.f32.vlgmr.msra.gmra.mxu0 %v6729_v45  ;;  %1733 = vmatmul.f32.vlgmr.msra.gmra.mxu1 %v6731_v46 }
 0x287   : > { %1753 = vmatmul.f32.vlgmr.msra.gmra.mxu2 %v6729_v45  ;;  %1773 = vmatmul.f32.vlgmr.msra.gmra.mxu3 %v6731_v46 }
 0x288   : > { %1857 = vmatpush.msra.mxu0 %v1599_v47  ;;  %1877 = vmatpush.msra.mxu1 %v1695_v18  ;;  %v1611_v47 = vld [vmem:[#allocation14 + $0x350] sm:$0xff]  ;;  %v1516_v18 = vld [vmem:[#allocation14 + $0x58] sm:$0xff] }
 0x289   : > { %1897 = vmatpush.msra.mxu2 %v1600_v48  ;;  %1917 = vmatpush.msra.mxu3 %v1696_v49  ;;  %v1476_v19 = vpop.xlane.xlu1 %1475  ;;  %v1612_v48 = vld [vmem:[#allocation14 + $0x358] sm:$0xff]  ;;  %v1509_v49 = vld [vmem:[#allocation14 + $0x20] sm:$0xff] }
 0x28a   : > { %1858 = vmatpush.msra.mxu0 %v1593_v1  ;;  %1878 = vmatpush.msra.mxu1 %v1689_v5  ;;  %v1477_v27 = vmul.f32 %v1476_v19, %v6702_v63  ;;  %v1534_v63 = vld [vmem:[#allocation14 + $0xe8] sm:$0xff]  ;;  %v1605_v1 = vld [vmem:[#allocation14 + $0x320] sm:$0xff] }
 0x28b   : > { %1898 = vmatpush.msra.mxu2 %v1594_v50  ;;  %1918 = vmatpush.msra.mxu3 %v1690_v51  ;;  %v1510_v5 = vld [vmem:[#allocation14 + $0x28] sm:$0xff] }
 0x28c   : > { %1859 = vmatpush.msra.mxu0 %v1587_v52  ;;  %1879 = vmatpush.msra.mxu1 %v1683_v7  ;;  %v6742_v36 = vadd.f32 1e-05, %v1477_v27  ;;  %v1606_v50 = vld [vmem:[#allocation14 + $0x328] sm:$0xff]  ;;  %v2027_v52 = vld [vmem:[#allocation17 + $0x2d0] sm:$0xff] }
 0x28d   : > { %1899 = vmatpush.msra.mxu2 %v1588_v53  ;;  %1919 = vmatpush.msra.mxu3 %v1684_v54  ;;  %v2123_v7 = vld [vmem:[#allocation17 + $0x5d0] sm:$0xff]  ;;  %v2028_v53 = vld [vmem:[#allocation17 + $0x2d8] sm:$0xff]  ;;  %v2093_v19 = vld [vmem:[#allocation17 + $0x4e0] sm:$0xff] }
 0x28e   : > { %1860 = vmatpush.msra.mxu0 %v1581_v16  ;;  %1880 = vmatpush.msra.mxu1 %v1677_v57  ;;  %5498 = vrsqrt.f32 %v6742_v36  ;;  %v2124_v54 = vld [vmem:[#allocation17 + $0x5d8] sm:$0xff]  ;;  %v2021_v57 = vld [vmem:[#allocation17 + $0x2a0] sm:$0xff]  ;;  %vm1485_vm5 = vweird.f32 %v6742_v36 }
 0x28f   : > { %1900 = vmatpush.msra.mxu2 %v1582_v58  ;;  %1920 = vmatpush.msra.mxu3 %v1678_v59  ;;  %v2117_v58 = vld [vmem:[#allocation17 + $0x5a0] sm:$0xff]  ;;  %v2022_v59 = vld [vmem:[#allocation17 + $0x2a8] sm:$0xff] }
 0x290   : > { %1793 = vmatmul.f32.vlgmr.msrb.gmra.mxu0 %v6729_v45  ;;  %1813 = vmatmul.f32.vlgmr.msrb.gmra.mxu1 %v6731_v46 }
 0x291   : > { %1833 = vmatmul.f32.vlgmr.msrb.gmra.mxu2 %v6729_v45  ;;  %1853 = vmatmul.f32.vlgmr.msrb.gmra.mxu3 %v6731_v46 }
 0x292   : > { %1861 = vmatpush.msra.mxu0 %v1575_v60  ;;  %1881 = vmatpush.msra.mxu1 %v1671_v3  ;;  %v2118_v60 = vld [vmem:[#allocation17 + $0x5a8] sm:$0xff]  ;;  %v2015_v3 = vld [vmem:[#allocation17 + $0x270] sm:$0xff] }
 0x293   : > { %1901 = vmatpush.msra.mxu2 %v1576_v61  ;;  %1921 = vmatpush.msra.mxu3 %v1672_v62  ;;  %v2111_v61 = vld [vmem:[#allocation17 + $0x570] sm:$0xff]  ;;  %v2016_v62 = vld [vmem:[#allocation17 + $0x278] sm:$0xff] }
 0x294   : > { %1862 = vmatpush.msra.mxu0 %v1569_v0  ;;  %1882 = vmatpush.msra.mxu1 %v1665_v6  ;;  %v6745_v51 = vpop.eup %5498  ;;  %v2112_v0 = vld [vmem:[#allocation17 + $0x578] sm:$0xff] }
 0x295   : > { %1902 = vmatpush.msra.mxu2 %v1570_v10  ;;  %1922 = vmatpush.msra.mxu3 %v1666_v9  ;;  %v1480_v16 = vmul.f32 %v6745_v51, %v6742_v36  ;;  %v2009_v10 = vld [vmem:[#allocation17 + $0x240] sm:$0xff]  ;;  %vm1486_vm4 = vweird.f32 %v6745_v51  ;;  %v2058_v36 = vld [vmem:[#allocation17 + $0x3c8] sm:$0xff] }
 0x296   : > { %1863 = vmatpush.msra.mxu0 %v1563_v2  ;;  %1883 = vmatpush.msra.mxu1 %v1659_v15  ;;  %v2105_v9 = vld [vmem:[#allocation17 + $0x540] sm:$0xff]  ;;  %v2010_v2 = vld [vmem:[#allocation17 + $0x248] sm:$0xff]  ;;  %vm1487_vm6 = vmor %vm1485_vm5, %vm1486_vm4 }
 0x297   : > { %1903 = vmatpush.msra.mxu2 %v1564_v14  ;;  %1923 = vmatpush.msra.mxu3 %v1660_v8  ;;  %v1481_v6 = vmul.f32 %v6745_v51, %v1480_v16  ;;  %v2106_v15 = vld [vmem:[#allocation17 + $0x548] sm:$0xff]  ;;  %v2003_v14 = vld [vmem:[#allocation17 + $0x210] sm:$0xff]  ;;  %v1949_v16 = vld [vmem:[#allocation17 + $0x60] sm:$0xff] }
 0x298   : > { %1864 = vmatpush.msra.mxu0 %v1557_v4  ;;  %1884 = vmatpush.msra.mxu1 %v1653_v55  ;;  %v2099_v8 = vld [vmem:[#allocation17 + $0x510] sm:$0xff]  ;;  %v2004_v4 = vld [vmem:[#allocation17 + $0x218] sm:$0xff] }
 0x299   : > { %1904 = vmatpush.msra.mxu2 %v1558_v17  ;;  %1924 = vmatpush.msra.mxu3 %v1654_v56  ;;  %v2100_v55 = vld [vmem:[#allocation17 + $0x518] sm:$0xff]  ;;  %v1482_v17 = vmul.f32 0.5, %v1481_v6  ;;  %v1997_v56 = vld [vmem:[#allocation17 + $0x1e0] sm:$0xff] }
 0x29a   : > { %1865 = vmatpush.msra.mxu0 %v1551_v21  ;;  %1885 = vmatpush.msra.mxu1 %v1647_v22  ;;  %v1998_v21 = vld [vmem:[#allocation17 + $0x1e8] sm:$0xff]  ;;  %v2040_v6 = vld [vmem:[#allocation17 + $0x338] sm:$0xff] }
 0x29b   : > { %1905 = vmatpush.msra.mxu2 %v1552_v23  ;;  %1925 = vmatpush.msra.mxu3 %v1648_v24  ;;  %v2094_v22 = vld [vmem:[#allocation17 + $0x4e8] sm:$0xff]  ;;  %v1991_v23 = vld [vmem:[#allocation17 + $0x1b0] sm:$0xff]  ;;  %v1483_v27 = vsub.f32 1.5, %v1482_v17 }
 0x29c   : > { %1866 = vmatpush.msra.mxu0 %v1545_v25  ;;  %1886 = vmatpush.msra.mxu1 %v1641_v26  ;;  %v2087_v24 = vld [vmem:[#allocation17 + $0x4b0] sm:$0xff]  ;;  %v1992_v25 = vld [vmem:[#allocation17 + $0x1b8] sm:$0xff]  ;;  %v2030_v17 = vld [vmem:[#allocation17 + $0x2e8] sm:$0xff] }
 0x29d   : > { %1906 = vmatpush.msra.mxu2 %v1546_v28  ;;  %1926 = vmatpush.msra.mxu3 %v1642_v29  ;;  %v2088_v26 = vld [vmem:[#allocation17 + $0x4b8] sm:$0xff]  ;;  %v1985_v28 = vld [vmem:[#allocation17 + $0x180] sm:$0xff] }
 0x29e   : > { %1867 = vmatpush.msra.mxu0 %v1539_v11  ;;  %1887 = vmatpush.msra.mxu1 %v1635_v31  ;;  %v2081_v29 = vld [vmem:[#allocation17 + $0x480] sm:$0xff]  ;;  %v1986_v11 = vld [vmem:[#allocation17 + $0x188] sm:$0xff] }
 0x29f   : > { %1907 = vmatpush.msra.mxu2 %v1540_v32  ;;  %1927 = vmatpush.msra.mxu3 %v1636_v33  ;;  %v2082_v31 = vld [vmem:[#allocation17 + $0x488] sm:$0xff]  ;;  %v1979_v32 = vld [vmem:[#allocation17 + $0x150] sm:$0xff] }
 0x2a0   : > { %1868 = vmatpush.msra.mxu0 %v1533_v34  ;;  %1888 = vmatpush.msra.mxu1 %v1629_v35  ;;  %v2075_v33 = vld [vmem:[#allocation17 + $0x450] sm:$0xff]  ;;  %v1980_v34 = vld [vmem:[#allocation17 + $0x158] sm:$0xff] }
 0x2a1   : > { %1908 = vmatpush.msra.mxu2 %v1534_v63  ;;  %1928 = vmatpush.msra.mxu3 %v1630_v37  ;;  %v2076_v35 = vld [vmem:[#allocation17 + $0x458] sm:$0xff]  ;;  %v1484_v63 = vmul.f32 %v6745_v51, %v1483_v27  ;;  %v1973_v37 = vld [vmem:[#allocation17 + $0x120] sm:$0xff]  ;;  %v2114_v27 = vld [vmem:[#allocation17 + $0x588] sm:$0xff] }
 0x2a2   : > { %1869 = vmatpush.msra.mxu0 %v1527_v38  ;;  %1889 = vmatpush.msra.mxu1 %v1623_v39  ;;  %v2069_v38 = vld [vmem:[#allocation17 + $0x420] sm:$0xff]  ;;  %v1974_v39 = vld [vmem:[#allocation17 + $0x128] sm:$0xff] }
 0x2a3   : > { %1909 = vmatpush.msra.mxu2 %v1528_v20  ;;  %1929 = vmatpush.msra.mxu3 %v1624_v30  ;;  %v2070_v20 = vld [vmem:[#allocation17 + $0x428] sm:$0xff]  ;;  %v1967_v30 = vld [vmem:[#allocation17 + $0xf0] sm:$0xff] }
 0x2a4   : > { %1870 = vmatpush.msra.mxu0 %v1521_v40  ;;  %1890 = vmatpush.msra.mxu1 %v1617_v41  ;;  %v2063_v40 = vld [vmem:[#allocation17 + $0x3f0] sm:$0xff]  ;;  %v1968_v41 = vld [vmem:[#allocation17 + $0xf8] sm:$0xff] }
 0x2a5   : > { %1910 = vmatpush.msra.mxu2 %v1522_v42  ;;  %1930 = vmatpush.msra.mxu3 %v1618_v43  ;;  %v2064_v42 = vld [vmem:[#allocation17 + $0x3f8] sm:$0xff] }
 0x2a6   : > { %1871 = vmatpush.msra.mxu0 %v1515_v44  ;;  %1891 = vmatpush.msra.mxu1 %v1611_v47  ;;  %v1464_v43 = vld [vmem:[#allocation11] sm:$0x3]  ;;  %v1488_v44 = vsel %vm1487_vm6, %v6745_v51, %v1484_v63  ;;  %v1961_v47 = vld [vmem:[#allocation17 + $0xc0] sm:$0xff]  ;;  %v1999_v63 = vld [vmem:[#allocation17 + $0x1f0] sm:$0xff] }
 0x2a7   : > { %1911 = vmatpush.msra.mxu2 %v1516_v18  ;;  %1931 = vmatpush.msra.mxu3 %v1612_v48  ;;  %v2057_v18 = vld [vmem:[#allocation17 + $0x3c0] sm:$0xff]  ;;  %v1962_v48 = vld [vmem:[#allocation17 + $0xc8] sm:$0xff]  ;;  %v1956_v51 = vld [vmem:[#allocation17 + $0x98] sm:$0xff] }
 0x2a8   : > { %1872 = vmatpush.msra.mxu0 %v1509_v49  ;;  %1892 = vmatpush.msra.mxu1 %v1605_v1  ;;  %v1955_v49 = vld [vmem:[#allocation17 + $0x90] sm:$0xff] }
 0x2a9   : > { %1912 = vmatpush.msra.mxu2 %v1510_v5  ;;  %1932 = vmatpush.msra.mxu3 %v1606_v50  ;;  %v2051_v1 = vld [vmem:[#allocation17 + $0x390] sm:$0xff]  ;;  %v1492_v5 = vperm.slane %v1464_v43, 0  ;;  %v1493_v50 = vperm.slane %v1464_v43, 1 }
 0x2aa   : > { %1873 = vmatmul.f32.vlgmr.msra.gmra.mxu0 %v6729_v45  ;;  %1893 = vmatmul.f32.vlgmr.msra.gmra.mxu1 %v6731_v46  ;;  %v2083_v43 = vld [vmem:[#allocation17 + $0x490] sm:$0xff] }
 0x2ab   : > { %1913 = vmatmul.f32.vlgmr.msra.gmra.mxu2 %v6729_v45  ;;  %1933 = vmatmul.f32.vlgmr.msra.gmra.mxu3 %v6731_v46 }
 0x2ac   : > { %2129 = vmatpush.msrb.mxu0 %v2027_v52  ;;  %2149 = vmatpush.msrb.mxu1 %v2123_v7  ;;  %v1489_v52 = vmul.f32 %v1488_v44, %v6717_v12  ;;  %v1490_v7 = vmul.f32 %v1488_v44, %v6720_v13  ;;  %v1988_v44 = vld [vmem:[#allocation17 + $0x198] sm:$0xff] }
 0x2ad   : > { %2169 = vmatpush.msrb.mxu2 %v2028_v53  ;;  %2189 = vmatpush.msrb.mxu3 %v2124_v54  ;;  %v2052_v53 = vld [vmem:[#allocation17 + $0x398] sm:$0xff] }
 0x2ae   : > { %2130 = vmatpush.msrb.mxu0 %v2021_v57  ;;  %2150 = vmatpush.msrb.mxu1 %v2117_v58  ;;  %v1465_v54 = vld [vmem:[#allocation13] sm:$0x3]  ;;  %v2045_v57 = vld [vmem:[#allocation17 + $0x360] sm:$0xff]  ;;  %v1950_v58 = vld [vmem:[#allocation17 + $0x68] sm:$0xff]  ;;  %v1496_v13 = vmul.f32 %v1492_v5, %v1489_v52 }
 0x2af   : > { %2170 = vmatpush.msrb.mxu2 %v2022_v59  ;;  %2190 = vmatpush.msrb.mxu3 %v2118_v60  ;;  %v2046_v59 = vld [vmem:[#allocation17 + $0x368] sm:$0xff]  ;;  %v1943_v60 = vld [vmem:[#allocation17 + $0x30] sm:$0xff]  ;;  %v1499_v12 = vperm.slane %v1465_v54, 0  ;;  %v2072_v52 = vld [vmem:[#allocation17 + $0x438] sm:$0xff] }
 0x2b0   : > { %2131 = vmatpush.msrb.mxu0 %v2015_v3  ;;  %2151 = vmatpush.msrb.mxu1 %v2111_v61  ;;  %v2039_v3 = vld [vmem:[#allocation17 + $0x330] sm:$0xff]  ;;  %v1500_v61 = vperm.slane %v1465_v54, 1  ;;  %v2066_v54 = vld [vmem:[#allocation17 + $0x408] sm:$0xff] }
 0x2b1   : > { %2171 = vmatpush.msrb.mxu2 %v2016_v62  ;;  %2191 = vmatpush.msrb.mxu3 %v2112_v0  ;;  %v1497_v62 = vmul.f32 %v1493_v50, %v1490_v7  ;;  %v1944_v0 = vld [vmem:[#allocation17 + $0x38] sm:$0xff]  ;;  %v2071_v5 = vld [vmem:[#allocation17 + $0x430] sm:$0xff]  ;;  %v1969_v7 = vld [vmem:[#allocation17 + $0x100] sm:$0xff] }
 0x2b2   : > { %2132 = vmatpush.msrb.mxu0 %v2009_v10  ;;  %2152 = vmatpush.msrb.mxu1 %v2105_v9  ;;  %v1937_v10 = vld [vmem:[#allocation17] sm:$0xff]  ;;  %v1976_v50 = vld [vmem:[#allocation17 + $0x138] sm:$0xff] }
 0x2b3   : > { %2172 = vmatpush.msrb.mxu2 %v2010_v2  ;;  %2192 = vmatpush.msrb.mxu3 %v2106_v15  ;;  %v2033_v9 = vld [vmem:[#allocation17 + $0x300] sm:$0xff]  ;;  %v1938_v2 = vld [vmem:[#allocation17 + $0x8] sm:$0xff] }
 0x2b4   : > { %2133 = vmatpush.msrb.mxu0 %v2003_v14  ;;  %2153 = vmatpush.msrb.mxu1 %v2099_v8  ;;  %v2034_v15 = vld [vmem:[#allocation17 + $0x308] sm:$0xff]  ;;  %v6760_v14 = vadd.f32 %v1499_v12, %v1496_v13  ;;  %v6762_v8 = vadd.f32 %v1500_v61, %v1497_v62  ;;  %v1951_v13 = vld [vmem:[#allocation17 + $0x70] sm:$0xff] }
 0x2b5   : > { %2173 = vmatpush.msrb.mxu2 %v2004_v4  ;;  %2193 = vmatpush.msrb.mxu3 %v2100_v55  ;;  %v2029_v4 = vld [vmem:[#allocation17 + $0x2e0] sm:$0xff]  ;;  %v1958_v12 = vld [vmem:[#allocation17 + $0xa8] sm:$0xff]  ;;  %v2047_v62 = vld [vmem:[#allocation17 + $0x370] sm:$0xff] }
 0x2b6   : > { %2134 = vmatpush.msrb.mxu0 %v1997_v56  ;;  %2154 = vmatpush.msrb.mxu1 %v2093_v19  ;;  %v2125_v55 = vld [vmem:[#allocation17 + $0x5e0] sm:$0xff]  ;;  %v2126_v56 = vld [vmem:[#allocation17 + $0x5e8] sm:$0xff]  ;;  %v2023_v19 = vld [vmem:[#allocation17 + $0x2b0] sm:$0xff] }
 0x2b7   : > { %2174 = vmatpush.msrb.mxu2 %v1998_v21  ;;  %2194 = vmatpush.msrb.mxu3 %v2094_v22  ;;  %v2119_v21 = vld [vmem:[#allocation17 + $0x5b0] sm:$0xff]  ;;  %v2024_v22 = vld [vmem:[#allocation17 + $0x2b8] sm:$0xff]  ;;  %v2054_v61 = vld [vmem:[#allocation17 + $0x3a8] sm:$0xff] }
 0x2b8   : > { %2135 = vmatpush.msrb.mxu0 %v1991_v23  ;;  %2155 = vmatpush.msrb.mxu1 %v2087_v24  ;;  %v2120_v23 = vld [vmem:[#allocation17 + $0x5b8] sm:$0xff]  ;;  %v2017_v24 = vld [vmem:[#allocation17 + $0x280] sm:$0xff] }
 0x2b9   : > { %2175 = vmatpush.msrb.mxu2 %v1992_v25  ;;  %2195 = vmatpush.msrb.mxu3 %v2088_v26  ;;  %v2113_v25 = vld [vmem:[#allocation17 + $0x580] sm:$0xff]  ;;  %v2018_v26 = vld [vmem:[#allocation17 + $0x288] sm:$0xff] }
 0x2ba   : > { %2136 = vmatpush.msrb.mxu0 %v1985_v28  ;;  %2156 = vmatpush.msrb.mxu1 %v2081_v29  ;;  %v2011_v28 = vld [vmem:[#allocation17 + $0x250] sm:$0xff] }
 0x2bb   : > { %2176 = vmatpush.msrb.mxu2 %v1986_v11  ;;  %2196 = vmatpush.msrb.mxu3 %v2082_v31  ;;  %v2107_v29 = vld [vmem:[#allocation17 + $0x550] sm:$0xff]  ;;  %v2012_v11 = vld [vmem:[#allocation17 + $0x258] sm:$0xff] }
 0x2bc   : > { %2137 = vmatpush.msrb.mxu0 %v1979_v32  ;;  %2157 = vmatpush.msrb.mxu1 %v2075_v33  ;;  %v2108_v31 = vld [vmem:[#allocation17 + $0x558] sm:$0xff]  ;;  %v2005_v32 = vld [vmem:[#allocation17 + $0x220] sm:$0xff] }
 0x2bd   : > { %2177 = vmatpush.msrb.mxu2 %v1980_v34  ;;  %2197 = vmatpush.msrb.mxu3 %v2076_v35  ;;  %v2101_v33 = vld [vmem:[#allocation17 + $0x520] sm:$0xff]  ;;  %v2006_v34 = vld [vmem:[#allocation17 + $0x228] sm:$0xff] }
 0x2be   : > { %2138 = vmatpush.msrb.mxu0 %v1973_v37  ;;  %2158 = vmatpush.msrb.mxu1 %v2069_v38  ;;  %v2102_v35 = vld [vmem:[#allocation17 + $0x528] sm:$0xff]  ;;  %v2095_v37 = vld [vmem:[#allocation17 + $0x4f0] sm:$0xff]  ;;  %v2000_v38 = vld [vmem:[#allocation17 + $0x1f8] sm:$0xff] }
 0x2bf   : > { %2178 = vmatpush.msrb.mxu2 %v1974_v39  ;;  %2198 = vmatpush.msrb.mxu3 %v2070_v20  ;;  %v2096_v39 = vld [vmem:[#allocation17 + $0x4f8] sm:$0xff]  ;;  %v1993_v20 = vld [vmem:[#allocation17 + $0x1c0] sm:$0xff] }
 0x2c0   : > { %2139 = vmatpush.msrb.mxu0 %v1967_v30  ;;  %2159 = vmatpush.msrb.mxu1 %v2063_v40  ;;  %v2089_v30 = vld [vmem:[#allocation17 + $0x4c0] sm:$0xff]  ;;  %v1994_v40 = vld [vmem:[#allocation17 + $0x1c8] sm:$0xff] }
 0x2c1   : > { %2179 = vmatpush.msrb.mxu2 %v1968_v41  ;;  %2199 = vmatpush.msrb.mxu3 %v2064_v42  ;;  %v2090_v41 = vld [vmem:[#allocation17 + $0x4c8] sm:$0xff]  ;;  %v1987_v42 = vld [vmem:[#allocation17 + $0x190] sm:$0xff] }
 0x2c2   : > { %2140 = vmatpush.msrb.mxu0 %v1961_v47  ;;  %2160 = vmatpush.msrb.mxu1 %v2057_v18  ;;  %v2084_v47 = vld [vmem:[#allocation17 + $0x498] sm:$0xff]  ;;  %v1981_v18 = vld [vmem:[#allocation17 + $0x160] sm:$0xff] }
 0x2c3   : > { %2180 = vmatpush.msrb.mxu2 %v1962_v48  ;;  %2200 = vmatpush.msrb.mxu3 %v2058_v36  ;;  %v2077_v48 = vld [vmem:[#allocation17 + $0x460] sm:$0xff]  ;;  %v1982_v36 = vld [vmem:[#allocation17 + $0x168] sm:$0xff] }
 0x2c4   : > { %2141 = vmatpush.msrb.mxu0 %v1955_v49  ;;  %2161 = vmatpush.msrb.mxu1 %v2051_v1  ;;  %v2078_v49 = vld [vmem:[#allocation17 + $0x468] sm:$0xff]  ;;  %v1975_v1 = vld [vmem:[#allocation17 + $0x130] sm:$0xff] }
 0x2c5   : > { %2181 = vmatpush.msrb.mxu2 %v1956_v51  ;;  %2201 = vmatpush.msrb.mxu3 %v2052_v53  ;;  %v2065_v51 = vld [vmem:[#allocation17 + $0x400] sm:$0xff]  ;;  %v1970_v53 = vld [vmem:[#allocation17 + $0x108] sm:$0xff] }
 0x2c6   : > { %2142 = vmatpush.msrb.mxu0 %v1949_v16  ;;  %2162 = vmatpush.msrb.mxu1 %v2045_v57  ;;  %v1963_v16 = vld [vmem:[#allocation17 + $0xd0] sm:$0xff] }
 0x2c7   : > { %2182 = vmatpush.msrb.mxu2 %v1950_v58  ;;  %2202 = vmatpush.msrb.mxu3 %v2046_v59  ;;  %v2059_v57 = vld [vmem:[#allocation17 + $0x3d0] sm:$0xff]  ;;  %v1964_v58 = vld [vmem:[#allocation17 + $0xd8] sm:$0xff] }
 0x2c8   : > { %2143 = vmatpush.msrb.mxu0 %v1943_v60  ;;  %2163 = vmatpush.msrb.mxu1 %v2039_v3  ;;  %v2060_v59 = vld [vmem:[#allocation17 + $0x3d8] sm:$0xff]  ;;  %v1957_v60 = vld [vmem:[#allocation17 + $0xa0] sm:$0xff] }
 0x2c9   : > { %2183 = vmatpush.msrb.mxu2 %v1944_v0  ;;  %2203 = vmatpush.msrb.mxu3 %v2040_v6  ;;  %v2053_v3 = vld [vmem:[#allocation17 + $0x3a0] sm:$0xff]  ;;  %v1952_v0 = vld [vmem:[#allocation17 + $0x78] sm:$0xff] }
 0x2ca   : > { %2144 = vmatpush.msrb.mxu0 %v1937_v10  ;;  %2164 = vmatpush.msrb.mxu1 %v2033_v9  ;;  %v2048_v6 = vld [vmem:[#allocation17 + $0x378] sm:$0xff]  ;;  %v1945_v10 = vld [vmem:[#allocation17 + $0x40] sm:$0xff] }
 0x2cb   : > { %2184 = vmatpush.msrb.mxu2 %v1938_v2  ;;  %2204 = vmatpush.msrb.mxu3 %v2034_v15  ;;  %v2041_v9 = vld [vmem:[#allocation17 + $0x340] sm:$0xff]  ;;  %v1946_v2 = vld [vmem:[#allocation17 + $0x48] sm:$0xff] }
 0x2cc   : > { %2145 = vmatmul.f32.vlgmr.msrb.gmra.mxu0 %v6760_v14  ;;  %2165 = vmatmul.f32.vlgmr.msrb.gmra.mxu1 %v6762_v8  ;;  %v2042_v15 = vld [vmem:[#allocation17 + $0x348] sm:$0xff] }
 0x2cd   : > { %2185 = vmatmul.f32.vlgmr.msrb.gmra.mxu2 %v6760_v14  ;;  %2205 = vmatmul.f32.vlgmr.msrb.gmra.mxu3 %v6762_v8 }
 0x2ce   : > { %2209 = vmatpush.msra.mxu0 %v2029_v4  ;;  %2229 = vmatpush.msra.mxu1 %v2125_v55  ;;  %v1939_v4 = vld [vmem:[#allocation17 + $0x10] sm:$0xff] }
 0x2cf   : > { %2249 = vmatpush.msra.mxu2 %v2030_v17  ;;  %2269 = vmatpush.msra.mxu3 %v2126_v56  ;;  %v2035_v55 = vld [vmem:[#allocation17 + $0x310] sm:$0xff]  ;;  %v1940_v17 = vld [vmem:[#allocation17 + $0x18] sm:$0xff] }
 0x2d0   : > { %2210 = vmatpush.msra.mxu0 %v2023_v19  ;;  %2230 = vmatpush.msra.mxu1 %v2119_v21  ;;  %v2036_v56 = vld [vmem:[#allocation17 + $0x318] sm:$0xff]  ;;  %v2031_v19 = vld [vmem:[#allocation17 + $0x2f0] sm:$0xff] }
 0x2d1   : > { %2250 = vmatpush.msra.mxu2 %v2024_v22  ;;  %2270 = vmatpush.msra.mxu3 %v2120_v23  ;;  %v2127_v21 = vld [vmem:[#allocation17 + $0x5f0] sm:$0xff]  ;;  %v2032_v22 = vld [vmem:[#allocation17 + $0x2f8] sm:$0xff] }
 0x2d2   : > { %2211 = vmatpush.msra.mxu0 %v2017_v24  ;;  %2231 = vmatpush.msra.mxu1 %v2113_v25  ;;  %v2128_v23 = vld [vmem:[#allocation17 + $0x5f8] sm:$0xff]  ;;  %v2025_v24 = vld [vmem:[#allocation17 + $0x2c0] sm:$0xff] }
 0x2d3   : > { %2251 = vmatpush.msra.mxu2 %v2018_v26  ;;  %2271 = vmatpush.msra.mxu3 %v2114_v27  ;;  %v2121_v25 = vld [vmem:[#allocation17 + $0x5c0] sm:$0xff]  ;;  %v2026_v26 = vld [vmem:[#allocation17 + $0x2c8] sm:$0xff] }
 0x2d4   : > { %2212 = vmatpush.msra.mxu0 %v2011_v28  ;;  %2232 = vmatpush.msra.mxu1 %v2107_v29  ;;  %v2122_v27 = vld [vmem:[#allocation17 + $0x5c8] sm:$0xff]  ;;  %v2019_v28 = vld [vmem:[#allocation17 + $0x290] sm:$0xff] }
 0x2d5   : > { %2252 = vmatpush.msra.mxu2 %v2012_v11  ;;  %2272 = vmatpush.msra.mxu3 %v2108_v31  ;;  %v2115_v29 = vld [vmem:[#allocation17 + $0x590] sm:$0xff]  ;;  %v2020_v11 = vld [vmem:[#allocation17 + $0x298] sm:$0xff] }
 0x2d6   : > { %2213 = vmatpush.msra.mxu0 %v2005_v32  ;;  %2233 = vmatpush.msra.mxu1 %v2101_v33  ;;  %v2116_v31 = vld [vmem:[#allocation17 + $0x598] sm:$0xff]  ;;  %v2013_v32 = vld [vmem:[#allocation17 + $0x260] sm:$0xff] }
 0x2d7   : > { %2253 = vmatpush.msra.mxu2 %v2006_v34  ;;  %2273 = vmatpush.msra.mxu3 %v2102_v35  ;;  %v2109_v33 = vld [vmem:[#allocation17 + $0x560] sm:$0xff]  ;;  %v2014_v34 = vld [vmem:[#allocation17 + $0x268] sm:$0xff] }
 0x2d8   : > { %2214 = vmatpush.msra.mxu0 %v1999_v63  ;;  %2234 = vmatpush.msra.mxu1 %v2095_v37  ;;  %v2110_v35 = vld [vmem:[#allocation17 + $0x568] sm:$0xff]  ;;  %v2007_v63 = vld [vmem:[#allocation17 + $0x230] sm:$0xff] }
 0x2d9   : > { %2254 = vmatpush.msra.mxu2 %v2000_v38  ;;  %2274 = vmatpush.msra.mxu3 %v2096_v39  ;;  %v2103_v37 = vld [vmem:[#allocation17 + $0x530] sm:$0xff]  ;;  %v2008_v38 = vld [vmem:[#allocation17 + $0x238] sm:$0xff] }
 0x2da   : > { %2215 = vmatpush.msra.mxu0 %v1993_v20  ;;  %2235 = vmatpush.msra.mxu1 %v2089_v30  ;;  %v2104_v39 = vld [vmem:[#allocation17 + $0x538] sm:$0xff]  ;;  %v2001_v20 = vld [vmem:[#allocation17 + $0x200] sm:$0xff] }
 0x2db   : > { %2255 = vmatpush.msra.mxu2 %v1994_v40  ;;  %2275 = vmatpush.msra.mxu3 %v2090_v41  ;;  %v2097_v30 = vld [vmem:[#allocation17 + $0x500] sm:$0xff]  ;;  %v2002_v40 = vld [vmem:[#allocation17 + $0x208] sm:$0xff] }
 0x2dc   : > { %2216 = vmatpush.msra.mxu0 %v1987_v42  ;;  %2236 = vmatpush.msra.mxu1 %v2083_v43  ;;  %v2098_v41 = vld [vmem:[#allocation17 + $0x508] sm:$0xff]  ;;  %v1995_v42 = vld [vmem:[#allocation17 + $0x1d0] sm:$0xff] }
 0x2dd   : > { %2256 = vmatpush.msra.mxu2 %v1988_v44  ;;  %2276 = vmatpush.msra.mxu3 %v2084_v47  ;;  %v2091_v43 = vld [vmem:[#allocation17 + $0x4d0] sm:$0xff]  ;;  %v1996_v44 = vld [vmem:[#allocation17 + $0x1d8] sm:$0xff] }
 0x2de   : > { %2217 = vmatpush.msra.mxu0 %v1981_v18  ;;  %2237 = vmatpush.msra.mxu1 %v2077_v48  ;;  %v2092_v47 = vld [vmem:[#allocation17 + $0x4d8] sm:$0xff]  ;;  %v1989_v18 = vld [vmem:[#allocation17 + $0x1a0] sm:$0xff] }
 0x2df   : > { %2257 = vmatpush.msra.mxu2 %v1982_v36  ;;  %2277 = vmatpush.msra.mxu3 %v2078_v49  ;;  %v2085_v48 = vld [vmem:[#allocation17 + $0x4a0] sm:$0xff]  ;;  %v1990_v36 = vld [vmem:[#allocation17 + $0x1a8] sm:$0xff] }
 0x2e0   : > { %2218 = vmatpush.msra.mxu0 %v1975_v1  ;;  %2238 = vmatpush.msra.mxu1 %v2071_v5  ;;  %v2086_v49 = vld [vmem:[#allocation17 + $0x4a8] sm:$0xff]  ;;  %v1983_v1 = vld [vmem:[#allocation17 + $0x170] sm:$0xff] }
 0x2e1   : > { %2258 = vmatpush.msra.mxu2 %v1976_v50  ;;  %2278 = vmatpush.msra.mxu3 %v2072_v52  ;;  %v2079_v5 = vld [vmem:[#allocation17 + $0x470] sm:$0xff]  ;;  %v1984_v50 = vld [vmem:[#allocation17 + $0x178] sm:$0xff] }
 0x2e2   : > { %2219 = vmatpush.msra.mxu0 %v1969_v7  ;;  %2239 = vmatpush.msra.mxu1 %v2065_v51  ;;  %v2080_v52 = vld [vmem:[#allocation17 + $0x478] sm:$0xff]  ;;  %v1977_v7 = vld [vmem:[#allocation17 + $0x140] sm:$0xff] }
 0x2e3   : > { %2259 = vmatpush.msra.mxu2 %v1970_v53  ;;  %2279 = vmatpush.msra.mxu3 %v2066_v54  ;;  %v2073_v51 = vld [vmem:[#allocation17 + $0x440] sm:$0xff]  ;;  %v1978_v53 = vld [vmem:[#allocation17 + $0x148] sm:$0xff] }
 0x2e4   : > { %2220 = vmatpush.msra.mxu0 %v1963_v16  ;;  %2240 = vmatpush.msra.mxu1 %v2059_v57  ;;  %v2074_v54 = vld [vmem:[#allocation17 + $0x448] sm:$0xff]  ;;  %v1971_v16 = vld [vmem:[#allocation17 + $0x110] sm:$0xff] }
 0x2e5   : > { %2260 = vmatpush.msra.mxu2 %v1964_v58  ;;  %2280 = vmatpush.msra.mxu3 %v2060_v59  ;;  %v2067_v57 = vld [vmem:[#allocation17 + $0x410] sm:$0xff]  ;;  %v1972_v58 = vld [vmem:[#allocation17 + $0x118] sm:$0xff] }
 0x2e6   : > { %2221 = vmatpush.msra.mxu0 %v1957_v60  ;;  %2241 = vmatpush.msra.mxu1 %v2053_v3  ;;  %v2068_v59 = vld [vmem:[#allocation17 + $0x418] sm:$0xff]  ;;  %v1965_v60 = vld [vmem:[#allocation17 + $0xe0] sm:$0xff] }
 0x2e7   : > { %2261 = vmatpush.msra.mxu2 %v1958_v12  ;;  %2281 = vmatpush.msra.mxu3 %v2054_v61  ;;  %v2061_v3 = vld [vmem:[#allocation17 + $0x3e0] sm:$0xff]  ;;  %v1966_v12 = vld [vmem:[#allocation17 + $0xe8] sm:$0xff] }
 0x2e8   : > { %2222 = vmatpush.msra.mxu0 %v1951_v13  ;;  %2242 = vmatpush.msra.mxu1 %v2047_v62  ;;  %v2062_v61 = vld [vmem:[#allocation17 + $0x3e8] sm:$0xff]  ;;  %v1959_v13 = vld [vmem:[#allocation17 + $0xb0] sm:$0xff] }
 0x2e9   : > { %2262 = vmatpush.msra.mxu2 %v1952_v0  ;;  %2282 = vmatpush.msra.mxu3 %v2048_v6  ;;  %v2055_v62 = vld [vmem:[#allocation17 + $0x3b0] sm:$0xff]  ;;  %v1960_v0 = vld [vmem:[#allocation17 + $0xb8] sm:$0xff] }
 0x2ea   : > { %2223 = vmatpush.msra.mxu0 %v1945_v10  ;;  %2243 = vmatpush.msra.mxu1 %v2041_v9  ;;  %v2056_v6 = vld [vmem:[#allocation17 + $0x3b8] sm:$0xff]  ;;  %v1953_v10 = vld [vmem:[#allocation17 + $0x80] sm:$0xff] }
 0x2eb   : > { %2263 = vmatpush.msra.mxu2 %v1946_v2  ;;  %2283 = vmatpush.msra.mxu3 %v2042_v15  ;;  %v2049_v9 = vld [vmem:[#allocation17 + $0x380] sm:$0xff]  ;;  %v1954_v2 = vld [vmem:[#allocation17 + $0x88] sm:$0xff] }
 0x2ec   : > { %2224 = vmatpush.msra.mxu0 %v1939_v4  ;;  %2244 = vmatpush.msra.mxu1 %v2035_v55  ;;  %v2050_v15 = vld [vmem:[#allocation17 + $0x388] sm:$0xff]  ;;  %v1947_v4 = vld [vmem:[#allocation17 + $0x50] sm:$0xff] }
 0x2ed   : > { %2264 = vmatpush.msra.mxu2 %v1940_v17  ;;  %2284 = vmatpush.msra.mxu3 %v2036_v56  ;;  %v2043_v55 = vld [vmem:[#allocation17 + $0x350] sm:$0xff]  ;;  %v1948_v17 = vld [vmem:[#allocation17 + $0x58] sm:$0xff] }
 0x2ee   : > { %2225 = vmatmul.f32.vlgmr.msra.gmra.mxu0 %v6760_v14  ;;  %2245 = vmatmul.f32.vlgmr.msra.gmra.mxu1 %v6762_v8  ;;  %v2044_v56 = vld [vmem:[#allocation17 + $0x358] sm:$0xff] }
 0x2ef   : > { %2265 = vmatmul.f32.vlgmr.msra.gmra.mxu2 %v6760_v14  ;;  %2285 = vmatmul.f32.vlgmr.msra.gmra.mxu3 %v6762_v8 }
 0x2f0   : > { %2289 = vmatpush.msrb.mxu0 %v2031_v19  ;;  %2309 = vmatpush.msrb.mxu1 %v2127_v21  ;;  %v1941_v19 = vld [vmem:[#allocation17 + $0x20] sm:$0xff] }
 0x2f1   : > { %2329 = vmatpush.msrb.mxu2 %v2032_v22  ;;  %2349 = vmatpush.msrb.mxu3 %v2128_v23  ;;  %v2037_v21 = vld [vmem:[#allocation17 + $0x320] sm:$0xff]  ;;  %v1942_v22 = vld [vmem:[#allocation17 + $0x28] sm:$0xff] }
 0x2f2   : > { %2290 = vmatpush.msrb.mxu0 %v2025_v24  ;;  %2310 = vmatpush.msrb.mxu1 %v2121_v25  ;;  %v2038_v23 = vld [vmem:[#allocation17 + $0x328] sm:$0xff] }
 0x2f3   : > { %2330 = vmatpush.msrb.mxu2 %v2026_v26  ;;  %2350 = vmatpush.msrb.mxu3 %v2122_v27 }
 0x2f4   : > { %2291 = vmatpush.msrb.mxu0 %v2019_v28  ;;  %2311 = vmatpush.msrb.mxu1 %v2115_v29 }
 0x2f5   : > { %2331 = vmatpush.msrb.mxu2 %v2020_v11  ;;  %2351 = vmatpush.msrb.mxu3 %v2116_v31 }
 0x2f6   : > { %2292 = vmatpush.msrb.mxu0 %v2013_v32  ;;  %2312 = vmatpush.msrb.mxu1 %v2109_v33 }
 0x2f7   : > { %2332 = vmatpush.msrb.mxu2 %v2014_v34  ;;  %2352 = vmatpush.msrb.mxu3 %v2110_v35 }
 0x2f8   : > { %2293 = vmatpush.msrb.mxu0 %v2007_v63  ;;  %2313 = vmatpush.msrb.mxu1 %v2103_v37 }
 0x2f9   : > { %2333 = vmatpush.msrb.mxu2 %v2008_v38  ;;  %2353 = vmatpush.msrb.mxu3 %v2104_v39  ;;  %v2391_v38 = vld [vmem:[#allocation20] sm:$0xf] }
 0x2fa   : > { %2294 = vmatpush.msrb.mxu0 %v2001_v20  ;;  %2314 = vmatpush.msrb.mxu1 %v2097_v30 }
 0x2fb   : > { %2334 = vmatpush.msrb.mxu2 %v2002_v40  ;;  %2354 = vmatpush.msrb.mxu3 %v2098_v41  ;;  %v2371_v41 = vld [vmem:[#allocation16] sm:$0x3] }
 0x2fc   : > { %2295 = vmatpush.msrb.mxu0 %v1995_v42  ;;  %2315 = vmatpush.msrb.mxu1 %v2091_v43 }
 0x2fd   : > { %2335 = vmatpush.msrb.mxu2 %v1996_v44  ;;  %2355 = vmatpush.msrb.mxu3 %v2092_v47  ;;  %v2393_v44 = vperm.slane %v2391_v38, 0 }
 0x2fe   : > { %2296 = vmatpush.msrb.mxu0 %v1989_v18  ;;  %2316 = vmatpush.msrb.mxu1 %v2085_v48  ;;  %v2373_v48 = vperm.slane %v2371_v41, 0 }
 0x2ff   : > { %2336 = vmatpush.msrb.mxu2 %v1990_v36  ;;  %2356 = vmatpush.msrb.mxu3 %v2086_v49 }
 0x300   : > { %2297 = vmatpush.msrb.mxu0 %v1983_v1  ;;  %2317 = vmatpush.msrb.mxu1 %v2079_v5 }
 0x301   : > { %2337 = vmatpush.msrb.mxu2 %v1984_v50  ;;  %2357 = vmatpush.msrb.mxu3 %v2080_v52 }
 0x302   : > { %2298 = vmatpush.msrb.mxu0 %v1977_v7  ;;  %2318 = vmatpush.msrb.mxu1 %v2073_v51  ;;  %v2394_v7 = vperm.slane %v2391_v38, 1  ;;  %v2379_v51 = vld [vmem:[#allocation19] sm:$0x3] }
 0x303   : > { %2338 = vmatpush.msrb.mxu2 %v1978_v53  ;;  %2358 = vmatpush.msrb.mxu3 %v2074_v54  ;;  %v1714_v24 = vpop.f32.mrf.mxu0  ;;  %v1734_v25 = vpop.f32.mrf.mxu1 }
 0x304   : > { %2299 = vmatpush.msrb.mxu0 %v1971_v16  ;;  %2319 = vmatpush.msrb.mxu1 %v2067_v57  ;;  %v1735_v18 = vadd.f32 %v1734_v25, %v1714_v24  ;;  %v2374_v16 = vperm.slane %v2371_v41, 1  ;;  %v2647_v41 = vld [vmem:[#allocation23 + $0xf8] sm:$0xff] }
 0x305   : > { %2339 = vmatpush.msrb.mxu2 %v1972_v58  ;;  %2359 = vmatpush.msrb.mxu3 %v2068_v59  ;;  %v2381_v59 = vperm.slane %v2379_v51, 0 }
 0x306   : > { %2300 = vmatpush.msrb.mxu0 %v1965_v60  ;;  %2320 = vmatpush.msrb.mxu1 %v2061_v3  ;;  %v2377_v5 = vadd.f32 %v2373_v48, %v1735_v18  ;;  %v2677_v18 = vld [vmem:[#allocation23 + $0x1e8] sm:$0xff]  ;;  %v2642_v48 = vld [vmem:[#allocation23 + $0xd0] sm:$0xff] }
 0x307   : > { %2340 = vmatpush.msrb.mxu2 %v1966_v12  ;;  %2360 = vmatpush.msrb.mxu3 %v2062_v61  ;;  %v2382_v61 = vperm.slane %v2379_v51, 1  ;;  %v2673_v51 = vld [vmem:[#allocation23 + $0x1c8] sm:$0xff] }
 0x308   : > { %2301 = vmatpush.msrb.mxu0 %v1959_v13  ;;  %2321 = vmatpush.msrb.mxu1 %v2055_v62 }
 0x309   : > { %2341 = vmatpush.msrb.mxu2 %v1960_v0  ;;  %2361 = vmatpush.msrb.mxu3 %v2056_v6 }
 0x30a   : > { %2302 = vmatpush.msrb.mxu0 %v1953_v10  ;;  %2322 = vmatpush.msrb.mxu1 %v2049_v9  ;;  %v1754_v26 = vpop.f32.mrf.mxu2  ;;  %v1774_v27 = vpop.f32.mrf.mxu3  ;;  %v2395_v9 = vperm.slane %v2391_v38, 2 }
 0x30b   : > { %2342 = vmatpush.msrb.mxu2 %v1954_v2  ;;  %2362 = vmatpush.msrb.mxu3 %v2050_v15  ;;  %v1775_v54 = vadd.f32 %v1774_v27, %v1754_v26 }
 0x30c   : > { %2303 = vmatpush.msrb.mxu0 %v1947_v4  ;;  %2323 = vmatpush.msrb.mxu1 %v2043_v55 }
 0x30d   : > { %2343 = vmatpush.msrb.mxu2 %v1948_v17  ;;  %2363 = vmatpush.msrb.mxu3 %v2044_v56  ;;  %v1794_v28 = vpop.f32.mrf.mxu0  ;;  %v1814_v29 = vpop.f32.mrf.mxu1  ;;  %v2378_v60 = vadd.f32 %v2374_v16, %v1775_v54  ;;  %v2670_v54 = vld [vmem:[#allocation23 + $0x1b0] sm:$0xff]  ;;  %v2639_v16 = vld [vmem:[#allocation23 + $0xb8] sm:$0xff] }
 0x30e   : > { %2304 = vmatpush.msrb.mxu0 %v1941_v19  ;;  %2324 = vmatpush.msrb.mxu1 %v2037_v21  ;;  %v1815_v42 = vadd.f32 %v1814_v29, %v1794_v28  ;;  %v2396_v19 = vperm.slane %v2391_v38, 3 }
 0x30f   : > { %2344 = vmatpush.msrb.mxu2 %v1942_v22  ;;  %2364 = vmatpush.msrb.mxu3 %v2038_v23 }
 0x310   : > { %2305 = vmatmul.f32.vlgmr.msrb.gmra.mxu0 %v6760_v14  ;;  %2325 = vmatmul.f32.vlgmr.msrb.gmra.mxu1 %v6762_v8 }
 0x311   : > { %2345 = vmatmul.f32.vlgmr.msrb.gmra.mxu2 %v6760_v14  ;;  %2365 = vmatmul.f32.vlgmr.msrb.gmra.mxu3 %v6762_v8 }
 0x314   : > { %v1834_v11 = vpop.f32.mrf.mxu2  ;;  %v1854_v31 = vpop.f32.mrf.mxu3 }
 0x315   : > { %v1855_v50 = vadd.f32 %v1854_v31, %v1834_v11 }
 0x327   : > { %v1874_v32 = vpop.f32.mrf.mxu0  ;;  %v1894_v33 = vpop.f32.mrf.mxu1 }
 0x328   : > { %v1895_v6 = vadd.f32 %v1894_v33, %v1874_v32 }
 0x32e   : > { %v1914_v34 = vpop.f32.mrf.mxu2  ;;  %v1934_v35 = vpop.f32.mrf.mxu3 }
 0x32f   : > { %v1935_v17 = vadd.f32 %v1934_v35, %v1914_v34 }
 0x349   : > { %v2146_v63 = vpop.f32.mrf.mxu0  ;;  %v2166_v37 = vpop.f32.mrf.mxu1 }
 0x34a   : > { %v2167_v57 = vadd.f32 %v2166_v37, %v2146_v63 }
 0x34c   : > { %v2385_v3 = vadd.f32 %v2381_v59, %v2167_v57  ;;  %v2671_v57 = vld [vmem:[#allocation23 + $0x1b8] sm:$0xff]  ;;  %v2668_v59 = vld [vmem:[#allocation23 + $0x1a0] sm:$0xff] }
 0x350   : > { %v2186_v39 = vpop.f32.mrf.mxu2  ;;  %v2206_v20 = vpop.f32.mrf.mxu3 }
 0x351   : > { %v2207_v12 = vadd.f32 %v2206_v20, %v2186_v39 }
 0x353   : > { %v2386_v13 = vadd.f32 %v2382_v61, %v2207_v12  ;;  %v2634_v12 = vld [vmem:[#allocation23 + $0x90] sm:$0xff] }
 0x354   : > { %v2666_v61 = vld [vmem:[#allocation23 + $0x190] sm:$0xff] }
 0x36b   : > { %v2226_v30 = vpop.f32.mrf.mxu0  ;;  %v2246_v40 = vpop.f32.mrf.mxu1 }
 0x36c   : > { %v2247_v43 = vadd.f32 %v2246_v40, %v2226_v30  ;;  %v2646_v30 = vld [vmem:[#allocation23 + $0xf0] sm:$0xff] }
 0x36d   : > { %v2678_v40 = vld [vmem:[#allocation23 + $0x1f0] sm:$0xff] }
 0x36e   : > { %v2387_v47 = vadd.f32 %v2247_v43, %v1815_v42  ;;  %v2679_v42 = vld [vmem:[#allocation23 + $0x1f8] sm:$0xff]  ;;  %v2644_v43 = vld [vmem:[#allocation23 + $0xe0] sm:$0xff] }
 0x370   : > { %v2401_v36 = vadd.f32 %v2393_v44, %v2387_v47  ;;  %v2676_v44 = vld [vmem:[#allocation23 + $0x1e0] sm:$0xff]  ;;  %v2645_v47 = vld [vmem:[#allocation23 + $0xe8] sm:$0xff] }
 0x372   : > { %v2266_v49 = vpop.f32.mrf.mxu2  ;;  %v2286_v1 = vpop.f32.mrf.mxu3  ;;  %2420 = vmatpush.xpose.msra.mxu0 %v2401_v36  ;;  %v2674_v36 = vld [vmem:[#allocation23 + $0x1d0] sm:$0xff] }
 0x373   : > { %v2287_v52 = vadd.f32 %v2286_v1, %v2266_v49  ;;  %v2643_v49 = vld [vmem:[#allocation23 + $0xd8] sm:$0xff] }
 0x374   : > { %v2675_v1 = vld [vmem:[#allocation23 + $0x1d8] sm:$0xff] }
 0x375   : > { %v2388_v53 = vadd.f32 %v2287_v52, %v1855_v50  ;;  %2421 = vmatmul.f32.vlgmr.msra.gmra.mxu0 %v2377_v5  ;;  %v2640_v50 = vld [vmem:[#allocation23 + $0xc0] sm:$0xff] }
 0x376   : > { %2680 = vmatpush.msrb.mxu0 %v2646_v30  ;;  %v2672_v52 = vld [vmem:[#allocation23 + $0x1c0] sm:$0xff] }
 0x377   : > { %v2402_v58 = vadd.f32 %v2394_v7, %v2388_v53  ;;  %v2641_v7 = vld [vmem:[#allocation23 + $0xc8] sm:$0xff]  ;;  %v2638_v53 = vld [vmem:[#allocation23 + $0xb0] sm:$0xff]  ;;  %v2656_v30 = vld [vmem:[#allocation23 + $0x140] sm:$0xff] }
 0x378   : > { %2681 = vmatpush.msrb.mxu0 %v2644_v43  ;;  %v2625_v43 = vld [vmem:[#allocation23 + $0x48] sm:$0xff] }
 0x379   : > { %2443 = vmatpush.xpose.msra.mxu1 %v2402_v58  ;;  %v2636_v58 = vld [vmem:[#allocation23 + $0xa0] sm:$0xff] }
 0x37a   : > { %2682 = vmatpush.msrb.mxu0 %v2642_v48  ;;  %v2654_v48 = vld [vmem:[#allocation23 + $0x130] sm:$0xff] }
 0x37c   : > { %2444 = vmatmul.f32.vlgmr.msra.gmra.mxu1 %v2378_v60  ;;  %2683 = vmatpush.msrb.mxu0 %v2640_v50  ;;  %v2637_v60 = vld [vmem:[#allocation23 + $0xa8] sm:$0xff]  ;;  %v2652_v50 = vld [vmem:[#allocation23 + $0x120] sm:$0xff] }
 0x37d   : > { %2424 = vmatmul.f32.gmra.mxu0 %v2385_v3  ;;  %2700 = vmatpush.msrb.mxu1 %v2678_v40  ;;  %v2669_v3 = vld [vmem:[#allocation23 + $0x1a8] sm:$0xff] }
 0x37e   : > { %2684 = vmatpush.msrb.mxu0 %v2638_v53 }
 0x37f   : > { %2701 = vmatpush.msrb.mxu1 %v2676_v44  ;;  %v2657_v44 = vld [vmem:[#allocation23 + $0x148] sm:$0xff] }
 0x380   : > { %2685 = vmatpush.msrb.mxu0 %v2636_v58  ;;  %v2619_v58 = vld [vmem:[#allocation23 + $0x18] sm:$0xff] }
 0x381   : > { %2702 = vmatpush.msrb.mxu1 %v2674_v36 }
 0x382   : > { %2686 = vmatpush.msrb.mxu0 %v2634_v12  ;;  %v2616_v12 = vld [vmem:[#allocation23] sm:$0xff] }
 0x383   : > { %2703 = vmatpush.msrb.mxu1 %v2672_v52 }
 0x384   : > { %2447 = vmatmul.f32.gmra.mxu1 %v2386_v13 }
 0x385   : > { %2704 = vmatpush.msrb.mxu1 %v2670_v54  ;;  %v2618_v54 = vld [vmem:[#allocation23 + $0x10] sm:$0xff] }
 0x387   : > { %2705 = vmatpush.msrb.mxu1 %v2668_v59  ;;  %v2651_v59 = vld [vmem:[#allocation23 + $0x118] sm:$0xff] }
 0x389   : > { %2706 = vmatpush.msrb.mxu1 %v2666_v61  ;;  %v2648_v61 = vld [vmem:[#allocation23 + $0x100] sm:$0xff] }
 0x38d   : > { %v2306_v62 = vpop.f32.mrf.mxu0  ;;  %v2326_v0 = vpop.f32.mrf.mxu1 }
 0x38e   : > { %v2327_v10 = vadd.f32 %v2326_v0, %v2306_v62  ;;  %v2635_v62 = vld [vmem:[#allocation23 + $0x98] sm:$0xff] }
 0x38f   : > { %v2667_v0 = vld [vmem:[#allocation23 + $0x198] sm:$0xff] }
 0x390   : > { %v2389_v2 = vadd.f32 %v2327_v10, %v1895_v6 }
 0x392   : > { %v2403_v15 = vadd.f32 %v2395_v9, %v2389_v2  ;;  %v2632_v9 = vld [vmem:[#allocation23 + $0x80] sm:$0xff] }
 0x393   : > { %v2664_v2 = vld [vmem:[#allocation23 + $0x180] sm:$0xff]  ;;  %2687 = vmatpush.msrb.mxu0 %v2632_v9  ;;  %v2615_v9 = vld [vmem:[#allocation22 + $0x1f8] sm:$0xff] }
 0x394   : > { %v2346_v4 = vpop.f32.mrf.mxu2  ;;  %v2366_v55 = vpop.f32.mrf.mxu3  ;;  %2521 = vmatpush.msra.mxu2 %v2403_v15  ;;  %v2633_v15 = vld [vmem:[#allocation23 + $0x88] sm:$0xff]  ;;  %2707 = vmatpush.msrb.mxu1 %v2664_v2  ;;  %v2612_v2 = vld [vmem:[#allocation22 + $0x1e0] sm:$0xff] }
 0x395   : > { %v2367_v56 = vadd.f32 %v2366_v55, %v2346_v4  ;;  %v2665_v4 = vld [vmem:[#allocation23 + $0x188] sm:$0xff] }
 0x396   : > { %2720 = vmatpush.msrb.mxu2 %v2647_v41 }
 0x397   : > { %v2390_v21 = vadd.f32 %v2367_v56, %v1935_v17  ;;  %v2630_v17 = vld [vmem:[#allocation23 + $0x70] sm:$0xff] }
 0x398   : > { %2721 = vmatpush.msrb.mxu2 %v2645_v47  ;;  %v2662_v56 = vld [vmem:[#allocation23 + $0x170] sm:$0xff]  ;;  %2688 = vmatpush.msrb.mxu0 %v2630_v17 }
 0x399   : > { %v2404_v22 = vadd.f32 %v2396_v19, %v2390_v21  ;;  %v2631_v21 = vld [vmem:[#allocation23 + $0x78] sm:$0xff]  ;;  %2708 = vmatpush.msrb.mxu1 %v2662_v56  ;;  %v2610_v17 = vld [vmem:[#allocation22 + $0x1d0] sm:$0xff] }
 0x39a   : > { %2722 = vmatpush.msrb.mxu2 %v2643_v49  ;;  %v2579_v56 = vld [vmem:[#allocation22 + $0xd8] sm:$0xff] }
 0x39b   : > { %2544 = vmatpush.msra.mxu3 %v2404_v22  ;;  %v2663_v22 = vld [vmem:[#allocation23 + $0x178] sm:$0xff] }
 0x39c   : > { %2723 = vmatpush.msrb.mxu2 %v2641_v7  ;;  %v2621_v7 = vld [vmem:[#allocation23 + $0x28] sm:$0xff] }
 0x39d   : > { %2740 = vmatpush.msrb.mxu3 %v2679_v42 }
 0x39e   : > { %2724 = vmatpush.msrb.mxu2 %v2639_v16  ;;  %v2650_v16 = vld [vmem:[#allocation23 + $0x110] sm:$0xff] }
 0x39f   : > { %2741 = vmatpush.msrb.mxu3 %v2677_v18  ;;  %v2622_v18 = vld [vmem:[#allocation23 + $0x30] sm:$0xff] }
 0x3a0   : > { %2725 = vmatpush.msrb.mxu2 %v2637_v60 }
 0x3a1   : > { %2742 = vmatpush.msrb.mxu3 %v2675_v1  ;;  %v2655_v1 = vld [vmem:[#allocation23 + $0x138] sm:$0xff] }
 0x3a2   : > { %2726 = vmatpush.msrb.mxu2 %v2635_v62  ;;  %v2649_v62 = vld [vmem:[#allocation23 + $0x108] sm:$0xff] }
 0x3a3   : > { %2743 = vmatpush.msrb.mxu3 %v2673_v51  ;;  %v2653_v51 = vld [vmem:[#allocation23 + $0x128] sm:$0xff] }
 0x3a4   : > { %2727 = vmatpush.msrb.mxu2 %v2633_v15  ;;  %v2581_v15 = vld [vmem:[#allocation22 + $0xe8] sm:$0xff] }
 0x3a5   : > { %2744 = vmatpush.msrb.mxu3 %v2671_v57 }
 0x3a6   : > { %2728 = vmatpush.msrb.mxu2 %v2631_v21  ;;  %v2576_v21 = vld [vmem:[#allocation22 + $0xc0] sm:$0xff] }
 0x3a7   : > { %2745 = vmatpush.msrb.mxu3 %v2669_v3 }
 0x3a9   : > { %2746 = vmatpush.msrb.mxu3 %v2667_v0  ;;  %v2582_v0 = vld [vmem:[#allocation22 + $0xf0] sm:$0xff] }
 0x3ab   : > { %2747 = vmatpush.msrb.mxu3 %v2665_v4  ;;  %v2613_v4 = vld [vmem:[#allocation22 + $0x1e8] sm:$0xff] }
 0x3ad   : > { %2748 = vmatpush.msrb.mxu3 %v2663_v22  ;;  %v2608_v22 = vld [vmem:[#allocation22 + $0x1c0] sm:$0xff] }
 0x3f2   : > { %v2422_v23 = vpop.f32.mrf.mxu0 }
 0x3f9   : > { %v2445_v24 = vpop.f32.mrf.mxu1 }
 0x3fa   : > { %v2446_v25 = vadd.f32 %v2445_v24, %v2422_v23  ;;  %v2425_v27 = vpop.f32.mrf.mxu0 }
 0x3fc   : > { %v2452_v26 = vsel %vm2451_vm7, %v2446_v25, -inf }
 0x3fd   : > { %2453 = vmax.xlane.f32.xlu2 %v2452_v26  ;;  %v2660_v26 = vld [vmem:[#allocation23 + $0x160] sm:$0xff] }
 0x3fe   : > { %2709 = vmatpush.msrb.mxu1 %v2660_v26  ;;  %v2606_v26 = vld [vmem:[#allocation22 + $0x1b0] sm:$0xff] }
 0x401   : > { %v2448_v28 = vpop.f32.mrf.mxu1 }
 0x402   : > { %v2449_v29 = vadd.f32 %v2448_v28, %v2425_v27  ;;  %v2629_v27 = vld [vmem:[#allocation23 + $0x68] sm:$0xff] }
 0x403   : > { %v2661_v28 = vld [vmem:[#allocation23 + $0x168] sm:$0xff]  ;;  %2729 = vmatpush.msrb.mxu2 %v2629_v27  ;;  %v2575_v27 = vld [vmem:[#allocation22 + $0xb8] sm:$0xff] }
 0x404   : > { %v2455_v11 = vsel %vm2451_vm7, %v2449_v29, -inf  ;;  %2749 = vmatpush.msrb.mxu3 %v2661_v28  ;;  %v2607_v28 = vld [vmem:[#allocation22 + $0x1b8] sm:$0xff] }
 0x405   : > { %2456 = vmax.xlane.f32.xlu2 %v2455_v11  ;;  %v2626_v11 = vld [vmem:[#allocation23 + $0x50] sm:$0xff] }
 0x470   : > { %v2454_v31 = vpop.xlane.xlu2 %2453 }
 0x471   : > { %v2458_v32 = vsub.f32 %v2446_v25, %v2454_v31  ;;  %v2628_v25 = vld [vmem:[#allocation23 + $0x60] sm:$0xff]  ;;  %v2658_v31 = vld [vmem:[#allocation23 + $0x150] sm:$0xff] }
 0x472   : > { %2689 = vmatpush.msrb.mxu0 %v2628_v25  ;;  %2710 = vmatpush.msrb.mxu1 %v2658_v31  ;;  %v2574_v25 = vld [vmem:[#allocation22 + $0xb0] sm:$0xff]  ;;  %v2573_v31 = vld [vmem:[#allocation22 + $0xa8] sm:$0xff] }
 0x473   : > { %v2460_v33 = vmul.f32 1.442695, %v2458_v32 }
 0x474   : > { %2690 = vmatpush.msrb.mxu0 %v2626_v11  ;;  %2711 = vmatpush.msrb.mxu1 %v2656_v30  ;;  %v2604_v11 = vld [vmem:[#allocation22 + $0x1a0] sm:$0xff]  ;;  %v2569_v30 = vld [vmem:[#allocation22 + $0x88] sm:$0xff] }
 0x475   : > { %5500 = vpow2.f32 %v2460_v33 }
 0x476   : > { %2712 = vmatpush.msrb.mxu1 %v2654_v48  ;;  %v2565_v48 = vld [vmem:[#allocation22 + $0x68] sm:$0xff] }
 0x478   : > { %v2457_v34 = vpop.xlane.xlu2 %2456  ;;  %2713 = vmatpush.msrb.mxu1 %v2652_v50  ;;  %v2560_v50 = vld [vmem:[#allocation22 + $0x40] sm:$0xff] }
 0x479   : > { %v2459_v35 = vsub.f32 %v2449_v29, %v2457_v34  ;;  %v2627_v34 = vld [vmem:[#allocation23 + $0x58] sm:$0xff] }
 0x47a   : > { %2730 = vmatpush.msrb.mxu2 %v2627_v34  ;;  %2714 = vmatpush.msrb.mxu1 %v2650_v16  ;;  %v2602_v34 = vld [vmem:[#allocation22 + $0x190] sm:$0xff]  ;;  %v2559_v16 = vld [vmem:[#allocation22 + $0x38] sm:$0xff] }
 0x47b   : > { %v6778_v63 = vpop.eup %5500  ;;  %v2462_v37 = vmul.f32 1.442695, %v2459_v35  ;;  %v2659_v35 = vld [vmem:[#allocation23 + $0x158] sm:$0xff] }
 0x47c   : > { %v2464_v38 = vsel %vm2451_vm7, %v6778_v63, 0.0  ;;  %2750 = vmatpush.msrb.mxu3 %v2659_v35  ;;  %2731 = vmatpush.msrb.mxu2 %v2625_v43  ;;  %v2571_v35 = vld [vmem:[#allocation22 + $0x98] sm:$0xff] }
 0x47d   : > { %5502 = vpow2.f32 %v2462_v37  ;;  %2465 = vadd.xlane.f32.xlu0 %v2464_v38  ;;  %2715 = vmatpush.msrb.mxu1 %v2648_v61  ;;  %v2567_v43 = vld [vmem:[#allocation22 + $0x78] sm:$0xff]  ;;  %v2586_v61 = vld [vmem:[#allocation22 + $0x110] sm:$0xff] }
 0x47e   : > { %2751 = vmatpush.msrb.mxu3 %v2657_v44  ;;  %v2599_v44 = vld [vmem:[#allocation22 + $0x178] sm:$0xff] }
 0x480   : > { %2752 = vmatpush.msrb.mxu3 %v2655_v1  ;;  %v2563_v1 = vld [vmem:[#allocation22 + $0x58] sm:$0xff] }
 0x482   : > { %2753 = vmatpush.msrb.mxu3 %v2653_v51  ;;  %v2593_v51 = vld [vmem:[#allocation22 + $0x148] sm:$0xff] }
 0x483   : > { %v6782_v39 = vpop.eup %5502 }
 0x484   : > { %v2467_v20 = vsel %vm2451_vm7, %v6782_v39, 0.0  ;;  %2754 = vmatpush.msrb.mxu3 %v2651_v59  ;;  %v2588_v59 = vld [vmem:[#allocation22 + $0x120] sm:$0xff] }
 0x485   : > { %2468 = vadd.xlane.f32.xlu1 %v2467_v20  ;;  %v2624_v20 = vld [vmem:[#allocation23 + $0x40] sm:$0xff] }
 0x486   : > { %2691 = vmatpush.msrb.mxu0 %v2624_v20  ;;  %2755 = vmatpush.msrb.mxu3 %v2649_v62  ;;  %v2600_v20 = vld [vmem:[#allocation22 + $0x180] sm:$0xff]  ;;  %v2587_v62 = vld [vmem:[#allocation22 + $0x118] sm:$0xff] }
 0x488   : > { %2692 = vmatpush.msrb.mxu0 %v2622_v18  ;;  %v2596_v18 = vld [vmem:[#allocation22 + $0x160] sm:$0xff] }
 0x4f0   : > { %v6786_v5 = vpop.xlane.xlu0 %2465 }
 0x4f1   : > { %5504 = vrcp.f32 %v6786_v5  ;;  %v2481_v19 = vand.u32 2147483648, %v6786_v5  ;;  %v2479_v24 = vand.u32 2147483647, %v6786_v5  ;;  %vm2475_vm9 = vweird.f32 %v6786_v5 }
 0x4f3   : > { %v2482_v33 = vor.u32 1.1754944e-38, %v2481_v19  ;;  %vm2480_vm11 = vcmp.eq.f32.partialorder %v2479_v24, 8.507059e+37  ;;  %v2611_v19 = vld [vmem:[#allocation22 + $0x1d8] sm:$0xff]  ;;  %v2609_v24 = vld [vmem:[#allocation22 + $0x1c8] sm:$0xff] }
 0x4f7   : > { %v5505_v13 = vpop.eup %5504 }
 0x4f8   : > { %v2471_v6 = vmul.f32 %v5505_v13, %v6786_v5  ;;  %v6790_v10 = vpop.xlane.xlu1 %2468  ;;  %vm2476_vm8 = vweird.f32 %v5505_v13  ;;  %v2620_v5 = vld [vmem:[#allocation23 + $0x20] sm:$0xff] }
 0x4f9   : > { %5506 = vrcp.f32 %v6790_v10  ;;  %vm2477_vm10 = vmor %vm2475_vm9, %vm2476_vm8  ;;  %v2496_v47 = vand.u32 2147483648, %v6790_v10  ;;  %v2494_v49 = vand.u32 2147483647, %v6790_v10  ;;  %vm2490_vm13 = vweird.f32 %v6790_v10  ;;  %2693 = vmatpush.msrb.mxu0 %v2620_v5  ;;  %v2595_v5 = vld [vmem:[#allocation22 + $0x158] sm:$0xff] }
 0x4fa   : > { %v2472_v55 = vsub.f32 1.0, %v2471_v6  ;;  %v2614_v6 = vld [vmem:[#allocation22 + $0x1f0] sm:$0xff]  ;;  %vm4208_vm8 = vcmask 1042432  }
 0x4fb   : > { %v2497_v53 = vor.u32 1.1754944e-38, %v2496_v47  ;;  %vm2495_vm15 = vcmp.eq.f32.partialorder %v2494_v49, 8.507059e+37  ;;  %2694 = vmatpush.msrb.mxu0 %v2618_v54  ;;  %2780 = vmatpush.msra.mxu1 %v2614_v6  ;;  %v2564_v47 = vld [vmem:[#allocation22 + $0x60] sm:$0xff]  ;;  %v2562_v49 = vld [vmem:[#allocation22 + $0x50] sm:$0xff] }
 0x4fc   : > { %v2473_v23 = vmul.f32 %v5505_v13, %v2472_v55  ;;  %v2578_v55 = vld [vmem:[#allocation22 + $0xd0] sm:$0xff]  ;;  %v2584_v6 = vld [vmem:[#allocation22 + $0x100] sm:$0xff] }
 0x4fd   : > { %2695 = vmatpush.msrb.mxu0 %v2616_v12  ;;  %2781 = vmatpush.msra.mxu1 %v2612_v2  ;;  %v2590_v54 = vld [vmem:[#allocation22 + $0x130] sm:$0xff] }
 0x4fe   : > { %v2474_v29 = vadd.f32 %v5505_v13, %v2473_v23  ;;  %v2577_v23 = vld [vmem:[#allocation22 + $0xc8] sm:$0xff]  ;;  %v2554_v12 = vld [vmem:[#allocation22 + $0x10] sm:$0xff] }
 0x4ff   : > { %v5507_v32 = vpop.eup %5506  ;;  %2760 = vmatpush.msra.mxu0 %v2582_v0  ;;  %2782 = vmatpush.msra.mxu1 %v2610_v17  ;;  %v2552_v0 = vld [vmem:[#allocation22] sm:$0xff] }
 0x500   : > { %v2478_v37 = vsel %vm2477_vm10, %v5505_v13, %v2474_v29  ;;  %v2486_v38 = vmul.f32 %v5507_v32, %v6790_v10  ;;  %vm2491_vm12 = vweird.f32 %v5507_v32  ;;  %v2617_v13 = vld [vmem:[#allocation23 + $0x8] sm:$0xff]  ;;  %v2583_v10 = vld [vmem:[#allocation22 + $0xf8] sm:$0xff]  ;;  %v2572_v29 = vld [vmem:[#allocation22 + $0xa0] sm:$0xff]  ;;  %vm4224_vm10 = vcmask 1041408  }
 0x501   : > { %v2483_v40 = vsel %vm2480_vm11, %v2482_v33, %v2478_v37  ;;  %vm2492_vm14 = vmor %vm2490_vm13, %vm2491_vm12  ;;  %2783 = vmatpush.msra.mxu1 %v2608_v22  ;;  %v2570_v33 = vld [vmem:[#allocation22 + $0x90] sm:$0xff]  ;;  %v2603_v37 = vld [vmem:[#allocation22 + $0x198] sm:$0xff]  ;;  %vm4240_vm12 = vcmask 1040384   ;;  %vm4256_vm13 = vcmask 1046528  }
 0x502   : > { %v2484_v41 = vmul.f32 %v6778_v63, %v2483_v40  ;;  %v2487_v42 = vsub.f32 1.0, %v2486_v38  ;;  %v2623_v63 = vld [vmem:[#allocation23 + $0x38] sm:$0xff]  ;;  %v2568_v38 = vld [vmem:[#allocation22 + $0x80] sm:$0xff]  ;;  %v2601_v40 = vld [vmem:[#allocation22 + $0x188] sm:$0xff] }
 0x503   : > { %2732 = vmatpush.msrb.mxu2 %v2623_v63  ;;  %2784 = vmatpush.msra.mxu1 %v2606_v26  ;;  %v2594_v63 = vld [vmem:[#allocation22 + $0x150] sm:$0xff]  ;;  %v3163_v17 = vld [vmem:[#allocation26 + $0x878] sm:$0xff] }
 0x504   : > { %v2488_v36 = vmul.f32 %v5507_v32, %v2487_v42  ;;  %5227 = vmatmul.msk.f32.vlgmr.msra.gmra.mxu2 %vm2451_vm7, %v2484_v41  ;;  %5229 = vmatmul.msk.f32.vlgmr.msra.gmra.mxu3 %vm2451_vm7, %v2484_v41  ;;  %v2566_v41 = vld [vmem:[#allocation22 + $0x70] sm:$0xff]  ;;  %v3127_v26 = vld [vmem:[#allocation26 + $0x758] sm:$0xff] }
 0x505   : > { %2733 = vmatpush.msrb.mxu2 %v2621_v7  ;;  %2820 = vmatpush.msra.mxu3 %v2615_v9  ;;  %v2598_v42 = vld [vmem:[#allocation22 + $0x170] sm:$0xff]  ;;  %v2561_v7 = vld [vmem:[#allocation22 + $0x48] sm:$0xff] }
 0x506   : > { %v2489_v52 = vadd.f32 %v5507_v32, %v2488_v36  ;;  %2785 = vmatpush.msra.mxu1 %v2604_v11  ;;  %v2597_v36 = vld [vmem:[#allocation22 + $0x168] sm:$0xff] }
 0x507   : > { %2734 = vmatpush.msrb.mxu2 %v2619_v58  ;;  %2821 = vmatpush.msra.mxu3 %v2613_v4  ;;  %v2556_v58 = vld [vmem:[#allocation22 + $0x20] sm:$0xff]  ;;  %v2585_v9 = vld [vmem:[#allocation22 + $0x108] sm:$0xff] }
 0x508   : > { %v2493_v57 = vsel %vm2492_vm14, %v5507_v32, %v2489_v52  ;;  %v2605_v32 = vld [vmem:[#allocation22 + $0x1a8] sm:$0xff]  ;;  %2786 = vmatpush.msra.mxu1 %v2602_v34  ;;  %v2592_v52 = vld [vmem:[#allocation22 + $0x140] sm:$0xff] }
 0x509   : > { %v2498_v60 = vsel %vm2495_vm15, %v2497_v53, %v2493_v57  ;;  %2735 = vmatpush.msrb.mxu2 %v2617_v13  ;;  %2822 = vmatpush.msra.mxu3 %v2611_v19  ;;  %v2558_v53 = vld [vmem:[#allocation22 + $0x30] sm:$0xff]  ;;  %v2591_v57 = vld [vmem:[#allocation22 + $0x138] sm:$0xff]  ;;  %vm4272_vm15 = vcmask 1045504  }
 0x50a   : > { %v2499_v3 = vmul.f32 %v6782_v39, %v2498_v60  ;;  %v2580_v39 = vld [vmem:[#allocation22 + $0xe0] sm:$0xff]  ;;  %2787 = vmatpush.msra.mxu1 %v2600_v20  ;;  %v2557_v60 = vld [vmem:[#allocation22 + $0x28] sm:$0xff]  ;;  %v2555_v13 = vld [vmem:[#allocation22 + $0x18] sm:$0xff] }
 0x50b   : > { %2800 = vmatpush.msra.mxu2 %v2583_v10  ;;  %2761 = vmatpush.msra.mxu0 %v2580_v39  ;;  %v2553_v10 = vld [vmem:[#allocation22 + $0x8] sm:$0xff]  ;;  %v3451_v19 = vld [vmem:[#allocation26 + $0x1178] sm:$0xff] }
 0x50c   : > { %5228 = vmatmul.msk.f32.gmra.mxu2 %vm2451_vm7, %v2499_v3  ;;  %5230 = vmatmul.msk.f32.gmra.mxu3 %vm2451_vm7, %v2499_v3  ;;  %v2589_v3 = vld [vmem:[#allocation22 + $0x128] sm:$0xff]  ;;  %v3091_v34 = vld [vmem:[#allocation26 + $0x638] sm:$0xff] }
 0x50d   : > { %2801 = vmatpush.msra.mxu2 %v2581_v15  ;;  %2762 = vmatpush.msra.mxu0 %v2578_v55  ;;  %v3162_v55 = vld [vmem:[#allocation26 + $0x870] sm:$0xff]  ;;  %v3145_v22 = vld [vmem:[#allocation26 + $0x7e8] sm:$0xff] }
 0x50e   : > { %2823 = vmatpush.msra.mxu3 %v2609_v24  ;;  %2788 = vmatpush.msra.mxu1 %v2598_v42  ;;  %v3433_v24 = vld [vmem:[#allocation26 + $0x10e8] sm:$0xff] }
 0x50f   : > { %2802 = vmatpush.msra.mxu2 %v2579_v56  ;;  %2763 = vmatpush.msra.mxu0 %v2576_v21  ;;  %v3450_v56 = vld [vmem:[#allocation26 + $0x1170] sm:$0xff]  ;;  %v3144_v21 = vld [vmem:[#allocation26 + $0x7e0] sm:$0xff]  ;;  %v3109_v11 = vld [vmem:[#allocation26 + $0x6c8] sm:$0xff] }
 0x510   : > { %2824 = vmatpush.msra.mxu3 %v2607_v28  ;;  %2789 = vmatpush.msra.mxu1 %v2596_v18  ;;  %v3415_v28 = vld [vmem:[#allocation26 + $0x1058] sm:$0xff]  ;;  %v3073_v20 = vld [vmem:[#allocation26 + $0x5a8] sm:$0xff] }
 0x511   : > { %2803 = vmatpush.msra.mxu2 %v2577_v23  ;;  %2764 = vmatpush.msra.mxu0 %v2574_v25  ;;  %v3432_v23 = vld [vmem:[#allocation26 + $0x10e0] sm:$0xff]  ;;  %v3126_v25 = vld [vmem:[#allocation26 + $0x750] sm:$0xff]  ;;  %v3037_v42 = vld [vmem:[#allocation26 + $0x488] sm:$0xff] }
 0x512   : > { %2825 = vmatpush.msra.mxu3 %v2605_v32  ;;  %2790 = vmatpush.msra.mxu1 %v2594_v63  ;;  %v3397_v32 = vld [vmem:[#allocation26 + $0xfc8] sm:$0xff]  ;;  %v3343_v63 = vld [vmem:[#allocation26 + $0xe18] sm:$0xff] }
 0x513   : > { %2804 = vmatpush.msra.mxu2 %v2575_v27  ;;  %2765 = vmatpush.msra.mxu0 %v2572_v29  ;;  %v3414_v27 = vld [vmem:[#allocation26 + $0x1050] sm:$0xff]  ;;  %v3108_v29 = vld [vmem:[#allocation26 + $0x6c0] sm:$0xff]  ;;  %v3361_v18 = vld [vmem:[#allocation26 + $0xea8] sm:$0xff] }
 0x514   : > { %2826 = vmatpush.msra.mxu3 %v2603_v37  ;;  %2791 = vmatpush.msra.mxu1 %v2592_v52  ;;  %v3379_v37 = vld [vmem:[#allocation26 + $0xf38] sm:$0xff]  ;;  %v3325_v52 = vld [vmem:[#allocation26 + $0xd88] sm:$0xff] }
 0x515   : > { %2805 = vmatpush.msra.mxu2 %v2573_v31  ;;  %2766 = vmatpush.msra.mxu0 %v2570_v33  ;;  %v3396_v31 = vld [vmem:[#allocation26 + $0xfc0] sm:$0xff]  ;;  %v3090_v33 = vld [vmem:[#allocation26 + $0x630] sm:$0xff] }
 0x516   : > { %2827 = vmatpush.msra.mxu3 %v2601_v40  ;;  %2792 = vmatpush.msra.mxu1 %v2590_v54  ;;  %v3055_v40 = vld [vmem:[#allocation26 + $0x518] sm:$0xff] }
 0x517   : > { %2806 = vmatpush.msra.mxu2 %v2571_v35  ;;  %2767 = vmatpush.msra.mxu0 %v2568_v38  ;;  %v3378_v35 = vld [vmem:[#allocation26 + $0xf30] sm:$0xff]  ;;  %v3072_v38 = vld [vmem:[#allocation26 + $0x5a0] sm:$0xff]  ;;  %v3307_v54 = vld [vmem:[#allocation26 + $0xcf8] sm:$0xff] }
 0x518   : > { %2828 = vmatpush.msra.mxu3 %v2599_v44  ;;  %2793 = vmatpush.msra.mxu1 %v2588_v59  ;;  %v3360_v44 = vld [vmem:[#allocation26 + $0xea0] sm:$0xff]  ;;  %v3289_v59 = vld [vmem:[#allocation26 + $0xc68] sm:$0xff] }
 0x519   : > { %2807 = vmatpush.msra.mxu2 %v2569_v30  ;;  %2768 = vmatpush.msra.mxu0 %v2566_v41  ;;  %v3054_v30 = vld [vmem:[#allocation26 + $0x510] sm:$0xff]  ;;  %v3036_v41 = vld [vmem:[#allocation26 + $0x480] sm:$0xff] }
 0x51a   : > { %2829 = vmatpush.msra.mxu3 %v2597_v36  ;;  %2794 = vmatpush.msra.mxu1 %v2586_v61  ;;  %v3342_v36 = vld [vmem:[#allocation26 + $0xe10] sm:$0xff]  ;;  %v3271_v61 = vld [vmem:[#allocation26 + $0xbd8] sm:$0xff] }
 0x51b   : > { %2808 = vmatpush.msra.mxu2 %v2567_v43  ;;  %2769 = vmatpush.msra.mxu0 %v2564_v47  ;;  %v3018_v43 = vld [vmem:[#allocation26 + $0x3f0] sm:$0xff]  ;;  %v3019_v47 = vld [vmem:[#allocation26 + $0x3f8] sm:$0xff] }
 0x51c   : > { %2830 = vmatpush.msra.mxu3 %v2595_v5  ;;  %2795 = vmatpush.msra.mxu1 %v2584_v6  ;;  %v3324_v5 = vld [vmem:[#allocation26 + $0xd80] sm:$0xff]  ;;  %v3253_v6 = vld [vmem:[#allocation26 + $0xb48] sm:$0xff] }
 0x51d   : > { %2809 = vmatpush.msra.mxu2 %v2565_v48  ;;  %2770 = vmatpush.msra.mxu0 %v2562_v49  ;;  %v3000_v48 = vld [vmem:[#allocation26 + $0x360] sm:$0xff]  ;;  %v3001_v49 = vld [vmem:[#allocation26 + $0x368] sm:$0xff] }
 0x51e   : > { %2831 = vmatpush.msra.mxu3 %v2593_v51  ;;  %v3306_v51 = vld [vmem:[#allocation26 + $0xcf0] sm:$0xff] }
 0x51f   : > { %2810 = vmatpush.msra.mxu2 %v2563_v1  ;;  %2771 = vmatpush.msra.mxu0 %v2560_v50  ;;  %v2982_v1 = vld [vmem:[#allocation26 + $0x2d0] sm:$0xff]  ;;  %v2983_v50 = vld [vmem:[#allocation26 + $0x2d8] sm:$0xff] }
 0x520   : > { %2832 = vmatpush.msra.mxu3 %v2591_v57  ;;  %v3288_v57 = vld [vmem:[#allocation26 + $0xc60] sm:$0xff] }
 0x521   : > { %2811 = vmatpush.msra.mxu2 %v2561_v7  ;;  %2772 = vmatpush.msra.mxu0 %v2558_v53  ;;  %v2964_v7 = vld [vmem:[#allocation26 + $0x240] sm:$0xff]  ;;  %v2965_v53 = vld [vmem:[#allocation26 + $0x248] sm:$0xff] }
 0x522   : > { %2833 = vmatpush.msra.mxu3 %v2589_v3  ;;  %v3270_v3 = vld [vmem:[#allocation26 + $0xbd0] sm:$0xff] }
 0x523   : > { %2812 = vmatpush.msra.mxu2 %v2559_v16  ;;  %2773 = vmatpush.msra.mxu0 %v2556_v58  ;;  %v2946_v16 = vld [vmem:[#allocation26 + $0x1b0] sm:$0xff]  ;;  %v2947_v58 = vld [vmem:[#allocation26 + $0x1b8] sm:$0xff] }
 0x524   : > { %2834 = vmatpush.msra.mxu3 %v2587_v62  ;;  %v3252_v62 = vld [vmem:[#allocation26 + $0xb40] sm:$0xff] }
 0x525   : > { %2813 = vmatpush.msra.mxu2 %v2557_v60  ;;  %2774 = vmatpush.msra.mxu0 %v2554_v12  ;;  %v2928_v60 = vld [vmem:[#allocation26 + $0x120] sm:$0xff]  ;;  %v2929_v12 = vld [vmem:[#allocation26 + $0x128] sm:$0xff] }
 0x526   : > { %2835 = vmatpush.msra.mxu3 %v2585_v9  ;;  %v3234_v9 = vld [vmem:[#allocation26 + $0xab0] sm:$0xff] }
 0x527   : > { %2814 = vmatpush.msra.mxu2 %v2555_v13  ;;  %2775 = vmatpush.msra.mxu0 %v2552_v0  ;;  %v2910_v13 = vld [vmem:[#allocation26 + $0x90] sm:$0xff]  ;;  %v2911_v0 = vld [vmem:[#allocation26 + $0x98] sm:$0xff] }
 0x529   : > { %2815 = vmatpush.msra.mxu2 %v2553_v10  ;;  %v2892_v10 = vld [vmem:[#allocation26] sm:$0xff] }
 0x587   : > { %v6808_v39 = vpop.f32.mrf.mxu2  ;;  %v6810_v2 = vpop.f32.mrf.mxu3 }
 0x58f   : > { %v6812_v15 = vpop.f32.mrf.mxu2  ;;  %v6814_v4 = vpop.f32.mrf.mxu3 }
 0x590   : > { %2696 = vmatmul.f32.vlgmr.msrb.gmra.mxu0 %v6812_v15  ;;  %2716 = vmatmul.f32.vlgmr.msrb.gmra.mxu1 %v6814_v4 }
 0x591   : > { %2736 = vmatmul.f32.vlgmr.msrb.gmra.mxu2 %v6812_v15  ;;  %2756 = vmatmul.f32.vlgmr.msrb.gmra.mxu3 %v6814_v4 }
 0x592   : > { %3468 = vmatpush.msrb.mxu0 %v3162_v55  ;;  %3508 = vmatpush.msrb.mxu2 %v3163_v17  ;;  %v2893_v55 = vld [vmem:[#allocation26 + $0x8] sm:$0xff]  ;;  %v3235_v17 = vld [vmem:[#allocation26 + $0xab8] sm:$0xff] }
 0x593   : > { %3488 = vmatpush.msrb.mxu1 %v3450_v56  ;;  %3528 = vmatpush.msrb.mxu3 %v3451_v19  ;;  %v3164_v56 = vld [vmem:[#allocation26 + $0x880] sm:$0xff]  ;;  %v3165_v19 = vld [vmem:[#allocation26 + $0x888] sm:$0xff] }
 0x594   : > { %3469 = vmatpush.msrb.mxu0 %v3144_v21  ;;  %3509 = vmatpush.msrb.mxu2 %v3145_v22  ;;  %v3216_v21 = vld [vmem:[#allocation26 + $0xa20] sm:$0xff]  ;;  %v3217_v22 = vld [vmem:[#allocation26 + $0xa28] sm:$0xff] }
 0x595   : > { %3489 = vmatpush.msrb.mxu1 %v3432_v23  ;;  %3529 = vmatpush.msrb.mxu3 %v3433_v24  ;;  %v3146_v23 = vld [vmem:[#allocation26 + $0x7f0] sm:$0xff]  ;;  %v3147_v24 = vld [vmem:[#allocation26 + $0x7f8] sm:$0xff] }
 0x596   : > { %3470 = vmatpush.msrb.mxu0 %v3126_v25  ;;  %3510 = vmatpush.msrb.mxu2 %v3127_v26  ;;  %v3198_v25 = vld [vmem:[#allocation26 + $0x990] sm:$0xff]  ;;  %v3199_v26 = vld [vmem:[#allocation26 + $0x998] sm:$0xff] }
 0x597   : > { %3490 = vmatpush.msrb.mxu1 %v3414_v27  ;;  %3530 = vmatpush.msrb.mxu3 %v3415_v28  ;;  %v3128_v27 = vld [vmem:[#allocation26 + $0x760] sm:$0xff]  ;;  %v3129_v28 = vld [vmem:[#allocation26 + $0x768] sm:$0xff] }
 0x598   : > { %2776 = vmatmul.f32.vlgmr.msra.gmra.mxu0 %v6808_v39  ;;  %2796 = vmatmul.f32.vlgmr.msra.gmra.mxu1 %v6810_v2 }
 0x599   : > { %2816 = vmatmul.f32.vlgmr.msra.gmra.mxu2 %v6808_v39  ;;  %2836 = vmatmul.f32.vlgmr.msra.gmra.mxu3 %v6810_v2 }
 0x59a   : > { %3471 = vmatpush.msrb.mxu0 %v3108_v29  ;;  %3511 = vmatpush.msrb.mxu2 %v3109_v11  ;;  %v3180_v29 = vld [vmem:[#allocation26 + $0x900] sm:$0xff]  ;;  %v3181_v11 = vld [vmem:[#allocation26 + $0x908] sm:$0xff] }
 0x59b   : > { %3491 = vmatpush.msrb.mxu1 %v3396_v31  ;;  %3531 = vmatpush.msrb.mxu3 %v3397_v32  ;;  %v3110_v31 = vld [vmem:[#allocation26 + $0x6d0] sm:$0xff]  ;;  %v3452_v32 = vld [vmem:[#allocation26 + $0x1180] sm:$0xff] }
 0x59c   : > { %3472 = vmatpush.msrb.mxu0 %v3090_v33  ;;  %3512 = vmatpush.msrb.mxu2 %v3091_v34  ;;  %v3111_v33 = vld [vmem:[#allocation26 + $0x6d8] sm:$0xff]  ;;  %v3453_v34 = vld [vmem:[#allocation26 + $0x1188] sm:$0xff] }
 0x59d   : > { %3492 = vmatpush.msrb.mxu1 %v3378_v35  ;;  %3532 = vmatpush.msrb.mxu3 %v3379_v37  ;;  %v3092_v35 = vld [vmem:[#allocation26 + $0x640] sm:$0xff]  ;;  %v3434_v37 = vld [vmem:[#allocation26 + $0x10f0] sm:$0xff] }
 0x59e   : > { %3473 = vmatpush.msrb.mxu0 %v3072_v38  ;;  %3513 = vmatpush.msrb.mxu2 %v3073_v20  ;;  %v3093_v38 = vld [vmem:[#allocation26 + $0x648] sm:$0xff]  ;;  %v3435_v20 = vld [vmem:[#allocation26 + $0x10f8] sm:$0xff] }
 0x59f   : > { %3493 = vmatpush.msrb.mxu1 %v3360_v44  ;;  %3533 = vmatpush.msrb.mxu3 %v3361_v18  ;;  %v3398_v44 = vld [vmem:[#allocation26 + $0xfd0] sm:$0xff]  ;;  %v3399_v18 = vld [vmem:[#allocation26 + $0xfd8] sm:$0xff] }
 0x5a0   : > { %3474 = vmatpush.msrb.mxu0 %v3054_v30  ;;  %3514 = vmatpush.msrb.mxu2 %v3055_v40  ;;  %v3074_v30 = vld [vmem:[#allocation26 + $0x5b0] sm:$0xff]  ;;  %v3416_v40 = vld [vmem:[#allocation26 + $0x1060] sm:$0xff] }
 0x5a1   : > { %3494 = vmatpush.msrb.mxu1 %v3342_v36  ;;  %3534 = vmatpush.msrb.mxu3 %v3343_v63  ;;  %v3380_v63 = vld [vmem:[#allocation26 + $0xf40] sm:$0xff] }
 0x5a2   : > { %3475 = vmatpush.msrb.mxu0 %v3036_v41  ;;  %3515 = vmatpush.msrb.mxu2 %v3037_v42  ;;  %v3075_v41 = vld [vmem:[#allocation26 + $0x5b8] sm:$0xff]  ;;  %v3417_v42 = vld [vmem:[#allocation26 + $0x1068] sm:$0xff] }
 0x5a3   : > { %3495 = vmatpush.msrb.mxu1 %v3324_v5  ;;  %3535 = vmatpush.msrb.mxu3 %v3325_v52  ;;  %v3381_v5 = vld [vmem:[#allocation26 + $0xf48] sm:$0xff]  ;;  %v3362_v52 = vld [vmem:[#allocation26 + $0xeb0] sm:$0xff] }
 0x5a4   : > { %3476 = vmatpush.msrb.mxu0 %v3018_v43  ;;  %3516 = vmatpush.msrb.mxu2 %v3019_v47  ;;  %v3056_v43 = vld [vmem:[#allocation26 + $0x520] sm:$0xff]  ;;  %v3057_v47 = vld [vmem:[#allocation26 + $0x528] sm:$0xff] }
 0x5a5   : > { %3496 = vmatpush.msrb.mxu1 %v3306_v51  ;;  %3536 = vmatpush.msrb.mxu3 %v3307_v54  ;;  %v3363_v51 = vld [vmem:[#allocation26 + $0xeb8] sm:$0xff]  ;;  %v3344_v54 = vld [vmem:[#allocation26 + $0xe20] sm:$0xff] }
 0x5a6   : > { %3477 = vmatpush.msrb.mxu0 %v3000_v48  ;;  %3517 = vmatpush.msrb.mxu2 %v3001_v49  ;;  %v3038_v49 = vld [vmem:[#allocation26 + $0x490] sm:$0xff] }
 0x5a7   : > { %3497 = vmatpush.msrb.mxu1 %v3288_v57  ;;  %3537 = vmatpush.msrb.mxu3 %v3289_v59  ;;  %v6824_v57 = vld [vmem:[#allocation25] sm:$0x3]  ;;  %v2984_v59 = vld [vmem:[#allocation26 + $0x2e0] sm:$0xff] }
 0x5a8   : > { %3478 = vmatpush.msrb.mxu0 %v2982_v1  ;;  %3518 = vmatpush.msrb.mxu2 %v2983_v50  ;;  %v3039_v1 = vld [vmem:[#allocation26 + $0x498] sm:$0xff]  ;;  %v3020_v50 = vld [vmem:[#allocation26 + $0x400] sm:$0xff] }
 0x5a9   : > { %3498 = vmatpush.msrb.mxu1 %v3270_v3  ;;  %3538 = vmatpush.msrb.mxu3 %v3271_v61  ;;  %v2985_v3 = vld [vmem:[#allocation26 + $0x2e8] sm:$0xff] }
 0x5aa   : > { %3479 = vmatpush.msrb.mxu0 %v2964_v7  ;;  %3519 = vmatpush.msrb.mxu2 %v2965_v53  ;;  %v3021_v7 = vld [vmem:[#allocation26 + $0x408] sm:$0xff]  ;;  %v3002_v53 = vld [vmem:[#allocation26 + $0x370] sm:$0xff] }
 0x5ab   : > { %3499 = vmatpush.msrb.mxu1 %v3252_v62  ;;  %3539 = vmatpush.msrb.mxu3 %v3253_v6  ;;  %v3327_v62 = vld [vmem:[#allocation26 + $0xd98] sm:$0xff]  ;;  %v2966_v6 = vld [vmem:[#allocation26 + $0x250] sm:$0xff] }
 0x5ac   : > { %3480 = vmatpush.msrb.mxu0 %v2946_v16  ;;  %3520 = vmatpush.msrb.mxu2 %v2947_v58  ;;  %v3003_v16 = vld [vmem:[#allocation26 + $0x378] sm:$0xff]  ;;  %v3345_v58 = vld [vmem:[#allocation26 + $0xe28] sm:$0xff] }
 0x5ad   : > { %3500 = vmatpush.msrb.mxu1 %v3234_v9  ;;  %3540 = vmatpush.msrb.mxu3 %v3235_v17  ;;  %v2967_v9 = vld [vmem:[#allocation26 + $0x258] sm:$0xff]  ;;  %v2842_v17 = vperm.slane %v6824_v57, 0 }
 0x5ae   : > { %3481 = vmatpush.msrb.mxu0 %v2928_v60  ;;  %3521 = vmatpush.msrb.mxu2 %v2929_v12  ;;  %v3326_v60 = vld [vmem:[#allocation26 + $0xd90] sm:$0xff] }
 0x5af   : > { %3501 = vmatpush.msrb.mxu1 %v3216_v21  ;;  %3541 = vmatpush.msrb.mxu3 %v3217_v22  ;;  %v2948_v21 = vld [vmem:[#allocation26 + $0x1c0] sm:$0xff]  ;;  %v3290_v22 = vld [vmem:[#allocation26 + $0xc70] sm:$0xff] }
 0x5b0   : > { %3482 = vmatpush.msrb.mxu0 %v2910_v13  ;;  %3522 = vmatpush.msrb.mxu2 %v2911_v0 }
 0x5b1   : > { %3502 = vmatpush.msrb.mxu1 %v3198_v25  ;;  %3542 = vmatpush.msrb.mxu3 %v3199_v26  ;;  %v3291_v25 = vld [vmem:[#allocation26 + $0xc78] sm:$0xff]  ;;  %v2930_v26 = vld [vmem:[#allocation26 + $0x130] sm:$0xff] }
 0x5b2   : > { %3483 = vmatpush.msrb.mxu0 %v2892_v10  ;;  %3523 = vmatpush.msrb.mxu2 %v2893_v55  ;;  %v3308_v10 = vld [vmem:[#allocation26 + $0xd00] sm:$0xff] }
 0x5b3   : > { %3503 = vmatpush.msrb.mxu1 %v3180_v29  ;;  %3543 = vmatpush.msrb.mxu3 %v3181_v11  ;;  %v3273_v11 = vld [vmem:[#allocation26 + $0xbe8] sm:$0xff] }
 0x5b4   : > { %3548 = vmatpush.msra.mxu0 %v3164_v56  ;;  %3588 = vmatpush.msra.mxu2 %v3165_v19  ;;  %v3309_v56 = vld [vmem:[#allocation26 + $0xd08] sm:$0xff] }
 0x5b5   : > { %3568 = vmatpush.msra.mxu1 %v3452_v32  ;;  %3608 = vmatpush.msra.mxu3 %v3453_v34  ;;  %v2912_v32 = vld [vmem:[#allocation26 + $0xa0] sm:$0xff]  ;;  %v2913_v34 = vld [vmem:[#allocation26 + $0xa8] sm:$0xff] }
 0x5b6   : > { %3549 = vmatpush.msra.mxu0 %v3146_v23  ;;  %3589 = vmatpush.msra.mxu2 %v3147_v24  ;;  %v2949_v23 = vld [vmem:[#allocation26 + $0x1c8] sm:$0xff] }
 0x5b7   : > { %3569 = vmatpush.msra.mxu1 %v3434_v37  ;;  %3609 = vmatpush.msra.mxu3 %v3435_v20 }
 0x5b8   : > { %3550 = vmatpush.msra.mxu0 %v3128_v27  ;;  %3590 = vmatpush.msra.mxu2 %v3129_v28  ;;  %v3272_v27 = vld [vmem:[#allocation26 + $0xbe0] sm:$0xff]  ;;  %v2931_v28 = vld [vmem:[#allocation26 + $0x138] sm:$0xff] }
 0x5b9   : > { %3570 = vmatpush.msra.mxu1 %v3416_v40  ;;  %3610 = vmatpush.msra.mxu3 %v3417_v42  ;;  %v2894_v40 = vld [vmem:[#allocation26 + $0x10] sm:$0xff]  ;;  %v2895_v42 = vld [vmem:[#allocation26 + $0x18] sm:$0xff] }
 0x5ba   : > { %3551 = vmatpush.msra.mxu0 %v3110_v31  ;;  %3591 = vmatpush.msra.mxu2 %v3111_v33  ;;  %v3254_v33 = vld [vmem:[#allocation26 + $0xb50] sm:$0xff] }
 0x5bb   : > { %3571 = vmatpush.msra.mxu1 %v3398_v44  ;;  %3611 = vmatpush.msra.mxu3 %v3399_v18  ;;  %v3237_v44 = vld [vmem:[#allocation26 + $0xac8] sm:$0xff]  ;;  %v3218_v18 = vld [vmem:[#allocation26 + $0xa30] sm:$0xff] }
 0x5bc   : > { %3552 = vmatpush.msra.mxu0 %v3092_v35  ;;  %3592 = vmatpush.msra.mxu2 %v3093_v38  ;;  %v3255_v38 = vld [vmem:[#allocation26 + $0xb58] sm:$0xff] }
 0x5bd   : > { %3572 = vmatpush.msra.mxu1 %v3380_v63  ;;  %3612 = vmatpush.msra.mxu3 %v3381_v5  ;;  %v3201_v63 = vld [vmem:[#allocation26 + $0x9a8] sm:$0xff] }
 0x5be   : > { %3553 = vmatpush.msra.mxu0 %v3074_v30  ;;  %3593 = vmatpush.msra.mxu2 %v3075_v41  ;;  %v2843_v30 = vperm.slane %v6824_v57, 1  ;;  %v3236_v41 = vld [vmem:[#allocation26 + $0xac0] sm:$0xff] }
 0x5bf   : > { %3573 = vmatpush.msra.mxu1 %v3362_v52  ;;  %3613 = vmatpush.msra.mxu3 %v3363_v51 }
 0x5c0   : > { %3554 = vmatpush.msra.mxu0 %v3056_v43  ;;  %3594 = vmatpush.msra.mxu2 %v3057_v47 }
 0x5c1   : > { %3574 = vmatpush.msra.mxu1 %v3344_v54  ;;  %3614 = vmatpush.msra.mxu3 %v3345_v58 }
 0x5c2   : > { %3555 = vmatpush.msra.mxu0 %v3038_v49  ;;  %3595 = vmatpush.msra.mxu2 %v3039_v1  ;;  %v3200_v49 = vld [vmem:[#allocation26 + $0x9a0] sm:$0xff]  ;;  %v3182_v1 = vld [vmem:[#allocation26 + $0x910] sm:$0xff] }
 0x5c3   : > { %3575 = vmatpush.msra.mxu1 %v3326_v60  ;;  %3615 = vmatpush.msra.mxu3 %v3327_v62  ;;  %v2886_v62 = vsub.f32 %v6808_v39, %v6812_v15  ;;  %v3148_v39 = vld [vmem:[#allocation26 + $0x800] sm:$0xff] }
 0x5c4   : > { %3556 = vmatpush.msra.mxu0 %v3020_v50  ;;  %3596 = vmatpush.msra.mxu2 %v3021_v7  ;;  %v3183_v50 = vld [vmem:[#allocation26 + $0x918] sm:$0xff] }
 0x5c5   : > { %3576 = vmatpush.msra.mxu1 %v3308_v10  ;;  %3616 = vmatpush.msra.mxu3 %v3309_v56 }
 0x5c6   : > { %3557 = vmatpush.msra.mxu0 %v3002_v53  ;;  %3597 = vmatpush.msra.mxu2 %v3003_v16 }
 0x5c7   : > { %3577 = vmatpush.msra.mxu1 %v3290_v22  ;;  %3617 = vmatpush.msra.mxu3 %v3291_v25  ;;  %v3167_v22 = vld [vmem:[#allocation26 + $0x898] sm:$0xff]  ;;  %v3149_v25 = vld [vmem:[#allocation26 + $0x808] sm:$0xff] }
 0x5c8   : > { %3558 = vmatpush.msra.mxu0 %v2984_v59  ;;  %3598 = vmatpush.msra.mxu2 %v2985_v3 }
 0x5c9   : > { %3578 = vmatpush.msra.mxu1 %v3272_v27  ;;  %3618 = vmatpush.msra.mxu3 %v3273_v11 }
 0x5ca   : > { %3559 = vmatpush.msra.mxu0 %v2966_v6  ;;  %3599 = vmatpush.msra.mxu2 %v2967_v9 }
 0x5cb   : > { %3579 = vmatpush.msra.mxu1 %v3254_v33  ;;  %3619 = vmatpush.msra.mxu3 %v3255_v38  ;;  %v3454_v33 = vld [vmem:[#allocation26 + $0x1190] sm:$0xff]  ;;  %v3095_v38 = vld [vmem:[#allocation26 + $0x658] sm:$0xff] }
 0x5cc   : > { %3560 = vmatpush.msra.mxu0 %v2948_v21  ;;  %3600 = vmatpush.msra.mxu2 %v2949_v23  ;;  %v3166_v21 = vld [vmem:[#allocation26 + $0x890] sm:$0xff] }
 0x5cd   : > { %3580 = vmatpush.msra.mxu1 %v3236_v41  ;;  %3620 = vmatpush.msra.mxu3 %v3237_v44  ;;  %v3419_v41 = vld [vmem:[#allocation26 + $0x1078] sm:$0xff] }
 0x5ce   : > { %3561 = vmatpush.msra.mxu0 %v2930_v26  ;;  %3601 = vmatpush.msra.mxu2 %v2931_v28  ;;  %v2887_v26 = vsub.f32 %v6810_v2, %v6814_v4  ;;  %v3130_v28 = vld [vmem:[#allocation26 + $0x770] sm:$0xff]  ;;  %v3059_v44 = vld [vmem:[#allocation26 + $0x538] sm:$0xff] }
 0x5cf   : > { %3581 = vmatpush.msra.mxu1 %v3218_v18  ;;  %v3094_v2 = vld [vmem:[#allocation26 + $0x650] sm:$0xff]  ;;  %v3040_v18 = vld [vmem:[#allocation26 + $0x4a0] sm:$0xff] }
 0x5d0   : > { %3562 = vmatpush.msra.mxu0 %v2912_v32  ;;  %3602 = vmatpush.msra.mxu2 %v2913_v34  ;;  %v3112_v32 = vld [vmem:[#allocation26 + $0x6e0] sm:$0xff]  ;;  %v3113_v34 = vld [vmem:[#allocation26 + $0x6e8] sm:$0xff] }
 0x5d1   : > { %3582 = vmatpush.msra.mxu1 %v3200_v49  ;;  %v3383_v49 = vld [vmem:[#allocation26 + $0xf58] sm:$0xff] }
 0x5d2   : > { %3563 = vmatpush.msra.mxu0 %v2894_v40  ;;  %3603 = vmatpush.msra.mxu2 %v2895_v42  ;;  %v3077_v40 = vld [vmem:[#allocation26 + $0x5c8] sm:$0xff]  ;;  %v3058_v42 = vld [vmem:[#allocation26 + $0x530] sm:$0xff] }
 0x5d3   : > { %3583 = vmatpush.msra.mxu1 %v3182_v1  ;;  %v3364_v1 = vld [vmem:[#allocation26 + $0xec0] sm:$0xff] }
 0x60d   : > { %v2697_v48 = vpop.f32.mrf.mxu0  ;;  %v2717_v36 = vpop.f32.mrf.mxu1 }
 0x60e   : > { %v2718_v12 = vadd.f32 %v2717_v36, %v2697_v48  ;;  %v3219_v48 = vld [vmem:[#allocation26 + $0xa38] sm:$0xff] }
 0x60f   : > { %3621 = vmatpush.msra.mxu3 %v3219_v48  ;;  %v3382_v48 = vld [vmem:[#allocation26 + $0xf50] sm:$0xff] }
 0x611   : > { %3622 = vmatpush.msra.mxu3 %v3201_v63  ;;  %v3022_v63 = vld [vmem:[#allocation26 + $0x410] sm:$0xff] }
 0x613   : > { %3623 = vmatpush.msra.mxu3 %v3183_v50  ;;  %v3365_v50 = vld [vmem:[#allocation26 + $0xec8] sm:$0xff] }
 0x614   : > { %v2737_v61 = vpop.f32.mrf.mxu2  ;;  %v2757_v13 = vpop.f32.mrf.mxu3 }
 0x615   : > { %v2777_v0 = vpop.f32.mrf.mxu0  ;;  %v2797_v19 = vpop.f32.mrf.mxu1  ;;  %v2758_v31 = vadd.f32 %v2757_v13, %v2737_v61 }
 0x616   : > { %v2778_v55 = vadd.f32 %v2777_v0, %v2718_v12 }
 0x618   : > { %v2798_v24 = vadd.f32 %v2797_v19, %v2778_v55 }
 0x61a   : > { %v2846_v29 = vadd.f32 %v2842_v17, %v2798_v24 }
 0x61c   : > { %v5231_v35 = vmul.f32 -1.442695, %v2846_v29  ;;  %v2817_v37 = vpop.f32.mrf.mxu2  ;;  %v2837_v43 = vpop.f32.mrf.mxu3  ;;  %v3131_v29 = vld [vmem:[#allocation26 + $0x778] sm:$0xff] }
 0x61d   : > { %v2818_v20 = vadd.f32 %v2817_v37, %v2758_v31  ;;  %v3436_v37 = vld [vmem:[#allocation26 + $0x1100] sm:$0xff] }
 0x61e   : > { %5508 = vpow2.f32 %v5231_v35  ;;  %v3455_v35 = vld [vmem:[#allocation26 + $0x1198] sm:$0xff] }
 0x61f   : > { %v2838_v47 = vadd.f32 %v2837_v43, %v2818_v20  ;;  %v3437_v20 = vld [vmem:[#allocation26 + $0x1108] sm:$0xff]  ;;  %v3400_v43 = vld [vmem:[#allocation26 + $0xfe0] sm:$0xff] }
 0x621   : > { %v2847_v36 = vadd.f32 %v2843_v30, %v2838_v47  ;;  %v3418_v30 = vld [vmem:[#allocation26 + $0x1070] sm:$0xff]  ;;  %v3401_v47 = vld [vmem:[#allocation26 + $0xfe8] sm:$0xff] }
 0x623   : > { %v5232_v5 = vmul.f32 -1.442695, %v2847_v36  ;;  %v3041_v36 = vld [vmem:[#allocation26 + $0x4a8] sm:$0xff] }
 0x624   : > { %v5509_v52 = vpop.eup %5508 }
 0x625   : > { %v2854_v7 = vadd.f32 1.0, %v5509_v52  ;;  %5510 = vpow2.f32 %v5232_v5  ;;  %v3023_v5 = vld [vmem:[#allocation26 + $0x418] sm:$0xff]  ;;  %v3004_v52 = vld [vmem:[#allocation26 + $0x380] sm:$0xff] }
 0x627   : > { %5512 = vrcp.f32 %v2854_v7  ;;  %v2867_v58 = vand.u32 2147483648, %v2854_v7  ;;  %v2865_v60 = vand.u32 2147483647, %v2854_v7  ;;  %vm2861_vm1 = vweird.f32 %v2854_v7 }
 0x629   : > { %v2868_v61 = vor.u32 1.1754944e-38, %v2867_v58  ;;  %vm2866_vm3 = vcmp.eq.f32.partialorder %v2865_v60, 8.507059e+37  ;;  %v3329_v58 = vld [vmem:[#allocation26 + $0xda8] sm:$0xff]  ;;  %v3310_v60 = vld [vmem:[#allocation26 + $0xd10] sm:$0xff] }
 0x62b   : > { %v5511_v51 = vpop.eup %5510 }
 0x62c   : > { %v2855_v53 = vadd.f32 1.0, %v5511_v51  ;;  %v3005_v51 = vld [vmem:[#allocation26 + $0x388] sm:$0xff] }
 0x62d   : > { %v5513_v54 = vpop.eup %5512 }
 0x62e   : > { %v2857_v16 = vmul.f32 %v5513_v54, %v2854_v7  ;;  %5514 = vrcp.f32 %v2855_v53  ;;  %vm2862_vm0 = vweird.f32 %v5513_v54  ;;  %v2882_v55 = vand.u32 2147483648, %v2855_v53  ;;  %v3346_v7 = vld [vmem:[#allocation26 + $0xe30] sm:$0xff] }
 0x62f   : > { %vm2863_vm2 = vmor %vm2861_vm1, %vm2862_vm0  ;;  %v2880_v56 = vand.u32 2147483647, %v2855_v53  ;;  %vm2876_vm5 = vweird.f32 %v2855_v53 }
 0x630   : > { %v2858_v57 = vsub.f32 1.0, %v2857_v16  ;;  %v2883_v24 = vor.u32 1.1754944e-38, %v2882_v55  ;;  %v3328_v16 = vld [vmem:[#allocation26 + $0xda0] sm:$0xff]  ;;  %v3275_v55 = vld [vmem:[#allocation26 + $0xbf8] sm:$0xff] }
 0x631   : > { %vm2881_vm7 = vcmp.eq.f32.partialorder %v2880_v56, 8.507059e+37  ;;  %v3256_v56 = vld [vmem:[#allocation26 + $0xb60] sm:$0xff] }
 0x632   : > { %v2859_v59 = vmul.f32 %v5513_v54, %v2858_v57  ;;  %v2987_v57 = vld [vmem:[#allocation26 + $0x2f8] sm:$0xff] }
 0x634   : > { %v5515_v3 = vpop.eup %5514  ;;  %v2860_v12 = vadd.f32 %v5513_v54, %v2859_v59  ;;  %v2968_v59 = vld [vmem:[#allocation26 + $0x260] sm:$0xff] }
 0x635   : > { %v2872_v13 = vmul.f32 %v5515_v3, %v2855_v53  ;;  %vm2877_vm4 = vweird.f32 %v5515_v3  ;;  %v3347_v53 = vld [vmem:[#allocation26 + $0xe38] sm:$0xff] }
 0x636   : > { %v2864_v0 = vsel %vm2863_vm2, %v5513_v54, %v2860_v12  ;;  %vm2878_vm6 = vmor %vm2876_vm5, %vm2877_vm4  ;;  %v2986_v54 = vld [vmem:[#allocation26 + $0x2f0] sm:$0xff]  ;;  %v3311_v12 = vld [vmem:[#allocation26 + $0xd18] sm:$0xff]  ;;  %vm4288_vm2 = vcmask 1044480  }
 0x637   : > { %v2869_v6 = vsel %vm2866_vm3, %v2868_v61, %v2864_v0  ;;  %v2873_v10 = vsub.f32 1.0, %v2872_v13  ;;  %v2950_v61 = vld [vmem:[#allocation26 + $0x1d0] sm:$0xff]  ;;  %v3292_v13 = vld [vmem:[#allocation26 + $0xc80] sm:$0xff]  ;;  %v3293_v0 = vld [vmem:[#allocation26 + $0xc88] sm:$0xff] }
 0x638   : > { %v2888_v9 = vmul.f32 %v2886_v62, %v2869_v6  ;;  %v2951_v62 = vld [vmem:[#allocation26 + $0x1d8] sm:$0xff]  ;;  %v2932_v6 = vld [vmem:[#allocation26 + $0x140] sm:$0xff] }
 0x639   : > { %v2874_v17 = vmul.f32 %v5515_v3, %v2873_v10  ;;  %v3274_v10 = vld [vmem:[#allocation26 + $0xbf0] sm:$0xff] }
 0x63a   : > { %v6831_v19 = vadd.f32 %v2888_v9, %v6812_v15  ;;  %v2933_v9 = vld [vmem:[#allocation26 + $0x148] sm:$0xff] }
 0x63b   : > { %v2875_v23 = vadd.f32 %v5515_v3, %v2874_v17  ;;  %v2914_v17 = vld [vmem:[#allocation26 + $0xb0] sm:$0xff] }
 0x63c   : > { %3484 = vmatmul.f32.vlgmr.msrb.gmra.mxu0 %v6831_v19  ;;  %3524 = vmatmul.f32.vlgmr.msrb.gmra.mxu2 %v6831_v19 }
 0x63d   : > { %v2879_v27 = vsel %vm2878_vm6, %v5515_v3, %v2875_v23  ;;  %3628 = vmatpush.msrb.mxu0 %v3166_v21  ;;  %3668 = vmatpush.msrb.mxu2 %v3167_v22  ;;  %v2969_v3 = vld [vmem:[#allocation26 + $0x268] sm:$0xff]  ;;  %v2915_v21 = vld [vmem:[#allocation26 + $0xb8] sm:$0xff]  ;;  %v2896_v23 = vld [vmem:[#allocation26 + $0x20] sm:$0xff] }
 0x63e   : > { %v2884_v15 = vsel %vm2881_vm7, %v2883_v24, %v2879_v27  ;;  %v3257_v22 = vld [vmem:[#allocation26 + $0xb68] sm:$0xff]  ;;  %v3238_v24 = vld [vmem:[#allocation26 + $0xad0] sm:$0xff] }
 0x63f   : > { %v2889_v11 = vmul.f32 %v2887_v26, %v2884_v15  ;;  %3629 = vmatpush.msrb.mxu0 %v3148_v39  ;;  %3669 = vmatpush.msrb.mxu2 %v3149_v25  ;;  %v2897_v39 = vld [vmem:[#allocation26 + $0x28] sm:$0xff]  ;;  %v3239_v25 = vld [vmem:[#allocation26 + $0xad8] sm:$0xff]  ;;  %v3168_v26 = vld [vmem:[#allocation26 + $0x8a0] sm:$0xff] }
 0x640   : > { %v3169_v27 = vld [vmem:[#allocation26 + $0x8a8] sm:$0xff]  ;;  %v3220_v15 = vld [vmem:[#allocation26 + $0xa40] sm:$0xff] }
 0x641   : > { %v6838_v31 = vadd.f32 %v2889_v11, %v6814_v4  ;;  %3630 = vmatpush.msrb.mxu0 %v3130_v28  ;;  %3670 = vmatpush.msrb.mxu2 %v3131_v29  ;;  %v3076_v4 = vld [vmem:[#allocation26 + $0x5c0] sm:$0xff]  ;;  %v3221_v28 = vld [vmem:[#allocation26 + $0xa48] sm:$0xff]  ;;  %v3150_v29 = vld [vmem:[#allocation26 + $0x810] sm:$0xff] }
 0x642   : > { %v3151_v11 = vld [vmem:[#allocation26 + $0x818] sm:$0xff] }
 0x643   : > { %3504 = vmatmul.f32.vlgmr.msrb.gmra.mxu1 %v6838_v31  ;;  %3544 = vmatmul.f32.vlgmr.msrb.gmra.mxu3 %v6838_v31 }
 0x644   : > { %3631 = vmatpush.msrb.mxu0 %v3112_v32  ;;  %3648 = vmatpush.msrb.mxu1 %v3454_v33  ;;  %v3202_v32 = vld [vmem:[#allocation26 + $0x9b0] sm:$0xff]  ;;  %v3203_v33 = vld [vmem:[#allocation26 + $0x9b8] sm:$0xff] }
 0x645   : > { %3671 = vmatpush.msrb.mxu2 %v3113_v34  ;;  %3688 = vmatpush.msrb.mxu3 %v3455_v35  ;;  %v3132_v34 = vld [vmem:[#allocation26 + $0x780] sm:$0xff]  ;;  %v3133_v35 = vld [vmem:[#allocation26 + $0x788] sm:$0xff] }
 0x646   : > { %3564 = vmatmul.f32.vlgmr.msra.gmra.mxu0 %v6831_v19  ;;  %3604 = vmatmul.f32.vlgmr.msra.gmra.mxu2 %v6831_v19 }
 0x647   : > { %3632 = vmatpush.msrb.mxu0 %v3094_v2  ;;  %3649 = vmatpush.msrb.mxu1 %v3436_v37  ;;  %v3184_v2 = vld [vmem:[#allocation26 + $0x920] sm:$0xff]  ;;  %v3185_v37 = vld [vmem:[#allocation26 + $0x928] sm:$0xff] }
 0x648   : > { %3672 = vmatpush.msrb.mxu2 %v3095_v38  ;;  %3689 = vmatpush.msrb.mxu3 %v3437_v20  ;;  %v3114_v38 = vld [vmem:[#allocation26 + $0x6f0] sm:$0xff]  ;;  %v3456_v20 = vld [vmem:[#allocation26 + $0x11a0] sm:$0xff] }
 0x649   : > { %3633 = vmatpush.msrb.mxu0 %v3076_v4  ;;  %3650 = vmatpush.msrb.mxu1 %v3418_v30  ;;  %v3115_v4 = vld [vmem:[#allocation26 + $0x6f8] sm:$0xff]  ;;  %v3457_v30 = vld [vmem:[#allocation26 + $0x11a8] sm:$0xff] }
 0x64a   : > { %3673 = vmatpush.msrb.mxu2 %v3077_v40  ;;  %3690 = vmatpush.msrb.mxu3 %v3419_v41  ;;  %v3096_v40 = vld [vmem:[#allocation26 + $0x660] sm:$0xff]  ;;  %v3438_v41 = vld [vmem:[#allocation26 + $0x1110] sm:$0xff] }
 0x64b   : > { %3634 = vmatpush.msrb.mxu0 %v3058_v42  ;;  %3651 = vmatpush.msrb.mxu1 %v3400_v43  ;;  %v3097_v42 = vld [vmem:[#allocation26 + $0x668] sm:$0xff]  ;;  %v3439_v43 = vld [vmem:[#allocation26 + $0x1118] sm:$0xff] }
 0x64c   : > { %3674 = vmatpush.msrb.mxu2 %v3059_v44  ;;  %3691 = vmatpush.msrb.mxu3 %v3401_v47  ;;  %v3078_v44 = vld [vmem:[#allocation26 + $0x5d0] sm:$0xff]  ;;  %v3420_v47 = vld [vmem:[#allocation26 + $0x1080] sm:$0xff] }
 0x64d   : > { %3584 = vmatmul.f32.vlgmr.msra.gmra.mxu1 %v6838_v31  ;;  %3624 = vmatmul.f32.vlgmr.msra.gmra.mxu3 %v6838_v31 }
 0x64e   : > { %3635 = vmatpush.msrb.mxu0 %v3040_v18  ;;  %3652 = vmatpush.msrb.mxu1 %v3382_v48  ;;  %v3079_v18 = vld [vmem:[#allocation26 + $0x5d8] sm:$0xff]  ;;  %v3421_v48 = vld [vmem:[#allocation26 + $0x1088] sm:$0xff] }
 0x64f   : > { %3675 = vmatpush.msrb.mxu2 %v3041_v36  ;;  %3692 = vmatpush.msrb.mxu3 %v3383_v49  ;;  %v3060_v36 = vld [vmem:[#allocation26 + $0x540] sm:$0xff]  ;;  %v3402_v49 = vld [vmem:[#allocation26 + $0xff0] sm:$0xff] }
 0x650   : > { %3636 = vmatpush.msrb.mxu0 %v3022_v63  ;;  %3653 = vmatpush.msrb.mxu1 %v3364_v1  ;;  %v3061_v63 = vld [vmem:[#allocation26 + $0x548] sm:$0xff]  ;;  %v3403_v1 = vld [vmem:[#allocation26 + $0xff8] sm:$0xff] }
 0x651   : > { %3676 = vmatpush.msrb.mxu2 %v3023_v5  ;;  %3693 = vmatpush.msrb.mxu3 %v3365_v50  ;;  %v3042_v5 = vld [vmem:[#allocation26 + $0x4b0] sm:$0xff]  ;;  %v3384_v50 = vld [vmem:[#allocation26 + $0xf60] sm:$0xff] }
 0x652   : > { %3637 = vmatpush.msrb.mxu0 %v3004_v52  ;;  %3654 = vmatpush.msrb.mxu1 %v3346_v7  ;;  %v3043_v52 = vld [vmem:[#allocation26 + $0x4b8] sm:$0xff]  ;;  %v3385_v7 = vld [vmem:[#allocation26 + $0xf68] sm:$0xff] }
 0x653   : > { %3677 = vmatpush.msrb.mxu2 %v3005_v51  ;;  %3694 = vmatpush.msrb.mxu3 %v3347_v53  ;;  %v3024_v51 = vld [vmem:[#allocation26 + $0x420] sm:$0xff]  ;;  %v3366_v53 = vld [vmem:[#allocation26 + $0xed0] sm:$0xff] }
 0x654   : > { %3638 = vmatpush.msrb.mxu0 %v2986_v54  ;;  %3655 = vmatpush.msrb.mxu1 %v3328_v16  ;;  %v3025_v54 = vld [vmem:[#allocation26 + $0x428] sm:$0xff]  ;;  %v3367_v16 = vld [vmem:[#allocation26 + $0xed8] sm:$0xff] }
 0x655   : > { %3678 = vmatpush.msrb.mxu2 %v2987_v57  ;;  %3695 = vmatpush.msrb.mxu3 %v3329_v58  ;;  %v3006_v57 = vld [vmem:[#allocation26 + $0x390] sm:$0xff]  ;;  %v3348_v58 = vld [vmem:[#allocation26 + $0xe40] sm:$0xff] }
 0x656   : > { %3639 = vmatpush.msrb.mxu0 %v2968_v59  ;;  %3656 = vmatpush.msrb.mxu1 %v3310_v60  ;;  %v3007_v59 = vld [vmem:[#allocation26 + $0x398] sm:$0xff]  ;;  %v3349_v60 = vld [vmem:[#allocation26 + $0xe48] sm:$0xff] }
 0x657   : > { %3679 = vmatpush.msrb.mxu2 %v2969_v3  ;;  %3696 = vmatpush.msrb.mxu3 %v3311_v12  ;;  %v2988_v3 = vld [vmem:[#allocation26 + $0x300] sm:$0xff]  ;;  %v3330_v12 = vld [vmem:[#allocation26 + $0xdb0] sm:$0xff] }
 0x658   : > { %3640 = vmatpush.msrb.mxu0 %v2950_v61  ;;  %3657 = vmatpush.msrb.mxu1 %v3292_v13  ;;  %v2989_v61 = vld [vmem:[#allocation26 + $0x308] sm:$0xff]  ;;  %v3331_v13 = vld [vmem:[#allocation26 + $0xdb8] sm:$0xff] }
 0x659   : > { %3680 = vmatpush.msrb.mxu2 %v2951_v62  ;;  %3697 = vmatpush.msrb.mxu3 %v3293_v0  ;;  %v2970_v62 = vld [vmem:[#allocation26 + $0x270] sm:$0xff]  ;;  %v3312_v0 = vld [vmem:[#allocation26 + $0xd20] sm:$0xff] }
 0x65a   : > { %3641 = vmatpush.msrb.mxu0 %v2932_v6  ;;  %3658 = vmatpush.msrb.mxu1 %v3274_v10  ;;  %v2971_v6 = vld [vmem:[#allocation26 + $0x278] sm:$0xff]  ;;  %v3313_v10 = vld [vmem:[#allocation26 + $0xd28] sm:$0xff] }
 0x65b   : > { %3681 = vmatpush.msrb.mxu2 %v2933_v9  ;;  %3698 = vmatpush.msrb.mxu3 %v3275_v55  ;;  %v2952_v9 = vld [vmem:[#allocation26 + $0x1e0] sm:$0xff]  ;;  %v3294_v55 = vld [vmem:[#allocation26 + $0xc90] sm:$0xff] }
 0x65c   : > { %3642 = vmatpush.msrb.mxu0 %v2914_v17  ;;  %3659 = vmatpush.msrb.mxu1 %v3256_v56  ;;  %v2953_v17 = vld [vmem:[#allocation26 + $0x1e8] sm:$0xff]  ;;  %v3295_v56 = vld [vmem:[#allocation26 + $0xc98] sm:$0xff] }
 0x65d   : > { %3682 = vmatpush.msrb.mxu2 %v2915_v21  ;;  %3699 = vmatpush.msrb.mxu3 %v3257_v22  ;;  %v2934_v21 = vld [vmem:[#allocation26 + $0x150] sm:$0xff]  ;;  %v3276_v22 = vld [vmem:[#allocation26 + $0xc00] sm:$0xff] }
 0x65e   : > { %3643 = vmatpush.msrb.mxu0 %v2896_v23  ;;  %3660 = vmatpush.msrb.mxu1 %v3238_v24  ;;  %v2935_v23 = vld [vmem:[#allocation26 + $0x158] sm:$0xff]  ;;  %v3277_v24 = vld [vmem:[#allocation26 + $0xc08] sm:$0xff] }
 0x65f   : > { %3683 = vmatpush.msrb.mxu2 %v2897_v39  ;;  %3700 = vmatpush.msrb.mxu3 %v3239_v25  ;;  %v2916_v39 = vld [vmem:[#allocation26 + $0xc0] sm:$0xff]  ;;  %v3258_v25 = vld [vmem:[#allocation26 + $0xb70] sm:$0xff] }
 0x660   : > { %3644 = vmatmul.f32.vlgmr.msrb.gmra.mxu0 %v6831_v19  ;;  %3684 = vmatmul.f32.vlgmr.msrb.gmra.mxu2 %v6831_v19 }
 0x661   : > { %3708 = vmatpush.msra.mxu0 %v3168_v26  ;;  %3748 = vmatpush.msra.mxu2 %v3169_v27  ;;  %v2917_v26 = vld [vmem:[#allocation26 + $0xc8] sm:$0xff]  ;;  %v3259_v27 = vld [vmem:[#allocation26 + $0xb78] sm:$0xff] }
 0x662   : > { %3661 = vmatpush.msrb.mxu1 %v3220_v15  ;;  %3701 = vmatpush.msrb.mxu3 %v3221_v28  ;;  %v2898_v15 = vld [vmem:[#allocation26 + $0x30] sm:$0xff]  ;;  %v3240_v28 = vld [vmem:[#allocation26 + $0xae0] sm:$0xff] }
 0x663   : > { %3709 = vmatpush.msra.mxu0 %v3150_v29  ;;  %3749 = vmatpush.msra.mxu2 %v3151_v11  ;;  %v2899_v29 = vld [vmem:[#allocation26 + $0x38] sm:$0xff]  ;;  %v3241_v11 = vld [vmem:[#allocation26 + $0xae8] sm:$0xff] }
 0x664   : > { %3662 = vmatpush.msrb.mxu1 %v3202_v32  ;;  %3702 = vmatpush.msrb.mxu3 %v3203_v33  ;;  %v3170_v32 = vld [vmem:[#allocation26 + $0x8b0] sm:$0xff]  ;;  %v3171_v33 = vld [vmem:[#allocation26 + $0x8b8] sm:$0xff] }
 0x665   : > { %3710 = vmatpush.msra.mxu0 %v3132_v34  ;;  %3750 = vmatpush.msra.mxu2 %v3133_v35  ;;  %v3222_v34 = vld [vmem:[#allocation26 + $0xa50] sm:$0xff]  ;;  %v3223_v35 = vld [vmem:[#allocation26 + $0xa58] sm:$0xff] }
 0x666   : > { %3663 = vmatpush.msrb.mxu1 %v3184_v2  ;;  %3703 = vmatpush.msrb.mxu3 %v3185_v37  ;;  %v3152_v2 = vld [vmem:[#allocation26 + $0x820] sm:$0xff]  ;;  %v3153_v37 = vld [vmem:[#allocation26 + $0x828] sm:$0xff] }
 0x667   : > { %3664 = vmatmul.f32.vlgmr.msrb.gmra.mxu1 %v6838_v31  ;;  %3704 = vmatmul.f32.vlgmr.msrb.gmra.mxu3 %v6838_v31 }
 0x668   : > { %3711 = vmatpush.msra.mxu0 %v3114_v38  ;;  %3728 = vmatpush.msra.mxu1 %v3456_v20  ;;  %v3204_v38 = vld [vmem:[#allocation26 + $0x9c0] sm:$0xff]  ;;  %v3205_v20 = vld [vmem:[#allocation26 + $0x9c8] sm:$0xff] }
 0x669   : > { %3751 = vmatpush.msra.mxu2 %v3115_v4  ;;  %3768 = vmatpush.msra.mxu3 %v3457_v30  ;;  %v3134_v4 = vld [vmem:[#allocation26 + $0x790] sm:$0xff]  ;;  %v3135_v30 = vld [vmem:[#allocation26 + $0x798] sm:$0xff] }
 0x66a   : > { %3712 = vmatpush.msra.mxu0 %v3096_v40  ;;  %3729 = vmatpush.msra.mxu1 %v3438_v41  ;;  %v3186_v40 = vld [vmem:[#allocation26 + $0x930] sm:$0xff]  ;;  %v3187_v41 = vld [vmem:[#allocation26 + $0x938] sm:$0xff] }
 0x66b   : > { %3752 = vmatpush.msra.mxu2 %v3097_v42  ;;  %3769 = vmatpush.msra.mxu3 %v3439_v43  ;;  %v3116_v42 = vld [vmem:[#allocation26 + $0x700] sm:$0xff]  ;;  %v3458_v43 = vld [vmem:[#allocation26 + $0x11b0] sm:$0xff] }
 0x66c   : > { %3713 = vmatpush.msra.mxu0 %v3078_v44  ;;  %3730 = vmatpush.msra.mxu1 %v3420_v47  ;;  %v3117_v44 = vld [vmem:[#allocation26 + $0x708] sm:$0xff]  ;;  %v3459_v47 = vld [vmem:[#allocation26 + $0x11b8] sm:$0xff] }
 0x66d   : > { %3753 = vmatpush.msra.mxu2 %v3079_v18  ;;  %3770 = vmatpush.msra.mxu3 %v3421_v48  ;;  %v3098_v18 = vld [vmem:[#allocation26 + $0x670] sm:$0xff]  ;;  %v3440_v48 = vld [vmem:[#allocation26 + $0x1120] sm:$0xff] }
 0x66e   : > { %3714 = vmatpush.msra.mxu0 %v3060_v36  ;;  %3731 = vmatpush.msra.mxu1 %v3402_v49  ;;  %v3099_v36 = vld [vmem:[#allocation26 + $0x678] sm:$0xff]  ;;  %v3441_v49 = vld [vmem:[#allocation26 + $0x1128] sm:$0xff] }
 0x66f   : > { %3754 = vmatpush.msra.mxu2 %v3061_v63  ;;  %3771 = vmatpush.msra.mxu3 %v3403_v1  ;;  %v3080_v63 = vld [vmem:[#allocation26 + $0x5e0] sm:$0xff]  ;;  %v3422_v1 = vld [vmem:[#allocation26 + $0x1090] sm:$0xff] }
 0x670   : > { %3715 = vmatpush.msra.mxu0 %v3042_v5  ;;  %3732 = vmatpush.msra.mxu1 %v3384_v50  ;;  %v3081_v5 = vld [vmem:[#allocation26 + $0x5e8] sm:$0xff]  ;;  %v3423_v50 = vld [vmem:[#allocation26 + $0x1098] sm:$0xff] }
 0x671   : > { %3755 = vmatpush.msra.mxu2 %v3043_v52  ;;  %3772 = vmatpush.msra.mxu3 %v3385_v7  ;;  %v3062_v52 = vld [vmem:[#allocation26 + $0x550] sm:$0xff]  ;;  %v3404_v7 = vld [vmem:[#allocation26 + $0x1000] sm:$0xff] }
 0x672   : > { %3716 = vmatpush.msra.mxu0 %v3024_v51  ;;  %3733 = vmatpush.msra.mxu1 %v3366_v53  ;;  %v3063_v51 = vld [vmem:[#allocation26 + $0x558] sm:$0xff]  ;;  %v3405_v53 = vld [vmem:[#allocation26 + $0x1008] sm:$0xff] }
 0x673   : > { %3756 = vmatpush.msra.mxu2 %v3025_v54  ;;  %3773 = vmatpush.msra.mxu3 %v3367_v16  ;;  %v3044_v54 = vld [vmem:[#allocation26 + $0x4c0] sm:$0xff]  ;;  %v3386_v16 = vld [vmem:[#allocation26 + $0xf70] sm:$0xff] }
 0x674   : > { %3717 = vmatpush.msra.mxu0 %v3006_v57  ;;  %3734 = vmatpush.msra.mxu1 %v3348_v58  ;;  %v3045_v57 = vld [vmem:[#allocation26 + $0x4c8] sm:$0xff]  ;;  %v3387_v58 = vld [vmem:[#allocation26 + $0xf78] sm:$0xff] }
 0x675   : > { %3757 = vmatpush.msra.mxu2 %v3007_v59  ;;  %3774 = vmatpush.msra.mxu3 %v3349_v60  ;;  %v3026_v59 = vld [vmem:[#allocation26 + $0x430] sm:$0xff]  ;;  %v3368_v60 = vld [vmem:[#allocation26 + $0xee0] sm:$0xff] }
 0x676   : > { %3718 = vmatpush.msra.mxu0 %v2988_v3  ;;  %3735 = vmatpush.msra.mxu1 %v3330_v12  ;;  %v3027_v3 = vld [vmem:[#allocation26 + $0x438] sm:$0xff]  ;;  %v3369_v12 = vld [vmem:[#allocation26 + $0xee8] sm:$0xff] }
 0x677   : > { %3758 = vmatpush.msra.mxu2 %v2989_v61  ;;  %3775 = vmatpush.msra.mxu3 %v3331_v13  ;;  %v3008_v61 = vld [vmem:[#allocation26 + $0x3a0] sm:$0xff]  ;;  %v3350_v13 = vld [vmem:[#allocation26 + $0xe50] sm:$0xff] }
 0x678   : > { %3719 = vmatpush.msra.mxu0 %v2970_v62  ;;  %3736 = vmatpush.msra.mxu1 %v3312_v0  ;;  %v3009_v62 = vld [vmem:[#allocation26 + $0x3a8] sm:$0xff]  ;;  %v3351_v0 = vld [vmem:[#allocation26 + $0xe58] sm:$0xff] }
 0x679   : > { %3759 = vmatpush.msra.mxu2 %v2971_v6  ;;  %3776 = vmatpush.msra.mxu3 %v3313_v10  ;;  %v2990_v6 = vld [vmem:[#allocation26 + $0x310] sm:$0xff]  ;;  %v3332_v10 = vld [vmem:[#allocation26 + $0xdc0] sm:$0xff] }
 0x67a   : > { %3720 = vmatpush.msra.mxu0 %v2952_v9  ;;  %3737 = vmatpush.msra.mxu1 %v3294_v55  ;;  %v2991_v9 = vld [vmem:[#allocation26 + $0x318] sm:$0xff]  ;;  %v3333_v55 = vld [vmem:[#allocation26 + $0xdc8] sm:$0xff] }
 0x67b   : > { %3760 = vmatpush.msra.mxu2 %v2953_v17  ;;  %3777 = vmatpush.msra.mxu3 %v3295_v56  ;;  %v2972_v17 = vld [vmem:[#allocation26 + $0x280] sm:$0xff]  ;;  %v3314_v56 = vld [vmem:[#allocation26 + $0xd30] sm:$0xff] }
 0x67c   : > { %3721 = vmatpush.msra.mxu0 %v2934_v21  ;;  %3738 = vmatpush.msra.mxu1 %v3276_v22  ;;  %v2973_v21 = vld [vmem:[#allocation26 + $0x288] sm:$0xff]  ;;  %v3315_v22 = vld [vmem:[#allocation26 + $0xd38] sm:$0xff] }
 0x67d   : > { %3761 = vmatpush.msra.mxu2 %v2935_v23  ;;  %3778 = vmatpush.msra.mxu3 %v3277_v24  ;;  %v2954_v23 = vld [vmem:[#allocation26 + $0x1f0] sm:$0xff]  ;;  %v3296_v24 = vld [vmem:[#allocation26 + $0xca0] sm:$0xff] }
 0x67e   : > { %3722 = vmatpush.msra.mxu0 %v2916_v39  ;;  %3739 = vmatpush.msra.mxu1 %v3258_v25  ;;  %v2955_v39 = vld [vmem:[#allocation26 + $0x1f8] sm:$0xff]  ;;  %v3297_v25 = vld [vmem:[#allocation26 + $0xca8] sm:$0xff] }
 0x67f   : > { %3762 = vmatpush.msra.mxu2 %v2917_v26  ;;  %3779 = vmatpush.msra.mxu3 %v3259_v27  ;;  %v2936_v26 = vld [vmem:[#allocation26 + $0x160] sm:$0xff]  ;;  %v3278_v27 = vld [vmem:[#allocation26 + $0xc10] sm:$0xff] }
 0x680   : > { %3723 = vmatpush.msra.mxu0 %v2898_v15  ;;  %3740 = vmatpush.msra.mxu1 %v3240_v28  ;;  %v2937_v15 = vld [vmem:[#allocation26 + $0x168] sm:$0xff]  ;;  %v3279_v28 = vld [vmem:[#allocation26 + $0xc18] sm:$0xff] }
 0x681   : > { %3763 = vmatpush.msra.mxu2 %v2899_v29  ;;  %3780 = vmatpush.msra.mxu3 %v3241_v11  ;;  %v2918_v29 = vld [vmem:[#allocation26 + $0xd0] sm:$0xff]  ;;  %v3260_v11 = vld [vmem:[#allocation26 + $0xb80] sm:$0xff] }
 0x682   : > { %3724 = vmatmul.f32.vlgmr.msra.gmra.mxu0 %v6831_v19  ;;  %3764 = vmatmul.f32.vlgmr.msra.gmra.mxu2 %v6831_v19 }
 0x683   : > { %3788 = vmatpush.msrb.mxu0 %v3170_v32  ;;  %3828 = vmatpush.msrb.mxu2 %v3171_v33  ;;  %v2919_v32 = vld [vmem:[#allocation26 + $0xd8] sm:$0xff]  ;;  %v3261_v33 = vld [vmem:[#allocation26 + $0xb88] sm:$0xff] }
 0x684   : > { %3741 = vmatpush.msra.mxu1 %v3222_v34  ;;  %3781 = vmatpush.msra.mxu3 %v3223_v35  ;;  %v2900_v34 = vld [vmem:[#allocation26 + $0x40] sm:$0xff]  ;;  %v3242_v35 = vld [vmem:[#allocation26 + $0xaf0] sm:$0xff] }
 0x685   : > { %3789 = vmatpush.msrb.mxu0 %v3152_v2  ;;  %3829 = vmatpush.msrb.mxu2 %v3153_v37  ;;  %v2901_v2 = vld [vmem:[#allocation26 + $0x48] sm:$0xff]  ;;  %v3243_v37 = vld [vmem:[#allocation26 + $0xaf8] sm:$0xff] }
 0x686   : > { %3742 = vmatpush.msra.mxu1 %v3204_v38  ;;  %3782 = vmatpush.msra.mxu3 %v3205_v20  ;;  %v3172_v38 = vld [vmem:[#allocation26 + $0x8c0] sm:$0xff]  ;;  %v3173_v20 = vld [vmem:[#allocation26 + $0x8c8] sm:$0xff] }
 0x687   : > { %3790 = vmatpush.msrb.mxu0 %v3134_v4  ;;  %3830 = vmatpush.msrb.mxu2 %v3135_v30  ;;  %v3224_v4 = vld [vmem:[#allocation26 + $0xa60] sm:$0xff]  ;;  %v3225_v30 = vld [vmem:[#allocation26 + $0xa68] sm:$0xff] }
 0x688   : > { %3743 = vmatpush.msra.mxu1 %v3186_v40  ;;  %3783 = vmatpush.msra.mxu3 %v3187_v41  ;;  %v3154_v40 = vld [vmem:[#allocation26 + $0x830] sm:$0xff]  ;;  %v3155_v41 = vld [vmem:[#allocation26 + $0x838] sm:$0xff] }
 0x689   : > { %3744 = vmatmul.f32.vlgmr.msra.gmra.mxu1 %v6838_v31  ;;  %3784 = vmatmul.f32.vlgmr.msra.gmra.mxu3 %v6838_v31 }
 0x68a   : > { %3791 = vmatpush.msrb.mxu0 %v3116_v42  ;;  %3808 = vmatpush.msrb.mxu1 %v3458_v43  ;;  %v3206_v42 = vld [vmem:[#allocation26 + $0x9d0] sm:$0xff]  ;;  %v3207_v43 = vld [vmem:[#allocation26 + $0x9d8] sm:$0xff] }
 0x68b   : > { %3831 = vmatpush.msrb.mxu2 %v3117_v44  ;;  %3848 = vmatpush.msrb.mxu3 %v3459_v47  ;;  %v3136_v44 = vld [vmem:[#allocation26 + $0x7a0] sm:$0xff]  ;;  %v3137_v47 = vld [vmem:[#allocation26 + $0x7a8] sm:$0xff] }
 0x68c   : > { %3792 = vmatpush.msrb.mxu0 %v3098_v18  ;;  %3809 = vmatpush.msrb.mxu1 %v3440_v48  ;;  %v3188_v18 = vld [vmem:[#allocation26 + $0x940] sm:$0xff]  ;;  %v3189_v48 = vld [vmem:[#allocation26 + $0x948] sm:$0xff] }
 0x68d   : > { %3832 = vmatpush.msrb.mxu2 %v3099_v36  ;;  %3849 = vmatpush.msrb.mxu3 %v3441_v49  ;;  %v3118_v36 = vld [vmem:[#allocation26 + $0x710] sm:$0xff]  ;;  %v3460_v49 = vld [vmem:[#allocation26 + $0x11c0] sm:$0xff] }
 0x68e   : > { %3793 = vmatpush.msrb.mxu0 %v3080_v63  ;;  %3810 = vmatpush.msrb.mxu1 %v3422_v1  ;;  %v3119_v63 = vld [vmem:[#allocation26 + $0x718] sm:$0xff]  ;;  %v3461_v1 = vld [vmem:[#allocation26 + $0x11c8] sm:$0xff] }
 0x68f   : > { %3833 = vmatpush.msrb.mxu2 %v3081_v5  ;;  %3850 = vmatpush.msrb.mxu3 %v3423_v50  ;;  %v3100_v5 = vld [vmem:[#allocation26 + $0x680] sm:$0xff]  ;;  %v3442_v50 = vld [vmem:[#allocation26 + $0x1130] sm:$0xff] }
 0x690   : > { %3794 = vmatpush.msrb.mxu0 %v3062_v52  ;;  %3811 = vmatpush.msrb.mxu1 %v3404_v7  ;;  %v3101_v52 = vld [vmem:[#allocation26 + $0x688] sm:$0xff]  ;;  %v3443_v7 = vld [vmem:[#allocation26 + $0x1138] sm:$0xff] }
 0x691   : > { %3834 = vmatpush.msrb.mxu2 %v3063_v51  ;;  %3851 = vmatpush.msrb.mxu3 %v3405_v53  ;;  %v3082_v51 = vld [vmem:[#allocation26 + $0x5f0] sm:$0xff]  ;;  %v3424_v53 = vld [vmem:[#allocation26 + $0x10a0] sm:$0xff] }
 0x692   : > { %3795 = vmatpush.msrb.mxu0 %v3044_v54  ;;  %3812 = vmatpush.msrb.mxu1 %v3386_v16  ;;  %v3083_v54 = vld [vmem:[#allocation26 + $0x5f8] sm:$0xff]  ;;  %v3425_v16 = vld [vmem:[#allocation26 + $0x10a8] sm:$0xff] }
 0x693   : > { %3835 = vmatpush.msrb.mxu2 %v3045_v57  ;;  %3852 = vmatpush.msrb.mxu3 %v3387_v58  ;;  %v3064_v57 = vld [vmem:[#allocation26 + $0x560] sm:$0xff]  ;;  %v3406_v58 = vld [vmem:[#allocation26 + $0x1010] sm:$0xff] }
 0x694   : > { %3796 = vmatpush.msrb.mxu0 %v3026_v59  ;;  %3813 = vmatpush.msrb.mxu1 %v3368_v60  ;;  %v3065_v59 = vld [vmem:[#allocation26 + $0x568] sm:$0xff]  ;;  %v3407_v60 = vld [vmem:[#allocation26 + $0x1018] sm:$0xff] }
 0x695   : > { %3836 = vmatpush.msrb.mxu2 %v3027_v3  ;;  %3853 = vmatpush.msrb.mxu3 %v3369_v12  ;;  %v3046_v3 = vld [vmem:[#allocation26 + $0x4d0] sm:$0xff]  ;;  %v3388_v12 = vld [vmem:[#allocation26 + $0xf80] sm:$0xff] }
 0x696   : > { %3797 = vmatpush.msrb.mxu0 %v3008_v61  ;;  %3814 = vmatpush.msrb.mxu1 %v3350_v13  ;;  %v3047_v61 = vld [vmem:[#allocation26 + $0x4d8] sm:$0xff]  ;;  %v3389_v13 = vld [vmem:[#allocation26 + $0xf88] sm:$0xff] }
 0x697   : > { %3837 = vmatpush.msrb.mxu2 %v3009_v62  ;;  %3854 = vmatpush.msrb.mxu3 %v3351_v0  ;;  %v3028_v62 = vld [vmem:[#allocation26 + $0x440] sm:$0xff]  ;;  %v3370_v0 = vld [vmem:[#allocation26 + $0xef0] sm:$0xff] }
 0x698   : > { %3798 = vmatpush.msrb.mxu0 %v2990_v6  ;;  %3815 = vmatpush.msrb.mxu1 %v3332_v10  ;;  %v3029_v6 = vld [vmem:[#allocation26 + $0x448] sm:$0xff]  ;;  %v3371_v10 = vld [vmem:[#allocation26 + $0xef8] sm:$0xff] }
 0x699   : > { %3838 = vmatpush.msrb.mxu2 %v2991_v9  ;;  %3855 = vmatpush.msrb.mxu3 %v3333_v55  ;;  %v3010_v9 = vld [vmem:[#allocation26 + $0x3b0] sm:$0xff]  ;;  %v3352_v55 = vld [vmem:[#allocation26 + $0xe60] sm:$0xff] }
 0x69a   : > { %3799 = vmatpush.msrb.mxu0 %v2972_v17  ;;  %3816 = vmatpush.msrb.mxu1 %v3314_v56  ;;  %v3011_v17 = vld [vmem:[#allocation26 + $0x3b8] sm:$0xff]  ;;  %v3353_v56 = vld [vmem:[#allocation26 + $0xe68] sm:$0xff] }
 0x69b   : > { %3839 = vmatpush.msrb.mxu2 %v2973_v21  ;;  %3856 = vmatpush.msrb.mxu3 %v3315_v22  ;;  %v2992_v21 = vld [vmem:[#allocation26 + $0x320] sm:$0xff]  ;;  %v3334_v22 = vld [vmem:[#allocation26 + $0xdd0] sm:$0xff] }
 0x69c   : > { %3800 = vmatpush.msrb.mxu0 %v2954_v23  ;;  %3817 = vmatpush.msrb.mxu1 %v3296_v24  ;;  %v2993_v23 = vld [vmem:[#allocation26 + $0x328] sm:$0xff]  ;;  %v3335_v24 = vld [vmem:[#allocation26 + $0xdd8] sm:$0xff] }
 0x69d   : > { %3840 = vmatpush.msrb.mxu2 %v2955_v39  ;;  %3857 = vmatpush.msrb.mxu3 %v3297_v25  ;;  %v2974_v39 = vld [vmem:[#allocation26 + $0x290] sm:$0xff]  ;;  %v3316_v25 = vld [vmem:[#allocation26 + $0xd40] sm:$0xff] }
 0x69e   : > { %3801 = vmatpush.msrb.mxu0 %v2936_v26  ;;  %3818 = vmatpush.msrb.mxu1 %v3278_v27  ;;  %v2975_v26 = vld [vmem:[#allocation26 + $0x298] sm:$0xff]  ;;  %v3317_v27 = vld [vmem:[#allocation26 + $0xd48] sm:$0xff] }
 0x69f   : > { %3841 = vmatpush.msrb.mxu2 %v2937_v15  ;;  %3858 = vmatpush.msrb.mxu3 %v3279_v28  ;;  %v2956_v15 = vld [vmem:[#allocation26 + $0x200] sm:$0xff]  ;;  %v3298_v28 = vld [vmem:[#allocation26 + $0xcb0] sm:$0xff] }
 0x6a0   : > { %3802 = vmatpush.msrb.mxu0 %v2918_v29  ;;  %3819 = vmatpush.msrb.mxu1 %v3260_v11  ;;  %v2957_v29 = vld [vmem:[#allocation26 + $0x208] sm:$0xff]  ;;  %v3299_v11 = vld [vmem:[#allocation26 + $0xcb8] sm:$0xff] }
 0x6a1   : > { %3842 = vmatpush.msrb.mxu2 %v2919_v32  ;;  %3859 = vmatpush.msrb.mxu3 %v3261_v33  ;;  %v2938_v32 = vld [vmem:[#allocation26 + $0x170] sm:$0xff]  ;;  %v3280_v33 = vld [vmem:[#allocation26 + $0xc20] sm:$0xff] }
 0x6a2   : > { %3803 = vmatpush.msrb.mxu0 %v2900_v34  ;;  %3820 = vmatpush.msrb.mxu1 %v3242_v35  ;;  %v2939_v34 = vld [vmem:[#allocation26 + $0x178] sm:$0xff]  ;;  %v3281_v35 = vld [vmem:[#allocation26 + $0xc28] sm:$0xff] }
 0x6a3   : > { %3843 = vmatpush.msrb.mxu2 %v2901_v2  ;;  %3860 = vmatpush.msrb.mxu3 %v3243_v37  ;;  %v2920_v2 = vld [vmem:[#allocation26 + $0xe0] sm:$0xff]  ;;  %v3262_v37 = vld [vmem:[#allocation26 + $0xb90] sm:$0xff] }
 0x6a4   : > { %3804 = vmatmul.f32.vlgmr.msrb.gmra.mxu0 %v6831_v19  ;;  %3844 = vmatmul.f32.vlgmr.msrb.gmra.mxu2 %v6831_v19 }
 0x6a5   : > { %3868 = vmatpush.msra.mxu0 %v3172_v38  ;;  %3908 = vmatpush.msra.mxu2 %v3173_v20  ;;  %v2921_v38 = vld [vmem:[#allocation26 + $0xe8] sm:$0xff]  ;;  %v3263_v20 = vld [vmem:[#allocation26 + $0xb98] sm:$0xff] }
 0x6a6   : > { %3821 = vmatpush.msrb.mxu1 %v3224_v4  ;;  %3861 = vmatpush.msrb.mxu3 %v3225_v30  ;;  %v2902_v4 = vld [vmem:[#allocation26 + $0x50] sm:$0xff]  ;;  %v3244_v30 = vld [vmem:[#allocation26 + $0xb00] sm:$0xff] }
 0x6a7   : > { %3869 = vmatpush.msra.mxu0 %v3154_v40  ;;  %3909 = vmatpush.msra.mxu2 %v3155_v41  ;;  %v2903_v40 = vld [vmem:[#allocation26 + $0x58] sm:$0xff]  ;;  %v3245_v41 = vld [vmem:[#allocation26 + $0xb08] sm:$0xff] }
 0x6a8   : > { %3822 = vmatpush.msrb.mxu1 %v3206_v42  ;;  %3862 = vmatpush.msrb.mxu3 %v3207_v43  ;;  %v3174_v42 = vld [vmem:[#allocation26 + $0x8d0] sm:$0xff]  ;;  %v3175_v43 = vld [vmem:[#allocation26 + $0x8d8] sm:$0xff] }
 0x6a9   : > { %3870 = vmatpush.msra.mxu0 %v3136_v44  ;;  %3910 = vmatpush.msra.mxu2 %v3137_v47  ;;  %v3226_v44 = vld [vmem:[#allocation26 + $0xa70] sm:$0xff]  ;;  %v3227_v47 = vld [vmem:[#allocation26 + $0xa78] sm:$0xff] }
 0x6aa   : > { %3823 = vmatpush.msrb.mxu1 %v3188_v18  ;;  %3863 = vmatpush.msrb.mxu3 %v3189_v48  ;;  %v3156_v18 = vld [vmem:[#allocation26 + $0x840] sm:$0xff]  ;;  %v3157_v48 = vld [vmem:[#allocation26 + $0x848] sm:$0xff] }
 0x6ab   : > { %3824 = vmatmul.f32.vlgmr.msrb.gmra.mxu1 %v6838_v31  ;;  %3864 = vmatmul.f32.vlgmr.msrb.gmra.mxu3 %v6838_v31 }
 0x6ac   : > { %3871 = vmatpush.msra.mxu0 %v3118_v36  ;;  %3888 = vmatpush.msra.mxu1 %v3460_v49  ;;  %v3208_v36 = vld [vmem:[#allocation26 + $0x9e0] sm:$0xff]  ;;  %v3209_v49 = vld [vmem:[#allocation26 + $0x9e8] sm:$0xff] }
 0x6ad   : > { %3911 = vmatpush.msra.mxu2 %v3119_v63  ;;  %3928 = vmatpush.msra.mxu3 %v3461_v1  ;;  %v3138_v63 = vld [vmem:[#allocation26 + $0x7b0] sm:$0xff]  ;;  %v3139_v1 = vld [vmem:[#allocation26 + $0x7b8] sm:$0xff] }
 0x6ae   : > { %3872 = vmatpush.msra.mxu0 %v3100_v5  ;;  %3889 = vmatpush.msra.mxu1 %v3442_v50  ;;  %v3190_v5 = vld [vmem:[#allocation26 + $0x950] sm:$0xff]  ;;  %v3191_v50 = vld [vmem:[#allocation26 + $0x958] sm:$0xff] }
 0x6af   : > { %3912 = vmatpush.msra.mxu2 %v3101_v52  ;;  %3929 = vmatpush.msra.mxu3 %v3443_v7  ;;  %v3120_v52 = vld [vmem:[#allocation26 + $0x720] sm:$0xff]  ;;  %v3462_v7 = vld [vmem:[#allocation26 + $0x11d0] sm:$0xff] }
 0x6b0   : > { %3873 = vmatpush.msra.mxu0 %v3082_v51  ;;  %3890 = vmatpush.msra.mxu1 %v3424_v53  ;;  %v3121_v51 = vld [vmem:[#allocation26 + $0x728] sm:$0xff]  ;;  %v3463_v53 = vld [vmem:[#allocation26 + $0x11d8] sm:$0xff] }
 0x6b1   : > { %3913 = vmatpush.msra.mxu2 %v3083_v54  ;;  %3930 = vmatpush.msra.mxu3 %v3425_v16  ;;  %v3102_v54 = vld [vmem:[#allocation26 + $0x690] sm:$0xff]  ;;  %v3444_v16 = vld [vmem:[#allocation26 + $0x1140] sm:$0xff] }
 0x6b2   : > { %3874 = vmatpush.msra.mxu0 %v3064_v57  ;;  %3891 = vmatpush.msra.mxu1 %v3406_v58  ;;  %v3103_v57 = vld [vmem:[#allocation26 + $0x698] sm:$0xff]  ;;  %v3445_v58 = vld [vmem:[#allocation26 + $0x1148] sm:$0xff] }
 0x6b3   : > { %3914 = vmatpush.msra.mxu2 %v3065_v59  ;;  %3931 = vmatpush.msra.mxu3 %v3407_v60  ;;  %v3084_v59 = vld [vmem:[#allocation26 + $0x600] sm:$0xff]  ;;  %v3426_v60 = vld [vmem:[#allocation26 + $0x10b0] sm:$0xff] }
 0x6b4   : > { %3875 = vmatpush.msra.mxu0 %v3046_v3  ;;  %3892 = vmatpush.msra.mxu1 %v3388_v12  ;;  %v3085_v3 = vld [vmem:[#allocation26 + $0x608] sm:$0xff]  ;;  %v3427_v12 = vld [vmem:[#allocation26 + $0x10b8] sm:$0xff] }
 0x6b5   : > { %3915 = vmatpush.msra.mxu2 %v3047_v61  ;;  %3932 = vmatpush.msra.mxu3 %v3389_v13  ;;  %v3066_v61 = vld [vmem:[#allocation26 + $0x570] sm:$0xff]  ;;  %v3408_v13 = vld [vmem:[#allocation26 + $0x1020] sm:$0xff] }
 0x6b6   : > { %3876 = vmatpush.msra.mxu0 %v3028_v62  ;;  %3893 = vmatpush.msra.mxu1 %v3370_v0  ;;  %v3067_v62 = vld [vmem:[#allocation26 + $0x578] sm:$0xff]  ;;  %v3409_v0 = vld [vmem:[#allocation26 + $0x1028] sm:$0xff] }
 0x6b7   : > { %3916 = vmatpush.msra.mxu2 %v3029_v6  ;;  %3933 = vmatpush.msra.mxu3 %v3371_v10  ;;  %v3048_v6 = vld [vmem:[#allocation26 + $0x4e0] sm:$0xff]  ;;  %v3390_v10 = vld [vmem:[#allocation26 + $0xf90] sm:$0xff] }
 0x6b8   : > { %3877 = vmatpush.msra.mxu0 %v3010_v9  ;;  %3894 = vmatpush.msra.mxu1 %v3352_v55  ;;  %v3049_v9 = vld [vmem:[#allocation26 + $0x4e8] sm:$0xff]  ;;  %v3391_v55 = vld [vmem:[#allocation26 + $0xf98] sm:$0xff] }
 0x6b9   : > { %3917 = vmatpush.msra.mxu2 %v3011_v17  ;;  %3934 = vmatpush.msra.mxu3 %v3353_v56  ;;  %v3030_v17 = vld [vmem:[#allocation26 + $0x450] sm:$0xff]  ;;  %v3372_v56 = vld [vmem:[#allocation26 + $0xf00] sm:$0xff] }
 0x6ba   : > { %3878 = vmatpush.msra.mxu0 %v2992_v21  ;;  %3895 = vmatpush.msra.mxu1 %v3334_v22  ;;  %v3031_v21 = vld [vmem:[#allocation26 + $0x458] sm:$0xff]  ;;  %v3373_v22 = vld [vmem:[#allocation26 + $0xf08] sm:$0xff] }
 0x6bb   : > { %3918 = vmatpush.msra.mxu2 %v2993_v23  ;;  %3935 = vmatpush.msra.mxu3 %v3335_v24  ;;  %v3012_v23 = vld [vmem:[#allocation26 + $0x3c0] sm:$0xff]  ;;  %v3354_v24 = vld [vmem:[#allocation26 + $0xe70] sm:$0xff] }
 0x6bc   : > { %3879 = vmatpush.msra.mxu0 %v2974_v39  ;;  %3896 = vmatpush.msra.mxu1 %v3316_v25  ;;  %v3013_v39 = vld [vmem:[#allocation26 + $0x3c8] sm:$0xff]  ;;  %v3355_v25 = vld [vmem:[#allocation26 + $0xe78] sm:$0xff] }
 0x6bd   : > { %3919 = vmatpush.msra.mxu2 %v2975_v26  ;;  %3936 = vmatpush.msra.mxu3 %v3317_v27  ;;  %v2994_v26 = vld [vmem:[#allocation26 + $0x330] sm:$0xff]  ;;  %v3336_v27 = vld [vmem:[#allocation26 + $0xde0] sm:$0xff] }
 0x6be   : > { %3880 = vmatpush.msra.mxu0 %v2956_v15  ;;  %3897 = vmatpush.msra.mxu1 %v3298_v28  ;;  %v2995_v15 = vld [vmem:[#allocation26 + $0x338] sm:$0xff]  ;;  %v3337_v28 = vld [vmem:[#allocation26 + $0xde8] sm:$0xff] }
 0x6bf   : > { %3920 = vmatpush.msra.mxu2 %v2957_v29  ;;  %3937 = vmatpush.msra.mxu3 %v3299_v11  ;;  %v2976_v29 = vld [vmem:[#allocation26 + $0x2a0] sm:$0xff]  ;;  %v3318_v11 = vld [vmem:[#allocation26 + $0xd50] sm:$0xff] }
 0x6c0   : > { %3881 = vmatpush.msra.mxu0 %v2938_v32  ;;  %3898 = vmatpush.msra.mxu1 %v3280_v33  ;;  %v2977_v32 = vld [vmem:[#allocation26 + $0x2a8] sm:$0xff]  ;;  %v3319_v33 = vld [vmem:[#allocation26 + $0xd58] sm:$0xff] }
 0x6c1   : > { %3921 = vmatpush.msra.mxu2 %v2939_v34  ;;  %3938 = vmatpush.msra.mxu3 %v3281_v35  ;;  %v2958_v34 = vld [vmem:[#allocation26 + $0x210] sm:$0xff]  ;;  %v3300_v35 = vld [vmem:[#allocation26 + $0xcc0] sm:$0xff] }
 0x6c2   : > { %3882 = vmatpush.msra.mxu0 %v2920_v2  ;;  %3899 = vmatpush.msra.mxu1 %v3262_v37  ;;  %v2959_v2 = vld [vmem:[#allocation26 + $0x218] sm:$0xff]  ;;  %v3301_v37 = vld [vmem:[#allocation26 + $0xcc8] sm:$0xff] }
 0x6c3   : > { %3922 = vmatpush.msra.mxu2 %v2921_v38  ;;  %3939 = vmatpush.msra.mxu3 %v3263_v20  ;;  %v2940_v38 = vld [vmem:[#allocation26 + $0x180] sm:$0xff]  ;;  %v3282_v20 = vld [vmem:[#allocation26 + $0xc30] sm:$0xff] }
 0x6c4   : > { %3883 = vmatpush.msra.mxu0 %v2902_v4  ;;  %3900 = vmatpush.msra.mxu1 %v3244_v30  ;;  %v2941_v4 = vld [vmem:[#allocation26 + $0x188] sm:$0xff]  ;;  %v3283_v30 = vld [vmem:[#allocation26 + $0xc38] sm:$0xff] }
 0x6c5   : > { %3923 = vmatpush.msra.mxu2 %v2903_v40  ;;  %3940 = vmatpush.msra.mxu3 %v3245_v41  ;;  %v2922_v40 = vld [vmem:[#allocation26 + $0xf0] sm:$0xff]  ;;  %v3264_v41 = vld [vmem:[#allocation26 + $0xba0] sm:$0xff] }
 0x6c6   : > { %3884 = vmatmul.f32.vlgmr.msra.gmra.mxu0 %v6831_v19  ;;  %3924 = vmatmul.f32.vlgmr.msra.gmra.mxu2 %v6831_v19 }
 0x6c7   : > { %3948 = vmatpush.msrb.mxu0 %v3174_v42  ;;  %3988 = vmatpush.msrb.mxu2 %v3175_v43  ;;  %v2923_v42 = vld [vmem:[#allocation26 + $0xf8] sm:$0xff]  ;;  %v3265_v43 = vld [vmem:[#allocation26 + $0xba8] sm:$0xff] }
 0x6c8   : > { %3901 = vmatpush.msra.mxu1 %v3226_v44  ;;  %3941 = vmatpush.msra.mxu3 %v3227_v47  ;;  %v2904_v44 = vld [vmem:[#allocation26 + $0x60] sm:$0xff]  ;;  %v3246_v47 = vld [vmem:[#allocation26 + $0xb10] sm:$0xff] }
 0x6c9   : > { %3949 = vmatpush.msrb.mxu0 %v3156_v18  ;;  %3989 = vmatpush.msrb.mxu2 %v3157_v48  ;;  %v2905_v18 = vld [vmem:[#allocation26 + $0x68] sm:$0xff]  ;;  %v3247_v48 = vld [vmem:[#allocation26 + $0xb18] sm:$0xff] }
 0x6ca   : > { %3902 = vmatpush.msra.mxu1 %v3208_v36  ;;  %3942 = vmatpush.msra.mxu3 %v3209_v49  ;;  %v3176_v36 = vld [vmem:[#allocation26 + $0x8e0] sm:$0xff]  ;;  %v3177_v49 = vld [vmem:[#allocation26 + $0x8e8] sm:$0xff] }
 0x6cb   : > { %3950 = vmatpush.msrb.mxu0 %v3138_v63  ;;  %3990 = vmatpush.msrb.mxu2 %v3139_v1  ;;  %v3228_v63 = vld [vmem:[#allocation26 + $0xa80] sm:$0xff]  ;;  %v3229_v1 = vld [vmem:[#allocation26 + $0xa88] sm:$0xff] }
 0x6cc   : > { %3903 = vmatpush.msra.mxu1 %v3190_v5  ;;  %3943 = vmatpush.msra.mxu3 %v3191_v50  ;;  %v3158_v5 = vld [vmem:[#allocation26 + $0x850] sm:$0xff]  ;;  %v3159_v50 = vld [vmem:[#allocation26 + $0x858] sm:$0xff] }
 0x6cd   : > { %3904 = vmatmul.f32.vlgmr.msra.gmra.mxu1 %v6838_v31  ;;  %3944 = vmatmul.f32.vlgmr.msra.gmra.mxu3 %v6838_v31 }
 0x6ce   : > { %3951 = vmatpush.msrb.mxu0 %v3120_v52  ;;  %3968 = vmatpush.msrb.mxu1 %v3462_v7  ;;  %v3210_v52 = vld [vmem:[#allocation26 + $0x9f0] sm:$0xff]  ;;  %v3211_v7 = vld [vmem:[#allocation26 + $0x9f8] sm:$0xff] }
 0x6cf   : > { %3991 = vmatpush.msrb.mxu2 %v3121_v51  ;;  %4008 = vmatpush.msrb.mxu3 %v3463_v53  ;;  %v3140_v51 = vld [vmem:[#allocation26 + $0x7c0] sm:$0xff]  ;;  %v3141_v53 = vld [vmem:[#allocation26 + $0x7c8] sm:$0xff] }
 0x6d0   : > { %3952 = vmatpush.msrb.mxu0 %v3102_v54  ;;  %3969 = vmatpush.msrb.mxu1 %v3444_v16  ;;  %v3192_v54 = vld [vmem:[#allocation26 + $0x960] sm:$0xff]  ;;  %v3193_v16 = vld [vmem:[#allocation26 + $0x968] sm:$0xff] }
 0x6d1   : > { %3992 = vmatpush.msrb.mxu2 %v3103_v57  ;;  %4009 = vmatpush.msrb.mxu3 %v3445_v58  ;;  %v3122_v57 = vld [vmem:[#allocation26 + $0x730] sm:$0xff]  ;;  %v3464_v58 = vld [vmem:[#allocation26 + $0x11e0] sm:$0xff] }
 0x6d2   : > { %3953 = vmatpush.msrb.mxu0 %v3084_v59  ;;  %3970 = vmatpush.msrb.mxu1 %v3426_v60  ;;  %v3123_v59 = vld [vmem:[#allocation26 + $0x738] sm:$0xff]  ;;  %v3465_v60 = vld [vmem:[#allocation26 + $0x11e8] sm:$0xff] }
 0x6d3   : > { %3993 = vmatpush.msrb.mxu2 %v3085_v3  ;;  %4010 = vmatpush.msrb.mxu3 %v3427_v12  ;;  %v3104_v3 = vld [vmem:[#allocation26 + $0x6a0] sm:$0xff]  ;;  %v3446_v12 = vld [vmem:[#allocation26 + $0x1150] sm:$0xff] }
 0x6d4   : > { %3954 = vmatpush.msrb.mxu0 %v3066_v61  ;;  %3971 = vmatpush.msrb.mxu1 %v3408_v13  ;;  %v3105_v61 = vld [vmem:[#allocation26 + $0x6a8] sm:$0xff]  ;;  %v3447_v13 = vld [vmem:[#allocation26 + $0x1158] sm:$0xff] }
 0x6d5   : > { %3994 = vmatpush.msrb.mxu2 %v3067_v62  ;;  %4011 = vmatpush.msrb.mxu3 %v3409_v0  ;;  %v3086_v62 = vld [vmem:[#allocation26 + $0x610] sm:$0xff]  ;;  %v3428_v0 = vld [vmem:[#allocation26 + $0x10c0] sm:$0xff] }
 0x6d6   : > { %3955 = vmatpush.msrb.mxu0 %v3048_v6  ;;  %3972 = vmatpush.msrb.mxu1 %v3390_v10  ;;  %v3087_v6 = vld [vmem:[#allocation26 + $0x618] sm:$0xff]  ;;  %v3429_v10 = vld [vmem:[#allocation26 + $0x10c8] sm:$0xff] }
 0x6d7   : > { %3995 = vmatpush.msrb.mxu2 %v3049_v9  ;;  %4012 = vmatpush.msrb.mxu3 %v3391_v55  ;;  %v3068_v9 = vld [vmem:[#allocation26 + $0x580] sm:$0xff]  ;;  %v3410_v55 = vld [vmem:[#allocation26 + $0x1030] sm:$0xff] }
 0x6d8   : > { %3956 = vmatpush.msrb.mxu0 %v3030_v17  ;;  %3973 = vmatpush.msrb.mxu1 %v3372_v56  ;;  %v3069_v17 = vld [vmem:[#allocation26 + $0x588] sm:$0xff]  ;;  %v3411_v56 = vld [vmem:[#allocation26 + $0x1038] sm:$0xff] }
 0x6d9   : > { %3996 = vmatpush.msrb.mxu2 %v3031_v21  ;;  %4013 = vmatpush.msrb.mxu3 %v3373_v22  ;;  %v3050_v21 = vld [vmem:[#allocation26 + $0x4f0] sm:$0xff]  ;;  %v3392_v22 = vld [vmem:[#allocation26 + $0xfa0] sm:$0xff] }
 0x6da   : > { %3957 = vmatpush.msrb.mxu0 %v3012_v23  ;;  %3974 = vmatpush.msrb.mxu1 %v3354_v24  ;;  %v3051_v23 = vld [vmem:[#allocation26 + $0x4f8] sm:$0xff]  ;;  %v3393_v24 = vld [vmem:[#allocation26 + $0xfa8] sm:$0xff] }
 0x6db   : > { %3997 = vmatpush.msrb.mxu2 %v3013_v39  ;;  %4014 = vmatpush.msrb.mxu3 %v3355_v25  ;;  %v3032_v39 = vld [vmem:[#allocation26 + $0x460] sm:$0xff]  ;;  %v3374_v25 = vld [vmem:[#allocation26 + $0xf10] sm:$0xff] }
 0x6dc   : > { %3958 = vmatpush.msrb.mxu0 %v2994_v26  ;;  %3975 = vmatpush.msrb.mxu1 %v3336_v27  ;;  %v3033_v26 = vld [vmem:[#allocation26 + $0x468] sm:$0xff]  ;;  %v3375_v27 = vld [vmem:[#allocation26 + $0xf18] sm:$0xff] }
 0x6dd   : > { %3998 = vmatpush.msrb.mxu2 %v2995_v15  ;;  %4015 = vmatpush.msrb.mxu3 %v3337_v28  ;;  %v3014_v15 = vld [vmem:[#allocation26 + $0x3d0] sm:$0xff]  ;;  %v3356_v28 = vld [vmem:[#allocation26 + $0xe80] sm:$0xff] }
 0x6de   : > { %3959 = vmatpush.msrb.mxu0 %v2976_v29  ;;  %3976 = vmatpush.msrb.mxu1 %v3318_v11  ;;  %v3015_v29 = vld [vmem:[#allocation26 + $0x3d8] sm:$0xff]  ;;  %v3357_v11 = vld [vmem:[#allocation26 + $0xe88] sm:$0xff] }
 0x6df   : > { %3999 = vmatpush.msrb.mxu2 %v2977_v32  ;;  %4016 = vmatpush.msrb.mxu3 %v3319_v33  ;;  %v2996_v32 = vld [vmem:[#allocation26 + $0x340] sm:$0xff]  ;;  %v3338_v33 = vld [vmem:[#allocation26 + $0xdf0] sm:$0xff] }
 0x6e0   : > { %3960 = vmatpush.msrb.mxu0 %v2958_v34  ;;  %3977 = vmatpush.msrb.mxu1 %v3300_v35  ;;  %v2997_v34 = vld [vmem:[#allocation26 + $0x348] sm:$0xff]  ;;  %v3339_v35 = vld [vmem:[#allocation26 + $0xdf8] sm:$0xff] }
 0x6e1   : > { %4000 = vmatpush.msrb.mxu2 %v2959_v2  ;;  %4017 = vmatpush.msrb.mxu3 %v3301_v37  ;;  %v2978_v2 = vld [vmem:[#allocation26 + $0x2b0] sm:$0xff]  ;;  %v3320_v37 = vld [vmem:[#allocation26 + $0xd60] sm:$0xff] }
 0x6e2   : > { %3961 = vmatpush.msrb.mxu0 %v2940_v38  ;;  %3978 = vmatpush.msrb.mxu1 %v3282_v20  ;;  %v2979_v38 = vld [vmem:[#allocation26 + $0x2b8] sm:$0xff]  ;;  %v3321_v20 = vld [vmem:[#allocation26 + $0xd68] sm:$0xff] }
 0x6e3   : > { %4001 = vmatpush.msrb.mxu2 %v2941_v4  ;;  %4018 = vmatpush.msrb.mxu3 %v3283_v30  ;;  %v2960_v4 = vld [vmem:[#allocation26 + $0x220] sm:$0xff]  ;;  %v3302_v30 = vld [vmem:[#allocation26 + $0xcd0] sm:$0xff] }
 0x6e4   : > { %3962 = vmatpush.msrb.mxu0 %v2922_v40  ;;  %3979 = vmatpush.msrb.mxu1 %v3264_v41  ;;  %v2961_v40 = vld [vmem:[#allocation26 + $0x228] sm:$0xff]  ;;  %v3303_v41 = vld [vmem:[#allocation26 + $0xcd8] sm:$0xff] }
 0x6e5   : > { %4002 = vmatpush.msrb.mxu2 %v2923_v42  ;;  %4019 = vmatpush.msrb.mxu3 %v3265_v43  ;;  %v2942_v42 = vld [vmem:[#allocation26 + $0x190] sm:$0xff]  ;;  %v3284_v43 = vld [vmem:[#allocation26 + $0xc40] sm:$0xff] }
 0x6e6   : > { %3963 = vmatpush.msrb.mxu0 %v2904_v44  ;;  %3980 = vmatpush.msrb.mxu1 %v3246_v47  ;;  %v2943_v44 = vld [vmem:[#allocation26 + $0x198] sm:$0xff]  ;;  %v3285_v47 = vld [vmem:[#allocation26 + $0xc48] sm:$0xff] }
 0x6e7   : > { %4003 = vmatpush.msrb.mxu2 %v2905_v18  ;;  %4020 = vmatpush.msrb.mxu3 %v3247_v48  ;;  %v2924_v18 = vld [vmem:[#allocation26 + $0x100] sm:$0xff]  ;;  %v3266_v48 = vld [vmem:[#allocation26 + $0xbb0] sm:$0xff] }
 0x6e8   : > { %3964 = vmatmul.f32.vlgmr.msrb.gmra.mxu0 %v6831_v19  ;;  %4004 = vmatmul.f32.vlgmr.msrb.gmra.mxu2 %v6831_v19 }
 0x6e9   : > { %4028 = vmatpush.msra.mxu0 %v3176_v36  ;;  %4068 = vmatpush.msra.mxu2 %v3177_v49  ;;  %v2925_v36 = vld [vmem:[#allocation26 + $0x108] sm:$0xff]  ;;  %v3267_v49 = vld [vmem:[#allocation26 + $0xbb8] sm:$0xff] }
 0x6ea   : > { %3981 = vmatpush.msrb.mxu1 %v3228_v63  ;;  %4021 = vmatpush.msrb.mxu3 %v3229_v1  ;;  %v2906_v63 = vld [vmem:[#allocation26 + $0x70] sm:$0xff]  ;;  %v3248_v1 = vld [vmem:[#allocation26 + $0xb20] sm:$0xff] }
 0x6eb   : > { %4029 = vmatpush.msra.mxu0 %v3158_v5  ;;  %4069 = vmatpush.msra.mxu2 %v3159_v50  ;;  %v2907_v5 = vld [vmem:[#allocation26 + $0x78] sm:$0xff]  ;;  %v3249_v50 = vld [vmem:[#allocation26 + $0xb28] sm:$0xff] }
 0x6ec   : > { %3982 = vmatpush.msrb.mxu1 %v3210_v52  ;;  %4022 = vmatpush.msrb.mxu3 %v3211_v7  ;;  %v3178_v52 = vld [vmem:[#allocation26 + $0x8f0] sm:$0xff]  ;;  %v3179_v7 = vld [vmem:[#allocation26 + $0x8f8] sm:$0xff] }
 0x6ed   : > { %4030 = vmatpush.msra.mxu0 %v3140_v51  ;;  %4070 = vmatpush.msra.mxu2 %v3141_v53  ;;  %v3230_v51 = vld [vmem:[#allocation26 + $0xa90] sm:$0xff]  ;;  %v3231_v53 = vld [vmem:[#allocation26 + $0xa98] sm:$0xff] }
 0x6ee   : > { %3983 = vmatpush.msrb.mxu1 %v3192_v54  ;;  %4023 = vmatpush.msrb.mxu3 %v3193_v16  ;;  %v3160_v54 = vld [vmem:[#allocation26 + $0x860] sm:$0xff]  ;;  %v3161_v16 = vld [vmem:[#allocation26 + $0x868] sm:$0xff] }
 0x6ef   : > { %3984 = vmatmul.f32.vlgmr.msrb.gmra.mxu1 %v6838_v31  ;;  %4024 = vmatmul.f32.vlgmr.msrb.gmra.mxu3 %v6838_v31 }
 0x6f0   : > { %4031 = vmatpush.msra.mxu0 %v3122_v57  ;;  %4048 = vmatpush.msra.mxu1 %v3464_v58  ;;  %v3212_v57 = vld [vmem:[#allocation26 + $0xa00] sm:$0xff]  ;;  %v3213_v58 = vld [vmem:[#allocation26 + $0xa08] sm:$0xff] }
 0x6f1   : > { %4071 = vmatpush.msra.mxu2 %v3123_v59  ;;  %4088 = vmatpush.msra.mxu3 %v3465_v60  ;;  %v3142_v59 = vld [vmem:[#allocation26 + $0x7d0] sm:$0xff]  ;;  %v3143_v60 = vld [vmem:[#allocation26 + $0x7d8] sm:$0xff] }
 0x6f2   : > { %4032 = vmatpush.msra.mxu0 %v3104_v3  ;;  %4049 = vmatpush.msra.mxu1 %v3446_v12  ;;  %v3194_v3 = vld [vmem:[#allocation26 + $0x970] sm:$0xff]  ;;  %v3195_v12 = vld [vmem:[#allocation26 + $0x978] sm:$0xff] }
 0x6f3   : > { %4072 = vmatpush.msra.mxu2 %v3105_v61  ;;  %4089 = vmatpush.msra.mxu3 %v3447_v13  ;;  %v3124_v61 = vld [vmem:[#allocation26 + $0x740] sm:$0xff]  ;;  %v3466_v13 = vld [vmem:[#allocation26 + $0x11f0] sm:$0xff] }
 0x6f4   : > { %4033 = vmatpush.msra.mxu0 %v3086_v62  ;;  %4050 = vmatpush.msra.mxu1 %v3428_v0  ;;  %v3125_v62 = vld [vmem:[#allocation26 + $0x748] sm:$0xff]  ;;  %v3467_v0 = vld [vmem:[#allocation26 + $0x11f8] sm:$0xff] }
 0x6f5   : > { %4073 = vmatpush.msra.mxu2 %v3087_v6  ;;  %4090 = vmatpush.msra.mxu3 %v3429_v10  ;;  %v3106_v6 = vld [vmem:[#allocation26 + $0x6b0] sm:$0xff]  ;;  %v3448_v10 = vld [vmem:[#allocation26 + $0x1160] sm:$0xff] }
 0x6f6   : > { %4034 = vmatpush.msra.mxu0 %v3068_v9  ;;  %4051 = vmatpush.msra.mxu1 %v3410_v55  ;;  %v3107_v9 = vld [vmem:[#allocation26 + $0x6b8] sm:$0xff]  ;;  %v3449_v55 = vld [vmem:[#allocation26 + $0x1168] sm:$0xff] }
 0x6f7   : > { %4074 = vmatpush.msra.mxu2 %v3069_v17  ;;  %4091 = vmatpush.msra.mxu3 %v3411_v56  ;;  %v3088_v17 = vld [vmem:[#allocation26 + $0x620] sm:$0xff]  ;;  %v3430_v56 = vld [vmem:[#allocation26 + $0x10d0] sm:$0xff] }
 0x6f8   : > { %4035 = vmatpush.msra.mxu0 %v3050_v21  ;;  %4052 = vmatpush.msra.mxu1 %v3392_v22  ;;  %v3089_v21 = vld [vmem:[#allocation26 + $0x628] sm:$0xff]  ;;  %v3431_v22 = vld [vmem:[#allocation26 + $0x10d8] sm:$0xff] }
 0x6f9   : > { %4075 = vmatpush.msra.mxu2 %v3051_v23  ;;  %4092 = vmatpush.msra.mxu3 %v3393_v24  ;;  %v3070_v23 = vld [vmem:[#allocation26 + $0x590] sm:$0xff]  ;;  %v3412_v24 = vld [vmem:[#allocation26 + $0x1040] sm:$0xff] }
 0x6fa   : > { %4036 = vmatpush.msra.mxu0 %v3032_v39  ;;  %4053 = vmatpush.msra.mxu1 %v3374_v25  ;;  %v3071_v39 = vld [vmem:[#allocation26 + $0x598] sm:$0xff]  ;;  %v3413_v25 = vld [vmem:[#allocation26 + $0x1048] sm:$0xff] }
 0x6fb   : > { %4076 = vmatpush.msra.mxu2 %v3033_v26  ;;  %4093 = vmatpush.msra.mxu3 %v3375_v27  ;;  %v3052_v26 = vld [vmem:[#allocation26 + $0x500] sm:$0xff]  ;;  %v3394_v27 = vld [vmem:[#allocation26 + $0xfb0] sm:$0xff] }
 0x6fc   : > { %4037 = vmatpush.msra.mxu0 %v3014_v15  ;;  %4054 = vmatpush.msra.mxu1 %v3356_v28  ;;  %v3053_v15 = vld [vmem:[#allocation26 + $0x508] sm:$0xff]  ;;  %v3395_v28 = vld [vmem:[#allocation26 + $0xfb8] sm:$0xff] }
 0x6fd   : > { %4077 = vmatpush.msra.mxu2 %v3015_v29  ;;  %4094 = vmatpush.msra.mxu3 %v3357_v11  ;;  %v3034_v29 = vld [vmem:[#allocation26 + $0x470] sm:$0xff]  ;;  %v3376_v11 = vld [vmem:[#allocation26 + $0xf20] sm:$0xff] }
 0x6fe   : > { %4038 = vmatpush.msra.mxu0 %v2996_v32  ;;  %4055 = vmatpush.msra.mxu1 %v3338_v33  ;;  %v3035_v32 = vld [vmem:[#allocation26 + $0x478] sm:$0xff]  ;;  %v3377_v33 = vld [vmem:[#allocation26 + $0xf28] sm:$0xff] }
 0x6ff   : > { %4078 = vmatpush.msra.mxu2 %v2997_v34  ;;  %4095 = vmatpush.msra.mxu3 %v3339_v35  ;;  %v3016_v34 = vld [vmem:[#allocation26 + $0x3e0] sm:$0xff]  ;;  %v3358_v35 = vld [vmem:[#allocation26 + $0xe90] sm:$0xff] }
 0x700   : > { %4039 = vmatpush.msra.mxu0 %v2978_v2  ;;  %4056 = vmatpush.msra.mxu1 %v3320_v37  ;;  %v3017_v2 = vld [vmem:[#allocation26 + $0x3e8] sm:$0xff]  ;;  %v3359_v37 = vld [vmem:[#allocation26 + $0xe98] sm:$0xff] }
 0x701   : > { %4079 = vmatpush.msra.mxu2 %v2979_v38  ;;  %4096 = vmatpush.msra.mxu3 %v3321_v20  ;;  %v2998_v38 = vld [vmem:[#allocation26 + $0x350] sm:$0xff]  ;;  %v3340_v20 = vld [vmem:[#allocation26 + $0xe00] sm:$0xff] }
 0x702   : > { %4040 = vmatpush.msra.mxu0 %v2960_v4  ;;  %4057 = vmatpush.msra.mxu1 %v3302_v30  ;;  %v2999_v4 = vld [vmem:[#allocation26 + $0x358] sm:$0xff]  ;;  %v3341_v30 = vld [vmem:[#allocation26 + $0xe08] sm:$0xff] }
 0x703   : > { %4080 = vmatpush.msra.mxu2 %v2961_v40  ;;  %4097 = vmatpush.msra.mxu3 %v3303_v41  ;;  %v2980_v40 = vld [vmem:[#allocation26 + $0x2c0] sm:$0xff]  ;;  %v3322_v41 = vld [vmem:[#allocation26 + $0xd70] sm:$0xff] }
 0x704   : > { %4041 = vmatpush.msra.mxu0 %v2942_v42  ;;  %4058 = vmatpush.msra.mxu1 %v3284_v43  ;;  %v2981_v42 = vld [vmem:[#allocation26 + $0x2c8] sm:$0xff]  ;;  %v3323_v43 = vld [vmem:[#allocation26 + $0xd78] sm:$0xff] }
 0x705   : > { %4081 = vmatpush.msra.mxu2 %v2943_v44  ;;  %4098 = vmatpush.msra.mxu3 %v3285_v47  ;;  %v2962_v44 = vld [vmem:[#allocation26 + $0x230] sm:$0xff]  ;;  %v3304_v47 = vld [vmem:[#allocation26 + $0xce0] sm:$0xff] }
 0x706   : > { %4042 = vmatpush.msra.mxu0 %v2924_v18  ;;  %4059 = vmatpush.msra.mxu1 %v3266_v48  ;;  %v2963_v18 = vld [vmem:[#allocation26 + $0x238] sm:$0xff]  ;;  %v3305_v48 = vld [vmem:[#allocation26 + $0xce8] sm:$0xff] }
 0x707   : > { %4082 = vmatpush.msra.mxu2 %v2925_v36  ;;  %4099 = vmatpush.msra.mxu3 %v3267_v49  ;;  %v2944_v36 = vld [vmem:[#allocation26 + $0x1a0] sm:$0xff]  ;;  %v3286_v49 = vld [vmem:[#allocation26 + $0xc50] sm:$0xff] }
 0x708   : > { %4043 = vmatpush.msra.mxu0 %v2906_v63  ;;  %4060 = vmatpush.msra.mxu1 %v3248_v1  ;;  %v2945_v63 = vld [vmem:[#allocation26 + $0x1a8] sm:$0xff]  ;;  %v3287_v1 = vld [vmem:[#allocation26 + $0xc58] sm:$0xff] }
 0x709   : > { %4083 = vmatpush.msra.mxu2 %v2907_v5  ;;  %4100 = vmatpush.msra.mxu3 %v3249_v50  ;;  %v2926_v5 = vld [vmem:[#allocation26 + $0x110] sm:$0xff]  ;;  %v3268_v50 = vld [vmem:[#allocation26 + $0xbc0] sm:$0xff] }
 0x70a   : > { %4044 = vmatmul.f32.vlgmr.msra.gmra.mxu0 %v6831_v19  ;;  %4084 = vmatmul.f32.vlgmr.msra.gmra.mxu2 %v6831_v19 }
 0x70b   : > { %4108 = vmatpush.msrb.mxu0 %v3178_v52  ;;  %4148 = vmatpush.msrb.mxu2 %v3179_v7  ;;  %v2927_v52 = vld [vmem:[#allocation26 + $0x118] sm:$0xff]  ;;  %v3269_v7 = vld [vmem:[#allocation26 + $0xbc8] sm:$0xff] }
 0x70c   : > { %4061 = vmatpush.msra.mxu1 %v3230_v51  ;;  %4101 = vmatpush.msra.mxu3 %v3231_v53  ;;  %v2908_v51 = vld [vmem:[#allocation26 + $0x80] sm:$0xff]  ;;  %v3250_v53 = vld [vmem:[#allocation26 + $0xb30] sm:$0xff] }
 0x70d   : > { %4109 = vmatpush.msrb.mxu0 %v3160_v54  ;;  %4149 = vmatpush.msrb.mxu2 %v3161_v16  ;;  %v2909_v54 = vld [vmem:[#allocation26 + $0x88] sm:$0xff]  ;;  %v3251_v16 = vld [vmem:[#allocation26 + $0xb38] sm:$0xff] }
 0x70e   : > { %4062 = vmatpush.msra.mxu1 %v3212_v57  ;;  %4102 = vmatpush.msra.mxu3 %v3213_v58  ;;  %v3232_v57 = vld [vmem:[#allocation26 + $0xaa0] sm:$0xff]  ;;  %v3233_v58 = vld [vmem:[#allocation26 + $0xaa8] sm:$0xff] }
 0x70f   : > { %4110 = vmatpush.msrb.mxu0 %v3142_v59  ;;  %4150 = vmatpush.msrb.mxu2 %v3143_v60  ;;  %v4366_v59 = vld [vmem:[#allocation29 + $0x1e0] sm:$0xff]  ;;  %v4367_v60 = vld [vmem:[#allocation29 + $0x1e8] sm:$0xff] }
 0x710   : > { %4063 = vmatpush.msra.mxu1 %v3194_v3  ;;  %4103 = vmatpush.msra.mxu3 %v3195_v12  ;;  %v3214_v3 = vld [vmem:[#allocation26 + $0xa10] sm:$0xff]  ;;  %v3215_v12 = vld [vmem:[#allocation26 + $0xa18] sm:$0xff] }
 0x711   : > { %4064 = vmatmul.f32.vlgmr.msra.gmra.mxu1 %v6838_v31  ;;  %4104 = vmatmul.f32.vlgmr.msra.gmra.mxu3 %v6838_v31 }
 0x712   : > { %4111 = vmatpush.msrb.mxu0 %v3124_v61  ;;  %4128 = vmatpush.msrb.mxu1 %v3466_v13  ;;  %v4362_v61 = vld [vmem:[#allocation29 + $0x1c0] sm:$0xff]  ;;  %v4363_v13 = vld [vmem:[#allocation29 + $0x1c8] sm:$0xff] }
 0x713   : > { %4151 = vmatpush.msrb.mxu2 %v3125_v62  ;;  %4168 = vmatpush.msrb.mxu3 %v3467_v0  ;;  %v3196_v62 = vld [vmem:[#allocation26 + $0x980] sm:$0xff]  ;;  %v3197_v0 = vld [vmem:[#allocation26 + $0x988] sm:$0xff] }
 0x714   : > { %4112 = vmatpush.msrb.mxu0 %v3106_v6  ;;  %4129 = vmatpush.msrb.mxu1 %v3448_v10  ;;  %v4358_v6 = vld [vmem:[#allocation29 + $0x1a0] sm:$0xff]  ;;  %v4359_v10 = vld [vmem:[#allocation29 + $0x1a8] sm:$0xff] }
 0x715   : > { %4152 = vmatpush.msrb.mxu2 %v3107_v9  ;;  %4169 = vmatpush.msrb.mxu3 %v3449_v55  ;;  %v4430_v9 = vld [vmem:[#allocation29 + $0x3e0] sm:$0xff] }
 0x716   : > { %4113 = vmatpush.msrb.mxu0 %v3088_v17  ;;  %4130 = vmatpush.msrb.mxu1 %v3430_v56  ;;  %v4354_v55 = vld [vmem:[#allocation29 + $0x180] sm:$0xff]  ;;  %v4355_v17 = vld [vmem:[#allocation29 + $0x188] sm:$0xff] }
 0x717   : > { %4153 = vmatpush.msrb.mxu2 %v3089_v21  ;;  %4170 = vmatpush.msrb.mxu3 %v3431_v22  ;;  %v4426_v56 = vld [vmem:[#allocation29 + $0x3c0] sm:$0xff]  ;;  %v4427_v21 = vld [vmem:[#allocation29 + $0x3c8] sm:$0xff] }
 0x718   : > { %4114 = vmatpush.msrb.mxu0 %v3070_v23  ;;  %4131 = vmatpush.msrb.mxu1 %v3412_v24  ;;  %v4350_v22 = vld [vmem:[#allocation29 + $0x160] sm:$0xff]  ;;  %v4351_v23 = vld [vmem:[#allocation29 + $0x168] sm:$0xff] }
 0x719   : > { %4154 = vmatpush.msrb.mxu2 %v3071_v39  ;;  %4171 = vmatpush.msrb.mxu3 %v3413_v25  ;;  %v4422_v24 = vld [vmem:[#allocation29 + $0x3a0] sm:$0xff]  ;;  %v4423_v39 = vld [vmem:[#allocation29 + $0x3a8] sm:$0xff]  ;;  %v6874_v25 = vpop.f32.mrf.mxu1 }
 0x71a   : > { %4115 = vmatpush.msrb.mxu0 %v3052_v26  ;;  %4132 = vmatpush.msrb.mxu1 %v3394_v27  ;;  %v4346_v26 = vld [vmem:[#allocation29 + $0x140] sm:$0xff] }
 0x71b   : > { %4155 = vmatpush.msrb.mxu2 %v3053_v15  ;;  %4172 = vmatpush.msrb.mxu3 %v3395_v28  ;;  %v4418_v27 = vld [vmem:[#allocation29 + $0x380] sm:$0xff]  ;;  %v4419_v15 = vld [vmem:[#allocation29 + $0x388] sm:$0xff]  ;;  %v6876_v28 = vpop.f32.mrf.mxu0 }
 0x71c   : > { %4116 = vmatpush.msrb.mxu0 %v3034_v29  ;;  %4133 = vmatpush.msrb.mxu1 %v3376_v11  ;;  %v4342_v29 = vld [vmem:[#allocation29 + $0x120] sm:$0xff]  ;;  %v4343_v11 = vld [vmem:[#allocation29 + $0x128] sm:$0xff] }
 0x71d   : > { %4156 = vmatpush.msrb.mxu2 %v3035_v32  ;;  %4173 = vmatpush.msrb.mxu3 %v3377_v33  ;;  %v4414_v32 = vld [vmem:[#allocation29 + $0x360] sm:$0xff]  ;;  %v4415_v33 = vld [vmem:[#allocation29 + $0x368] sm:$0xff] }
 0x71e   : > { %4117 = vmatpush.msrb.mxu0 %v3016_v34  ;;  %4134 = vmatpush.msrb.mxu1 %v3358_v35  ;;  %v4338_v34 = vld [vmem:[#allocation29 + $0x100] sm:$0xff]  ;;  %v4339_v35 = vld [vmem:[#allocation29 + $0x108] sm:$0xff] }
 0x71f   : > { %4157 = vmatpush.msrb.mxu2 %v3017_v2  ;;  %4174 = vmatpush.msrb.mxu3 %v3359_v37  ;;  %v4410_v2 = vld [vmem:[#allocation29 + $0x340] sm:$0xff]  ;;  %v4411_v37 = vld [vmem:[#allocation29 + $0x348] sm:$0xff] }
 0x720   : > { %4118 = vmatpush.msrb.mxu0 %v2998_v38  ;;  %4135 = vmatpush.msrb.mxu1 %v3340_v20  ;;  %v6878_v38 = vpop.f32.mrf.mxu3  ;;  %v4334_v20 = vld [vmem:[#allocation29 + $0xe0] sm:$0xff] }
 0x721   : > { %4158 = vmatpush.msrb.mxu2 %v2999_v4  ;;  %4175 = vmatpush.msrb.mxu3 %v3341_v30  ;;  %v4335_v4 = vld [vmem:[#allocation29 + $0xe8] sm:$0xff]  ;;  %v4406_v30 = vld [vmem:[#allocation29 + $0x320] sm:$0xff] }
 0x722   : > { %4119 = vmatpush.msrb.mxu0 %v2980_v40  ;;  %4136 = vmatpush.msrb.mxu1 %v3322_v41  ;;  %v4407_v40 = vld [vmem:[#allocation29 + $0x328] sm:$0xff]  ;;  %v6880_v41 = vpop.f32.mrf.mxu2 }
 0x723   : > { %4159 = vmatpush.msrb.mxu2 %v2981_v42  ;;  %4176 = vmatpush.msrb.mxu3 %v3323_v43  ;;  %v4330_v42 = vld [vmem:[#allocation29 + $0xc0] sm:$0xff]  ;;  %v4331_v43 = vld [vmem:[#allocation29 + $0xc8] sm:$0xff] }
 0x724   : > { %4120 = vmatpush.msrb.mxu0 %v2962_v44  ;;  %4137 = vmatpush.msrb.mxu1 %v3304_v47  ;;  %v4402_v44 = vld [vmem:[#allocation29 + $0x300] sm:$0xff]  ;;  %v4403_v47 = vld [vmem:[#allocation29 + $0x308] sm:$0xff] }
 0x725   : > { %4160 = vmatpush.msrb.mxu2 %v2963_v18  ;;  %4177 = vmatpush.msrb.mxu3 %v3305_v48  ;;  %v6882_v18 = vpop.f32.mrf.mxu1  ;;  %v4326_v48 = vld [vmem:[#allocation29 + $0xa0] sm:$0xff] }
 0x726   : > { %4121 = vmatpush.msrb.mxu0 %v2944_v36  ;;  %4138 = vmatpush.msrb.mxu1 %v3286_v49  ;;  %v4327_v36 = vld [vmem:[#allocation29 + $0xa8] sm:$0xff]  ;;  %v4398_v49 = vld [vmem:[#allocation29 + $0x2e0] sm:$0xff] }
 0x727   : > { %4161 = vmatpush.msrb.mxu2 %v2945_v63  ;;  %4178 = vmatpush.msrb.mxu3 %v3287_v1  ;;  %v4399_v63 = vld [vmem:[#allocation29 + $0x2e8] sm:$0xff]  ;;  %v6884_v1 = vpop.f32.mrf.mxu0 }
 0x728   : > { %4122 = vmatpush.msrb.mxu0 %v2926_v5  ;;  %4139 = vmatpush.msrb.mxu1 %v3268_v50  ;;  %v4322_v5 = vld [vmem:[#allocation29 + $0x80] sm:$0xff]  ;;  %v4323_v50 = vld [vmem:[#allocation29 + $0x88] sm:$0xff] }
 0x729   : > { %4162 = vmatpush.msrb.mxu2 %v2927_v52  ;;  %4179 = vmatpush.msrb.mxu3 %v3269_v7  ;;  %v4394_v52 = vld [vmem:[#allocation29 + $0x2c0] sm:$0xff]  ;;  %v4395_v7 = vld [vmem:[#allocation29 + $0x2c8] sm:$0xff] }
 0x72a   : > { %4123 = vmatpush.msrb.mxu0 %v2908_v51  ;;  %4140 = vmatpush.msrb.mxu1 %v3250_v53  ;;  %v4318_v51 = vld [vmem:[#allocation29 + $0x60] sm:$0xff]  ;;  %v4319_v53 = vld [vmem:[#allocation29 + $0x68] sm:$0xff] }
 0x72b   : > { %4163 = vmatpush.msrb.mxu2 %v2909_v54  ;;  %4180 = vmatpush.msrb.mxu3 %v3251_v16  ;;  %v4390_v54 = vld [vmem:[#allocation29 + $0x2a0] sm:$0xff]  ;;  %v4391_v16 = vld [vmem:[#allocation29 + $0x2a8] sm:$0xff] }
 0x72c   : > { %4124 = vmatmul.f32.vlgmr.msrb.gmra.mxu0 %v6831_v19  ;;  %4164 = vmatmul.f32.vlgmr.msrb.gmra.mxu2 %v6831_v19  ;;  %v4431_v19 = vld [vmem:[#allocation29 + $0x3e8] sm:$0xff] }
 0x72d   : > { %4141 = vmatpush.msrb.mxu1 %v3232_v57  ;;  %4181 = vmatpush.msrb.mxu3 %v3233_v58  ;;  %v6886_v57 = vpop.f32.mrf.mxu3  ;;  %v4314_v58 = vld [vmem:[#allocation29 + $0x40] sm:$0xff] }
 0x72e   : > { %4434 = vmatpush.msra.mxu0 %v4366_v59  ;;  %4474 = vmatpush.msra.mxu2 %v4367_v60  ;;  %v4315_v59 = vld [vmem:[#allocation29 + $0x48] sm:$0xff]  ;;  %v4386_v60 = vld [vmem:[#allocation29 + $0x280] sm:$0xff] }
 0x72f   : > { %4142 = vmatpush.msrb.mxu1 %v3214_v3  ;;  %4182 = vmatpush.msrb.mxu3 %v3215_v12  ;;  %v4387_v3 = vld [vmem:[#allocation29 + $0x288] sm:$0xff]  ;;  %v6888_v12 = vpop.f32.mrf.mxu2 }
 0x730   : > { %4435 = vmatpush.msra.mxu0 %v4362_v61  ;;  %4475 = vmatpush.msra.mxu2 %v4363_v13  ;;  %v6890_v61 = vpop.f32.mrf.mxu1  ;;  %v4310_v13 = vld [vmem:[#allocation29 + $0x20] sm:$0xff] }
 0x731   : > { %4143 = vmatpush.msrb.mxu1 %v3196_v62  ;;  %4183 = vmatpush.msrb.mxu3 %v3197_v0  ;;  %v4311_v62 = vld [vmem:[#allocation29 + $0x28] sm:$0xff]  ;;  %v4382_v0 = vld [vmem:[#allocation29 + $0x260] sm:$0xff] }
 0x732   : > { %4144 = vmatmul.f32.vlgmr.msrb.gmra.mxu1 %v6838_v31  ;;  %4184 = vmatmul.f32.vlgmr.msrb.gmra.mxu3 %v6838_v31  ;;  %v4347_v31 = vld [vmem:[#allocation29 + $0x148] sm:$0xff] }
 0x733   : > { %4436 = vmatpush.msra.mxu0 %v4358_v6  ;;  %4476 = vmatpush.msra.mxu2 %v4359_v10  ;;  %v4383_v6 = vld [vmem:[#allocation29 + $0x268] sm:$0xff]  ;;  %v6892_v10 = vpop.f32.mrf.mxu0 }
 0x734   : > { %4454 = vmatpush.msra.mxu1 %v4430_v9  ;;  %4494 = vmatpush.msra.mxu3 %v4431_v19  ;;  %v4306_v9 = vld [vmem:[#allocation29] sm:$0xff]  ;;  %v4307_v19 = vld [vmem:[#allocation29 + $0x8] sm:$0xff] }
 0x735   : > { %4437 = vmatpush.msra.mxu0 %v4354_v55  ;;  %4477 = vmatpush.msra.mxu2 %v4355_v17  ;;  %v4368_v55 = vld [vmem:[#allocation29 + $0x1f0] sm:$0xff]  ;;  %v4369_v17 = vld [vmem:[#allocation29 + $0x1f8] sm:$0xff] }
 0x736   : > { %4455 = vmatpush.msra.mxu1 %v4426_v56  ;;  %4495 = vmatpush.msra.mxu3 %v4427_v21  ;;  %v4378_v56 = vld [vmem:[#allocation29 + $0x240] sm:$0xff]  ;;  %v4379_v21 = vld [vmem:[#allocation29 + $0x248] sm:$0xff] }
 0x737   : > { %4438 = vmatpush.msra.mxu0 %v4350_v22  ;;  %4478 = vmatpush.msra.mxu2 %v4351_v23  ;;  %v4364_v22 = vld [vmem:[#allocation29 + $0x1d0] sm:$0xff]  ;;  %v4365_v23 = vld [vmem:[#allocation29 + $0x1d8] sm:$0xff] }
 0x738   : > { %4456 = vmatpush.msra.mxu1 %v4422_v24  ;;  %4496 = vmatpush.msra.mxu3 %v4423_v39  ;;  %v6894_v24 = vpop.f32.mrf.mxu3  ;;  %v4374_v39 = vld [vmem:[#allocation29 + $0x220] sm:$0xff] }
 0x739   : > { %4439 = vmatpush.msra.mxu0 %v4346_v26  ;;  %4479 = vmatpush.msra.mxu2 %v4347_v31  ;;  %v4375_v26 = vld [vmem:[#allocation29 + $0x228] sm:$0xff]  ;;  %v4360_v31 = vld [vmem:[#allocation29 + $0x1b0] sm:$0xff] }
 0x73a   : > { %4457 = vmatpush.msra.mxu1 %v4418_v27  ;;  %4497 = vmatpush.msra.mxu3 %v4419_v15  ;;  %v4361_v27 = vld [vmem:[#allocation29 + $0x1b8] sm:$0xff]  ;;  %v6896_v15 = vpop.f32.mrf.mxu2 }
 0x73b   : > { %4440 = vmatpush.msra.mxu0 %v4342_v29  ;;  %4480 = vmatpush.msra.mxu2 %v4343_v11  ;;  %v6898_v29 = vpop.f32.mrf.mxu1  ;;  %v4370_v11 = vld [vmem:[#allocation29 + $0x200] sm:$0xff] }
 0x73c   : > { %4458 = vmatpush.msra.mxu1 %v4414_v32  ;;  %4498 = vmatpush.msra.mxu3 %v4415_v33  ;;  %v4371_v32 = vld [vmem:[#allocation29 + $0x208] sm:$0xff]  ;;  %v4356_v33 = vld [vmem:[#allocation29 + $0x190] sm:$0xff] }
 0x73d   : > { %4441 = vmatpush.msra.mxu0 %v4338_v34  ;;  %4481 = vmatpush.msra.mxu2 %v4339_v35  ;;  %v4432_v34 = vld [vmem:[#allocation29 + $0x3f0] sm:$0xff]  ;;  %v6900_v35 = vpop.f32.mrf.mxu0 }
 0x73e   : > { %4459 = vmatpush.msra.mxu1 %v4410_v2  ;;  %4499 = vmatpush.msra.mxu3 %v4411_v37  ;;  %v4357_v2 = vld [vmem:[#allocation29 + $0x198] sm:$0xff] }
 0x73f   : > { %4442 = vmatpush.msra.mxu0 %v4334_v20  ;;  %4482 = vmatpush.msra.mxu2 %v4335_v4  ;;  %v4433_v37 = vld [vmem:[#allocation29 + $0x3f8] sm:$0xff]  ;;  %v4352_v20 = vld [vmem:[#allocation29 + $0x170] sm:$0xff] }
 0x740   : > { %4460 = vmatpush.msra.mxu1 %v4406_v30  ;;  %4500 = vmatpush.msra.mxu3 %v4407_v40  ;;  %v4428_v4 = vld [vmem:[#allocation29 + $0x3d0] sm:$0xff]  ;;  %v4188_v30 = vlaneseq  ;;  %v4353_v40 = vld [vmem:[#allocation29 + $0x178] sm:$0xff] }
 0x741   : > { %4443 = vmatpush.msra.mxu0 %v4330_v42  ;;  %4483 = vmatpush.msra.mxu2 %v4331_v43  ;;  %v4429_v42 = vld [vmem:[#allocation29 + $0x3d8] sm:$0xff]  ;;  %v4348_v43 = vld [vmem:[#allocation29 + $0x150] sm:$0xff] }
 0x742   : > { %4461 = vmatpush.msra.mxu1 %v4402_v44  ;;  %4501 = vmatpush.msra.mxu3 %v4403_v47  ;;  %v4424_v44 = vld [vmem:[#allocation29 + $0x3b0] sm:$0xff]  ;;  %v6902_v47 = vpop.f32.mrf.mxu3 }
 0x743   : > { %4444 = vmatpush.msra.mxu0 %v4326_v48  ;;  %4484 = vmatpush.msra.mxu2 %v4327_v36  ;;  %v4349_v48 = vld [vmem:[#allocation29 + $0x158] sm:$0xff] }
 0x744   : > { %4462 = vmatpush.msra.mxu1 %v4398_v49  ;;  %4502 = vmatpush.msra.mxu3 %v4399_v63  ;;  %v4425_v36 = vld [vmem:[#allocation29 + $0x3b8] sm:$0xff]  ;;  %v4344_v49 = vld [vmem:[#allocation29 + $0x130] sm:$0xff] }
 0x745   : > { %4445 = vmatpush.msra.mxu0 %v4322_v5  ;;  %4485 = vmatpush.msra.mxu2 %v4323_v50  ;;  %v4420_v63 = vld [vmem:[#allocation29 + $0x390] sm:$0xff]  ;;  %v4189_v5 = vshrl.u32 %v4188_v30, 7  ;;  %v6904_v50 = vpop.f32.mrf.mxu2 }
 0x746   : > { %4463 = vmatpush.msra.mxu1 %v4394_v52  ;;  %4503 = vmatpush.msra.mxu3 %v4395_v7  ;;  %v3825_v52 = vpop.f32.mrf.mxu1  ;;  %v4345_v7 = vld [vmem:[#allocation29 + $0x138] sm:$0xff] }
 0x747   : > { %4446 = vmatpush.msra.mxu0 %v4318_v51  ;;  %4486 = vmatpush.msra.mxu2 %v4319_v53  ;;  %v4421_v51 = vld [vmem:[#allocation29 + $0x398] sm:$0xff]  ;;  %v3506_v53 = vadd.f32 %v6874_v25, %v6876_v28 }
 0x748   : > { %4464 = vmatpush.msra.mxu1 %v4390_v54  ;;  %4504 = vmatpush.msra.mxu3 %v4391_v16  ;;  %v4340_v54 = vld [vmem:[#allocation29 + $0x110] sm:$0xff]  ;;  %v4337_v25 = vld [vmem:[#allocation29 + $0xf8] sm:$0xff] }
 0x749   : > { %4447 = vmatpush.msra.mxu0 %v4314_v58  ;;  %4487 = vmatpush.msra.mxu2 %v4315_v59  ;;  %v4416_v16 = vld [vmem:[#allocation29 + $0x370] sm:$0xff]  ;;  %v3805_v58 = vpop.f32.mrf.mxu0  ;;  %v4341_v59 = vld [vmem:[#allocation29 + $0x118] sm:$0xff] }
 0x74a   : > { %4465 = vmatpush.msra.mxu1 %v4386_v60  ;;  %4505 = vmatpush.msra.mxu3 %v4387_v3  ;;  %v4417_v60 = vld [vmem:[#allocation29 + $0x378] sm:$0xff]  ;;  %v4336_v3 = vld [vmem:[#allocation29 + $0xf0] sm:$0xff] }
 0x74b   : > { %4448 = vmatpush.msra.mxu0 %v4310_v13  ;;  %4488 = vmatpush.msra.mxu2 %v4311_v62  ;;  %v4412_v13 = vld [vmem:[#allocation29 + $0x350] sm:$0xff]  ;;  %v3546_v62 = vadd.f32 %v6878_v38, %v6880_v41  ;;  %v4413_v28 = vld [vmem:[#allocation29 + $0x358] sm:$0xff] }
 0x74c   : > { %4466 = vmatpush.msra.mxu1 %v4382_v0  ;;  %4506 = vmatpush.msra.mxu3 %v4383_v6  ;;  %v6910_v0 = vand.u32 7, %v4189_v5  ;;  %v4204_v6 = vrot.slane %v3506_v53, 5  ;;  %v4333_v38 = vld [vmem:[#allocation29 + $0xd8] sm:$0xff]  ;;  %v3786_v5 = vadd.f32 %v6902_v47, %v6904_v50 }
 0x74d   : > { %4449 = vmatpush.msra.mxu0 %v4306_v9  ;;  %4489 = vmatpush.msra.mxu2 %v4307_v19  ;;  %v3586_v9 = vadd.f32 %v6882_v18, %v6884_v1  ;;  %v4332_v19 = vld [vmem:[#allocation29 + $0xd0] sm:$0xff]  ;;  %v4409_v41 = vld [vmem:[#allocation29 + $0x338] sm:$0xff]  ;;  %v3845_v18 = vpop.f32.mrf.mxu2 }
 0x74e   : > { %4467 = vmatpush.msra.mxu1 %v4378_v56  ;;  %4507 = vmatpush.msra.mxu3 %v4379_v21  ;;  %v4328_v56 = vld [vmem:[#allocation29 + $0xb0] sm:$0xff]  ;;  %vm4211_vm9 = vcmp.ge.s32.totalorder %v6910_v0, 3  ;;  %v3905_v1 = vpop.f32.mrf.mxu1  ;;  %vm4227_vm11 = vcmp.ge.s32.totalorder %v6910_v0, 2  ;;  %vm4243_vm14 = vcmp.ge.s32.totalorder %v6910_v0, 1  ;;  %vm4259_vm0 = vcmp.lt.s32.totalorder %v6910_v0, 7 }
 0x74f   : > { %4514 = vmatpush.msrb.mxu0 %v4368_v55  ;;  %4554 = vmatpush.msrb.mxu2 %v4369_v17  ;;  %v4408_v55 = vld [vmem:[#allocation29 + $0x330] sm:$0xff]  ;;  %v6914_v17 = vpop.f32.mrf.mxu3  ;;  %vm4275_vm1 = vcmp.lt.s32.totalorder %v6910_v0, 6  ;;  %vm4291_vm3 = vcmp.lt.s32.totalorder %v6910_v0, 5  ;;  %v4642_v0 = vld [vmem:[#allocation31 + $0x160] sm:$0xff] }
 0x750   : > { %4468 = vmatpush.msra.mxu1 %v4374_v39  ;;  %4508 = vmatpush.msra.mxu3 %v4375_v26  ;;  %v4404_v21 = vld [vmem:[#allocation29 + $0x310] sm:$0xff]  ;;  %v4329_v39 = vld [vmem:[#allocation29 + $0xb8] sm:$0xff] }
 0x751   : > { %4515 = vmatpush.msrb.mxu0 %v4364_v22  ;;  %4555 = vmatpush.msrb.mxu2 %v4365_v23  ;;  %v4205_v22 = vrot.slane %v3546_v62, 5  ;;  %v3666_v23 = vadd.f32 %v6890_v61, %v6892_v10  ;;  %v4405_v26 = vld [vmem:[#allocation29 + $0x318] sm:$0xff]  ;;  %v3626_v61 = vadd.f32 %v6886_v57, %v6888_v12  ;;  %v3885_v10 = vpop.f32.mrf.mxu0 }
 0x752   : > { %4469 = vmatpush.msra.mxu1 %v4370_v11  ;;  %4509 = vmatpush.msra.mxu3 %v4371_v32  ;;  %v3746_v11 = vadd.f32 %v6898_v29, %v6900_v35  ;;  %v3826_v32 = vadd.f32 %v3825_v52, %v3805_v58  ;;  %v4396_v29 = vld [vmem:[#allocation29 + $0x2d0] sm:$0xff]  ;;  %v4321_v57 = vld [vmem:[#allocation29 + $0x78] sm:$0xff] }
 0x753   : > { %4516 = vmatpush.msrb.mxu0 %v4360_v31  ;;  %4556 = vmatpush.msrb.mxu2 %v4361_v27  ;;  %v4209_v31 = vsel %vm4208_vm8, 0.0, %v4204_v6  ;;  %v4220_v27 = vrot.slane %v3586_v9, 6  ;;  %v4210_v35 = vsel %vm4208_vm8, 0.0, %v4205_v22  ;;  %v4236_v30 = vrot.slane %v3666_v23, 7  ;;  %v4397_v12 = vld [vmem:[#allocation29 + $0x2d8] sm:$0xff]  ;;  %v4312_v58 = vld [vmem:[#allocation29 + $0x30] sm:$0xff] }
 0x754   : > { %4534 = vmatpush.msrb.mxu1 %v4432_v34  ;;  %4574 = vmatpush.msrb.mxu3 %v4433_v37  ;;  %v4400_v34 = vld [vmem:[#allocation29 + $0x2f0] sm:$0xff]  ;;  %v4401_v37 = vld [vmem:[#allocation29 + $0x2f8] sm:$0xff]  ;;  %v4215_v53 = vsel %vm4211_vm9, %v4210_v35, 0.0 }
 0x755   : > { %4517 = vmatpush.msrb.mxu0 %v4356_v33  ;;  %4557 = vmatpush.msrb.mxu2 %v4357_v2  ;;  %v4324_v33 = vld [vmem:[#allocation29 + $0x90] sm:$0xff]  ;;  %v4325_v2 = vld [vmem:[#allocation29 + $0x98] sm:$0xff]  ;;  %v4241_v47 = vsel %vm4240_vm12, 0.0, %v4236_v30  ;;  %v3925_v50 = vpop.f32.mrf.mxu2 }
 0x756   : > { %4535 = vmatpush.msrb.mxu1 %v4428_v4  ;;  %4575 = vmatpush.msrb.mxu3 %v4429_v42  ;;  %v4320_v4 = vld [vmem:[#allocation29 + $0x70] sm:$0xff]  ;;  %v4225_v42 = vsel %vm4224_vm10, 0.0, %v4220_v27 }
 0x757   : > { %4518 = vmatpush.msrb.mxu0 %v4352_v20  ;;  %4558 = vmatpush.msrb.mxu2 %v4353_v40  ;;  %v6924_v20 = vadd.f32 %v3905_v1, %v3885_v10  ;;  %v4214_v40 = vsel %vm4211_vm9, %v4209_v31, 0.0  ;;  %v3945_v52 = vpop.f32.mrf.mxu3  ;;  %v4381_v1 = vld [vmem:[#allocation29 + $0x258] sm:$0xff] }
 0x758   : > { %4536 = vmatpush.msrb.mxu1 %v4424_v44  ;;  %4576 = vmatpush.msrb.mxu3 %v4425_v36  ;;  %v4252_v44 = vrot.slane %v3826_v32, 1  ;;  %v4392_v36 = vld [vmem:[#allocation29 + $0x2b0] sm:$0xff]  ;;  %v3946_v62 = vadd.f32 %v3945_v52, %v3925_v50  ;;  %v4377_v10 = vld [vmem:[#allocation29 + $0x238] sm:$0xff] }
 0x759   : > { %4519 = vmatpush.msrb.mxu0 %v4348_v43  ;;  %4559 = vmatpush.msrb.mxu2 %v4349_v48  ;;  %v4216_v43 = vadd.f32 %v4214_v40, %v3746_v11  ;;  %v4316_v48 = vld [vmem:[#allocation29 + $0x50] sm:$0xff] }
 0x75a   : > { %4537 = vmatpush.msrb.mxu1 %v4420_v63  ;;  %4577 = vmatpush.msrb.mxu3 %v4421_v51  ;;  %v3706_v63 = vadd.f32 %v6894_v24, %v6896_v15  ;;  %v4393_v51 = vld [vmem:[#allocation29 + $0x2b8] sm:$0xff]  ;;  %v4388_v24 = vld [vmem:[#allocation29 + $0x290] sm:$0xff]  ;;  %v4230_v15 = vsel %vm4227_vm11, %v4225_v42, 0.0  ;;  %v4269_v31 = vrot.slane %v3946_v62, 2  ;;  %v4646_v62 = vld [vmem:[#allocation31 + $0x180] sm:$0xff] }
 0x75b   : > { %4520 = vmatpush.msrb.mxu0 %v4344_v49  ;;  %4560 = vmatpush.msrb.mxu2 %v4345_v7  ;;  %v4221_v49 = vrot.slane %v3626_v61, 6  ;;  %v4317_v7 = vld [vmem:[#allocation29 + $0x58] sm:$0xff]  ;;  %v4376_v11 = vld [vmem:[#allocation29 + $0x230] sm:$0xff] }
 0x75c   : > { %4538 = vmatpush.msrb.mxu1 %v4416_v16  ;;  %4578 = vmatpush.msrb.mxu3 %v4417_v60  ;;  %v4268_v16 = vrot.slane %v6924_v20, 2  ;;  %v4389_v60 = vld [vmem:[#allocation29 + $0x298] sm:$0xff]  ;;  %v4237_v9 = vrot.slane %v3706_v63, 7  ;;  %v4274_v30 = vsel %vm4272_vm15, %v4269_v31, 0.0  ;;  %v4707_v31 = vld [vmem:[#allocation31 + $0x368] sm:$0xff] }
 0x75d   : > { %4521 = vmatpush.msrb.mxu0 %v4340_v54  ;;  %4561 = vmatpush.msrb.mxu2 %v4341_v59  ;;  %v3866_v54 = vadd.f32 %v6914_v17, %v3845_v18  ;;  %v4313_v59 = vld [vmem:[#allocation29 + $0x38] sm:$0xff]  ;;  %v4226_v6 = vsel %vm4224_vm10, 0.0, %v4221_v49 }
 0x75e   : > { %4539 = vmatpush.msrb.mxu1 %v4412_v13  ;;  %4579 = vmatpush.msrb.mxu3 %v4413_v28  ;;  %v4257_v13 = vsel %vm4256_vm13, %v4252_v44, 0.0  ;;  %v4384_v28 = vld [vmem:[#allocation29 + $0x270] sm:$0xff]  ;;  %v4385_v17 = vld [vmem:[#allocation29 + $0x278] sm:$0xff]  ;;  %v4242_v32 = vsel %vm4240_vm12, 0.0, %v4237_v9  ;;  %v4718_v9 = vld [vmem:[#allocation31 + $0x3c0] sm:$0xff] }
 0x75f   : > { %4522 = vmatpush.msrb.mxu0 %v4336_v3  ;;  %4562 = vmatpush.msrb.mxu2 %v4337_v25  ;;  %v4232_v3 = vadd.f32 %v4230_v15, %v4216_v43  ;;  %v4308_v25 = vld [vmem:[#allocation29 + $0x10] sm:$0xff]  ;;  %v4262_v22 = vsel %vm4259_vm0, %v4257_v13, 0.0  ;;  %v4298_v61 = vld [vmem:[#allocation28] sm:$0x3]  ;;  %v4654_v15 = vld [vmem:[#allocation31 + $0x1c0] sm:$0xff] }
 0x760   : > { %4540 = vmatpush.msrb.mxu1 %v4408_v55  ;;  %4580 = vmatpush.msrb.mxu3 %v4409_v41  ;;  %v4309_v55 = vld [vmem:[#allocation29 + $0x18] sm:$0xff]  ;;  %v4273_v41 = vsel %vm4272_vm15, %v4268_v16, 0.0 }
 0x761   : > { %4523 = vmatpush.msrb.mxu0 %v4332_v19  ;;  %4563 = vmatpush.msrb.mxu2 %v4333_v38  ;;  %v4217_v19 = vadd.f32 %v4215_v53, %v3786_v5  ;;  %v4253_v38 = vrot.slane %v3866_v54, 1  ;;  %v4279_v5 = vsel %vm4275_vm1, %v4274_v30, 0.0  ;;  %v4658_v53 = vld [vmem:[#allocation31 + $0x1e0] sm:$0xff]  ;;  %v4659_v54 = vld [vmem:[#allocation31 + $0x1e8] sm:$0xff] }
 0x762   : > { %4541 = vmatpush.msrb.mxu1 %v4404_v21  ;;  %4581 = vmatpush.msrb.mxu3 %v4405_v26  ;;  %v4246_v21 = vsel %vm4243_vm14, %v4241_v47, 0.0  ;;  %v4655_v47 = vld [vmem:[#allocation31 + $0x1c8] sm:$0xff]  ;;  %v4690_v30 = vld [vmem:[#allocation31 + $0x2e0] sm:$0xff] }
 0x763   : > { %4524 = vmatpush.msrb.mxu0 %v4328_v56  ;;  %4564 = vmatpush.msrb.mxu2 %v4329_v39  ;;  %v4380_v56 = vld [vmem:[#allocation29 + $0x250] sm:$0xff]  ;;  %v4231_v39 = vsel %vm4227_vm11, %v4226_v6, 0.0  ;;  %v4248_v26 = vadd.f32 %v4246_v21, %v4232_v3  ;;  %v4651_v3 = vld [vmem:[#allocation31 + $0x1a8] sm:$0xff]  ;;  %v4634_v21 = vld [vmem:[#allocation31 + $0x120] sm:$0xff] }
 0x764   : > { %4542 = vmatpush.msrb.mxu1 %v4400_v34  ;;  %4582 = vmatpush.msrb.mxu3 %v4401_v37  ;;  %v4278_v34 = vsel %vm4275_vm1, %v4273_v41, 0.0  ;;  %v4258_v37 = vsel %vm4256_vm13, %v4253_v38, 0.0  ;;  %v4723_v6 = vld [vmem:[#allocation31 + $0x3e8] sm:$0xff]  ;;  %v4714_v38 = vld [vmem:[#allocation31 + $0x3a0] sm:$0xff] }
 0x765   : > { %4525 = vmatpush.msrb.mxu0 %v4324_v33  ;;  %4565 = vmatpush.msrb.mxu2 %v4325_v2  ;;  %v3965_v23 = vpop.f32.mrf.mxu0  ;;  %v4233_v33 = vadd.f32 %v4231_v39, %v4217_v19  ;;  %v4264_v2 = vadd.f32 %v4262_v22, %v4248_v26  ;;  %v4263_v42 = vsel %vm4259_vm0, %v4258_v37, 0.0  ;;  %v4643_v19 = vld [vmem:[#allocation31 + $0x168] sm:$0xff]  ;;  %v4710_v22 = vld [vmem:[#allocation31 + $0x380] sm:$0xff] }
 0x766   : > { %4543 = vmatpush.msrb.mxu1 %v4396_v29  ;;  %4583 = vmatpush.msrb.mxu3 %v4397_v12  ;;  %v4373_v29 = vld [vmem:[#allocation29 + $0x218] sm:$0xff]  ;;  %v4247_v12 = vsel %vm4243_vm14, %v4242_v32, 0.0  ;;  %v4639_v41 = vld [vmem:[#allocation31 + $0x148] sm:$0xff]  ;;  %v4706_v39 = vld [vmem:[#allocation31 + $0x360] sm:$0xff] }
 0x767   : > { %4526 = vmatpush.msrb.mxu0 %v4320_v4  ;;  %4566 = vmatpush.msrb.mxu2 %v4321_v57  ;;  %v4372_v4 = vld [vmem:[#allocation29 + $0x210] sm:$0xff]  ;;  %v4280_v35 = vadd.f32 %v4278_v34, %v4264_v2  ;;  %v4300_v57 = vperm.slane %v4298_v61, 0  ;;  %v4631_v26 = vld [vmem:[#allocation31 + $0x108] sm:$0xff]  ;;  %v4622_v34 = vld [vmem:[#allocation31 + $0xc0] sm:$0xff] }
 0x768   : > { %4544 = vmatpush.msrb.mxu1 %v4392_v36  ;;  %4584 = vmatpush.msrb.mxu3 %v4393_v51  ;;  %v4249_v36 = vadd.f32 %v4247_v12, %v4233_v33  ;;  %v4627_v32 = vld [vmem:[#allocation31 + $0xe8] sm:$0xff]  ;;  %v4618_v37 = vld [vmem:[#allocation31 + $0xa0] sm:$0xff] }
 0x769   : > { %4527 = vmatpush.msrb.mxu0 %v4316_v48  ;;  %4567 = vmatpush.msrb.mxu2 %v4317_v7  ;;  %v4703_v33 = vld [vmem:[#allocation31 + $0x348] sm:$0xff]  ;;  %v4610_v12 = vld [vmem:[#allocation31 + $0x60] sm:$0xff] }
 0x76a   : > { %4545 = vmatpush.msrb.mxu1 %v4388_v24  ;;  %4585 = vmatpush.msrb.mxu3 %v4389_v60  ;;  %v4265_v52 = vadd.f32 %v4263_v42, %v4249_v36  ;;  %v4301_v24 = vperm.slane %v4298_v61, 1  ;;  %v4650_v60 = vld [vmem:[#allocation31 + $0x1a0] sm:$0xff]  ;;  %v4699_v2 = vld [vmem:[#allocation31 + $0x328] sm:$0xff] }
 0x76b   : > { %4528 = vmatpush.msrb.mxu0 %v4312_v58  ;;  %4568 = vmatpush.msrb.mxu2 %v4313_v59  ;;  %v4005_v44 = vpop.f32.mrf.mxu2  ;;  %v4698_v61 = vld [vmem:[#allocation31 + $0x320] sm:$0xff] }
 0x76c   : > { %v3985_v18 = vpop.f32.mrf.mxu1  ;;  %4546 = vmatpush.msrb.mxu1 %v4384_v28  ;;  %4586 = vmatpush.msrb.mxu3 %v4385_v17  ;;  %v4281_v16 = vadd.f32 %v4279_v5, %v4265_v52  ;;  %v4647_v28 = vld [vmem:[#allocation31 + $0x188] sm:$0xff]  ;;  %v4638_v17 = vld [vmem:[#allocation31 + $0x140] sm:$0xff] }
 0x76d   : > { %4529 = vmatpush.msrb.mxu0 %v4308_v25  ;;  %v3986_v27 = vadd.f32 %v3985_v18, %v3965_v23  ;;  %4569 = vmatpush.msrb.mxu2 %v4309_v55  ;;  %v4722_v25 = vld [vmem:[#allocation31 + $0x3e0] sm:$0xff]  ;;  %v4719_v55 = vld [vmem:[#allocation31 + $0x3c8] sm:$0xff] }
 0x76e   : > { %4547 = vmatpush.msrb.mxu1 %v4380_v56  ;;  %4587 = vmatpush.msrb.mxu3 %v4381_v1  ;;  %v4715_v56 = vld [vmem:[#allocation31 + $0x3a8] sm:$0xff]  ;;  %v4630_v1 = vld [vmem:[#allocation31 + $0x100] sm:$0xff] }
 0x76f   : > { %v4284_v20 = vrot.slane %v3986_v27, 3  ;;  %v4635_v23 = vld [vmem:[#allocation31 + $0x128] sm:$0xff]  ;;  %v4626_v27 = vld [vmem:[#allocation31 + $0xe0] sm:$0xff] }
 0x770   : > { %4548 = vmatpush.msrb.mxu1 %v4376_v11  ;;  %4588 = vmatpush.msrb.mxu3 %v4377_v10  ;;  %v4711_v18 = vld [vmem:[#allocation31 + $0x388] sm:$0xff]  ;;  %v4702_v11 = vld [vmem:[#allocation31 + $0x340] sm:$0xff] }
 0x771   : > { %v4289_v40 = vsel %vm4288_vm2, %v4284_v20, 0.0  ;;  %v4623_v10 = vld [vmem:[#allocation31 + $0xc8] sm:$0xff]  ;;  %v4694_v20 = vld [vmem:[#allocation31 + $0x300] sm:$0xff] }
 0x772   : > { %v4294_v43 = vsel %vm4291_vm3, %v4289_v40, 0.0  ;;  %v4025_v48 = vpop.f32.mrf.mxu3  ;;  %4549 = vmatpush.msrb.mxu1 %v4372_v4  ;;  %4589 = vmatpush.msrb.mxu3 %v4373_v29  ;;  %v4619_v4 = vld [vmem:[#allocation31 + $0xa8] sm:$0xff]  ;;  %v4686_v42 = vld [vmem:[#allocation31 + $0x2c0] sm:$0xff] }
 0x773   : > { %v4296_v49 = vadd.f32 %v4294_v43, %v4280_v35  ;;  %v4026_v63 = vadd.f32 %v4025_v48, %v4005_v44  ;;  %v4695_v29 = vld [vmem:[#allocation31 + $0x308] sm:$0xff]  ;;  %v4614_v35 = vld [vmem:[#allocation31 + $0x80] sm:$0xff] }
 0x774   : > { %v4615_v40 = vld [vmem:[#allocation31 + $0x88] sm:$0xff]  ;;  %v4606_v48 = vld [vmem:[#allocation31 + $0x40] sm:$0xff] }
 0x775   : > { %v4304_v7 = vadd.f32 %v4300_v57, %v4296_v49  ;;  %v4285_v51 = vrot.slane %v4026_v63, 3  ;;  %v4691_v57 = vld [vmem:[#allocation31 + $0x2e8] sm:$0xff]  ;;  %v4682_v36 = vld [vmem:[#allocation31 + $0x2a0] sm:$0xff] }
 0x776   : > { %v4611_v43 = vld [vmem:[#allocation31 + $0x68] sm:$0xff]  ;;  %v4602_v5 = vld [vmem:[#allocation31 + $0x20] sm:$0xff] }
 0x777   : > { %v4290_v58 = vsel %vm4288_vm2, %v4285_v51, 0.0  ;;  %4450 = vmatmul.f32.vlgmr.msra.gmra.mxu0 %v4304_v7  ;;  %4490 = vmatmul.f32.vlgmr.msra.gmra.mxu2 %v4304_v7  ;;  %v4687_v44 = vld [vmem:[#allocation31 + $0x2c8] sm:$0xff]  ;;  %v4678_v52 = vld [vmem:[#allocation31 + $0x280] sm:$0xff] }
 0x778   : > { %v4295_v50 = vsel %vm4291_vm3, %v4290_v58, 0.0  ;;  %4726 = vmatpush.msra.mxu0 %v4658_v53  ;;  %4766 = vmatpush.msra.mxu2 %v4659_v54  ;;  %v4607_v49 = vld [vmem:[#allocation31 + $0x48] sm:$0xff]  ;;  %v4598_v53 = vld [vmem:[#allocation31] sm:$0xff] }
 0x779   : > { %v4297_v59 = vadd.f32 %v4295_v50, %v4281_v16  ;;  %v4683_v63 = vld [vmem:[#allocation31 + $0x2a8] sm:$0xff]  ;;  %v4674_v54 = vld [vmem:[#allocation31 + $0x260] sm:$0xff] }
 0x77a   : > { %4727 = vmatpush.msra.mxu0 %v4654_v15  ;;  %4767 = vmatpush.msra.mxu2 %v4655_v47  ;;  %v4679_v51 = vld [vmem:[#allocation31 + $0x288] sm:$0xff]  ;;  %v4660_v15 = vld [vmem:[#allocation31 + $0x1f0] sm:$0xff]  ;;  %v4661_v47 = vld [vmem:[#allocation31 + $0x1f8] sm:$0xff] }
 0x77b   : > { %v4305_v13 = vadd.f32 %v4301_v24, %v4297_v59  ;;  %v4599_v16 = vld [vmem:[#allocation31 + $0x8] sm:$0xff]  ;;  %v6974_v24 = vadd.f32 %v6760_v14, %v6729_v45  ;;  %v4670_v50 = vld [vmem:[#allocation31 + $0x240] sm:$0xff]  ;;  %v4652_v45 = vld [vmem:[#allocation31 + $0x1b0] sm:$0xff] }
 0x77c   : > { %4728 = vmatpush.msra.mxu0 %v4650_v60  ;;  %4768 = vmatpush.msra.mxu2 %v4651_v3  ;;  %v4675_v58 = vld [vmem:[#allocation31 + $0x268] sm:$0xff]  ;;  %v4656_v60 = vld [vmem:[#allocation31 + $0x1d0] sm:$0xff]  ;;  %v4657_v3 = vld [vmem:[#allocation31 + $0x1d8] sm:$0xff] }
 0x77d   : > { %4470 = vmatmul.f32.vlgmr.msra.gmra.mxu1 %v4305_v13  ;;  %4510 = vmatmul.f32.vlgmr.msra.gmra.mxu3 %v4305_v13  ;;  %v4671_v59 = vld [vmem:[#allocation31 + $0x248] sm:$0xff]  ;;  %v4653_v14 = vld [vmem:[#allocation31 + $0x1b8] sm:$0xff] }
 0x77e   : > { %4729 = vmatpush.msra.mxu0 %v4646_v62  ;;  %4746 = vmatpush.msra.mxu1 %v4722_v25  ;;  %v4667_v62 = vld [vmem:[#allocation31 + $0x228] sm:$0xff]  ;;  %v4662_v25 = vld [vmem:[#allocation31 + $0x200] sm:$0xff] }
 0x77f   : > { %4769 = vmatpush.msra.mxu2 %v4647_v28  ;;  %4786 = vmatpush.msra.mxu3 %v4723_v6  ;;  %v4663_v28 = vld [vmem:[#allocation31 + $0x208] sm:$0xff]  ;;  %v6980_v6 = vadd.f32 %v6762_v8, %v6731_v46  ;;  %v4640_v46 = vld [vmem:[#allocation31 + $0x150] sm:$0xff] }
 0x780   : > { %4530 = vmatmul.f32.vlgmr.msrb.gmra.mxu0 %v4304_v7  ;;  %4570 = vmatmul.f32.vlgmr.msrb.gmra.mxu2 %v4304_v7  ;;  %v4603_v7 = vld [vmem:[#allocation31 + $0x28] sm:$0xff]  ;;  %v4716_v8 = vld [vmem:[#allocation31 + $0x3b0] sm:$0xff] }
 0x781   : > { %4730 = vmatpush.msra.mxu0 %v4642_v0  ;;  %4747 = vmatpush.msra.mxu1 %v4718_v9  ;;  %v4648_v0 = vld [vmem:[#allocation31 + $0x190] sm:$0xff] }
 0x782   : > { %4770 = vmatpush.msra.mxu2 %v4643_v19  ;;  %4787 = vmatpush.msra.mxu3 %v4719_v55  ;;  %v4724_v9 = vld [vmem:[#allocation31 + $0x3f0] sm:$0xff]  ;;  %v4649_v19 = vld [vmem:[#allocation31 + $0x198] sm:$0xff] }
 0x783   : > { %4731 = vmatpush.msra.mxu0 %v4638_v17  ;;  %4748 = vmatpush.msra.mxu1 %v4714_v38  ;;  %v4725_v55 = vld [vmem:[#allocation31 + $0x3f8] sm:$0xff]  ;;  %v4644_v17 = vld [vmem:[#allocation31 + $0x170] sm:$0xff] }
 0x784   : > { %4771 = vmatpush.msra.mxu2 %v4639_v41  ;;  %4788 = vmatpush.msra.mxu3 %v4715_v56  ;;  %v4720_v38 = vld [vmem:[#allocation31 + $0x3d0] sm:$0xff]  ;;  %v4645_v41 = vld [vmem:[#allocation31 + $0x178] sm:$0xff] }
 0x785   : > { %4732 = vmatpush.msra.mxu0 %v4634_v21  ;;  %4749 = vmatpush.msra.mxu1 %v4710_v22  ;;  %v4721_v56 = vld [vmem:[#allocation31 + $0x3d8] sm:$0xff] }
 0x786   : > { %4772 = vmatpush.msra.mxu2 %v4635_v23  ;;  %4789 = vmatpush.msra.mxu3 %v4711_v18  ;;  %v4641_v21 = vld [vmem:[#allocation31 + $0x158] sm:$0xff]  ;;  %v4636_v23 = vld [vmem:[#allocation31 + $0x130] sm:$0xff] }
 0x787   : > { %4550 = vmatmul.f32.vlgmr.msrb.gmra.mxu1 %v4305_v13  ;;  %4590 = vmatmul.f32.vlgmr.msrb.gmra.mxu3 %v4305_v13  ;;  %v4666_v13 = vld [vmem:[#allocation31 + $0x220] sm:$0xff]  ;;  %v4717_v22 = vld [vmem:[#allocation31 + $0x3b8] sm:$0xff]  ;;  %v4712_v18 = vld [vmem:[#allocation31 + $0x390] sm:$0xff] }
 0x788   : > { %4733 = vmatpush.msra.mxu0 %v4630_v1  ;;  %4750 = vmatpush.msra.mxu1 %v4706_v39  ;;  %v4637_v1 = vld [vmem:[#allocation31 + $0x138] sm:$0xff] }
 0x789   : > { %4773 = vmatpush.msra.mxu2 %v4631_v26  ;;  %4790 = vmatpush.msra.mxu3 %v4707_v31  ;;  %v4713_v39 = vld [vmem:[#allocation31 + $0x398] sm:$0xff]  ;;  %v4632_v26 = vld [vmem:[#allocation31 + $0x110] sm:$0xff] }
 0x78a   : > { %4734 = vmatpush.msra.mxu0 %v4626_v27  ;;  %4751 = vmatpush.msra.mxu1 %v4702_v11  ;;  %v4708_v31 = vld [vmem:[#allocation31 + $0x370] sm:$0xff]  ;;  %v4633_v27 = vld [vmem:[#allocation31 + $0x118] sm:$0xff] }
 0x78b   : > { %4774 = vmatpush.msra.mxu2 %v4627_v32  ;;  %4791 = vmatpush.msra.mxu3 %v4703_v33  ;;  %v4709_v11 = vld [vmem:[#allocation31 + $0x378] sm:$0xff]  ;;  %v4628_v32 = vld [vmem:[#allocation31 + $0xf0] sm:$0xff] }
 0x78c   : > { %4735 = vmatpush.msra.mxu0 %v4622_v34  ;;  %4752 = vmatpush.msra.mxu1 %v4698_v61  ;;  %v4704_v33 = vld [vmem:[#allocation31 + $0x350] sm:$0xff]  ;;  %v4629_v34 = vld [vmem:[#allocation31 + $0xf8] sm:$0xff] }
 0x78d   : > { %4775 = vmatpush.msra.mxu2 %v4623_v10  ;;  %4792 = vmatpush.msra.mxu3 %v4699_v2  ;;  %v4705_v61 = vld [vmem:[#allocation31 + $0x358] sm:$0xff]  ;;  %v4624_v10 = vld [vmem:[#allocation31 + $0xd0] sm:$0xff] }
 0x78e   : > { %4736 = vmatpush.msra.mxu0 %v4618_v37  ;;  %4753 = vmatpush.msra.mxu1 %v4694_v20  ;;  %v4700_v2 = vld [vmem:[#allocation31 + $0x330] sm:$0xff]  ;;  %v4625_v37 = vld [vmem:[#allocation31 + $0xd8] sm:$0xff] }
 0x78f   : > { %4776 = vmatpush.msra.mxu2 %v4619_v4  ;;  %4793 = vmatpush.msra.mxu3 %v4695_v29  ;;  %v4701_v20 = vld [vmem:[#allocation31 + $0x338] sm:$0xff]  ;;  %v4620_v4 = vld [vmem:[#allocation31 + $0xb0] sm:$0xff] }
 0x790   : > { %4737 = vmatpush.msra.mxu0 %v4614_v35  ;;  %4754 = vmatpush.msra.mxu1 %v4690_v30  ;;  %v4696_v29 = vld [vmem:[#allocation31 + $0x310] sm:$0xff]  ;;  %v4621_v35 = vld [vmem:[#allocation31 + $0xb8] sm:$0xff] }
 0x791   : > { %4777 = vmatpush.msra.mxu2 %v4615_v40  ;;  %4794 = vmatpush.msra.mxu3 %v4691_v57  ;;  %v4697_v30 = vld [vmem:[#allocation31 + $0x318] sm:$0xff]  ;;  %v4616_v40 = vld [vmem:[#allocation31 + $0x90] sm:$0xff] }
 0x792   : > { %4738 = vmatpush.msra.mxu0 %v4610_v12  ;;  %4755 = vmatpush.msra.mxu1 %v4686_v42  ;;  %v4692_v57 = vld [vmem:[#allocation31 + $0x2f0] sm:$0xff]  ;;  %v4617_v12 = vld [vmem:[#allocation31 + $0x98] sm:$0xff] }
 0x793   : > { %4778 = vmatpush.msra.mxu2 %v4611_v43  ;;  %4795 = vmatpush.msra.mxu3 %v4687_v44  ;;  %v4693_v42 = vld [vmem:[#allocation31 + $0x2f8] sm:$0xff]  ;;  %v4612_v43 = vld [vmem:[#allocation31 + $0x70] sm:$0xff] }
 0x794   : > { %4739 = vmatpush.msra.mxu0 %v4606_v48  ;;  %4756 = vmatpush.msra.mxu1 %v4682_v36  ;;  %v4688_v44 = vld [vmem:[#allocation31 + $0x2d0] sm:$0xff]  ;;  %v4613_v48 = vld [vmem:[#allocation31 + $0x78] sm:$0xff] }
 0x795   : > { %4779 = vmatpush.msra.mxu2 %v4607_v49  ;;  %4796 = vmatpush.msra.mxu3 %v4683_v63  ;;  %v4689_v36 = vld [vmem:[#allocation31 + $0x2d8] sm:$0xff]  ;;  %v4608_v49 = vld [vmem:[#allocation31 + $0x50] sm:$0xff] }
 0x796   : > { %4740 = vmatpush.msra.mxu0 %v4602_v5  ;;  %4757 = vmatpush.msra.mxu1 %v4678_v52  ;;  %v4684_v63 = vld [vmem:[#allocation31 + $0x2b0] sm:$0xff]  ;;  %v4609_v5 = vld [vmem:[#allocation31 + $0x58] sm:$0xff] }
 0x797   : > { %4780 = vmatpush.msra.mxu2 %v4603_v7  ;;  %4797 = vmatpush.msra.mxu3 %v4679_v51  ;;  %v4685_v52 = vld [vmem:[#allocation31 + $0x2b8] sm:$0xff]  ;;  %v4604_v7 = vld [vmem:[#allocation31 + $0x30] sm:$0xff] }
 0x798   : > { %4741 = vmatpush.msra.mxu0 %v4598_v53  ;;  %4758 = vmatpush.msra.mxu1 %v4674_v54  ;;  %v4680_v51 = vld [vmem:[#allocation31 + $0x290] sm:$0xff]  ;;  %v4605_v53 = vld [vmem:[#allocation31 + $0x38] sm:$0xff] }
 0x799   : > { %4781 = vmatpush.msra.mxu2 %v4599_v16  ;;  %4798 = vmatpush.msra.mxu3 %v4675_v58  ;;  %v4681_v54 = vld [vmem:[#allocation31 + $0x298] sm:$0xff]  ;;  %v4600_v16 = vld [vmem:[#allocation31 + $0x10] sm:$0xff] }
 0x79a   : > { %4742 = vmatmul.f32.vlgmr.msra.gmra.mxu0 %v6974_v24  ;;  %4782 = vmatmul.f32.vlgmr.msra.gmra.mxu2 %v6974_v24  ;;  %v4676_v58 = vld [vmem:[#allocation31 + $0x270] sm:$0xff] }
 0x79b   : > { %4806 = vmatpush.msrb.mxu0 %v4660_v15  ;;  %4846 = vmatpush.msrb.mxu2 %v4661_v47  ;;  %v4601_v15 = vld [vmem:[#allocation31 + $0x18] sm:$0xff] }
 0x79c   : > { %4759 = vmatpush.msra.mxu1 %v4670_v50  ;;  %4799 = vmatpush.msra.mxu3 %v4671_v59  ;;  %v4677_v47 = vld [vmem:[#allocation31 + $0x278] sm:$0xff]  ;;  %v4672_v50 = vld [vmem:[#allocation31 + $0x250] sm:$0xff] }
 0x79d   : > { %4807 = vmatpush.msrb.mxu0 %v4656_v60  ;;  %4847 = vmatpush.msrb.mxu2 %v4657_v3  ;;  %v4673_v59 = vld [vmem:[#allocation31 + $0x258] sm:$0xff]  ;;  %v4668_v60 = vld [vmem:[#allocation31 + $0x230] sm:$0xff] }
 0x79e   : > { %4760 = vmatpush.msra.mxu1 %v4666_v13  ;;  %4800 = vmatpush.msra.mxu3 %v4667_v62  ;;  %v4669_v3 = vld [vmem:[#allocation31 + $0x238] sm:$0xff]  ;;  %v4664_v13 = vld [vmem:[#allocation31 + $0x210] sm:$0xff] }
 0x79f   : > { %4808 = vmatpush.msrb.mxu0 %v4652_v45  ;;  %4848 = vmatpush.msrb.mxu2 %v4653_v14  ;;  %v4665_v62 = vld [vmem:[#allocation31 + $0x218] sm:$0xff]  ;;  %v4045_v45 = vpop.f32.mrf.mxu0  ;;  %v4065_v14 = vpop.f32.mrf.mxu1 }
 0x7a0   : > { %4761 = vmatpush.msra.mxu1 %v4662_v25  ;;  %4801 = vmatpush.msra.mxu3 %v4663_v28  ;;  %v4085_v25 = vpop.f32.mrf.mxu2  ;;  %v4105_v28 = vpop.f32.mrf.mxu3 }
 0x7a1   : > { %4762 = vmatmul.f32.vlgmr.msra.gmra.mxu1 %v6980_v6  ;;  %4802 = vmatmul.f32.vlgmr.msra.gmra.mxu3 %v6980_v6 }
 0x7a2   : > { %4809 = vmatpush.msrb.mxu0 %v4648_v0  ;;  %4826 = vmatpush.msrb.mxu1 %v4724_v9 }
 0x7a3   : > { %4849 = vmatpush.msrb.mxu2 %v4649_v19  ;;  %4866 = vmatpush.msrb.mxu3 %v4725_v55 }
 0x7a4   : > { %4810 = vmatpush.msrb.mxu0 %v4644_v17  ;;  %4827 = vmatpush.msrb.mxu1 %v4720_v38 }
 0x7a5   : > { %4850 = vmatpush.msrb.mxu2 %v4645_v41  ;;  %4867 = vmatpush.msrb.mxu3 %v4721_v56 }
 0x7a6   : > { %4811 = vmatpush.msrb.mxu0 %v4640_v46  ;;  %4828 = vmatpush.msrb.mxu1 %v4716_v8 }
 0x7a7   : > { %4851 = vmatpush.msrb.mxu2 %v4641_v21  ;;  %4868 = vmatpush.msrb.mxu3 %v4717_v22 }
 0x7a8   : > { %4812 = vmatpush.msrb.mxu0 %v4636_v23  ;;  %4829 = vmatpush.msrb.mxu1 %v4712_v18  ;;  %v4890_v23 = vld [vmem:[#allocation32] sm:$0xf] }
 0x7a9   : > { %4852 = vmatpush.msrb.mxu2 %v4637_v1  ;;  %4869 = vmatpush.msrb.mxu3 %v4713_v39  ;;  %v4125_v0 = vpop.f32.mrf.mxu0 }
 0x7aa   : > { %4813 = vmatpush.msrb.mxu0 %v4632_v26  ;;  %4830 = vmatpush.msrb.mxu1 %v4708_v31  ;;  %v4892_v31 = vperm.slane %v4890_v23, 0 }
 0x7ab   : > { %4853 = vmatpush.msrb.mxu2 %v4633_v27  ;;  %4870 = vmatpush.msrb.mxu3 %v4709_v11 }
 0x7ac   : > { %4814 = vmatpush.msrb.mxu0 %v4628_v32  ;;  %4831 = vmatpush.msrb.mxu1 %v4704_v33  ;;  %v4106_v32 = vadd.f32 %v4105_v28, %v4085_v25 }
 0x7ad   : > { %4854 = vmatpush.msrb.mxu2 %v4629_v34  ;;  %4871 = vmatpush.msrb.mxu3 %v4705_v61 }
 0x7ae   : > { %4815 = vmatpush.msrb.mxu0 %v4624_v10  ;;  %4832 = vmatpush.msrb.mxu1 %v4700_v2 }
 0x7af   : > { %4855 = vmatpush.msrb.mxu2 %v4625_v37  ;;  %4872 = vmatpush.msrb.mxu3 %v4701_v20  ;;  %v4165_v9 = vpop.f32.mrf.mxu2  ;;  %v4893_v37 = vperm.slane %v4890_v23, 1 }
 0x7b0   : > { %4816 = vmatpush.msrb.mxu0 %v4620_v4  ;;  %4833 = vmatpush.msrb.mxu1 %v4696_v29 }
 0x7b1   : > { %4856 = vmatpush.msrb.mxu2 %v4621_v35  ;;  %4873 = vmatpush.msrb.mxu3 %v4697_v30 }
 0x7b2   : > { %4817 = vmatpush.msrb.mxu0 %v4616_v40  ;;  %4834 = vmatpush.msrb.mxu1 %v4692_v57 }
 0x7b3   : > { %4857 = vmatpush.msrb.mxu2 %v4617_v12  ;;  %4874 = vmatpush.msrb.mxu3 %v4693_v42  ;;  %v4894_v42 = vperm.slane %v4890_v23, 2 }
 0x7b4   : > { %4818 = vmatpush.msrb.mxu0 %v4612_v43  ;;  %4835 = vmatpush.msrb.mxu1 %v4688_v44 }
 0x7b5   : > { %4858 = vmatpush.msrb.mxu2 %v4613_v48  ;;  %4875 = vmatpush.msrb.mxu3 %v4689_v36  ;;  %v4185_v19 = vpop.f32.mrf.mxu3 }
 0x7b6   : > { %4819 = vmatpush.msrb.mxu0 %v4608_v49  ;;  %4836 = vmatpush.msrb.mxu1 %v4684_v63  ;;  %v4186_v48 = vadd.f32 %v4185_v19, %v4165_v9 }
 0x7b7   : > { %4859 = vmatpush.msrb.mxu2 %v4609_v5  ;;  %4876 = vmatpush.msrb.mxu3 %v4685_v52 }
 0x7b8   : > { %4820 = vmatpush.msrb.mxu0 %v4604_v7  ;;  %4837 = vmatpush.msrb.mxu1 %v4680_v51  ;;  %v4895_v7 = vperm.slane %v4890_v23, 3 }
 0x7b9   : > { %4860 = vmatpush.msrb.mxu2 %v4605_v53  ;;  %4877 = vmatpush.msrb.mxu3 %v4681_v54 }
 0x7ba   : > { %4821 = vmatpush.msrb.mxu0 %v4600_v16  ;;  %4838 = vmatpush.msrb.mxu1 %v4676_v58 }
 0x7bb   : > { %4861 = vmatpush.msrb.mxu2 %v4601_v15  ;;  %4878 = vmatpush.msrb.mxu3 %v4677_v47 }
 0x7bc   : > { %4822 = vmatmul.f32.vlgmr.msrb.gmra.mxu0 %v6974_v24  ;;  %4862 = vmatmul.f32.vlgmr.msrb.gmra.mxu2 %v6974_v24  ;;  %v4145_v24 = vpop.f32.mrf.mxu1 }
 0x7bd   : > { %4839 = vmatpush.msrb.mxu1 %v4672_v50  ;;  %4879 = vmatpush.msrb.mxu3 %v4673_v59  ;;  %v4146_v35 = vadd.f32 %v4145_v24, %v4125_v0 }
 0x7bf   : > { %4840 = vmatpush.msrb.mxu1 %v4668_v60  ;;  %4880 = vmatpush.msrb.mxu3 %v4669_v3 }
 0x7c1   : > { %4841 = vmatpush.msrb.mxu1 %v4664_v13  ;;  %4881 = vmatpush.msrb.mxu3 %v4665_v62 }
 0x7c2   : > { %4842 = vmatmul.f32.vlgmr.msrb.gmra.mxu1 %v6980_v6  ;;  %4882 = vmatmul.f32.vlgmr.msrb.gmra.mxu3 %v6980_v6  ;;  %v4066_v6 = vadd.f32 %v4065_v14, %v4045_v45 }
 0x7f4   : > { %v4451_v55 = vpop.f32.mrf.mxu0 }
 0x7fa   : > { %v4471_v17 = vpop.f32.mrf.mxu1  ;;  %v4491_v38 = vpop.f32.mrf.mxu2 }
 0x7fb   : > { %v4472_v8 = vadd.f32 %v4471_v17, %v4451_v55 }
 0x7fd   : > { %v4531_v56 = vpop.f32.mrf.mxu0  ;;  %v4594_v39 = vadd.f32 %v4472_v8, %v4066_v6 }
 0x800   : > { %v4511_v41 = vpop.f32.mrf.mxu3 }
 0x801   : > { %v4512_v27 = vadd.f32 %v4511_v41, %v4491_v38 }
 0x803   : > { %v4571_v21 = vpop.f32.mrf.mxu2  ;;  %v4595_v10 = vadd.f32 %v4512_v27, %v4106_v32 }
 0x804   : > { %v4551_v46 = vpop.f32.mrf.mxu1 }
 0x805   : > { %v4552_v29 = vadd.f32 %v4551_v46, %v4531_v56 }
 0x807   : > { %v4596_v57 = vadd.f32 %v4552_v29, %v4146_v35 }
 0x80a   : > { %v4591_v22 = vpop.f32.mrf.mxu3 }
 0x80b   : > { %v4592_v43 = vadd.f32 %v4591_v22, %v4571_v21 }
 0x80d   : > { %v4597_v5 = vadd.f32 %v4592_v43, %v4186_v48 }
 0x817   : > { %v4743_v18 = vpop.f32.mrf.mxu0 }
 0x81d   : > { %v4783_v34 = vpop.f32.mrf.mxu2 }
 0x81e   : > { %v4763_v1 = vpop.f32.mrf.mxu1 }
 0x81f   : > { %v4764_v26 = vadd.f32 %v4763_v1, %v4743_v18 }
 0x821   : > { %v4886_v11 = vadd.f32 %v4764_v26, %v4594_v39 }
 0x823   : > { %v4900_v33 = vadd.f32 %v4892_v31, %v4886_v11 }
 0x824   : > { %v4803_v61 = vpop.f32.mrf.mxu3 }
 0x825   : > { %4904 = vst [vmem:[%s6989_s8] sm:$0xff] %v4900_v33  ;;  %v4804_v2 = vadd.f32 %v4803_v61, %v4783_v34 }
 0x827   : > { %v4887_v20 = vadd.f32 %v4804_v2, %v4595_v10 }
 0x829   : > { %v4901_v4 = vadd.f32 %v4893_v37, %v4887_v20 }
 0x82b   : > { %4905 = vst [vmem:[%s6989_s8 + $0x8] sm:$0xff] %v4901_v4 }
 0x839   : > { %v4823_v30 = vpop.f32.mrf.mxu0 }
 0x83f   : > { %v4843_v40 = vpop.f32.mrf.mxu1  ;;  %v4863_v49 = vpop.f32.mrf.mxu2 }
 0x840   : > { %v4844_v12 = vadd.f32 %v4843_v40, %v4823_v30 }
 0x842   : > { %v4888_v44 = vadd.f32 %v4844_v12, %v4596_v57 }
 0x844   : > { %v4902_v36 = vadd.f32 %v4894_v42, %v4888_v44 }
 0x845   : > { %v4883_v63 = vpop.f32.mrf.mxu3 }
 0x846   : > { %4906 = vst [vmem:[%s6989_s8 + $0x10] sm:$0xff] %v4902_v36  ;;  %v4884_v52 = vadd.f32 %v4883_v63, %v4863_v49 }
 0x848   : > { %v4889_v51 = vadd.f32 %v4884_v52, %v4597_v5 }
 0x84a   : > { %v4903_v53 = vadd.f32 %v4895_v7, %v4889_v51 }
 0x84c   : > { %4907 = vst [vmem:[%s6989_s8 + $0x18] sm:$0xff] %v4903_v53 }
 0x84d   : > { %6143 = shalt.err (!%p6140_p9)
}
 0x84e   : > { %5318 = dma.vmem_to_hbm [thread:$0]  (%p6528_p13), %s4923_s21, 512, %s4925_s19, %s4909_s27  }
 0x84f PF: > { %s7104_s10 = sld [smem:[#allocation47_spill]]  ;;  %p7105_p10 = scmp.ge.s32.totalorder %s6222_s24, 2 }
 0x851   : > { %p5383_p11 = pnand %p7105_p10, %p6533_p4 }
 0x853   : > { %p5384_p0 = pneg %p5383_p11 }
 0x855   : > { %s4936_s8 = sand.u32 1, %s7104_s10  }
 0x856   : > { %s4937_s7 = scalar_lea.sflag [#allocation4], %s4936_s8 }
 0x857   : > { %6205 = dma.done.wait (%p5384_p0), %s4937_s7, 512  }
 0x858   : > { %6207 = vsyncadd (%p5384_p0), %s4937_s7, 4294966784  ;;  %s7106_s1 = sld [smem:[#allocation48_spill]]  ;;  %p43_p2 = scmp.ge.s32.totalorder %s6508_s26, 4  }
 0x859   : > { %s7107_s22 = smov %s6218_s23  ;;  %s7108_s23 = smov %s6520_s29 }
 0x85a   : > { %s7109_s24 = smov %s6508_s26  ;;  %45 = sbr.rel (!%p43_p2) target bundleno = 29 (0x1d), region = 221 }
 0x85f   :  { %4943 = vsyncpa [#allocation3], 1 }
 0x860   :  { %4945 = vsyncpa [#allocation3 + $0x1], 1 }
 0x861   :  { %4946 = vsyncpa [#allocation6], 1 }
 0x862   :  { %4947 = vsyncpa [#allocation9], 1 }
 0x863   :  { %4948 = vsyncpa [#allocation12], 1 }
 0x864   :  { %4949 = vsyncpa [#allocation15], 1 }
 0x865   :  { %4950 = vsyncpa [#allocation18], 1 }
 0x866   :  { %4951 = vsyncpa [#allocation21], 1 }
 0x867   :  { %4952 = vsyncpa [#allocation24], 1 }
 0x868   :  { %4953 = vsyncpa [#allocation27], 1 }
 0x869   :  { %4954 = vsyncpa [#allocation30], 1 }
 0x86a   :  { %4955 = vsyncpa [#allocation33], 1 }
 0x86b   :  { %4956 = vsyncpa [#allocation4], 1 }
 0x86c   :  { %4958 = vsyncpa [#allocation4 + $0x1], 1 }

</bundles_post_ra>
